<compile_context>
chip_gen: v7x
topology: tpu7x:2x2x1
jax: 0.10.0
libtpu: 0.0.40
codegen_flags: <defaults>
</compile_context>

<pallas_src>
import functools

import numpy as np
import jax
import jax.numpy as jnp
from jax.experimental import pallas as pl
from jax.experimental.pallas import tpu as pltpu


# ---------------------------------------------------------------------------
# helpers
# ---------------------------------------------------------------------------
def _const_spec(shape):
    """Whole-array BlockSpec whose block never changes across the grid."""
    zeros = (0,) * len(shape)
    return pl.BlockSpec(shape, lambda i, _z=zeros: _z)


def _layernorm(z, g, b, eps):
    mu = jnp.mean(z, axis=-1, keepdims=True)
    zc = z - mu
    var = jnp.mean(zc * zc, axis=-1, keepdims=True)
    return zc * jax.lax.rsqrt(var + eps) * g + b


def _banded_conv_weight(w, w_in):
    """w: (3, 3, Cin, Cout) conv kernel (ky, kx, cin, cout).

    Returns (3, w_in*Cin, w_in*Cout) banded matmul weights, one per ky, with the 'same'
    zero padding along x folded in.  Output columns are ordered so the two x-parities
    occupy contiguous halves -> the 2x2 width max-pool is a max of two lane halves.
    """
    _, _, cin, cout = w.shape
    half = (w_in // 2) * cout
    band = np.zeros((3, w_in * cin, w_in * cout), np.float32)
    for ky in range(3):
        for x in range(w_in):
            col = (x % 2) * half + (x // 2) * cout
            for kx in range(3):
                xin = x + kx - 1
                if 0 <= xin < w_in:
                    band[ky, xin * cin:(xin + 1) * cin, col:col + cout] = w[ky, kx]
    return jnp.asarray(band)


# ---------------------------------------------------------------------------
# Fused kernel: CNN (per frame-block) + transformer encoder + head (last step)
# ---------------------------------------------------------------------------
def _fused_kernel(frames_ref,
                  w1b_ref, c1b_ref, w2b_ref, c2b_ref, pw_ref, pb_ref,
                  wqkv_ref, bqkv_ref, wo_ref, bo_ref, ln1g_ref, ln1b_ref,
                  f1w_ref, f1b_ref, f2w_ref, f2b_ref, ln2g_ref, ln2b_ref,
                  fc1w_ref, fc1b_ref, fc2w_ref, fc2b_ref,
                  o_ref,
                  pad1_ref, pad2_ref, feats_ref,
                  *, B, T, FPB, H, W, C1, C2, E, NH, L, eps):
    i = pl.program_id(0)
    H2, W2, H4, W4 = H // 2, W // 2, H // 4, W // 4
    half1 = W2 * C1          # lane width after conv1 width-pool
    half2 = W4 * C2          # lane width after conv2 width-pool

    # ---- one-time zeroing of the y-halo rows of the conv scratches ----------
    @pl.when(i == 0)
    def _init_halo():
        pad1_ref[:, 0:1, :] = jnp.zeros((FPB, 1, W), jnp.float32)
        pad1_ref[:, H + 1:H + 2, :] = jnp.zeros((FPB, 1, W), jnp.float32)
        pad2_ref[:, 0:1, :] = jnp.zeros((FPB, 1, half1), jnp.float32)
        pad2_ref[:, H2 + 1:H2 + 2, :] = jnp.zeros((FPB, 1, half1), jnp.float32)

    # ===================== CNN stage for this block of frames =================
    pad1_ref[:, 1:H + 1, :] = frames_ref[...]

    # conv1 ('same'): 3 accumulated MXU matmuls against y-banded weights.
    r1 = FPB * H
    acc = jnp.dot(pad1_ref[:, 0:H, :].reshape(r1, W), w1b_ref[0],
                  preferred_element_type=jnp.float32)
    for ky in (1, 2):
        acc = acc + jnp.dot(pad1_ref[:, ky:ky + H, :].reshape(r1, W), w1b_ref[ky],
                            preferred_element_type=jnp.float32)
    a = jnp.maximum(acc + c1b_ref[...], 0.0)                 # (FPB*H, W*C1) lane-dense
    # 2x2 max-pool: width = max of parity halves (baked into band columns),
    #               height = max of merged consecutive row pairs.
    a = jnp.maximum(a[:, :half1], a[:, half1:])              # (FPB*H,  W2*C1)
    a = a.reshape(FPB * H2, 2 * half1)
    a = jnp.maximum(a[:, :half1], a[:, half1:])              # (FPB*H2, W2*C1)

    pad2_ref[:, 1:H2 + 1, :] = a.reshape(FPB, H2, half1)

    # conv2: same banded-matmul scheme with Cin = C1.
    r2 = FPB * H2
    acc = jnp.dot(pad2_ref[:, 0:H2, :].reshape(r2, half1), w2b_ref[0],
                  preferred_element_type=jnp.float32)
    for ky in (1, 2):
        acc = acc + jnp.dot(pad2_ref[:, ky:ky + H2, :].reshape(r2, half1), w2b_ref[ky],
                            preferred_element_type=jnp.float32)
    a = jnp.maximum(acc + c2b_ref[...], 0.0)                 # (FPB*H2, W2*C2)
    a = jnp.maximum(a[:, :half2], a[:, half2:])              # (FPB*H2, W4*C2)
    a = a.reshape(FPB * H4, 2 * half2)
    a = jnp.maximum(a[:, :half2], a[:, half2:])              # (FPB*H4, W4*C2)

    # NHWC flatten + input projection; park this block's features in VMEM scratch.
    feat = a.reshape(FPB, H4 * W4 * C2)
    feats_ref[i] = (jnp.dot(feat, pw_ref[...], preferred_element_type=jnp.float32)
                    + pb_ref[...])

    # ============ transformer encoder + head once all frames are processed ====
    @pl.when(i == pl.num_programs(0) - 1)
    def _transformer_and_head():
        Dh = E // NH
        scale = 1.0 / float(Dh) ** 0.5
        BT = B * T
        x = feats_ref[...].reshape(BT, E)

        for blk in range(L):
            # packed QKV projection (one lane-dense matmul)
            qkv = (jnp.dot(x, wqkv_ref[blk], preferred_element_type=jnp.float32)
                   + bqkv_ref[blk])                                     # (BT, 3E)

            # head-batched attention: single batch dim z = (head, batch) so the whole
            # softmax pipeline runs once for all heads.
            def _split(base):
                parts = [qkv[:, base + h * Dh: base + (h + 1) * Dh].reshape(1, B, T, Dh)
                         for h in range(NH)]
                return jnp.concatenate(parts, axis=0).reshape(NH * B, T, Dh)

            qh, kh, vh = _split(0), _split(E), _split(2 * E)
            s = jnp.einsum('zqd,zkd->zqk', qh, kh,
                           preferred_element_type=jnp.float32) * scale  # (NH*B, T, T)
            s = s - jnp.max(s, axis=-1, keepdims=True)
            p = jnp.exp(s)
            p = p / jnp.sum(p, axis=-1, keepdims=True)                  # exact softmax
            oz = jnp.einsum('zqk,zkd->zqd', p, vh,
                            preferred_element_type=jnp.float32)         # (NH*B, T, Dh)

            # out-projection accumulated from per-head WEIGHT slices (no lane concat).
            attn = jnp.zeros((BT, E), jnp.float32)
            for h in range(NH):
                oh = oz[h * B:(h + 1) * B].reshape(BT, Dh)
                attn = attn + jnp.dot(oh, wo_ref[blk, h],
                                      preferred_element_type=jnp.float32)
            attn = attn + bo_ref[blk]

            # post-norm residual blocks (dropout = identity in eval mode)
            x = _layernorm(x + attn, ln1g_ref[blk], ln1b_ref[blk], eps)
            ffn = jnp.maximum(
                jnp.dot(x, f1w_ref[blk], preferred_element_type=jnp.float32)
                + f1b_ref[blk], 0.0)
            ffn = (jnp.dot(ffn, f2w_ref[blk], preferred_element_type=jnp.float32)
                   + f2b_ref[blk])
            x = _layernorm(x + ffn, ln2g_ref[blk], ln2b_ref[blk], eps)

        # head: avg-pool over time + fc1/ReLU + fc2 (dropouts = identity)
        pooled = jnp.mean(x.reshape(B, T, E), axis=1)                   # (B, E)
        hid = jnp.maximum(
            jnp.dot(pooled, fc1w_ref[...], preferred_element_type=jnp.float32)
            + fc1b_ref[...], 0.0)
        o_ref[...] = (jnp.dot(hid, fc2w_ref[...], preferred_element_type=jnp.float32)
                      + fc2b_ref[...])


# ---------------------------------------------------------------------------
# Wrapper: one fused pallas_call
# ---------------------------------------------------------------------------
def transformer_model_forward(x, params, *, num_heads=4, frames_per_step=4):
    """x: (B, T, H, W, 1) float32  ->  (B, n_future) float32."""
    B, T, H, W, C = x.shape
    assert C == 1 and H % 4 == 0 and W % 4 == 0
    BT = B * T
    fpb = frames_per_step
    if BT % fpb != 0:
        fpb = BT
    nsteps = BT // fpb

    frames = x.reshape(BT, H, W)                 # squeeze Cin=1; no other wrapper work
    C1 = params["conv1_band"].shape[2] // W
    C2 = params["conv2_band"].shape[2] // (W // 2)
    E = params["proj_b"].shape[-1]
    L = params["blk_wqkv"].shape[0]
    NF = params["fc2_b"].shape[-1]

    kernel = functools.partial(
        _fused_kernel, B=B, T=T, FPB=fpb, H=H, W=W, C1=C1, C2=C2, E=E,
        NH=num_heads, L=L, eps=1e-5)

    args = (frames,
            params["conv1_band"], params["conv1_bias_row"],
            params["conv2_band"], params["conv2_bias_row"],
            params["proj_w"], params["proj_b"],
            params["blk_wqkv"], params["blk_bqkv"],
            params["blk_wo"], params["blk_bo"],
            params["blk_ln1_g"], params["blk_ln1_b"],
            params["blk_ffn1_w"], params["blk_ffn1_b"],
            params["blk_ffn2_w"], params["blk_ffn2_b"],
            params["blk_ln2_g"], params["blk_ln2_b"],
            params["fc1_w"], params["fc1_b"],
            params["fc2_w"], params["fc2_b"])

    in_specs = [pl.BlockSpec((fpb, H, W), lambda i: (i, 0, 0))]
    in_specs += [_const_spec(a.shape) for a in args[1:]]

    return pl.pallas_call(
        kernel,
        out_shape=jax.ShapeDtypeStruct((B, NF), jnp.float32),
        grid=(nsteps,),
        in_specs=in_specs,
        out_specs=pl.BlockSpec((B, NF), lambda i: (0, 0)),
        scratch_shapes=[
            pltpu.VMEM((fpb, H + 2, W), jnp.float32),                   # y-padded conv1 in
            pltpu.VMEM((fpb, H // 2 + 2, (W // 2) * C1), jnp.float32),  # y-padded conv2 in
            pltpu.VMEM((nsteps, fpb, E), jnp.float32),                  # projected features
        ],
        compiler_params=pltpu.CompilerParams(
            dimension_semantics=("arbitrary",)),   # feats accumulate sequentially
    )(*args)


# ---------------------------------------------------------------------------
# Deterministic parameter init: raw (reference) layouts + kernel-ready layouts.
#   raw "w1"/"w2" are HWIO (== PyTorch conv.weight.transpose(2,3,1,0)); linear weights
#   are stored transposed (in, out); proj_w_nchw rows follow PyTorch's NCHW flatten.
# ---------------------------------------------------------------------------
def init_params(key, H, W, *, embed_dim=64, num_heads=4, ff_dim=64,
                n_future=1, num_blocks=2):
    C1, C2 = 32, 64
    H4, W4, W2 = H // 4, W // 4, W // 2
    cnn_out = H4 * W4 * C2
    Dh = embed_dim // num_heads
    L = num_blocks
    ks = jax.random.split(key, 16)

    def dense(k, shape, scale=0.1):
        return (scale * jax.random.normal(k, shape)).astype(jnp.float32)

    w1 = dense(ks[0], (3, 3, 1, C1))
    b1 = dense(ks[1], (C1,), 0.05)
    w2 = dense(ks[2], (3, 3, C1, C2))
    b2 = dense(ks[3], (C2,), 0.05)
    proj_w_nchw = dense(ks[4], (cnn_out, embed_dim))
    proj_b = dense(ks[5], (embed_dim,), 0.05)

    wqkv, bqkv, wo, bo, w1f, b1f, w2f, b2f = [], [], [], [], [], [], [], []
    for i in range(L):
        bk = jax.random.split(jax.random.fold_in(ks[6], i), 8)
        wqkv.append(dense(bk[0], (embed_dim, 3 * embed_dim)))
        bqkv.append(dense(bk[1], (3 * embed_dim,), 0.05))
        wo.append(dense(bk[2], (embed_dim, embed_dim)))
        bo.append(dense(bk[3], (embed_dim,), 0.05))
        w1f.append(dense(bk[4], (embed_dim, ff_dim)))
        b1f.append(dense(bk[5], (ff_dim,), 0.05))
        w2f.append(dense(bk[6], (ff_dim, embed_dim)))
        b2f.append(dense(bk[7], (embed_dim,), 0.05))

    raw = {
        "w1": w1, "b1": b1, "w2": w2, "b2": b2,
        "proj_w_nchw": proj_w_nchw, "proj_b": proj_b,
        "wqkv": jnp.stack(wqkv), "bqkv": jnp.stack(bqkv),
        "wo": jnp.stack(wo), "bo": jnp.stack(bo),
        "ln1g": jnp.ones((L, embed_dim), jnp.float32),
        "ln1b": jnp.zeros((L, embed_dim), jnp.float32),
        "w1f": jnp.stack(w1f), "b1f": jnp.stack(b1f),
        "w2f": jnp.stack(w2f), "b2f": jnp.stack(b2f),
        "ln2g": jnp.ones((L, embed_dim), jnp.float32),
        "ln2b": jnp.zeros((L, embed_dim), jnp.float32),
        "fc1w": dense(ks[7], (embed_dim, 32)), "fc1b": dense(ks[8], (32,), 0.05),
        "fc2w": dense(ks[9], (32, n_future)), "fc2b": dense(ks[10], (n_future,), 0.05),
    }

    # one-time layout transforms: banded conv weights, NCHW->NHWC projection rows,
    # head-major out-projection, stacked per-block weights.
    proj_w = (proj_w_nchw.reshape(C2, H4, W4, embed_dim)
              .transpose(1, 2, 0, 3).reshape(cnn_out, embed_dim))
    params = {
        "conv1_band": _banded_conv_weight(np.asarray(w1), W),        # (3, W,     W*C1)
        "conv1_bias_row": jnp.tile(b1, W)[None, :],                  # (1, W*C1)
        "conv2_band": _banded_conv_weight(np.asarray(w2), W2),       # (3, W2*C1, W2*C2)
        "conv2_bias_row": jnp.tile(b2, W2)[None, :],                 # (1, W2*C2)
        "proj_w": proj_w, "proj_b": proj_b[None, :],
        "blk_wqkv": raw["wqkv"], "blk_bqkv": raw["bqkv"][:, None, :],
        "blk_wo": raw["wo"].reshape(L, num_heads, Dh, embed_dim),
        "blk_bo": raw["bo"][:, None, :],
        "blk_ln1_g": raw["ln1g"][:, None, :], "blk_ln1_b": raw["ln1b"][:, None, :],
        "blk_ffn1_w": raw["w1f"], "blk_ffn1_b": raw["b1f"][:, None, :],
        "blk_ffn2_w": raw["w2f"], "blk_ffn2_b": raw["b2f"][:, None, :],
        "blk_ln2_g": raw["ln2g"][:, None, :], "blk_ln2_b": raw["ln2b"][:, None, :],
        "fc1_w": raw["fc1w"], "fc1_b": raw["fc1b"][None, :],
        "fc2_w": raw["fc2w"], "fc2_b": raw["fc2b"][None, :],
    }
    return params, raw


# ---------------------------------------------------------------------------
# Pure-JAX reference of the PyTorch forward (used only to validate the kernel)
# ---------------------------------------------------------------------------
def _ref_layernorm(z, g, b, eps=1e-5):
    mu = jnp.mean(z, axis=-1, keepdims=True)
    zc = z - mu
    var = jnp.mean(zc * zc, axis=-1, keepdims=True)
    return zc * jax.lax.rsqrt(var + eps) * g + b


def reference_forward(x, raw, *, num_heads=4):
    B, T, H, W, _ = x.shape
    BT = B * T
    img = x.reshape(BT, H, W, 1)

    def conv_relu(z, w, b):
        z = jax.lax.conv_general_dilated(z, w, (1, 1), 'SAME',
                                         dimension_numbers=('NHWC', 'HWIO', 'NHWC'))
        return jnp.maximum(z + b, 0.0)

    def pool2(z):
        n, h, w, c = z.shape
        return jnp.max(z.reshape(n, h // 2, 2, w // 2, 2, c), axis=(2, 4))

    a = pool2(conv_relu(img, raw["w1"], raw["b1"]))
    a = pool2(conv_relu(a, raw["w2"], raw["b2"]))
    feat = jnp.transpose(a, (0, 3, 1, 2)).reshape(BT, -1)        # NCHW flatten (PyTorch)
    z = feat @ raw["proj_w_nchw"] + raw["proj_b"]

    E = z.shape[-1]
    Dh = E // num_heads
    for blk in range(raw["wqkv"].shape[0]):
        qkv = z @ raw["wqkv"][blk] + raw["bqkv"][blk]
        split = lambda u: u.reshape(B, T, num_heads, Dh).transpose(0, 2, 1, 3)
        qh, kh, vh = split(qkv[:, :E]), split(qkv[:, E:2 * E]), split(qkv[:, 2 * E:])
        s = jnp.einsum('bhqd,bhkd->bhqk', qh, kh) / float(Dh) ** 0.5
        p = jax.nn.softmax(s, axis=-1)
        o = jnp.einsum('bhqk,bhkd->bhqd', p, vh).transpose(0, 2, 1, 3).reshape(BT, E)
        attn = o @ raw["wo"][blk] + raw["bo"][blk]
        z = _ref_layernorm(z + attn, raw["ln1g"][blk], raw["ln1b"][blk])
        f = (jnp.maximum(z @ raw["w1f"][blk] + raw["b1f"][blk], 0.0)
             @ raw["w2f"][blk] + raw["b2f"][blk])
        z = _ref_layernorm(z + f, raw["ln2g"][blk], raw["ln2b"][blk])
    pooled = jnp.mean(z.reshape(B, T, E), axis=1)
    hid = jnp.maximum(pooled @ raw["fc1w"] + raw["fc1b"], 0.0)
    return hid @ raw["fc2w"] + raw["fc2b"]


if __name__ == "__main__":
    key = jax.random.PRNGKey(0)
    k_in, k_par = jax.random.split(key)

    # Small shapes consistent with the module: batch=2, timesteps=4, 16x16 gray frames.
    B, T, H, W, C = 2, 4, 16, 16, 1
    x = jax.random.normal(k_in, (B, T, H, W, C), dtype=jnp.float32)
    params, raw = init_params(k_par, H, W)

    fwd = jax.jit(transformer_model_forward)
    out = jax.block_until_ready(fwd(x, params))
    assert out.shape == (B, 1), out.shape
    assert bool(jnp.all(jnp.isfinite(out)))

    # Validate against the pure-JAX reference of the PyTorch forward (eval-mode dropout).
    ref = reference_forward(x, raw)
    assert bool(jnp.allclose(out, ref, rtol=5e-2, atol=5e-3)), (out, ref)

    print("KERNEL_OK")
</pallas_src>

<mosaic_0001>
module attributes {stable_mosaic.version = 11 : i64} {
  func.func @_fused_kernel(%arg0: i32, %arg1: memref<4x16x16xf32, #tpu.memory_space<vmem>>, %arg2: memref<3x16x512xf32, #tpu.memory_space<vmem>>, %arg3: memref<1x512xf32, #tpu.memory_space<vmem>>, %arg4: memref<3x256x512xf32, #tpu.memory_space<vmem>>, %arg5: memref<1x512xf32, #tpu.memory_space<vmem>>, %arg6: memref<1024x64xf32, #tpu.memory_space<vmem>>, %arg7: memref<1x64xf32, #tpu.memory_space<vmem>>, %arg8: memref<2x64x192xf32, #tpu.memory_space<vmem>>, %arg9: memref<2x1x192xf32, #tpu.memory_space<vmem>>, %arg10: memref<2x4x16x64xf32, #tpu.memory_space<vmem>>, %arg11: memref<2x1x64xf32, #tpu.memory_space<vmem>>, %arg12: memref<2x1x64xf32, #tpu.memory_space<vmem>>, %arg13: memref<2x1x64xf32, #tpu.memory_space<vmem>>, %arg14: memref<2x64x64xf32, #tpu.memory_space<vmem>>, %arg15: memref<2x1x64xf32, #tpu.memory_space<vmem>>, %arg16: memref<2x64x64xf32, #tpu.memory_space<vmem>>, %arg17: memref<2x1x64xf32, #tpu.memory_space<vmem>>, %arg18: memref<2x1x64xf32, #tpu.memory_space<vmem>>, %arg19: memref<2x1x64xf32, #tpu.memory_space<vmem>>, %arg20: memref<64x32xf32, #tpu.memory_space<vmem>>, %arg21: memref<1x32xf32, #tpu.memory_space<vmem>>, %arg22: memref<32x1xf32, #tpu.memory_space<vmem>>, %arg23: memref<1x1xf32, #tpu.memory_space<vmem>>, %arg24: memref<2x1xf32, #tpu.memory_space<vmem>>, %arg25: memref<4x18x16xf32, #tpu.memory_space<vmem>>, %arg26: memref<4x10x256xf32, #tpu.memory_space<vmem>>, %arg27: memref<2x4x64xf32, #tpu.memory_space<vmem>>) attributes {dimension_semantics = [#tpu.dimension_semantics<arbitrary>], iteration_bounds = array<i64: 2>, scalar_prefetch = 0 : i64, scratch_operands = 3 : i64, tpu.core_type = #tpu.core_type<tc>, window_params = [{transform_indices = @transform_0, window_bounds = array<i64: 4, 16, 16>}, {pipeline_mode = #tpu.pipeline_mode<synchronous>, transform_indices = @transform_1, window_bounds = array<i64: 3, 16, 512>}, {pipeline_mode = #tpu.pipeline_mode<synchronous>, transform_indices = @transform_2, window_bounds = array<i64: 1, 512>}, {pipeline_mode = #tpu.pipeline_mode<synchronous>, transform_indices = @transform_3, window_bounds = array<i64: 3, 256, 512>}, {pipeline_mode = #tpu.pipeline_mode<synchronous>, transform_indices = @transform_4, window_bounds = array<i64: 1, 512>}, {pipeline_mode = #tpu.pipeline_mode<synchronous>, transform_indices = @transform_5, window_bounds = array<i64: 1024, 64>}, {pipeline_mode = #tpu.pipeline_mode<synchronous>, transform_indices = @transform_6, window_bounds = array<i64: 1, 64>}, {pipeline_mode = #tpu.pipeline_mode<synchronous>, transform_indices = @transform_7, window_bounds = array<i64: 2, 64, 192>}, {pipeline_mode = #tpu.pipeline_mode<synchronous>, transform_indices = @transform_8, window_bounds = array<i64: 2, 1, 192>}, {pipeline_mode = #tpu.pipeline_mode<synchronous>, transform_indices = @transform_9, window_bounds = array<i64: 2, 4, 16, 64>}, {pipeline_mode = #tpu.pipeline_mode<synchronous>, transform_indices = @transform_10, window_bounds = array<i64: 2, 1, 64>}, {pipeline_mode = #tpu.pipeline_mode<synchronous>, transform_indices = @transform_11, window_bounds = array<i64: 2, 1, 64>}, {pipeline_mode = #tpu.pipeline_mode<synchronous>, transform_indices = @transform_12, window_bounds = array<i64: 2, 1, 64>}, {pipeline_mode = #tpu.pipeline_mode<synchronous>, transform_indices = @transform_13, window_bounds = array<i64: 2, 64, 64>}, {pipeline_mode = #tpu.pipeline_mode<synchronous>, transform_indices = @transform_14, window_bounds = array<i64: 2, 1, 64>}, {pipeline_mode = #tpu.pipeline_mode<synchronous>, transform_indices = @transform_15, window_bounds = array<i64: 2, 64, 64>}, {pipeline_mode = #tpu.pipeline_mode<synchronous>, transform_indices = @transform_16, window_bounds = array<i64: 2, 1, 64>}, {pipeline_mode = #tpu.pipeline_mode<synchronous>, transform_indices = @transform_17, window_bounds = array<i64: 2, 1, 64>}, {pipeline_mode = #tpu.pipeline_mode<synchronous>, transform_indices = @transform_18, window_bounds = array<i64: 2, 1, 64>}, {pipeline_mode = #tpu.pipeline_mode<synchronous>, transform_indices = @transform_19, window_bounds = array<i64: 64, 32>}, {pipeline_mode = #tpu.pipeline_mode<synchronous>, transform_indices = @transform_20, window_bounds = array<i64: 1, 32>}, {pipeline_mode = #tpu.pipeline_mode<synchronous>, transform_indices = @transform_21, window_bounds = array<i64: 32, 1>}, {pipeline_mode = #tpu.pipeline_mode<synchronous>, transform_indices = @transform_22, window_bounds = array<i64: 1, 1>}, {pipeline_mode = #tpu.pipeline_mode<synchronous>, transform_indices = @transform_23, window_bounds = array<i64: 2, 1>}]} {
    %c0_i32 = arith.constant 0 : i32
    %0 = arith.cmpi eq, %arg0, %c0_i32 : i32
    %1 = arith.extui %0 : i1 to i32
    %c0_i32_0 = arith.constant 0 : i32
    %2 = arith.cmpi ne, %1, %c0_i32_0 : i32
    scf.if %2 {
      %cst_62 = arith.constant 0.000000e+00 : f32
      %78 = vector.broadcast %cst_62 : f32 to vector<4x1x16xf32>
      %c0_63 = arith.constant 0 : index
      %c0_64 = arith.constant 0 : index
      %c0_65 = arith.constant 0 : index
      %79 = vector.load %arg25[%c0_63, %c0_64, %c0_65] : memref<4x18x16xf32, #tpu.memory_space<vmem>>, vector<4x1x16xf32>
      tpu.vector_store %arg25[%c0_63, %c0_64, %c0_65], %78 {strides = array<i32>} : memref<4x18x16xf32, #tpu.memory_space<vmem>>, vector<4x1x16xf32>,
      %cst_66 = arith.constant 0.000000e+00 : f32
      %80 = vector.broadcast %cst_66 : f32 to vector<4x1x16xf32>
      %c0_67 = arith.constant 0 : index
      %c17 = arith.constant 17 : index
      %c0_68 = arith.constant 0 : index
      %81 = vector.load %arg25[%c0_67, %c17, %c0_68] : memref<4x18x16xf32, #tpu.memory_space<vmem>>, vector<4x1x16xf32>
      tpu.vector_store %arg25[%c0_67, %c17, %c0_68], %80 {strides = array<i32>} : memref<4x18x16xf32, #tpu.memory_space<vmem>>, vector<4x1x16xf32>,
      %cst_69 = arith.constant 0.000000e+00 : f32
      %82 = vector.broadcast %cst_69 : f32 to vector<4x1x256xf32>
      %c0_70 = arith.constant 0 : index
      %c0_71 = arith.constant 0 : index
      %c0_72 = arith.constant 0 : index
      %83 = vector.load %arg26[%c0_70, %c0_71, %c0_72] : memref<4x10x256xf32, #tpu.memory_space<vmem>>, vector<4x1x256xf32>
      tpu.vector_store %arg26[%c0_70, %c0_71, %c0_72], %82 {strides = array<i32>} : memref<4x10x256xf32, #tpu.memory_space<vmem>>, vector<4x1x256xf32>,
      %cst_73 = arith.constant 0.000000e+00 : f32
      %84 = vector.broadcast %cst_73 : f32 to vector<4x1x256xf32>
      %c0_74 = arith.constant 0 : index
      %c9 = arith.constant 9 : index
      %c0_75 = arith.constant 0 : index
      %85 = vector.load %arg26[%c0_74, %c9, %c0_75] : memref<4x10x256xf32, #tpu.memory_space<vmem>>, vector<4x1x256xf32>
      tpu.vector_store %arg26[%c0_74, %c9, %c0_75], %84 {strides = array<i32>} : memref<4x10x256xf32, #tpu.memory_space<vmem>>, vector<4x1x256xf32>,
    } else {
    }
    %c0 = arith.constant 0 : index
    %c0_1 = arith.constant 0 : index
    %c0_2 = arith.constant 0 : index
    %3 = vector.load %arg1[%c0, %c0_1, %c0_2] : memref<4x16x16xf32, #tpu.memory_space<vmem>>, vector<4x16x16xf32>
    %c0_3 = arith.constant 0 : index
    %c1 = arith.constant 1 : index
    %c0_4 = arith.constant 0 : index
    %4 = vector.load %arg25[%c0_3, %c1, %c0_4] : memref<4x18x16xf32, #tpu.memory_space<vmem>>, vector<4x16x16xf32>
    tpu.vector_store %arg25[%c0_3, %c1, %c0_4], %3 {strides = array<i32>} : memref<4x18x16xf32, #tpu.memory_space<vmem>>, vector<4x16x16xf32>,
    %c0_5 = arith.constant 0 : index
    %c0_6 = arith.constant 0 : index
    %c0_7 = arith.constant 0 : index
    %5 = vector.load %arg25[%c0_5, %c0_6, %c0_7] : memref<4x18x16xf32, #tpu.memory_space<vmem>>, vector<4x16x16xf32>
    %6 = vector.shape_cast %5 : vector<4x16x16xf32> to vector<64x16xf32>
    %c0_8 = arith.constant 0 : index
    %c0_9 = arith.constant 0 : index
    %c0_10 = arith.constant 0 : index
    %7 = vector.load %arg2[%c0_8, %c0_9, %c0_10] : memref<3x16x512xf32, #tpu.memory_space<vmem>>, vector<1x16x512xf32>
    %8 = vector.shape_cast %7 : vector<1x16x512xf32> to vector<16x512xf32>
    %cst = arith.constant dense<0.000000e+00> : vector<64x512xf32>
    %9 = tpu.matmul %6, %8, %cst {dimension_numbers = #tpu.dot_dimension_numbers<[1], [0], [0], [1], [0, 0, 1, 1], [], []>} : vector<64x16xf32>, vector<16x512xf32>, vector<64x512xf32> -> vector<64x512xf32>
    %c0_11 = arith.constant 0 : index
    %c1_12 = arith.constant 1 : index
    %c0_13 = arith.constant 0 : index
    %10 = vector.load %arg25[%c0_11, %c1_12, %c0_13] : memref<4x18x16xf32, #tpu.memory_space<vmem>>, vector<4x16x16xf32>
    %11 = vector.shape_cast %10 : vector<4x16x16xf32> to vector<64x16xf32>
    %c1_14 = arith.constant 1 : index
    %c0_15 = arith.constant 0 : index
    %c0_16 = arith.constant 0 : index
    %12 = vector.load %arg2[%c1_14, %c0_15, %c0_16] : memref<3x16x512xf32, #tpu.memory_space<vmem>>, vector<1x16x512xf32>
    %13 = vector.shape_cast %12 : vector<1x16x512xf32> to vector<16x512xf32>
    %cst_17 = arith.constant dense<0.000000e+00> : vector<64x512xf32>
    %14 = tpu.matmul %11, %13, %cst_17 {dimension_numbers = #tpu.dot_dimension_numbers<[1], [0], [0], [1], [0, 0, 1, 1], [], []>} : vector<64x16xf32>, vector<16x512xf32>, vector<64x512xf32> -> vector<64x512xf32>
    %15 = arith.addf %9, %14 : vector<64x512xf32>
    %c0_18 = arith.constant 0 : index
    %c2 = arith.constant 2 : index
    %c0_19 = arith.constant 0 : index
    %16 = vector.load %arg25[%c0_18, %c2, %c0_19] : memref<4x18x16xf32, #tpu.memory_space<vmem>>, vector<4x16x16xf32>
    %17 = vector.shape_cast %16 : vector<4x16x16xf32> to vector<64x16xf32>
    %c2_20 = arith.constant 2 : index
    %c0_21 = arith.constant 0 : index
    %c0_22 = arith.constant 0 : index
    %18 = vector.load %arg2[%c2_20, %c0_21, %c0_22] : memref<3x16x512xf32, #tpu.memory_space<vmem>>, vector<1x16x512xf32>
    %19 = vector.shape_cast %18 : vector<1x16x512xf32> to vector<16x512xf32>
    %cst_23 = arith.constant dense<0.000000e+00> : vector<64x512xf32>
    %20 = tpu.matmul %17, %19, %cst_23 {dimension_numbers = #tpu.dot_dimension_numbers<[1], [0], [0], [1], [0, 0, 1, 1], [], []>} : vector<64x16xf32>, vector<16x512xf32>, vector<64x512xf32> -> vector<64x512xf32>
    %21 = arith.addf %15, %20 : vector<64x512xf32>
    %c0_24 = arith.constant 0 : index
    %c0_25 = arith.constant 0 : index
    %22 = vector.load %arg3[%c0_24, %c0_25] : memref<1x512xf32, #tpu.memory_space<vmem>>, vector<1x512xf32>
    %23 = vector.broadcast %22 : vector<1x512xf32> to vector<64x512xf32>
    %24 = arith.addf %21, %23 : vector<64x512xf32>
    %cst_26 = arith.constant 0.000000e+00 : f32
    %25 = vector.broadcast %cst_26 : f32 to vector<64x512xf32>
    %26 = arith.maximumf %24, %25 : vector<64x512xf32>
    %27 = vector.extract_strided_slice %26 {offsets = [0, 0], sizes = [64, 256], strides = [1, 1]} : vector<64x512xf32> to vector<64x256xf32>
    %28 = vector.extract_strided_slice %26 {offsets = [0, 256], sizes = [64, 256], strides = [1, 1]} : vector<64x512xf32> to vector<64x256xf32>
    %29 = arith.maximumf %27, %28 : vector<64x256xf32>
    %30 = vector.shape_cast %29 : vector<64x256xf32> to vector<32x512xf32>
    %31 = vector.extract_strided_slice %30 {offsets = [0, 0], sizes = [32, 256], strides = [1, 1]} : vector<32x512xf32> to vector<32x256xf32>
    %32 = vector.extract_strided_slice %30 {offsets = [0, 256], sizes = [32, 256], strides = [1, 1]} : vector<32x512xf32> to vector<32x256xf32>
    %33 = arith.maximumf %31, %32 : vector<32x256xf32>
    %34 = vector.shape_cast %33 : vector<32x256xf32> to vector<4x8x256xf32>
    %c0_27 = arith.constant 0 : index
    %c1_28 = arith.constant 1 : index
    %c0_29 = arith.constant 0 : index
    %35 = vector.load %arg26[%c0_27, %c1_28, %c0_29] : memref<4x10x256xf32, #tpu.memory_space<vmem>>, vector<4x8x256xf32>
    tpu.vector_store %arg26[%c0_27, %c1_28, %c0_29], %34 {strides = array<i32>} : memref<4x10x256xf32, #tpu.memory_space<vmem>>, vector<4x8x256xf32>,
    %c0_30 = arith.constant 0 : index
    %c0_31 = arith.constant 0 : index
    %c0_32 = arith.constant 0 : index
    %36 = vector.load %arg26[%c0_30, %c0_31, %c0_32] : memref<4x10x256xf32, #tpu.memory_space<vmem>>, vector<4x8x256xf32>
    %37 = vector.shape_cast %36 : vector<4x8x256xf32> to vector<32x256xf32>
    %c0_33 = arith.constant 0 : index
    %c0_34 = arith.constant 0 : index
    %c0_35 = arith.constant 0 : index
    %38 = vector.load %arg4[%c0_33, %c0_34, %c0_35] : memref<3x256x512xf32, #tpu.memory_space<vmem>>, vector<1x256x512xf32>
    %39 = vector.shape_cast %38 : vector<1x256x512xf32> to vector<256x512xf32>
    %cst_36 = arith.constant dense<0.000000e+00> : vector<32x512xf32>
    %40 = tpu.matmul %37, %39, %cst_36 {dimension_numbers = #tpu.dot_dimension_numbers<[1], [0], [0], [1], [0, 0, 1, 1], [], []>} : vector<32x256xf32>, vector<256x512xf32>, vector<32x512xf32> -> vector<32x512xf32>
    %c0_37 = arith.constant 0 : index
    %c1_38 = arith.constant 1 : index
    %c0_39 = arith.constant 0 : index
    %41 = vector.load %arg26[%c0_37, %c1_38, %c0_39] : memref<4x10x256xf32, #tpu.memory_space<vmem>>, vector<4x8x256xf32>
    %42 = vector.shape_cast %41 : vector<4x8x256xf32> to vector<32x256xf32>
    %c1_40 = arith.constant 1 : index
    %c0_41 = arith.constant 0 : index
    %c0_42 = arith.constant 0 : index
    %43 = vector.load %arg4[%c1_40, %c0_41, %c0_42] : memref<3x256x512xf32, #tpu.memory_space<vmem>>, vector<1x256x512xf32>
    %44 = vector.shape_cast %43 : vector<1x256x512xf32> to vector<256x512xf32>
    %cst_43 = arith.constant dense<0.000000e+00> : vector<32x512xf32>
    %45 = tpu.matmul %42, %44, %cst_43 {dimension_numbers = #tpu.dot_dimension_numbers<[1], [0], [0], [1], [0, 0, 1, 1], [], []>} : vector<32x256xf32>, vector<256x512xf32>, vector<32x512xf32> -> vector<32x512xf32>
    %46 = arith.addf %40, %45 : vector<32x512xf32>
    %c0_44 = arith.constant 0 : index
    %c2_45 = arith.constant 2 : index
    %c0_46 = arith.constant 0 : index
    %47 = vector.load %arg26[%c0_44, %c2_45, %c0_46] : memref<4x10x256xf32, #tpu.memory_space<vmem>>, vector<4x8x256xf32>
    %48 = vector.shape_cast %47 : vector<4x8x256xf32> to vector<32x256xf32>
    %c2_47 = arith.constant 2 : index
    %c0_48 = arith.constant 0 : index
    %c0_49 = arith.constant 0 : index
    %49 = vector.load %arg4[%c2_47, %c0_48, %c0_49] : memref<3x256x512xf32, #tpu.memory_space<vmem>>, vector<1x256x512xf32>
    %50 = vector.shape_cast %49 : vector<1x256x512xf32> to vector<256x512xf32>
    %cst_50 = arith.constant dense<0.000000e+00> : vector<32x512xf32>
    %51 = tpu.matmul %48, %50, %cst_50 {dimension_numbers = #tpu.dot_dimension_numbers<[1], [0], [0], [1], [0, 0, 1, 1], [], []>} : vector<32x256xf32>, vector<256x512xf32>, vector<32x512xf32> -> vector<32x512xf32>
    %52 = arith.addf %46, %51 : vector<32x512xf32>
    %c0_51 = arith.constant 0 : index
    %c0_52 = arith.constant 0 : index
    %53 = vector.load %arg5[%c0_51, %c0_52] : memref<1x512xf32, #tpu.memory_space<vmem>>, vector<1x512xf32>
    %54 = vector.broadcast %53 : vector<1x512xf32> to vector<32x512xf32>
    %55 = arith.addf %52, %54 : vector<32x512xf32>
    %cst_53 = arith.constant 0.000000e+00 : f32
    %56 = vector.broadcast %cst_53 : f32 to vector<32x512xf32>
    %57 = arith.maximumf %55, %56 : vector<32x512xf32>
    %58 = vector.extract_strided_slice %57 {offsets = [0, 0], sizes = [32, 256], strides = [1, 1]} : vector<32x512xf32> to vector<32x256xf32>
    %59 = vector.extract_strided_slice %57 {offsets = [0, 256], sizes = [32, 256], strides = [1, 1]} : vector<32x512xf32> to vector<32x256xf32>
    %60 = arith.maximumf %58, %59 : vector<32x256xf32>
    %61 = vector.shape_cast %60 : vector<32x256xf32> to vector<16x512xf32>
    %62 = vector.extract_strided_slice %61 {offsets = [0, 0], sizes = [16, 256], strides = [1, 1]} : vector<16x512xf32> to vector<16x256xf32>
    %63 = vector.extract_strided_slice %61 {offsets = [0, 256], sizes = [16, 256], strides = [1, 1]} : vector<16x512xf32> to vector<16x256xf32>
    %64 = arith.maximumf %62, %63 : vector<16x256xf32>
    %65 = vector.shape_cast %64 : vector<16x256xf32> to vector<4x1024xf32>
    %c0_54 = arith.constant 0 : index
    %c0_55 = arith.constant 0 : index
    %66 = vector.load %arg6[%c0_54, %c0_55] : memref<1024x64xf32, #tpu.memory_space<vmem>>, vector<1024x64xf32>
    %cst_56 = arith.constant dense<0.000000e+00> : vector<4x64xf32>
    %67 = tpu.matmul %65, %66, %cst_56 {dimension_numbers = #tpu.dot_dimension_numbers<[1], [0], [0], [1], [0, 0, 1, 1], [], []>} : vector<4x1024xf32>, vector<1024x64xf32>, vector<4x64xf32> -> vector<4x64xf32>
    %c0_57 = arith.constant 0 : index
    %c0_58 = arith.constant 0 : index
    %68 = vector.load %arg7[%c0_57, %c0_58] : memref<1x64xf32, #tpu.memory_space<vmem>>, vector<1x64xf32>
    %69 = vector.broadcast %68 : vector<1x64xf32> to vector<4x64xf32>
    %70 = arith.addf %67, %69 : vector<4x64xf32>
    %71 = arith.index_cast %arg0 : i32 to index
    %c0_59 = arith.constant 0 : index
    %c0_60 = arith.constant 0 : index
    %72 = vector.load %arg27[%71, %c0_59, %c0_60] : memref<2x4x64xf32, #tpu.memory_space<vmem>>, vector<1x4x64xf32>
    %73 = vector.shape_cast %72 : vector<1x4x64xf32> to vector<4x64xf32>
    %74 = vector.shape_cast %70 : vector<4x64xf32> to vector<1x4x64xf32>
    tpu.vector_store %arg27[%71, %c0_59, %c0_60], %74 {strides = array<i32>} : memref<2x4x64xf32, #tpu.memory_space<vmem>>, vector<1x4x64xf32>,
    %c1_i32 = arith.constant 1 : i32
    %75 = arith.cmpi eq, %arg0, %c1_i32 : i32
    %76 = arith.extui %75 : i1 to i32
    %c0_i32_61 = arith.constant 0 : i32
    %77 = arith.cmpi ne, %76, %c0_i32_61 : i32
    scf.if %77 {
      %c0_62 = arith.constant 0 : index
      %c0_63 = arith.constant 0 : index
      %c0_64 = arith.constant 0 : index
      %78 = vector.load %arg27[%c0_62, %c0_63, %c0_64] : memref<2x4x64xf32, #tpu.memory_space<vmem>>, vector<2x4x64xf32>
      %79 = vector.shape_cast %78 : vector<2x4x64xf32> to vector<8x64xf32>
      %c0_65 = arith.constant 0 : index
      %c0_66 = arith.constant 0 : index
      %c0_67 = arith.constant 0 : index
      %80 = vector.load %arg8[%c0_65, %c0_66, %c0_67] : memref<2x64x192xf32, #tpu.memory_space<vmem>>, vector<1x64x192xf32>
      %81 = vector.shape_cast %80 : vector<1x64x192xf32> to vector<64x192xf32>
      %cst_68 = arith.constant dense<0.000000e+00> : vector<8x192xf32>
      %82 = tpu.matmul %79, %81, %cst_68 {dimension_numbers = #tpu.dot_dimension_numbers<[1], [0], [0], [1], [0, 0, 1, 1], [], []>} : vector<8x64xf32>, vector<64x192xf32>, vector<8x192xf32> -> vector<8x192xf32>
      %c0_69 = arith.constant 0 : index
      %c0_70 = arith.constant 0 : index
      %c0_71 = arith.constant 0 : index
      %83 = vector.load %arg9[%c0_69, %c0_70, %c0_71] : memref<2x1x192xf32, #tpu.memory_space<vmem>>, vector<1x1x192xf32>
      %84 = vector.shape_cast %83 : vector<1x1x192xf32> to vector<1x192xf32>
      %85 = vector.broadcast %84 : vector<1x192xf32> to vector<8x192xf32>
      %86 = arith.addf %82, %85 : vector<8x192xf32>
      %87 = vector.extract_strided_slice %86 {offsets = [0, 0], sizes = [8, 16], strides = [1, 1]} : vector<8x192xf32> to vector<8x16xf32>
      %88 = vector.shape_cast %87 : vector<8x16xf32> to vector<1x2x4x16xf32>
      %89 = vector.extract_strided_slice %86 {offsets = [0, 16], sizes = [8, 16], strides = [1, 1]} : vector<8x192xf32> to vector<8x16xf32>
      %90 = vector.shape_cast %89 : vector<8x16xf32> to vector<1x2x4x16xf32>
      %91 = vector.extract_strided_slice %86 {offsets = [0, 32], sizes = [8, 16], strides = [1, 1]} : vector<8x192xf32> to vector<8x16xf32>
      %92 = vector.shape_cast %91 : vector<8x16xf32> to vector<1x2x4x16xf32>
      %93 = vector.extract_strided_slice %86 {offsets = [0, 48], sizes = [8, 16], strides = [1, 1]} : vector<8x192xf32> to vector<8x16xf32>
      %94 = vector.shape_cast %93 : vector<8x16xf32> to vector<1x2x4x16xf32>
      %95 = tpu.concatenate %88, %90, %92, %94 in 0 : vector<1x2x4x16xf32>, vector<1x2x4x16xf32>, vector<1x2x4x16xf32>, vector<1x2x4x16xf32> -> vector<4x2x4x16xf32>
      %96 = vector.shape_cast %95 : vector<4x2x4x16xf32> to vector<8x4x16xf32>
      %97 = vector.extract_strided_slice %86 {offsets = [0, 64], sizes = [8, 16], strides = [1, 1]} : vector<8x192xf32> to vector<8x16xf32>
      %98 = vector.shape_cast %97 : vector<8x16xf32> to vector<1x2x4x16xf32>
      %99 = vector.extract_strided_slice %86 {offsets = [0, 80], sizes = [8, 16], strides = [1, 1]} : vector<8x192xf32> to vector<8x16xf32>
      %100 = vector.shape_cast %99 : vector<8x16xf32> to vector<1x2x4x16xf32>
      %101 = vector.extract_strided_slice %86 {offsets = [0, 96], sizes = [8, 16], strides = [1, 1]} : vector<8x192xf32> to vector<8x16xf32>
      %102 = vector.shape_cast %101 : vector<8x16xf32> to vector<1x2x4x16xf32>
      %103 = vector.extract_strided_slice %86 {offsets = [0, 112], sizes = [8, 16], strides = [1, 1]} : vector<8x192xf32> to vector<8x16xf32>
      %104 = vector.shape_cast %103 : vector<8x16xf32> to vector<1x2x4x16xf32>
      %105 = tpu.concatenate %98, %100, %102, %104 in 0 : vector<1x2x4x16xf32>, vector<1x2x4x16xf32>, vector<1x2x4x16xf32>, vector<1x2x4x16xf32> -> vector<4x2x4x16xf32>
      %106 = vector.shape_cast %105 : vector<4x2x4x16xf32> to vector<8x4x16xf32>
      %107 = vector.extract_strided_slice %86 {offsets = [0, 128], sizes = [8, 16], strides = [1, 1]} : vector<8x192xf32> to vector<8x16xf32>
      %108 = vector.shape_cast %107 : vector<8x16xf32> to vector<1x2x4x16xf32>
      %109 = vector.extract_strided_slice %86 {offsets = [0, 144], sizes = [8, 16], strides = [1, 1]} : vector<8x192xf32> to vector<8x16xf32>
      %110 = vector.shape_cast %109 : vector<8x16xf32> to vector<1x2x4x16xf32>
      %111 = vector.extract_strided_slice %86 {offsets = [0, 160], sizes = [8, 16], strides = [1, 1]} : vector<8x192xf32> to vector<8x16xf32>
      %112 = vector.shape_cast %111 : vector<8x16xf32> to vector<1x2x4x16xf32>
      %113 = vector.extract_strided_slice %86 {offsets = [0, 176], sizes = [8, 16], strides = [1, 1]} : vector<8x192xf32> to vector<8x16xf32>
      %114 = vector.shape_cast %113 : vector<8x16xf32> to vector<1x2x4x16xf32>
      %115 = tpu.concatenate %108, %110, %112, %114 in 0 : vector<1x2x4x16xf32>, vector<1x2x4x16xf32>, vector<1x2x4x16xf32>, vector<1x2x4x16xf32> -> vector<4x2x4x16xf32>
      %116 = vector.shape_cast %115 : vector<4x2x4x16xf32> to vector<8x4x16xf32>
      "tpu.trace_start"() <{level = 10 : i32, message = "zqd,zkd->zqk"}> : () -> ()
      %cst_72 = arith.constant dense<0.000000e+00> : vector<8x4x4xf32>
      %117 = tpu.matmul %96, %106, %cst_72 {dimension_numbers = #tpu.dot_dimension_numbers<[2], [2], [1], [1], [0, 0, 0, 1, 1, 1], [0], [0]>} : vector<8x4x16xf32>, vector<8x4x16xf32>, vector<8x4x4xf32> -> vector<8x4x4xf32>
      "tpu.trace_stop"() : () -> ()
      %cst_73 = arith.constant 2.500000e-01 : f32
      %118 = vector.broadcast %cst_73 : f32 to vector<8x4x4xf32>
      %119 = arith.mulf %117, %118 : vector<8x4x4xf32>
      %cst_74 = arith.constant dense<0xFF800000> : vector<8x4xf32>
      %120 = vector.multi_reduction <maximumf>, %119, %cst_74 [2] : vector<8x4x4xf32> to vector<8x4xf32>
      %121 = vector.shape_cast %120 : vector<8x4xf32> to vector<8x4x1xf32>
      %122 = vector.broadcast %121 : vector<8x4x1xf32> to vector<8x4x4xf32>
      %123 = arith.subf %119, %122 : vector<8x4x4xf32>
      %124 = math.exp %123 : vector<8x4x4xf32>
      %cst_75 = arith.constant dense<0.000000e+00> : vector<8x4xf32>
      %125 = vector.multi_reduction <add>, %124, %cst_75 [2] : vector<8x4x4xf32> to vector<8x4xf32>
      %126 = vector.shape_cast %125 : vector<8x4xf32> to vector<8x4x1xf32>
      %127 = vector.broadcast %126 : vector<8x4x1xf32> to vector<8x4x4xf32>
      %128 = arith.divf %124, %127 : vector<8x4x4xf32>
      "tpu.trace_start"() <{level = 10 : i32, message = "zqk,zkd->zqd"}> : () -> ()
      %cst_76 = arith.constant dense<0.000000e+00> : vector<8x4x16xf32>
      %129 = tpu.matmul %128, %116, %cst_76 {dimension_numbers = #tpu.dot_dimension_numbers<[2], [1], [1], [2], [0, 0, 0, 1, 1, 2], [0], [0]>} : vector<8x4x4xf32>, vector<8x4x16xf32>, vector<8x4x16xf32> -> vector<8x4x16xf32>
      %cst_77 = arith.constant 0.000000e+00 : f32
      "tpu.trace_stop"() : () -> ()
      %130 = vector.broadcast %cst_77 : f32 to vector<8x64xf32>
      %131 = vector.extract_strided_slice %129 {offsets = [0, 0, 0], sizes = [2, 4, 16], strides = [1, 1, 1]} : vector<8x4x16xf32> to vector<2x4x16xf32>
      %132 = vector.shape_cast %131 : vector<2x4x16xf32> to vector<8x16xf32>
      %c0_78 = arith.constant 0 : index
      %c0_79 = arith.constant 0 : index
      %c0_80 = arith.constant 0 : index
      %c0_81 = arith.constant 0 : index
      %133 = vector.load %arg10[%c0_78, %c0_79, %c0_80, %c0_81] : memref<2x4x16x64xf32, #tpu.memory_space<vmem>>, vector<1x1x16x64xf32>
      %134 = vector.shape_cast %133 : vector<1x1x16x64xf32> to vector<16x64xf32>
      %cst_82 = arith.constant dense<0.000000e+00> : vector<8x64xf32>
      %135 = tpu.matmul %132, %134, %cst_82 {dimension_numbers = #tpu.dot_dimension_numbers<[1], [0], [0], [1], [0, 0, 1, 1], [], []>} : vector<8x16xf32>, vector<16x64xf32>, vector<8x64xf32> -> vector<8x64xf32>
      %136 = arith.addf %130, %135 : vector<8x64xf32>
      %137 = vector.extract_strided_slice %129 {offsets = [2, 0, 0], sizes = [2, 4, 16], strides = [1, 1, 1]} : vector<8x4x16xf32> to vector<2x4x16xf32>
      %138 = vector.shape_cast %137 : vector<2x4x16xf32> to vector<8x16xf32>
      %c0_83 = arith.constant 0 : index
      %c1_84 = arith.constant 1 : index
      %c0_85 = arith.constant 0 : index
      %c0_86 = arith.constant 0 : index
      %139 = vector.load %arg10[%c0_83, %c1_84, %c0_85, %c0_86] : memref<2x4x16x64xf32, #tpu.memory_space<vmem>>, vector<1x1x16x64xf32>
      %140 = vector.shape_cast %139 : vector<1x1x16x64xf32> to vector<16x64xf32>
      %cst_87 = arith.constant dense<0.000000e+00> : vector<8x64xf32>
      %141 = tpu.matmul %138, %140, %cst_87 {dimension_numbers = #tpu.dot_dimension_numbers<[1], [0], [0], [1], [0, 0, 1, 1], [], []>} : vector<8x16xf32>, vector<16x64xf32>, vector<8x64xf32> -> vector<8x64xf32>
      %142 = arith.addf %136, %141 : vector<8x64xf32>
      %143 = vector.extract_strided_slice %129 {offsets = [4, 0, 0], sizes = [2, 4, 16], strides = [1, 1, 1]} : vector<8x4x16xf32> to vector<2x4x16xf32>
      %144 = vector.shape_cast %143 : vector<2x4x16xf32> to vector<8x16xf32>
      %c0_88 = arith.constant 0 : index
      %c2_89 = arith.constant 2 : index
      %c0_90 = arith.constant 0 : index
      %c0_91 = arith.constant 0 : index
      %145 = vector.load %arg10[%c0_88, %c2_89, %c0_90, %c0_91] : memref<2x4x16x64xf32, #tpu.memory_space<vmem>>, vector<1x1x16x64xf32>
      %146 = vector.shape_cast %145 : vector<1x1x16x64xf32> to vector<16x64xf32>
      %cst_92 = arith.constant dense<0.000000e+00> : vector<8x64xf32>
      %147 = tpu.matmul %144, %146, %cst_92 {dimension_numbers = #tpu.dot_dimension_numbers<[1], [0], [0], [1], [0, 0, 1, 1], [], []>} : vector<8x16xf32>, vector<16x64xf32>, vector<8x64xf32> -> vector<8x64xf32>
      %148 = arith.addf %142, %147 : vector<8x64xf32>
      %149 = vector.extract_strided_slice %129 {offsets = [6, 0, 0], sizes = [2, 4, 16], strides = [1, 1, 1]} : vector<8x4x16xf32> to vector<2x4x16xf32>
      %150 = vector.shape_cast %149 : vector<2x4x16xf32> to vector<8x16xf32>
      %c0_93 = arith.constant 0 : index
      %c3 = arith.constant 3 : index
      %c0_94 = arith.constant 0 : index
      %c0_95 = arith.constant 0 : index
      %151 = vector.load %arg10[%c0_93, %c3, %c0_94, %c0_95] : memref<2x4x16x64xf32, #tpu.memory_space<vmem>>, vector<1x1x16x64xf32>
      %152 = vector.shape_cast %151 : vector<1x1x16x64xf32> to vector<16x64xf32>
      %cst_96 = arith.constant dense<0.000000e+00> : vector<8x64xf32>
      %153 = tpu.matmul %150, %152, %cst_96 {dimension_numbers = #tpu.dot_dimension_numbers<[1], [0], [0], [1], [0, 0, 1, 1], [], []>} : vector<8x16xf32>, vector<16x64xf32>, vector<8x64xf32> -> vector<8x64xf32>
      %154 = arith.addf %148, %153 : vector<8x64xf32>
      %c0_97 = arith.constant 0 : index
      %c0_98 = arith.constant 0 : index
      %c0_99 = arith.constant 0 : index
      %155 = vector.load %arg11[%c0_97, %c0_98, %c0_99] : memref<2x1x64xf32, #tpu.memory_space<vmem>>, vector<1x1x64xf32>
      %156 = vector.shape_cast %155 : vector<1x1x64xf32> to vector<1x64xf32>
      %157 = vector.broadcast %156 : vector<1x64xf32> to vector<8x64xf32>
      %158 = arith.addf %154, %157 : vector<8x64xf32>
      %159 = arith.addf %79, %158 : vector<8x64xf32>
      %c0_100 = arith.constant 0 : index
      %c0_101 = arith.constant 0 : index
      %c0_102 = arith.constant 0 : index
      %160 = vector.load %arg12[%c0_100, %c0_101, %c0_102] : memref<2x1x64xf32, #tpu.memory_space<vmem>>, vector<1x1x64xf32>
      %161 = vector.shape_cast %160 : vector<1x1x64xf32> to vector<1x64xf32>
      %c0_103 = arith.constant 0 : index
      %c0_104 = arith.constant 0 : index
      %c0_105 = arith.constant 0 : index
      %162 = vector.load %arg13[%c0_103, %c0_104, %c0_105] : memref<2x1x64xf32, #tpu.memory_space<vmem>>, vector<1x1x64xf32>
      %163 = vector.shape_cast %162 : vector<1x1x64xf32> to vector<1x64xf32>
      %cst_106 = arith.constant dense<0.000000e+00> : vector<8xf32>
      %164 = vector.multi_reduction <add>, %159, %cst_106 [1] : vector<8x64xf32> to vector<8xf32>
      %165 = vector.shape_cast %164 : vector<8xf32> to vector<8x1xf32>
      %cst_107 = arith.constant 6.400000e+01 : f32
      %166 = vector.broadcast %cst_107 : f32 to vector<8x1xf32>
      %167 = arith.divf %165, %166 : vector<8x1xf32>
      %168 = vector.broadcast %167 : vector<8x1xf32> to vector<8x64xf32>
      %169 = arith.subf %159, %168 : vector<8x64xf32>
      %170 = arith.mulf %169, %169 : vector<8x64xf32>
      %cst_108 = arith.constant dense<0.000000e+00> : vector<8xf32>
      %171 = vector.multi_reduction <add>, %170, %cst_108 [1] : vector<8x64xf32> to vector<8xf32>
      %172 = vector.shape_cast %171 : vector<8xf32> to vector<8x1xf32>
      %cst_109 = arith.constant 6.400000e+01 : f32
      %173 = vector.broadcast %cst_109 : f32 to vector<8x1xf32>
      %174 = arith.divf %172, %173 : vector<8x1xf32>
      %cst_110 = arith.constant 9.99999974E-6 : f32
      %175 = vector.broadcast %cst_110 : f32 to vector<8x1xf32>
      %176 = arith.addf %174, %175 : vector<8x1xf32>
      %177 = math.rsqrt %176 : vector<8x1xf32>
      %178 = vector.broadcast %177 : vector<8x1xf32> to vector<8x64xf32>
      %179 = arith.mulf %169, %178 : vector<8x64xf32>
      %180 = vector.broadcast %161 : vector<1x64xf32> to vector<8x64xf32>
      %181 = arith.mulf %179, %180 : vector<8x64xf32>
      %182 = vector.broadcast %163 : vector<1x64xf32> to vector<8x64xf32>
      %183 = arith.addf %181, %182 : vector<8x64xf32>
      %c0_111 = arith.constant 0 : index
      %c0_112 = arith.constant 0 : index
      %c0_113 = arith.constant 0 : index
      %184 = vector.load %arg14[%c0_111, %c0_112, %c0_113] : memref<2x64x64xf32, #tpu.memory_space<vmem>>, vector<1x64x64xf32>
      %185 = vector.shape_cast %184 : vector<1x64x64xf32> to vector<64x64xf32>
      %cst_114 = arith.constant dense<0.000000e+00> : vector<8x64xf32>
      %186 = tpu.matmul %183, %185, %cst_114 {dimension_numbers = #tpu.dot_dimension_numbers<[1], [0], [0], [1], [0, 0, 1, 1], [], []>} : vector<8x64xf32>, vector<64x64xf32>, vector<8x64xf32> -> vector<8x64xf32>
      %c0_115 = arith.constant 0 : index
      %c0_116 = arith.constant 0 : index
      %c0_117 = arith.constant 0 : index
      %187 = vector.load %arg15[%c0_115, %c0_116, %c0_117] : memref<2x1x64xf32, #tpu.memory_space<vmem>>, vector<1x1x64xf32>
      %188 = vector.shape_cast %187 : vector<1x1x64xf32> to vector<1x64xf32>
      %189 = vector.broadcast %188 : vector<1x64xf32> to vector<8x64xf32>
      %190 = arith.addf %186, %189 : vector<8x64xf32>
      %cst_118 = arith.constant 0.000000e+00 : f32
      %191 = vector.broadcast %cst_118 : f32 to vector<8x64xf32>
      %192 = arith.maximumf %190, %191 : vector<8x64xf32>
      %c0_119 = arith.constant 0 : index
      %c0_120 = arith.constant 0 : index
      %c0_121 = arith.constant 0 : index
      %193 = vector.load %arg16[%c0_119, %c0_120, %c0_121] : memref<2x64x64xf32, #tpu.memory_space<vmem>>, vector<1x64x64xf32>
      %194 = vector.shape_cast %193 : vector<1x64x64xf32> to vector<64x64xf32>
      %cst_122 = arith.constant dense<0.000000e+00> : vector<8x64xf32>
      %195 = tpu.matmul %192, %194, %cst_122 {dimension_numbers = #tpu.dot_dimension_numbers<[1], [0], [0], [1], [0, 0, 1, 1], [], []>} : vector<8x64xf32>, vector<64x64xf32>, vector<8x64xf32> -> vector<8x64xf32>
      %c0_123 = arith.constant 0 : index
      %c0_124 = arith.constant 0 : index
      %c0_125 = arith.constant 0 : index
      %196 = vector.load %arg17[%c0_123, %c0_124, %c0_125] : memref<2x1x64xf32, #tpu.memory_space<vmem>>, vector<1x1x64xf32>
      %197 = vector.shape_cast %196 : vector<1x1x64xf32> to vector<1x64xf32>
      %198 = vector.broadcast %197 : vector<1x64xf32> to vector<8x64xf32>
      %199 = arith.addf %195, %198 : vector<8x64xf32>
      %200 = arith.addf %183, %199 : vector<8x64xf32>
      %c0_126 = arith.constant 0 : index
      %c0_127 = arith.constant 0 : index
      %c0_128 = arith.constant 0 : index
      %201 = vector.load %arg18[%c0_126, %c0_127, %c0_128] : memref<2x1x64xf32, #tpu.memory_space<vmem>>, vector<1x1x64xf32>
      %202 = vector.shape_cast %201 : vector<1x1x64xf32> to vector<1x64xf32>
      %c0_129 = arith.constant 0 : index
      %c0_130 = arith.constant 0 : index
      %c0_131 = arith.constant 0 : index
      %203 = vector.load %arg19[%c0_129, %c0_130, %c0_131] : memref<2x1x64xf32, #tpu.memory_space<vmem>>, vector<1x1x64xf32>
      %204 = vector.shape_cast %203 : vector<1x1x64xf32> to vector<1x64xf32>
      %cst_132 = arith.constant dense<0.000000e+00> : vector<8xf32>
      %205 = vector.multi_reduction <add>, %200, %cst_132 [1] : vector<8x64xf32> to vector<8xf32>
      %206 = vector.shape_cast %205 : vector<8xf32> to vector<8x1xf32>
      %cst_133 = arith.constant 6.400000e+01 : f32
      %207 = vector.broadcast %cst_133 : f32 to vector<8x1xf32>
      %208 = arith.divf %206, %207 : vector<8x1xf32>
      %209 = vector.broadcast %208 : vector<8x1xf32> to vector<8x64xf32>
      %210 = arith.subf %200, %209 : vector<8x64xf32>
      %211 = arith.mulf %210, %210 : vector<8x64xf32>
      %cst_134 = arith.constant dense<0.000000e+00> : vector<8xf32>
      %212 = vector.multi_reduction <add>, %211, %cst_134 [1] : vector<8x64xf32> to vector<8xf32>
      %213 = vector.shape_cast %212 : vector<8xf32> to vector<8x1xf32>
      %cst_135 = arith.constant 6.400000e+01 : f32
      %214 = vector.broadcast %cst_135 : f32 to vector<8x1xf32>
      %215 = arith.divf %213, %214 : vector<8x1xf32>
      %cst_136 = arith.constant 9.99999974E-6 : f32
      %216 = vector.broadcast %cst_136 : f32 to vector<8x1xf32>
      %217 = arith.addf %215, %216 : vector<8x1xf32>
      %218 = math.rsqrt %217 : vector<8x1xf32>
      %219 = vector.broadcast %218 : vector<8x1xf32> to vector<8x64xf32>
      %220 = arith.mulf %210, %219 : vector<8x64xf32>
      %221 = vector.broadcast %202 : vector<1x64xf32> to vector<8x64xf32>
      %222 = arith.mulf %220, %221 : vector<8x64xf32>
      %223 = vector.broadcast %204 : vector<1x64xf32> to vector<8x64xf32>
      %224 = arith.addf %222, %223 : vector<8x64xf32>
      %c1_137 = arith.constant 1 : index
      %c0_138 = arith.constant 0 : index
      %c0_139 = arith.constant 0 : index
      %225 = vector.load %arg8[%c1_137, %c0_138, %c0_139] : memref<2x64x192xf32, #tpu.memory_space<vmem>>, vector<1x64x192xf32>
      %226 = vector.shape_cast %225 : vector<1x64x192xf32> to vector<64x192xf32>
      %cst_140 = arith.constant dense<0.000000e+00> : vector<8x192xf32>
      %227 = tpu.matmul %224, %226, %cst_140 {dimension_numbers = #tpu.dot_dimension_numbers<[1], [0], [0], [1], [0, 0, 1, 1], [], []>} : vector<8x64xf32>, vector<64x192xf32>, vector<8x192xf32> -> vector<8x192xf32>
      %c1_141 = arith.constant 1 : index
      %c0_142 = arith.constant 0 : index
      %c0_143 = arith.constant 0 : index
      %228 = vector.load %arg9[%c1_141, %c0_142, %c0_143] : memref<2x1x192xf32, #tpu.memory_space<vmem>>, vector<1x1x192xf32>
      %229 = vector.shape_cast %228 : vector<1x1x192xf32> to vector<1x192xf32>
      %230 = vector.broadcast %229 : vector<1x192xf32> to vector<8x192xf32>
      %231 = arith.addf %227, %230 : vector<8x192xf32>
      %232 = vector.extract_strided_slice %231 {offsets = [0, 0], sizes = [8, 16], strides = [1, 1]} : vector<8x192xf32> to vector<8x16xf32>
      %233 = vector.shape_cast %232 : vector<8x16xf32> to vector<1x2x4x16xf32>
      %234 = vector.extract_strided_slice %231 {offsets = [0, 16], sizes = [8, 16], strides = [1, 1]} : vector<8x192xf32> to vector<8x16xf32>
      %235 = vector.shape_cast %234 : vector<8x16xf32> to vector<1x2x4x16xf32>
      %236 = vector.extract_strided_slice %231 {offsets = [0, 32], sizes = [8, 16], strides = [1, 1]} : vector<8x192xf32> to vector<8x16xf32>
      %237 = vector.shape_cast %236 : vector<8x16xf32> to vector<1x2x4x16xf32>
      %238 = vector.extract_strided_slice %231 {offsets = [0, 48], sizes = [8, 16], strides = [1, 1]} : vector<8x192xf32> to vector<8x16xf32>
      %239 = vector.shape_cast %238 : vector<8x16xf32> to vector<1x2x4x16xf32>
      %240 = tpu.concatenate %233, %235, %237, %239 in 0 : vector<1x2x4x16xf32>, vector<1x2x4x16xf32>, vector<1x2x4x16xf32>, vector<1x2x4x16xf32> -> vector<4x2x4x16xf32>
      %241 = vector.shape_cast %240 : vector<4x2x4x16xf32> to vector<8x4x16xf32>
      %242 = vector.extract_strided_slice %231 {offsets = [0, 64], sizes = [8, 16], strides = [1, 1]} : vector<8x192xf32> to vector<8x16xf32>
      %243 = vector.shape_cast %242 : vector<8x16xf32> to vector<1x2x4x16xf32>
      %244 = vector.extract_strided_slice %231 {offsets = [0, 80], sizes = [8, 16], strides = [1, 1]} : vector<8x192xf32> to vector<8x16xf32>
      %245 = vector.shape_cast %244 : vector<8x16xf32> to vector<1x2x4x16xf32>
      %246 = vector.extract_strided_slice %231 {offsets = [0, 96], sizes = [8, 16], strides = [1, 1]} : vector<8x192xf32> to vector<8x16xf32>
      %247 = vector.shape_cast %246 : vector<8x16xf32> to vector<1x2x4x16xf32>
      %248 = vector.extract_strided_slice %231 {offsets = [0, 112], sizes = [8, 16], strides = [1, 1]} : vector<8x192xf32> to vector<8x16xf32>
      %249 = vector.shape_cast %248 : vector<8x16xf32> to vector<1x2x4x16xf32>
      %250 = tpu.concatenate %243, %245, %247, %249 in 0 : vector<1x2x4x16xf32>, vector<1x2x4x16xf32>, vector<1x2x4x16xf32>, vector<1x2x4x16xf32> -> vector<4x2x4x16xf32>
      %251 = vector.shape_cast %250 : vector<4x2x4x16xf32> to vector<8x4x16xf32>
      %252 = vector.extract_strided_slice %231 {offsets = [0, 128], sizes = [8, 16], strides = [1, 1]} : vector<8x192xf32> to vector<8x16xf32>
      %253 = vector.shape_cast %252 : vector<8x16xf32> to vector<1x2x4x16xf32>
      %254 = vector.extract_strided_slice %231 {offsets = [0, 144], sizes = [8, 16], strides = [1, 1]} : vector<8x192xf32> to vector<8x16xf32>
      %255 = vector.shape_cast %254 : vector<8x16xf32> to vector<1x2x4x16xf32>
      %256 = vector.extract_strided_slice %231 {offsets = [0, 160], sizes = [8, 16], strides = [1, 1]} : vector<8x192xf32> to vector<8x16xf32>
      %257 = vector.shape_cast %256 : vector<8x16xf32> to vector<1x2x4x16xf32>
      %258 = vector.extract_strided_slice %231 {offsets = [0, 176], sizes = [8, 16], strides = [1, 1]} : vector<8x192xf32> to vector<8x16xf32>
      %259 = vector.shape_cast %258 : vector<8x16xf32> to vector<1x2x4x16xf32>
      %260 = tpu.concatenate %253, %255, %257, %259 in 0 : vector<1x2x4x16xf32>, vector<1x2x4x16xf32>, vector<1x2x4x16xf32>, vector<1x2x4x16xf32> -> vector<4x2x4x16xf32>
      %261 = vector.shape_cast %260 : vector<4x2x4x16xf32> to vector<8x4x16xf32>
      "tpu.trace_start"() <{level = 10 : i32, message = "zqd,zkd->zqk"}> : () -> ()
      %cst_144 = arith.constant dense<0.000000e+00> : vector<8x4x4xf32>
      %262 = tpu.matmul %241, %251, %cst_144 {dimension_numbers = #tpu.dot_dimension_numbers<[2], [2], [1], [1], [0, 0, 0, 1, 1, 1], [0], [0]>} : vector<8x4x16xf32>, vector<8x4x16xf32>, vector<8x4x4xf32> -> vector<8x4x4xf32>
      "tpu.trace_stop"() : () -> ()
      %cst_145 = arith.constant 2.500000e-01 : f32
      %263 = vector.broadcast %cst_145 : f32 to vector<8x4x4xf32>
      %264 = arith.mulf %262, %263 : vector<8x4x4xf32>
      %cst_146 = arith.constant dense<0xFF800000> : vector<8x4xf32>
      %265 = vector.multi_reduction <maximumf>, %264, %cst_146 [2] : vector<8x4x4xf32> to vector<8x4xf32>
      %266 = vector.shape_cast %265 : vector<8x4xf32> to vector<8x4x1xf32>
      %267 = vector.broadcast %266 : vector<8x4x1xf32> to vector<8x4x4xf32>
      %268 = arith.subf %264, %267 : vector<8x4x4xf32>
      %269 = math.exp %268 : vector<8x4x4xf32>
      %cst_147 = arith.constant dense<0.000000e+00> : vector<8x4xf32>
      %270 = vector.multi_reduction <add>, %269, %cst_147 [2] : vector<8x4x4xf32> to vector<8x4xf32>
      %271 = vector.shape_cast %270 : vector<8x4xf32> to vector<8x4x1xf32>
      %272 = vector.broadcast %271 : vector<8x4x1xf32> to vector<8x4x4xf32>
      %273 = arith.divf %269, %272 : vector<8x4x4xf32>
      "tpu.trace_start"() <{level = 10 : i32, message = "zqk,zkd->zqd"}> : () -> ()
      %cst_148 = arith.constant dense<0.000000e+00> : vector<8x4x16xf32>
      %274 = tpu.matmul %273, %261, %cst_148 {dimension_numbers = #tpu.dot_dimension_numbers<[2], [1], [1], [2], [0, 0, 0, 1, 1, 2], [0], [0]>} : vector<8x4x4xf32>, vector<8x4x16xf32>, vector<8x4x16xf32> -> vector<8x4x16xf32>
      %cst_149 = arith.constant 0.000000e+00 : f32
      "tpu.trace_stop"() : () -> ()
      %275 = vector.broadcast %cst_149 : f32 to vector<8x64xf32>
      %276 = vector.extract_strided_slice %274 {offsets = [0, 0, 0], sizes = [2, 4, 16], strides = [1, 1, 1]} : vector<8x4x16xf32> to vector<2x4x16xf32>
      %277 = vector.shape_cast %276 : vector<2x4x16xf32> to vector<8x16xf32>
      %c1_150 = arith.constant 1 : index
      %c0_151 = arith.constant 0 : index
      %c0_152 = arith.constant 0 : index
      %c0_153 = arith.constant 0 : index
      %278 = vector.load %arg10[%c1_150, %c0_151, %c0_152, %c0_153] : memref<2x4x16x64xf32, #tpu.memory_space<vmem>>, vector<1x1x16x64xf32>
      %279 = vector.shape_cast %278 : vector<1x1x16x64xf32> to vector<16x64xf32>
      %cst_154 = arith.constant dense<0.000000e+00> : vector<8x64xf32>
      %280 = tpu.matmul %277, %279, %cst_154 {dimension_numbers = #tpu.dot_dimension_numbers<[1], [0], [0], [1], [0, 0, 1, 1], [], []>} : vector<8x16xf32>, vector<16x64xf32>, vector<8x64xf32> -> vector<8x64xf32>
      %281 = arith.addf %275, %280 : vector<8x64xf32>
      %282 = vector.extract_strided_slice %274 {offsets = [2, 0, 0], sizes = [2, 4, 16], strides = [1, 1, 1]} : vector<8x4x16xf32> to vector<2x4x16xf32>
      %283 = vector.shape_cast %282 : vector<2x4x16xf32> to vector<8x16xf32>
      %c1_155 = arith.constant 1 : index
      %c1_156 = arith.constant 1 : index
      %c0_157 = arith.constant 0 : index
      %c0_158 = arith.constant 0 : index
      %284 = vector.load %arg10[%c1_155, %c1_156, %c0_157, %c0_158] : memref<2x4x16x64xf32, #tpu.memory_space<vmem>>, vector<1x1x16x64xf32>
      %285 = vector.shape_cast %284 : vector<1x1x16x64xf32> to vector<16x64xf32>
      %cst_159 = arith.constant dense<0.000000e+00> : vector<8x64xf32>
      %286 = tpu.matmul %283, %285, %cst_159 {dimension_numbers = #tpu.dot_dimension_numbers<[1], [0], [0], [1], [0, 0, 1, 1], [], []>} : vector<8x16xf32>, vector<16x64xf32>, vector<8x64xf32> -> vector<8x64xf32>
      %287 = arith.addf %281, %286 : vector<8x64xf32>
      %288 = vector.extract_strided_slice %274 {offsets = [4, 0, 0], sizes = [2, 4, 16], strides = [1, 1, 1]} : vector<8x4x16xf32> to vector<2x4x16xf32>
      %289 = vector.shape_cast %288 : vector<2x4x16xf32> to vector<8x16xf32>
      %c1_160 = arith.constant 1 : index
      %c2_161 = arith.constant 2 : index
      %c0_162 = arith.constant 0 : index
      %c0_163 = arith.constant 0 : index
      %290 = vector.load %arg10[%c1_160, %c2_161, %c0_162, %c0_163] : memref<2x4x16x64xf32, #tpu.memory_space<vmem>>, vector<1x1x16x64xf32>
      %291 = vector.shape_cast %290 : vector<1x1x16x64xf32> to vector<16x64xf32>
      %cst_164 = arith.constant dense<0.000000e+00> : vector<8x64xf32>
      %292 = tpu.matmul %289, %291, %cst_164 {dimension_numbers = #tpu.dot_dimension_numbers<[1], [0], [0], [1], [0, 0, 1, 1], [], []>} : vector<8x16xf32>, vector<16x64xf32>, vector<8x64xf32> -> vector<8x64xf32>
      %293 = arith.addf %287, %292 : vector<8x64xf32>
      %294 = vector.extract_strided_slice %274 {offsets = [6, 0, 0], sizes = [2, 4, 16], strides = [1, 1, 1]} : vector<8x4x16xf32> to vector<2x4x16xf32>
      %295 = vector.shape_cast %294 : vector<2x4x16xf32> to vector<8x16xf32>
      %c1_165 = arith.constant 1 : index
      %c3_166 = arith.constant 3 : index
      %c0_167 = arith.constant 0 : index
      %c0_168 = arith.constant 0 : index
      %296 = vector.load %arg10[%c1_165, %c3_166, %c0_167, %c0_168] : memref<2x4x16x64xf32, #tpu.memory_space<vmem>>, vector<1x1x16x64xf32>
      %297 = vector.shape_cast %296 : vector<1x1x16x64xf32> to vector<16x64xf32>
      %cst_169 = arith.constant dense<0.000000e+00> : vector<8x64xf32>
      %298 = tpu.matmul %295, %297, %cst_169 {dimension_numbers = #tpu.dot_dimension_numbers<[1], [0], [0], [1], [0, 0, 1, 1], [], []>} : vector<8x16xf32>, vector<16x64xf32>, vector<8x64xf32> -> vector<8x64xf32>
      %299 = arith.addf %293, %298 : vector<8x64xf32>
      %c1_170 = arith.constant 1 : index
      %c0_171 = arith.constant 0 : index
      %c0_172 = arith.constant 0 : index
      %300 = vector.load %arg11[%c1_170, %c0_171, %c0_172] : memref<2x1x64xf32, #tpu.memory_space<vmem>>, vector<1x1x64xf32>
      %301 = vector.shape_cast %300 : vector<1x1x64xf32> to vector<1x64xf32>
      %302 = vector.broadcast %301 : vector<1x64xf32> to vector<8x64xf32>
      %303 = arith.addf %299, %302 : vector<8x64xf32>
      %304 = arith.addf %224, %303 : vector<8x64xf32>
      %c1_173 = arith.constant 1 : index
      %c0_174 = arith.constant 0 : index
      %c0_175 = arith.constant 0 : index
      %305 = vector.load %arg12[%c1_173, %c0_174, %c0_175] : memref<2x1x64xf32, #tpu.memory_space<vmem>>, vector<1x1x64xf32>
      %306 = vector.shape_cast %305 : vector<1x1x64xf32> to vector<1x64xf32>
      %c1_176 = arith.constant 1 : index
      %c0_177 = arith.constant 0 : index
      %c0_178 = arith.constant 0 : index
      %307 = vector.load %arg13[%c1_176, %c0_177, %c0_178] : memref<2x1x64xf32, #tpu.memory_space<vmem>>, vector<1x1x64xf32>
      %308 = vector.shape_cast %307 : vector<1x1x64xf32> to vector<1x64xf32>
      %cst_179 = arith.constant dense<0.000000e+00> : vector<8xf32>
      %309 = vector.multi_reduction <add>, %304, %cst_179 [1] : vector<8x64xf32> to vector<8xf32>
      %310 = vector.shape_cast %309 : vector<8xf32> to vector<8x1xf32>
      %cst_180 = arith.constant 6.400000e+01 : f32
      %311 = vector.broadcast %cst_180 : f32 to vector<8x1xf32>
      %312 = arith.divf %310, %311 : vector<8x1xf32>
      %313 = vector.broadcast %312 : vector<8x1xf32> to vector<8x64xf32>
      %314 = arith.subf %304, %313 : vector<8x64xf32>
      %315 = arith.mulf %314, %314 : vector<8x64xf32>
      %cst_181 = arith.constant dense<0.000000e+00> : vector<8xf32>
      %316 = vector.multi_reduction <add>, %315, %cst_181 [1] : vector<8x64xf32> to vector<8xf32>
      %317 = vector.shape_cast %316 : vector<8xf32> to vector<8x1xf32>
      %cst_182 = arith.constant 6.400000e+01 : f32
      %318 = vector.broadcast %cst_182 : f32 to vector<8x1xf32>
      %319 = arith.divf %317, %318 : vector<8x1xf32>
      %cst_183 = arith.constant 9.99999974E-6 : f32
      %320 = vector.broadcast %cst_183 : f32 to vector<8x1xf32>
      %321 = arith.addf %319, %320 : vector<8x1xf32>
      %322 = math.rsqrt %321 : vector<8x1xf32>
      %323 = vector.broadcast %322 : vector<8x1xf32> to vector<8x64xf32>
      %324 = arith.mulf %314, %323 : vector<8x64xf32>
      %325 = vector.broadcast %306 : vector<1x64xf32> to vector<8x64xf32>
      %326 = arith.mulf %324, %325 : vector<8x64xf32>
      %327 = vector.broadcast %308 : vector<1x64xf32> to vector<8x64xf32>
      %328 = arith.addf %326, %327 : vector<8x64xf32>
      %c1_184 = arith.constant 1 : index
      %c0_185 = arith.constant 0 : index
      %c0_186 = arith.constant 0 : index
      %329 = vector.load %arg14[%c1_184, %c0_185, %c0_186] : memref<2x64x64xf32, #tpu.memory_space<vmem>>, vector<1x64x64xf32>
      %330 = vector.shape_cast %329 : vector<1x64x64xf32> to vector<64x64xf32>
      %cst_187 = arith.constant dense<0.000000e+00> : vector<8x64xf32>
      %331 = tpu.matmul %328, %330, %cst_187 {dimension_numbers = #tpu.dot_dimension_numbers<[1], [0], [0], [1], [0, 0, 1, 1], [], []>} : vector<8x64xf32>, vector<64x64xf32>, vector<8x64xf32> -> vector<8x64xf32>
      %c1_188 = arith.constant 1 : index
      %c0_189 = arith.constant 0 : index
      %c0_190 = arith.constant 0 : index
      %332 = vector.load %arg15[%c1_188, %c0_189, %c0_190] : memref<2x1x64xf32, #tpu.memory_space<vmem>>, vector<1x1x64xf32>
      %333 = vector.shape_cast %332 : vector<1x1x64xf32> to vector<1x64xf32>
      %334 = vector.broadcast %333 : vector<1x64xf32> to vector<8x64xf32>
      %335 = arith.addf %331, %334 : vector<8x64xf32>
      %cst_191 = arith.constant 0.000000e+00 : f32
      %336 = vector.broadcast %cst_191 : f32 to vector<8x64xf32>
      %337 = arith.maximumf %335, %336 : vector<8x64xf32>
      %c1_192 = arith.constant 1 : index
      %c0_193 = arith.constant 0 : index
      %c0_194 = arith.constant 0 : index
      %338 = vector.load %arg16[%c1_192, %c0_193, %c0_194] : memref<2x64x64xf32, #tpu.memory_space<vmem>>, vector<1x64x64xf32>
      %339 = vector.shape_cast %338 : vector<1x64x64xf32> to vector<64x64xf32>
      %cst_195 = arith.constant dense<0.000000e+00> : vector<8x64xf32>
      %340 = tpu.matmul %337, %339, %cst_195 {dimension_numbers = #tpu.dot_dimension_numbers<[1], [0], [0], [1], [0, 0, 1, 1], [], []>} : vector<8x64xf32>, vector<64x64xf32>, vector<8x64xf32> -> vector<8x64xf32>
      %c1_196 = arith.constant 1 : index
      %c0_197 = arith.constant 0 : index
      %c0_198 = arith.constant 0 : index
      %341 = vector.load %arg17[%c1_196, %c0_197, %c0_198] : memref<2x1x64xf32, #tpu.memory_space<vmem>>, vector<1x1x64xf32>
      %342 = vector.shape_cast %341 : vector<1x1x64xf32> to vector<1x64xf32>
      %343 = vector.broadcast %342 : vector<1x64xf32> to vector<8x64xf32>
      %344 = arith.addf %340, %343 : vector<8x64xf32>
      %345 = arith.addf %328, %344 : vector<8x64xf32>
      %c1_199 = arith.constant 1 : index
      %c0_200 = arith.constant 0 : index
      %c0_201 = arith.constant 0 : index
      %346 = vector.load %arg18[%c1_199, %c0_200, %c0_201] : memref<2x1x64xf32, #tpu.memory_space<vmem>>, vector<1x1x64xf32>
      %347 = vector.shape_cast %346 : vector<1x1x64xf32> to vector<1x64xf32>
      %c1_202 = arith.constant 1 : index
      %c0_203 = arith.constant 0 : index
      %c0_204 = arith.constant 0 : index
      %348 = vector.load %arg19[%c1_202, %c0_203, %c0_204] : memref<2x1x64xf32, #tpu.memory_space<vmem>>, vector<1x1x64xf32>
      %349 = vector.shape_cast %348 : vector<1x1x64xf32> to vector<1x64xf32>
      %cst_205 = arith.constant dense<0.000000e+00> : vector<8xf32>
      %350 = vector.multi_reduction <add>, %345, %cst_205 [1] : vector<8x64xf32> to vector<8xf32>
      %351 = vector.shape_cast %350 : vector<8xf32> to vector<8x1xf32>
      %cst_206 = arith.constant 6.400000e+01 : f32
      %352 = vector.broadcast %cst_206 : f32 to vector<8x1xf32>
      %353 = arith.divf %351, %352 : vector<8x1xf32>
      %354 = vector.broadcast %353 : vector<8x1xf32> to vector<8x64xf32>
      %355 = arith.subf %345, %354 : vector<8x64xf32>
      %356 = arith.mulf %355, %355 : vector<8x64xf32>
      %cst_207 = arith.constant dense<0.000000e+00> : vector<8xf32>
      %357 = vector.multi_reduction <add>, %356, %cst_207 [1] : vector<8x64xf32> to vector<8xf32>
      %358 = vector.shape_cast %357 : vector<8xf32> to vector<8x1xf32>
      %cst_208 = arith.constant 6.400000e+01 : f32
      %359 = vector.broadcast %cst_208 : f32 to vector<8x1xf32>
      %360 = arith.divf %358, %359 : vector<8x1xf32>
      %cst_209 = arith.constant 9.99999974E-6 : f32
      %361 = vector.broadcast %cst_209 : f32 to vector<8x1xf32>
      %362 = arith.addf %360, %361 : vector<8x1xf32>
      %363 = math.rsqrt %362 : vector<8x1xf32>
      %364 = vector.broadcast %363 : vector<8x1xf32> to vector<8x64xf32>
      %365 = arith.mulf %355, %364 : vector<8x64xf32>
      %366 = vector.broadcast %347 : vector<1x64xf32> to vector<8x64xf32>
      %367 = arith.mulf %365, %366 : vector<8x64xf32>
      %368 = vector.broadcast %349 : vector<1x64xf32> to vector<8x64xf32>
      %369 = arith.addf %367, %368 : vector<8x64xf32>
      %370 = vector.shape_cast %369 : vector<8x64xf32> to vector<2x4x64xf32>
      %cst_210 = arith.constant dense<0.000000e+00> : vector<2x64xf32>
      %371 = vector.multi_reduction <add>, %370, %cst_210 [1] : vector<2x4x64xf32> to vector<2x64xf32>
      %cst_211 = arith.constant 4.000000e+00 : f32
      %372 = vector.broadcast %cst_211 : f32 to vector<2x64xf32>
      %373 = arith.divf %371, %372 : vector<2x64xf32>
      %c0_212 = arith.constant 0 : index
      %c0_213 = arith.constant 0 : index
      %374 = vector.load %arg20[%c0_212, %c0_213] : memref<64x32xf32, #tpu.memory_space<vmem>>, vector<64x32xf32>
      %cst_214 = arith.constant dense<0.000000e+00> : vector<2x32xf32>
      %375 = tpu.matmul %373, %374, %cst_214 {dimension_numbers = #tpu.dot_dimension_numbers<[1], [0], [0], [1], [0, 0, 1, 1], [], []>} : vector<2x64xf32>, vector<64x32xf32>, vector<2x32xf32> -> vector<2x32xf32>
      %c0_215 = arith.constant 0 : index
      %c0_216 = arith.constant 0 : index
      %376 = vector.load %arg21[%c0_215, %c0_216] : memref<1x32xf32, #tpu.memory_space<vmem>>, vector<1x32xf32>
      %377 = vector.broadcast %376 : vector<1x32xf32> to vector<2x32xf32>
      %378 = arith.addf %375, %377 : vector<2x32xf32>
      %cst_217 = arith.constant 0.000000e+00 : f32
      %379 = vector.broadcast %cst_217 : f32 to vector<2x32xf32>
      %380 = arith.maximumf %378, %379 : vector<2x32xf32>
      %c0_218 = arith.constant 0 : index
      %c0_219 = arith.constant 0 : index
      %381 = vector.load %arg22[%c0_218, %c0_219] : memref<32x1xf32, #tpu.memory_space<vmem>>, vector<32x1xf32>
      %cst_220 = arith.constant dense<0.000000e+00> : vector<2x1xf32>
      %382 = tpu.matmul %380, %381, %cst_220 {dimension_numbers = #tpu.dot_dimension_numbers<[1], [0], [0], [1], [0, 0, 1, 1], [], []>} : vector<2x32xf32>, vector<32x1xf32>, vector<2x1xf32> -> vector<2x1xf32>
      %c0_221 = arith.constant 0 : index
      %c0_222 = arith.constant 0 : index
      %383 = vector.load %arg23[%c0_221, %c0_222] : memref<1x1xf32, #tpu.memory_space<vmem>>, vector<1x1xf32>
      %384 = vector.broadcast %383 : vector<1x1xf32> to vector<2x1xf32>
      %385 = arith.addf %382, %384 : vector<2x1xf32>
      %c0_223 = arith.constant 0 : index
      %c0_224 = arith.constant 0 : index
      %386 = vector.load %arg24[%c0_223, %c0_224] : memref<2x1xf32, #tpu.memory_space<vmem>>, vector<2x1xf32>
      tpu.vector_store %arg24[%c0_223, %c0_224], %385 {strides = array<i32>} : memref<2x1xf32, #tpu.memory_space<vmem>>, vector<2x1xf32>,
    } else {
    }
    return
  }
  func.func @transform_0(%arg0: i32) -> (i32, i32, i32) {
    %c0_i32 = arith.constant 0 : i32
    %c0_i32_0 = arith.constant 0 : i32
    %c0_i32_1 = arith.constant 0 : i32
    return %arg0, %c0_i32, %c0_i32_0 : i32, i32, i32
  }
  func.func @transform_1(%arg0: i32) -> (i32, i32, i32) {
    %c0_i32 = arith.constant 0 : i32
    %c0_i32_0 = arith.constant 0 : i32
    %c0_i32_1 = arith.constant 0 : i32
    %c0_i32_2 = arith.constant 0 : i32
    return %c0_i32, %c0_i32_0, %c0_i32_1 : i32, i32, i32
  }
  func.func @transform_2(%arg0: i32) -> (i32, i32) {
    %c0_i32 = arith.constant 0 : i32
    %c0_i32_0 = arith.constant 0 : i32
    %c0_i32_1 = arith.constant 0 : i32
    return %c0_i32, %c0_i32_0 : i32, i32
  }
  func.func @transform_3(%arg0: i32) -> (i32, i32, i32) {
    %c0_i32 = arith.constant 0 : i32
    %c0_i32_0 = arith.constant 0 : i32
    %c0_i32_1 = arith.constant 0 : i32
    %c0_i32_2 = arith.constant 0 : i32
    return %c0_i32, %c0_i32_0, %c0_i32_1 : i32, i32, i32
  }
  func.func @transform_4(%arg0: i32) -> (i32, i32) {
    %c0_i32 = arith.constant 0 : i32
    %c0_i32_0 = arith.constant 0 : i32
    %c0_i32_1 = arith.constant 0 : i32
    return %c0_i32, %c0_i32_0 : i32, i32
  }
  func.func @transform_5(%arg0: i32) -> (i32, i32) {
    %c0_i32 = arith.constant 0 : i32
    %c0_i32_0 = arith.constant 0 : i32
    %c0_i32_1 = arith.constant 0 : i32
    return %c0_i32, %c0_i32_0 : i32, i32
  }
  func.func @transform_6(%arg0: i32) -> (i32, i32) {
    %c0_i32 = arith.constant 0 : i32
    %c0_i32_0 = arith.constant 0 : i32
    %c0_i32_1 = arith.constant 0 : i32
    return %c0_i32, %c0_i32_0 : i32, i32
  }
  func.func @transform_7(%arg0: i32) -> (i32, i32, i32) {
    %c0_i32 = arith.constant 0 : i32
    %c0_i32_0 = arith.constant 0 : i32
    %c0_i32_1 = arith.constant 0 : i32
    %c0_i32_2 = arith.constant 0 : i32
    return %c0_i32, %c0_i32_0, %c0_i32_1 : i32, i32, i32
  }
  func.func @transform_8(%arg0: i32) -> (i32, i32, i32) {
    %c0_i32 = arith.constant 0 : i32
    %c0_i32_0 = arith.constant 0 : i32
    %c0_i32_1 = arith.constant 0 : i32
    %c0_i32_2 = arith.constant 0 : i32
    return %c0_i32, %c0_i32_0, %c0_i32_1 : i32, i32, i32
  }
  func.func @transform_9(%arg0: i32) -> (i32, i32, i32, i32) {
    %c0_i32 = arith.constant 0 : i32
    %c0_i32_0 = arith.constant 0 : i32
    %c0_i32_1 = arith.constant 0 : i32
    %c0_i32_2 = arith.constant 0 : i32
    %c0_i32_3 = arith.constant 0 : i32
    return %c0_i32, %c0_i32_0, %c0_i32_1, %c0_i32_2 : i32, i32, i32, i32
  }
  func.func @transform_10(%arg0: i32) -> (i32, i32, i32) {
    %c0_i32 = arith.constant 0 : i32
    %c0_i32_0 = arith.constant 0 : i32
    %c0_i32_1 = arith.constant 0 : i32
    %c0_i32_2 = arith.constant 0 : i32
    return %c0_i32, %c0_i32_0, %c0_i32_1 : i32, i32, i32
  }
  func.func @transform_11(%arg0: i32) -> (i32, i32, i32) {
    %c0_i32 = arith.constant 0 : i32
    %c0_i32_0 = arith.constant 0 : i32
    %c0_i32_1 = arith.constant 0 : i32
    %c0_i32_2 = arith.constant 0 : i32
    return %c0_i32, %c0_i32_0, %c0_i32_1 : i32, i32, i32
  }
  func.func @transform_12(%arg0: i32) -> (i32, i32, i32) {
    %c0_i32 = arith.constant 0 : i32
    %c0_i32_0 = arith.constant 0 : i32
    %c0_i32_1 = arith.constant 0 : i32
    %c0_i32_2 = arith.constant 0 : i32
    return %c0_i32, %c0_i32_0, %c0_i32_1 : i32, i32, i32
  }
  func.func @transform_13(%arg0: i32) -> (i32, i32, i32) {
    %c0_i32 = arith.constant 0 : i32
    %c0_i32_0 = arith.constant 0 : i32
    %c0_i32_1 = arith.constant 0 : i32
    %c0_i32_2 = arith.constant 0 : i32
    return %c0_i32, %c0_i32_0, %c0_i32_1 : i32, i32, i32
  }
  func.func @transform_14(%arg0: i32) -> (i32, i32, i32) {
    %c0_i32 = arith.constant 0 : i32
    %c0_i32_0 = arith.constant 0 : i32
    %c0_i32_1 = arith.constant 0 : i32
    %c0_i32_2 = arith.constant 0 : i32
    return %c0_i32, %c0_i32_0, %c0_i32_1 : i32, i32, i32
  }
  func.func @transform_15(%arg0: i32) -> (i32, i32, i32) {
    %c0_i32 = arith.constant 0 : i32
    %c0_i32_0 = arith.constant 0 : i32
    %c0_i32_1 = arith.constant 0 : i32
    %c0_i32_2 = arith.constant 0 : i32
    return %c0_i32, %c0_i32_0, %c0_i32_1 : i32, i32, i32
  }
  func.func @transform_16(%arg0: i32) -> (i32, i32, i32) {
    %c0_i32 = arith.constant 0 : i32
    %c0_i32_0 = arith.constant 0 : i32
    %c0_i32_1 = arith.constant 0 : i32
    %c0_i32_2 = arith.constant 0 : i32
    return %c0_i32, %c0_i32_0, %c0_i32_1 : i32, i32, i32
  }
  func.func @transform_17(%arg0: i32) -> (i32, i32, i32) {
    %c0_i32 = arith.constant 0 : i32
    %c0_i32_0 = arith.constant 0 : i32
    %c0_i32_1 = arith.constant 0 : i32
    %c0_i32_2 = arith.constant 0 : i32
    return %c0_i32, %c0_i32_0, %c0_i32_1 : i32, i32, i32
  }
  func.func @transform_18(%arg0: i32) -> (i32, i32, i32) {
    %c0_i32 = arith.constant 0 : i32
    %c0_i32_0 = arith.constant 0 : i32
    %c0_i32_1 = arith.constant 0 : i32
    %c0_i32_2 = arith.constant 0 : i32
    return %c0_i32, %c0_i32_0, %c0_i32_1 : i32, i32, i32
  }
  func.func @transform_19(%arg0: i32) -> (i32, i32) {
    %c0_i32 = arith.constant 0 : i32
    %c0_i32_0 = arith.constant 0 : i32
    %c0_i32_1 = arith.constant 0 : i32
    return %c0_i32, %c0_i32_0 : i32, i32
  }
  func.func @transform_20(%arg0: i32) -> (i32, i32) {
    %c0_i32 = arith.constant 0 : i32
    %c0_i32_0 = arith.constant 0 : i32
    %c0_i32_1 = arith.constant 0 : i32
    return %c0_i32, %c0_i32_0 : i32, i32
  }
  func.func @transform_21(%arg0: i32) -> (i32, i32) {
    %c0_i32 = arith.constant 0 : i32
    %c0_i32_0 = arith.constant 0 : i32
    %c0_i32_1 = arith.constant 0 : i32
    return %c0_i32, %c0_i32_0 : i32, i32
  }
  func.func @transform_22(%arg0: i32) -> (i32, i32) {
    %c0_i32 = arith.constant 0 : i32
    %c0_i32_0 = arith.constant 0 : i32
    %c0_i32_1 = arith.constant 0 : i32
    return %c0_i32, %c0_i32_0 : i32, i32
  }
  func.func @transform_23(%arg0: i32) -> (i32, i32) {
    %c0_i32 = arith.constant 0 : i32
    %c0_i32_0 = arith.constant 0 : i32
    %c0_i32_1 = arith.constant 0 : i32
    return %c0_i32, %c0_i32_0 : i32, i32
  }
}

</mosaic_0001>

<bundles_post_ra>
// kernel: transformer_model_forward.1
= control target key start
LH: loop header
LB: loop body
LE: loop exit
PB: predicated region body
PF: predicated region fallthrough
CT: control target
= control target key end

     0   :  { %s13138_s0 = inlined_call_operand.hbm [shape: f32[8,16,16], index: 0, kind: input, shape index: {}]   ;;  %s13139_s1 = inlined_call_operand.hbm [shape: f32[3,16,512], index: 1, kind: input, shape index: {}]   ;;  %s13140_s2 = inlined_call_operand.hbm [shape: f32[1,512], index: 2, kind: input, shape index: {}]   ;;  %s13141_s3 = inlined_call_operand.hbm [shape: f32[3,256,512], index: 3, kind: input, shape index: {}]   ;;  %s13142_s4 = inlined_call_operand.hbm [shape: f32[1,512], index: 4, kind: input, shape index: {}]   ;;  %s13143_s5 = inlined_call_operand.vmem [shape: f32[1024,64], index: 5, kind: input, shape index: {}]   ;;  %s13144_s6 = inlined_call_operand.hbm [shape: f32[1,64], index: 6, kind: input, shape index: {}]   ;;  %s13145_s7 = inlined_call_operand.hbm [shape: f32[2,64,192], index: 7, kind: input, shape index: {}]   ;;  %s13146_s8 = inlined_call_operand.hbm [shape: f32[2,1,192], index: 8, kind: input, shape index: {}]   ;;  %s13147_s9 = inlined_call_operand.hbm [shape: f32[2,4,16,64], index: 9, kind: input, shape index: {}]   ;;  %s13148_s10 = inlined_call_operand.hbm [shape: f32[2,1,64], index: 10, kind: input, shape index: {}]   ;;  %s13149_s11 = inlined_call_operand.hbm [shape: f32[2,1,64], index: 11, kind: input, shape index: {}]   ;;  %s13150_s12 = inlined_call_operand.hbm [shape: f32[2,1,64], index: 12, kind: input, shape index: {}]   ;;  %s13151_s13 = inlined_call_operand.hbm [shape: f32[2,64,64], index: 13, kind: input, shape index: {}]   ;;  %s13152_s14 = inlined_call_operand.hbm [shape: f32[2,1,64], index: 14, kind: input, shape index: {}]   ;;  %s13153_s15 = inlined_call_operand.hbm [shape: f32[2,64,64], index: 15, kind: input, shape index: {}]   ;;  %s13154_s16 = inlined_call_operand.hbm [shape: f32[2,1,64], index: 16, kind: input, shape index: {}]   ;;  %s13155_s17 = inlined_call_operand.hbm [shape: f32[2,1,64], index: 17, kind: input, shape index: {}]   ;;  %s13156_s18 = inlined_call_operand.hbm [shape: f32[2,1,64], index: 18, kind: input, shape index: {}]   ;;  %s13157_s19 = inlined_call_operand.vmem [shape: f32[64,32], index: 19, kind: input, shape index: {}]   ;;  %s13158_s20 = inlined_call_operand.hbm [shape: f32[1,32], index: 20, kind: input, shape index: {}]   ;;  %s13159_s21 = inlined_call_operand.vmem [shape: f32[32,1], index: 21, kind: input, shape index: {}]   ;;  %s13160_s22 = inlined_call_operand.<no memory space> [shape: f32[1,1], index: 22, kind: input, shape index: {}]   ;;  %s13161_s23 = inlined_call_operand.vmem [shape: f32[2,1], index: 23, kind: output, shape index: {}]  }
   0x1   :  { %13189 = sst [smem:[#allocation50_spill]] %s13138_s0  ;;  %v28_v0 = vstv %s13160_s22 }
   0x2   :  { %13190 = sst [smem:[#allocation51_spill]] %s13139_s1  ;;  %29 = vst [vmem:[#allocation5] sm:$0x1] %v28_v0 }
   0x3   :  { %13191 = sst [smem:[#allocation52_spill]] %s13140_s2 }
   0x4   :  { %13192 = sst [smem:[#allocation53_spill]] %s13141_s3 }
   0x5   :  { %13193 = sst [smem:[#allocation54_spill]] %s13142_s4 }
   0x6   :  { %13194 = sst [smem:[#allocation55_spill]] %s13143_s5 }
   0x7   :  { %13195 = sst [smem:[#allocation56_spill]] %s13144_s6 }
   0x8   :  { %13196 = sst [smem:[#allocation57_spill]] %s13145_s7 }
   0x9   :  { %13197 = sst [smem:[#allocation58_spill]] %s13146_s8 }
   0xa   :  { %13198 = sst [smem:[#allocation59_spill]] %s13148_s10 }
   0xb   :  { %13199 = sst [smem:[#allocation60_spill]] %s13150_s12 }
   0xc   :  { %13200 = sst [smem:[#allocation61_spill]] %s13152_s14 }
   0xd   :  { %13201 = sst [smem:[#allocation62_spill]] %s13157_s19 }
   0xe   :  { %13202 = sst [smem:[#allocation63_spill]] %s13159_s21 }
   0xf   :  { %13203 = sst [smem:[#allocation64_spill]] %s13161_s23 }
  0x10   :  { %30 = vsyncpa [#allocation7], 0 }
  0x11   :  { %32 = vsyncpa [#allocation7 + $0x1], 0 }
  0x12   :  { %33 = vsyncpa [#allocation9], 0 }
  0x13   :  { %34 = vsyncpa [#allocation12], 0 }
  0x14   :  { %35 = vsyncpa [#allocation15], 0 }
  0x15   :  { %36 = vsyncpa [#allocation18], 0 }
  0x16   :  { %37 = vsyncpa [#allocation21], 0 }
  0x17   :  { %38 = vsyncpa [#allocation24], 0 }
  0x18   :  { %39 = vsyncpa [#allocation27], 0 }
  0x19   :  { %40 = vsyncpa [#allocation30], 0 }
  0x1a   :  { %41 = vsyncpa [#allocation33], 0  ;;  %s11406_s24 = smov 0   ;;  %s11408_s25 = smov 0  }
  0x1b   :  { %s11410_s5 = smov 0   ;;  %s11412_s1 = smov 0  }
  0x1c LB: > { %13204 = sst [smem:[#allocation45_spill]] %s11228_s24  ;;  %s11242_s22 = smov [#allocation8]   ;;  %s11240_s1 = sphi %s11412_s1, %s13267_s1   ;;  %s11236_s5 = sphi %s11410_s5, %s13266_s5   ;;  %s11232_s25 = sphi %s11408_s25, %s13265_s25   ;;  %s11228_s24 = sphi %s11406_s24, %s13262_s24  }
  0x1d   : > { %13205 = sst [smem:[#allocation46_spill]] %s11232_s25  ;;  %s573_s26 = sshll.u32 %s11242_s22, 4  ;;  %s11433_s26 = int_to_ptr.vmem [resolvable:$true] %s573_s26 }
  0x1e   : > { %13206 = sst [smem:[#allocation47_spill]] %s11236_s5  ;;  %s11427_s2 = sadd.s32 4294967295, %s11240_s1  }
  0x1f   : > { %13207 = sst [smem:[#allocation48_spill]] %s11427_s2  ;;  %p8771_p0 = scmp.ge.s32.totalorder %s11240_s1, 1 }
  0x20   : > { %p13178_p1 = scmp.eq.s32.totalorder %s11427_s2, 0  ;;  %p561_p2 = scmp.lt.s32.totalorder %s11240_s1, 3 }
  0x21   : > { %s11243_s27 = smov [#allocation11]   ;;  %s11244_s29 = smov [#allocation14]  }
  0x22   : > { %p11435_p4 = pnand %p8771_p0, %p561_p2  ;;  %s597_s7 = sshll.u32 %s11243_s27, 4  ;;  %s11447_s7 = int_to_ptr.vmem [resolvable:$true] %s597_s7 }
  0x23   : > { %s625_s3 = sshll.u32 %s11244_s29, 4  ;;  %s13211_s30 = sld [smem:[#allocation51_spill]]  ;;  %s11449_s3 = int_to_ptr.vmem [resolvable:$true] %s625_s3 }
  0x24   : > { %s13208_s6 = scalar_select %p11435_p4, 1, 0 }
  0x25   : > { %p10395_p5 = pneg %p11435_p4 }
  0x26   : > { %13209 = sst [smem:[#allocation49_spill]] %s13208_s6 }
  0x27   : > { %p11443_p6 = pnand %p10395_p5, %p13178_p1 }
  0x29   : > { %s10636_s22 = scalar_lea.hbm %s13211_s30, 3072  ;;  %p11459_p8 = pneg %p11443_p6 }
  0x2a   : > { %p10637_p7 = scmp.ne.s32.totalorder %s13211_s30, %s10636_s22  ;;  %p10643_p11 = scmp.lt.u32.totalorder %s10636_s22, %s13211_s30 }
  0x2c   : > { %p10639_p9 = pnand %p11459_p8, %p10637_p7 }
  0x2e   : > { %p10640_p10 = pneg %p10639_p9 }
  0x30   : > { %p10645_p12 = pnand %p10643_p11, %p10640_p10 }
  0x32   : > { %10648 = shalt.err (!%p10645_p12)
}
  0x33   : > { %s10649_s21 = scalar_lea.vmem %s11433_s26, 3072  ;;  %p10657_p5 = scmp.lt.s32.totalorder %s11433_s26, %s11433_s26 }
  0x34   : > { %p10650_p13 = scmp.ne.s32.totalorder %s11433_s26, %s10649_s21  ;;  %p10658_p3 = scmp.lt.s32.totalorder %s10649_s21, %s10649_s21 }
  0x36   : > { %p10652_p0 = pnand %p10650_p13, %p11459_p8  ;;  %p10659_p7 = por %p10658_p3, %p10657_p5 }
  0x38   : > { %p10653_p2 = pneg %p10652_p0 }
  0x3a   : > { %p10660_p9 = pnand %p10659_p7, %p10653_p2 }
  0x3c   : > { %10663 = shalt.err (!%p10660_p9)
}
  0x3d   : > { %s11245_s23 = smov 512   ;;  %s11246_s19 = smov 32  }
  0x3e   : > { %10398 = dma.hbm_to_vmem [thread:$0]  (!%p11443_p6), %s13211_s30, 3072, %s11433_s26, [#allocation9], %s11245_s23, %s11245_s23, %s11246_s19  }
  0x3f   : > { %s13213_s6 = sld [smem:[#allocation53_spill]] }
  0x45   : > { %s10664_s2 = scalar_lea.hbm %s13213_s6, 49152 }
  0x46   : > { %p10665_p3 = scmp.ne.s32.totalorder %s13213_s6, %s10664_s2  ;;  %p10671_p12 = scmp.lt.u32.totalorder %s10664_s2, %s13213_s6 }
  0x48   : > { %p10667_p10 = pnand %p10665_p3, %p11459_p8 }
  0x4a   : > { %p10668_p11 = pneg %p10667_p10 }
  0x4c   : > { %p10673_p13 = pnand %p10671_p12, %p10668_p11 }
  0x4e   : > { %10676 = shalt.err (!%p10673_p13)
}
  0x4f   : > { %s10677_s26 = scalar_lea.vmem %s11447_s7, 49152  ;;  %p10685_p7 = scmp.lt.s32.totalorder %s11447_s7, %s11447_s7 }
  0x50   : > { %p10678_p0 = scmp.ne.s32.totalorder %s11447_s7, %s10677_s26  ;;  %p10686_p9 = scmp.lt.s32.totalorder %s10677_s26, %s10677_s26 }
  0x52   : > { %p10680_p2 = pnand %p10678_p0, %p11459_p8  ;;  %p10687_p3 = por %p10686_p9, %p10685_p7 }
  0x54   : > { %p10681_p5 = pneg %p10680_p2 }
  0x56   : > { %p10688_p10 = pnand %p10687_p3, %p10681_p5 }
  0x58   : > { %10691 = shalt.err (!%p10688_p10)
}
  0x59   : > { %10404 = dma.hbm_to_vmem [thread:$0]  (!%p11443_p6), %s13213_s6, 49152, %s11447_s7, [#allocation12], %s11245_s23, %s11245_s23, %s11246_s19  }
  0x5a   : > { %s13214_s0 = sld [smem:[#allocation56_spill]] }
  0x60   : > { %s10692_s4 = scalar_lea.hbm %s13214_s0, 16 }
  0x61   : > { %p10693_p11 = scmp.ne.s32.totalorder %s13214_s0, %s10692_s4  ;;  %p10699_p0 = scmp.lt.u32.totalorder %s10692_s4, %s13214_s0 }
  0x63   : > { %p10695_p12 = pnand %p10693_p11, %p11459_p8 }
  0x65   : > { %p10696_p13 = pneg %p10695_p12 }
  0x67   : > { %p10701_p2 = pnand %p10699_p0, %p10696_p13 }
  0x69   : > { %10704 = shalt.err (!%p10701_p2)
}
  0x6a   : > { %s10705_s7 = scalar_lea.vmem %s11449_s3, 16  ;;  %s10712_s23 = scalar_lea.vmem %s11449_s3, 32 }
  0x6b   : > { %p10706_p5 = scmp.ne.s32.totalorder %s11449_s3, %s10705_s7  ;;  %p10713_p3 = scmp.lt.s32.totalorder %s11449_s3, %s11449_s3 }
  0x6c   : > { %p10714_p10 = scmp.lt.s32.totalorder %s10712_s23, %s10705_s7 }
  0x6d   : > { %p10708_p7 = pnand %p10706_p5, %p11459_p8 }
  0x6e   : > { %p10715_p11 = por %p10714_p10, %p10713_p3 }
  0x6f   : > { %p10709_p9 = pneg %p10708_p7 }
  0x71   : > { %p10716_p12 = pnand %p10715_p11, %p10709_p9 }
  0x73   : > { %10719 = shalt.err (!%p10716_p12)
}
  0x74   : > { %10410 = dma.hbm_to_vmem [thread:$0]  (!%p11443_p6), %s13214_s0, 16, %s11449_s3, [#allocation15]  }
  0x75   : > { %s11247_s5 = smov [#allocation17]   ;;  %s13215_s8 = sld [smem:[#allocation58_spill]] }
  0x76   : > { %s648_s2 = sshll.u32 %s11247_s5, 4  ;;  %s649_s2 = int_to_ptr.vmem [resolvable:$true] %s648_s2 }
  0x7b   : > { %s10720_s29 = scalar_lea.hbm %s13215_s8, 64 }
  0x7c   : > { %p10721_p13 = scmp.ne.s32.totalorder %s13215_s8, %s10720_s29  ;;  %p10727_p5 = scmp.lt.u32.totalorder %s10720_s29, %s13215_s8 }
  0x7e   : > { %p10723_p0 = pnand %p10721_p13, %p11459_p8 }
  0x80   : > { %p10724_p2 = pneg %p10723_p0 }
  0x82   : > { %p10729_p7 = pnand %p10727_p5, %p10724_p2 }
  0x84   : > { %10732 = shalt.err (!%p10729_p7)
}
  0x85   : > { %s10733_s3 = scalar_lea.vmem %s649_s2, 64  ;;  %p10741_p11 = scmp.lt.s32.totalorder %s649_s2, %s649_s2 }
  0x86   : > { %p10734_p9 = scmp.ne.s32.totalorder %s649_s2, %s10733_s3  ;;  %p10742_p12 = scmp.lt.s32.totalorder %s10733_s3, %s10733_s3 }
  0x88   : > { %p10736_p3 = pnand %p10734_p9, %p11459_p8  ;;  %p10743_p1 = por %p10742_p12, %p10741_p11 }
  0x8a   : > { %p10737_p10 = pneg %p10736_p3 }
  0x8c   : > { %p10744_p4 = pnand %p10743_p1, %p10737_p10 }
  0x8e   : > { %10747 = shalt.err (!%p10744_p4)
}
  0x8f   : > { %s11248_s24 = smov 2   ;;  %s11249_s4 = smov [#allocation20]  }
  0x90   : > { %10416 = dma.hbm_to_vmem [thread:$0]  (!%p11443_p6), %s13215_s8, 64, %s649_s2, [#allocation18], %s11246_s19, %s11246_s19, %s11248_s24  }
  0x91   : > { %s674_s22 = sshll.u32 %s11249_s4, 4  ;;  %s11250_s29 = smov [#allocation23]   ;;  %s675_s22 = int_to_ptr.vmem [resolvable:$true] %s674_s22 }
  0x92   : > { %s700_s21 = sshll.u32 %s11250_s29, 4  ;;  %s13216_s10 = sld [smem:[#allocation59_spill]]  ;;  %s701_s21 = int_to_ptr.vmem [resolvable:$true] %s700_s21 }
  0x98   : > { %s10748_s23 = scalar_lea.hbm %s13216_s10, 32 }
  0x99   : > { %p10749_p1 = scmp.ne.s32.totalorder %s13216_s10, %s10748_s23  ;;  %p10755_p0 = scmp.lt.u32.totalorder %s10748_s23, %s13216_s10 }
  0x9b   : > { %p10751_p4 = pnand %p10749_p1, %p11459_p8 }
  0x9d   : > { %p10752_p13 = pneg %p10751_p4 }
  0x9f   : > { %p10757_p2 = pnand %p10755_p0, %p10752_p13 }
  0xa1   : > { %10760 = shalt.err (!%p10757_p2)
}
  0xa2   : > { %s10761_s19 = scalar_lea.vmem %s675_s22, 32  ;;  %p10769_p3 = scmp.lt.s32.totalorder %s675_s22, %s675_s22 }
  0xa3   : > { %p10762_p5 = scmp.ne.s32.totalorder %s675_s22, %s10761_s19  ;;  %p10770_p10 = scmp.lt.s32.totalorder %s10761_s19, %s10761_s19 }
  0xa5   : > { %p10764_p7 = pnand %p10762_p5, %p11459_p8  ;;  %p10771_p11 = por %p10770_p10, %p10769_p3 }
  0xa7   : > { %p10765_p9 = pneg %p10764_p7 }
  0xa9   : > { %p10772_p12 = pnand %p10771_p11, %p10765_p9 }
  0xab   : > { %10775 = shalt.err (!%p10772_p12)
}
  0xac   : > { %s13184_s0 = smov 16   ;;  %s13182_s2 = smov 1  }
  0xad   : > { %10422 = dma.hbm_to_vmem [thread:$0]  (!%p11443_p6), %s13216_s10, 32, %s675_s22, [#allocation21], %s13184_s0, %s13184_s0, %s13182_s2  }
  0xae   : > { %s13217_s12 = sld [smem:[#allocation60_spill]] }
  0xb4   : > { %s10776_s29 = scalar_lea.hbm %s13217_s12, 32 }
  0xb5   : > { %p10777_p1 = scmp.ne.s32.totalorder %s13217_s12, %s10776_s29  ;;  %p10783_p0 = scmp.lt.u32.totalorder %s10776_s29, %s13217_s12 }
  0xb7   : > { %p10779_p4 = pnand %p10777_p1, %p11459_p8 }
  0xb9   : > { %p10780_p13 = pneg %p10779_p4 }
  0xbb   : > { %p10785_p2 = pnand %p10783_p0, %p10780_p13 }
  0xbd   : > { %10788 = shalt.err (!%p10785_p2)
}
  0xbe   : > { %s10789_s25 = scalar_lea.vmem %s701_s21, 32  ;;  %p10797_p3 = scmp.lt.s32.totalorder %s701_s21, %s701_s21 }
  0xbf   : > { %p10790_p5 = scmp.ne.s32.totalorder %s701_s21, %s10789_s25  ;;  %p10798_p10 = scmp.lt.s32.totalorder %s10789_s25, %s10789_s25 }
  0xc1   : > { %p10792_p7 = pnand %p10790_p5, %p11459_p8  ;;  %p10799_p11 = por %p10798_p10, %p10797_p3 }
  0xc3   : > { %p10793_p9 = pneg %p10792_p7 }
  0xc5   : > { %p10800_p12 = pnand %p10799_p11, %p10793_p9 }
  0xc7   : > { %10803 = shalt.err (!%p10800_p12)
}
  0xc8   : > { %10428 = dma.hbm_to_vmem [thread:$0]  (!%p11443_p6), %s13217_s12, 32, %s701_s21, [#allocation24], %s13184_s0, %s13184_s0, %s13182_s2  }
  0xc9   : > { %s11253_s6 = smov [#allocation26]   ;;  %s11254_s5 = smov [#allocation29]  }
  0xca   : > { %s726_s24 = sshll.u32 %s11253_s6, 4  ;;  %s752_s4 = sshll.u32 %s11254_s5, 4  ;;  %s727_s24 = int_to_ptr.vmem [resolvable:$true] %s726_s24  ;;  %s753_s4 = int_to_ptr.vmem [resolvable:$true] %s752_s4 }
  0xcb   : > { %s13218_s14 = sld [smem:[#allocation61_spill]] }
  0xd1   : > { %s10804_s7 = scalar_lea.hbm %s13218_s14, 32 }
  0xd2   : > { %p10805_p1 = scmp.ne.s32.totalorder %s13218_s14, %s10804_s7  ;;  %p10811_p0 = scmp.lt.u32.totalorder %s10804_s7, %s13218_s14 }
  0xd4   : > { %p10807_p4 = pnand %p10805_p1, %p11459_p8 }
  0xd6   : > { %p10808_p13 = pneg %p10807_p4 }
  0xd8   : > { %p10813_p2 = pnand %p10811_p0, %p10808_p13 }
  0xda   : > { %10816 = shalt.err (!%p10813_p2)
}
  0xdb   : > { %s10817_s21 = scalar_lea.vmem %s727_s24, 32  ;;  %p10825_p3 = scmp.lt.s32.totalorder %s727_s24, %s727_s24 }
  0xdc   : > { %p10818_p5 = scmp.ne.s32.totalorder %s727_s24, %s10817_s21  ;;  %p10826_p10 = scmp.lt.s32.totalorder %s10817_s21, %s10817_s21 }
  0xde   : > { %p10820_p7 = pnand %p10818_p5, %p11459_p8  ;;  %p10827_p11 = por %p10826_p10, %p10825_p3 }
  0xe0   : > { %p10821_p9 = pneg %p10820_p7 }
  0xe2   : > { %p10828_p12 = pnand %p10827_p11, %p10821_p9 }
  0xe4   : > { %10831 = shalt.err (!%p10828_p12)
}
  0xe5   : > { %10434 = dma.hbm_to_vmem [thread:$0]  (!%p11443_p6), %s13218_s14, 32, %s727_s24, [#allocation27], %s13184_s0, %s13184_s0, %s13182_s2  }
  0xe6   : > { %s10832_s26 = scalar_lea.hbm %s13154_s16, 32 }
  0xe7   : > { %p10833_p1 = scmp.ne.s32.totalorder %s13154_s16, %s10832_s26  ;;  %p10839_p0 = scmp.lt.u32.totalorder %s10832_s26, %s13154_s16 }
  0xe9   : > { %p10835_p4 = pnand %p10833_p1, %p11459_p8 }
  0xeb   : > { %p10836_p13 = pneg %p10835_p4 }
  0xed   : > { %p10841_p2 = pnand %p10839_p0, %p10836_p13 }
  0xef   : > { %10844 = shalt.err (!%p10841_p2)
}
  0xf0   : > { %s10845_s22 = scalar_lea.vmem %s753_s4, 32  ;;  %p10853_p3 = scmp.lt.s32.totalorder %s753_s4, %s753_s4 }
  0xf1   : > { %p10846_p5 = scmp.ne.s32.totalorder %s753_s4, %s10845_s22  ;;  %p10854_p10 = scmp.lt.s32.totalorder %s10845_s22, %s10845_s22 }
  0xf3   : > { %p10848_p7 = pnand %p10846_p5, %p11459_p8  ;;  %p10855_p11 = por %p10854_p10, %p10853_p3 }
  0xf5   : > { %p10849_p9 = pneg %p10848_p7 }
  0xf7   : > { %p10856_p12 = pnand %p10855_p11, %p10849_p9 }
  0xf9   : > { %10859 = shalt.err (!%p10856_p12)
}
  0xfa   : > { %10440 = dma.hbm_to_vmem [thread:$0]  (!%p11443_p6), %s13154_s16, 32, %s753_s4, [#allocation30], %s13184_s0, %s13184_s0, %s13182_s2  }
  0xfb   : > { %s11255_s19 = smov [#allocation32]   ;;  %s11256_s5 = smov [#allocation10]  }
  0xfc   : > { %s778_s6 = sshll.u32 %s11255_s19, 4  ;;  %s587_s29 = sshll.u32 %s11256_s5, 4  ;;  %s779_s6 = int_to_ptr.vmem [resolvable:$true] %s778_s6  ;;  %s588_s29 = int_to_ptr.vmem [resolvable:$true] %s587_s29 }
  0xfd   : > { %s10860_s23 = scalar_lea.hbm %s13156_s18, 32 }
  0xfe   : > { %p10861_p1 = scmp.ne.s32.totalorder %s13156_s18, %s10860_s23  ;;  %p10867_p0 = scmp.lt.u32.totalorder %s10860_s23, %s13156_s18 }
 0x100   : > { %p10863_p4 = pnand %p10861_p1, %p11459_p8 }
 0x102   : > { %p10864_p13 = pneg %p10863_p4 }
 0x104   : > { %p10869_p2 = pnand %p10867_p0, %p10864_p13 }
 0x106   : > { %10872 = shalt.err (!%p10869_p2)
}
 0x107   : > { %s10873_s4 = scalar_lea.vmem %s779_s6, 32  ;;  %p10881_p3 = scmp.lt.s32.totalorder %s779_s6, %s779_s6 }
 0x108   : > { %p10874_p5 = scmp.ne.s32.totalorder %s779_s6, %s10873_s4  ;;  %p10882_p10 = scmp.lt.s32.totalorder %s10873_s4, %s10873_s4 }
 0x10a   : > { %p10876_p7 = pnand %p10874_p5, %p11459_p8  ;;  %p10883_p11 = por %p10882_p10, %p10881_p3 }
 0x10c   : > { %p10877_p9 = pneg %p10876_p7 }
 0x10e   : > { %p10884_p12 = pnand %p10883_p11, %p10877_p9 }
 0x110   : > { %10887 = shalt.err (!%p10884_p12)
}
 0x111   : > { %10446 = dma.hbm_to_vmem [thread:$0]  (!%p11443_p6), %s13156_s18, 32, %s779_s6, [#allocation33], %s13184_s0, %s13184_s0, %s13182_s2  }
 0x112   : > { %s13219_s7 = sld [smem:[#allocation52_spill]] }
 0x118   : > { %s10888_s23 = scalar_lea.hbm %s13219_s7, 64 }
 0x119   : > { %p10889_p1 = scmp.ne.s32.totalorder %s13219_s7, %s10888_s23  ;;  %p10895_p0 = scmp.lt.u32.totalorder %s10888_s23, %s13219_s7 }
 0x11b   : > { %p10891_p4 = pnand %p10889_p1, %p11459_p8 }
 0x11d   : > { %p10892_p13 = pneg %p10891_p4 }
 0x11f   : > { %p10897_p2 = pnand %p10895_p0, %p10892_p13 }
 0x121   : > { %10900 = shalt.err (!%p10897_p2)
}
 0x122   : > { %s10901_s4 = scalar_lea.vmem %s588_s29, 64  ;;  %p10909_p3 = scmp.lt.s32.totalorder %s588_s29, %s588_s29 }
 0x123   : > { %p10902_p5 = scmp.ne.s32.totalorder %s588_s29, %s10901_s4  ;;  %p10910_p10 = scmp.lt.s32.totalorder %s10901_s4, %s10901_s4 }
 0x125   : > { %p10904_p7 = pnand %p10902_p5, %p11459_p8  ;;  %p10911_p11 = por %p10910_p10, %p10909_p3 }
 0x127   : > { %p10905_p9 = pneg %p10904_p7 }
 0x129   : > { %p10912_p12 = pnand %p10911_p11, %p10905_p9 }
 0x12b   : > { %10915 = shalt.err (!%p10912_p12)
}
 0x12c   : > { %10401 = dma.hbm_to_vmem [thread:$0]  (!%p11443_p6), %s13219_s7, 64, %s588_s29, [#allocation9]  }
 0x12d   : > { %s11257_s19 = smov [#allocation13]   ;;  %s11258_s26 = smov [#allocation16]  }
 0x12e   : > { %s611_s5 = sshll.u32 %s11257_s19, 4  ;;  %s635_s23 = sshll.u32 %s11258_s26, 4  ;;  %s612_s5 = int_to_ptr.vmem [resolvable:$true] %s611_s5  ;;  %s636_s23 = int_to_ptr.vmem [resolvable:$true] %s635_s23 }
 0x12f   : > { %s13220_s22 = sld [smem:[#allocation54_spill]] }
 0x135   : > { %s10916_s24 = scalar_lea.hbm %s13220_s22, 64 }
 0x136   : > { %p10917_p1 = scmp.ne.s32.totalorder %s13220_s22, %s10916_s24  ;;  %p10923_p0 = scmp.lt.u32.totalorder %s10916_s24, %s13220_s22 }
 0x138   : > { %p10919_p4 = pnand %p10917_p1, %p11459_p8 }
 0x13a   : > { %p10920_p13 = pneg %p10919_p4 }
 0x13c   : > { %p10925_p2 = pnand %p10923_p0, %p10920_p13 }
 0x13e   : > { %10928 = shalt.err (!%p10925_p2)
}
 0x13f   : > { %s10929_s29 = scalar_lea.vmem %s612_s5, 64  ;;  %p10937_p3 = scmp.lt.s32.totalorder %s612_s5, %s612_s5 }
 0x140   : > { %p10930_p5 = scmp.ne.s32.totalorder %s612_s5, %s10929_s29  ;;  %p10938_p10 = scmp.lt.s32.totalorder %s10929_s29, %s10929_s29 }
 0x142   : > { %p10932_p7 = pnand %p10930_p5, %p11459_p8  ;;  %p10939_p11 = por %p10938_p10, %p10937_p3 }
 0x144   : > { %p10933_p9 = pneg %p10932_p7 }
 0x146   : > { %p10940_p12 = pnand %p10939_p11, %p10933_p9 }
 0x148   : > { %10943 = shalt.err (!%p10940_p12)
}
 0x149   : > { %10407 = dma.hbm_to_vmem [thread:$0]  (!%p11443_p6), %s13220_s22, 64, %s612_s5, [#allocation12]  }
 0x14a   : > { %s13221_s26 = sld [smem:[#allocation57_spill]] }
 0x150   : > { %s10944_s3 = scalar_lea.hbm %s13221_s26, 4096 }
 0x151   : > { %p10945_p1 = scmp.ne.s32.totalorder %s13221_s26, %s10944_s3  ;;  %p10951_p0 = scmp.lt.u32.totalorder %s10944_s3, %s13221_s26 }
 0x153   : > { %p10947_p4 = pnand %p10945_p1, %p11459_p8 }
 0x155   : > { %p10948_p13 = pneg %p10947_p4 }
 0x157   : > { %p10953_p2 = pnand %p10951_p0, %p10948_p13 }
 0x159   : > { %10956 = shalt.err (!%p10953_p2)
}
 0x15a   : > { %s10957_s29 = scalar_lea.vmem %s636_s23, 4096  ;;  %p10965_p3 = scmp.lt.s32.totalorder %s636_s23, %s636_s23 }
 0x15b   : > { %p10958_p5 = scmp.ne.s32.totalorder %s636_s23, %s10957_s29  ;;  %p10966_p10 = scmp.lt.s32.totalorder %s10957_s29, %s10957_s29 }
 0x15d   : > { %p10960_p7 = pnand %p10958_p5, %p11459_p8  ;;  %p10967_p11 = por %p10966_p10, %p10965_p3 }
 0x15f   : > { %p10961_p9 = pneg %p10960_p7 }
 0x161   : > { %p10968_p12 = pnand %p10967_p11, %p10961_p9 }
 0x163   : > { %10971 = shalt.err (!%p10968_p12)
}
 0x164   : > { %s11259_s5 = smov 256   ;;  %s13222_s2 = smov 16  }
 0x165   : > { %10413 = dma.hbm_to_vmem [thread:$0]  (!%p11443_p6), %s13221_s26, 4096, %s636_s23, [#allocation15], %s11259_s5, %s11259_s5, %s13222_s2  }
 0x166   : > { %s11260_s19 = smov [#allocation19]   ;;  %s10972_s4 = scalar_lea.hbm %s13147_s9, 2048 }
 0x167   : > { %s661_s3 = sshll.u32 %s11260_s19, 4  ;;  %p10973_p1 = scmp.ne.s32.totalorder %s13147_s9, %s10972_s4  ;;  %s662_s3 = int_to_ptr.vmem [resolvable:$true] %s661_s3 }
 0x168   : > { %p10979_p0 = scmp.lt.u32.totalorder %s10972_s4, %s13147_s9 }
 0x169   : > { %p10975_p4 = pnand %p10973_p1, %p11459_p8 }
 0x16b   : > { %p10976_p13 = pneg %p10975_p4 }
 0x16d   : > { %p10981_p2 = pnand %p10979_p0, %p10976_p13 }
 0x16f   : > { %10984 = shalt.err (!%p10981_p2)
}
 0x170   : > { %s10985_s23 = scalar_lea.vmem %s662_s3, 2048  ;;  %p10993_p3 = scmp.lt.s32.totalorder %s662_s3, %s662_s3 }
 0x171   : > { %p10986_p5 = scmp.ne.s32.totalorder %s662_s3, %s10985_s23  ;;  %p10994_p10 = scmp.lt.s32.totalorder %s10985_s23, %s10985_s23 }
 0x173   : > { %p10988_p7 = pnand %p10986_p5, %p11459_p8  ;;  %p10995_p11 = por %p10994_p10, %p10993_p3 }
 0x175   : > { %p10989_p9 = pneg %p10988_p7 }
 0x177   : > { %p10996_p12 = pnand %p10995_p11, %p10989_p9 }
 0x179   : > { %10999 = shalt.err (!%p10996_p12)
}
 0x17a   : > { %s11261_s5 = smov 128   ;;  %s11262_s21 = smov 8  }
 0x17b   : > { %10419 = dma.hbm_to_vmem [thread:$0]  (!%p11443_p6), %s13147_s9, 2048, %s662_s3, [#allocation18], %s11261_s5, %s11261_s5, %s11262_s21  }
 0x17c   : > { %s11263_s0 = smov [#allocation22]   ;;  %s11264_s25 = smov [#allocation25]  }
 0x17d   : > { %s687_s19 = sshll.u32 %s11263_s0, 4  ;;  %s713_s24 = sshll.u32 %s11264_s25, 4  ;;  %s688_s19 = int_to_ptr.vmem [resolvable:$true] %s687_s19  ;;  %s714_s24 = int_to_ptr.vmem [resolvable:$true] %s713_s24 }
 0x17e   : > { %s11000_s29 = scalar_lea.hbm %s13149_s11, 32 }
 0x17f   : > { %p11001_p1 = scmp.ne.s32.totalorder %s13149_s11, %s11000_s29  ;;  %p11007_p0 = scmp.lt.u32.totalorder %s11000_s29, %s13149_s11 }
 0x181   : > { %p11003_p4 = pnand %p11001_p1, %p11459_p8 }
 0x183   : > { %p11004_p13 = pneg %p11003_p4 }
 0x185   : > { %p11009_p2 = pnand %p11007_p0, %p11004_p13 }
 0x187   : > { %11012 = shalt.err (!%p11009_p2)
}
 0x188   : > { %s11013_s3 = scalar_lea.vmem %s688_s19, 32  ;;  %p11021_p3 = scmp.lt.s32.totalorder %s688_s19, %s688_s19 }
 0x189   : > { %p11014_p5 = scmp.ne.s32.totalorder %s688_s19, %s11013_s3  ;;  %p11022_p10 = scmp.lt.s32.totalorder %s11013_s3, %s11013_s3 }
 0x18b   : > { %p11016_p7 = pnand %p11014_p5, %p11459_p8  ;;  %p11023_p11 = por %p11022_p10, %p11021_p3 }
 0x18d   : > { %p11017_p9 = pneg %p11016_p7 }
 0x18f   : > { %p11024_p12 = pnand %p11023_p11, %p11017_p9 }
 0x191   : > { %11027 = shalt.err (!%p11024_p12)
}
 0x192   : > { %s13223_s10 = smov 1   ;;  %s11028_s0 = scalar_lea.hbm %s13151_s13, 2048 }
 0x193   : > { %10425 = dma.hbm_to_vmem [thread:$0]  (!%p11443_p6), %s13149_s11, 32, %s688_s19, [#allocation21], %s13222_s2, %s13222_s2, %s13223_s10  }
 0x194   : > { %p11029_p1 = scmp.ne.s32.totalorder %s13151_s13, %s11028_s0  ;;  %p11035_p0 = scmp.lt.u32.totalorder %s11028_s0, %s13151_s13 }
 0x196   : > { %p11031_p4 = pnand %p11029_p1, %p11459_p8 }
 0x198   : > { %p11032_p13 = pneg %p11031_p4 }
 0x19a   : > { %p11037_p2 = pnand %p11035_p0, %p11032_p13 }
 0x19c   : > { %11040 = shalt.err (!%p11037_p2)
}
 0x19d   : > { %s11041_s23 = scalar_lea.vmem %s714_s24, 2048  ;;  %p11049_p3 = scmp.lt.s32.totalorder %s714_s24, %s714_s24 }
 0x19e   : > { %p11042_p5 = scmp.ne.s32.totalorder %s714_s24, %s11041_s23  ;;  %p11050_p10 = scmp.lt.s32.totalorder %s11041_s23, %s11041_s23 }
 0x1a0   : > { %p11044_p7 = pnand %p11042_p5, %p11459_p8  ;;  %p11051_p11 = por %p11050_p10, %p11049_p3 }
 0x1a2   : > { %p11045_p9 = pneg %p11044_p7 }
 0x1a4   : > { %p11052_p12 = pnand %p11051_p11, %p11045_p9 }
 0x1a6   : > { %11055 = shalt.err (!%p11052_p12)
}
 0x1a7   : > { %10431 = dma.hbm_to_vmem [thread:$0]  (!%p11443_p6), %s13151_s13, 2048, %s714_s24, [#allocation24], %s11261_s5, %s11261_s5, %s11262_s21  }
 0x1a8   : > { %s11265_s12 = smov [#allocation28]   ;;  %s11266_s8 = smov [#allocation31]  }
 0x1a9   : > { %s739_s14 = sshll.u32 %s11265_s12, 4  ;;  %s765_s7 = sshll.u32 %s11266_s8, 4  ;;  %s740_s14 = int_to_ptr.vmem [resolvable:$true] %s739_s14  ;;  %s766_s7 = int_to_ptr.vmem [resolvable:$true] %s765_s7 }
 0x1aa   : > { %s11056_s4 = scalar_lea.hbm %s13153_s15, 2048 }
 0x1ab   : > { %p11057_p1 = scmp.ne.s32.totalorder %s13153_s15, %s11056_s4  ;;  %p11063_p0 = scmp.lt.u32.totalorder %s11056_s4, %s13153_s15 }
 0x1ad   : > { %p11059_p4 = pnand %p11057_p1, %p11459_p8 }
 0x1af   : > { %p11060_p13 = pneg %p11059_p4 }
 0x1b1   : > { %p11065_p2 = pnand %p11063_p0, %p11060_p13 }
 0x1b3   : > { %11068 = shalt.err (!%p11065_p2)
}
 0x1b4   : > { %s11069_s24 = scalar_lea.vmem %s740_s14, 2048  ;;  %p11077_p3 = scmp.lt.s32.totalorder %s740_s14, %s740_s14 }
 0x1b5   : > { %p11070_p5 = scmp.ne.s32.totalorder %s740_s14, %s11069_s24  ;;  %p11078_p10 = scmp.lt.s32.totalorder %s11069_s24, %s11069_s24 }
 0x1b7   : > { %p11072_p7 = pnand %p11070_p5, %p11459_p8  ;;  %p11079_p11 = por %p11078_p10, %p11077_p3 }
 0x1b9   : > { %p11073_p9 = pneg %p11072_p7 }
 0x1bb   : > { %p11080_p12 = pnand %p11079_p11, %p11073_p9 }
 0x1bd   : > { %11083 = shalt.err (!%p11080_p12)
}
 0x1be   : > { %10437 = dma.hbm_to_vmem [thread:$0]  (!%p11443_p6), %s13153_s15, 2048, %s740_s14, [#allocation27], %s11261_s5, %s11261_s5, %s11262_s21  }
 0x1bf   : > { %s11084_s25 = scalar_lea.hbm %s13155_s17, 32 }
 0x1c0   : > { %p11085_p1 = scmp.ne.s32.totalorder %s13155_s17, %s11084_s25  ;;  %p11091_p0 = scmp.lt.u32.totalorder %s11084_s25, %s13155_s17 }
 0x1c2   : > { %p11087_p4 = pnand %p11085_p1, %p11459_p8 }
 0x1c4   : > { %p11088_p13 = pneg %p11087_p4 }
 0x1c6   : > { %p11093_p2 = pnand %p11091_p0, %p11088_p13 }
 0x1c8   : > { %11096 = shalt.err (!%p11093_p2)
}
 0x1c9   : > { %s11097_s19 = scalar_lea.vmem %s766_s7, 32  ;;  %p11105_p3 = scmp.lt.s32.totalorder %s766_s7, %s766_s7 }
 0x1ca   : > { %p11098_p5 = scmp.ne.s32.totalorder %s766_s7, %s11097_s19  ;;  %p11106_p10 = scmp.lt.s32.totalorder %s11097_s19, %s11097_s19 }
 0x1cc   : > { %p11100_p7 = pnand %p11098_p5, %p11459_p8  ;;  %p11107_p11 = por %p11106_p10, %p11105_p3 }
 0x1ce   : > { %p11101_p9 = pneg %p11100_p7 }
 0x1d0   : > { %p11108_p12 = pnand %p11107_p11, %p11101_p9 }
 0x1d2   : > { %11111 = shalt.err (!%p11108_p12)
}
 0x1d3   : > { %10443 = dma.hbm_to_vmem [thread:$0]  (!%p11443_p6), %s13155_s17, 32, %s766_s7, [#allocation30], %s13222_s2, %s13222_s2, %s13223_s10  }
 0x1d4   : > { %s11267_s3 = smov [#allocation34]   ;;  %s11112_s25 = scalar_lea.hbm %s13158_s20, 16 }
 0x1d5   : > { %s795_s12 = sshll.u32 %s11267_s3, 4  ;;  %p11113_p1 = scmp.ne.s32.totalorder %s13158_s20, %s11112_s25  ;;  %s796_s12 = int_to_ptr.vmem [resolvable:$true] %s795_s12 }
 0x1d6   : > { %p11119_p0 = scmp.lt.u32.totalorder %s11112_s25, %s13158_s20 }
 0x1d7   : > { %p11115_p4 = pnand %p11113_p1, %p11459_p8 }
 0x1d9   : > { %p11116_p13 = pneg %p11115_p4 }
 0x1db   : > { %p11121_p2 = pnand %p11119_p0, %p11116_p13 }
 0x1dd   : > { %11124 = shalt.err (!%p11121_p2)
}
 0x1de   : > { %s11125_s2 = scalar_lea.vmem %s796_s12, 16  ;;  %s11132_s10 = scalar_lea.vmem %s796_s12, 32 }
 0x1df   : > { %p11126_p5 = scmp.ne.s32.totalorder %s796_s12, %s11125_s2  ;;  %p11133_p3 = scmp.lt.s32.totalorder %s796_s12, %s796_s12 }
 0x1e0   : > { %p11134_p10 = scmp.lt.s32.totalorder %s11132_s10, %s11125_s2 }
 0x1e1   : > { %p11128_p7 = pnand %p11126_p5, %p11459_p8 }
 0x1e2   : > { %p11135_p11 = por %p11134_p10, %p11133_p3 }
 0x1e3   : > { %p11129_p9 = pneg %p11128_p7 }
 0x1e5   : > { %p11136_p12 = pnand %p11135_p11, %p11129_p9 }
 0x1e7   : > { %11139 = shalt.err (!%p11136_p12)
}
 0x1e8   : > { %s13224_s14 = sld [smem:[#allocation47_spill]]  ;;  %s13225_s24 = sld [smem:[#allocation46_spill]] }
 0x1e9   : > { %s13226_s27 = sld [smem:[#allocation45_spill]]  ;;  %s13227_s3 = sld [smem:[#allocation48_spill]] }
 0x1ea   : > { %10449 = dma.hbm_to_vmem [thread:$0]  (!%p11443_p6), %s13158_s20, 16, %s796_s12, [#allocation33]  }
 0x1eb   : > { %s11833_s8 = sadd.s32 1, %s11240_s1   ;;  %p62_p4 = scmp.eq.s32.totalorder %s11240_s1, 0 }
 0x1ec   : > { %s51_s0 = ssub.s32 %s11240_s1, %s11833_s8  ;;  %p10472_p0 = scmp.lt.s32.totalorder %s11240_s1, 2 }
 0x1ed   : > { %p52_p1 = scmp.eq.s32.totalorder %s51_s0, 0  ;;  %s8966_s12 = sshll.u32 %s11240_s1, 10 }
 0x1ee   : > { %s54_s28 = sadd.s32 1, %s13224_s14  ;;  %p61_p8 = scmp.ne.s32.totalorder %s13224_s14, %s13225_s24 }
 0x1ef   : > { %p67_p13 = scmp.ne.s32.totalorder %s13225_s24, %s13226_s27  ;;  %p13228_p5 = scmp.eq.s32.totalorder %s13227_s3, 0 }
 0x1f0   : > { %s11845_s25 = scalar_select %p52_p1, %s13224_s14, %s54_s28  }
 0x1f1   : > { %p63_p2 = por %p62_p4, %p61_p8  ;;  %p11849_p7 = por %p13228_p5, %p67_p13 }
 0x1f2   : > { %s812_s6 = sand.u32 1, %s13224_s14   ;;  %s13230_s10 = sld [smem:[#allocation50_spill]] }
 0x1f3   : > { %s8791_s29 = sshll.u32 %s812_s6, 6  ;;  %p11860_p6 = pnand %p10472_p0, %p63_p2 }
 0x1f4   : > { %s816_s19 = scalar_lea.vmem [#allocation6], %s8791_s29  ;;  %s11866_s1 = scalar_lea.sflag [#allocation7], %s812_s6 }
 0x1f5   : > { %s824_s24 = sshll.u32 %s816_s19, 4  ;;  %p11142_p3 = pneg %p11860_p6  ;;  %s11864_s24 = int_to_ptr.vmem [resolvable:$true] %s824_s24 }
 0x1f8   : > { %s11858_s7 = scalar_lea.hbm %s13230_s10, %s8966_s12  ;;  %s11145_s0 = scalar_lea.hbm %s13230_s10, 2048 }
 0x1f9   : > { %s11140_s14 = scalar_lea.hbm %s11858_s7, 1024  ;;  %p11146_p12 = scmp.lt.u32.totalorder %s11858_s7, %s13230_s10 }
 0x1fa   : > { %p11141_p9 = scmp.ne.s32.totalorder %s11858_s7, %s11140_s14  ;;  %p11147_p8 = scmp.lt.u32.totalorder %s11145_s0, %s11140_s14 }
 0x1fb   : > { %p11149_p4 = scmp.lt.u32.totalorder %s11140_s14, %s11858_s7 }
 0x1fc   : > { %p11143_p10 = pnand %p11142_p3, %p11141_p9  ;;  %p11148_p1 = por %p11147_p8, %p11146_p12 }
 0x1fe   : > { %p11144_p11 = pneg %p11143_p10  ;;  %p11150_p13 = por %p11149_p4, %p11148_p1 }
 0x200   : > { %p11151_p0 = pnand %p11150_p13, %p11144_p11 }
 0x202   : > { %11154 = shalt.err (!%p11151_p0)
}
 0x203   : > { %s11155_s6 = scalar_lea.vmem %s11864_s24, 1024  ;;  %s11268_s23 = smov [#allocation6]  }
 0x204   : > { %p11156_p2 = scmp.ne.s32.totalorder %s11864_s24, %s11155_s6  ;;  %s11160_s2 = sshll.u32 %s11268_s23, 4  ;;  %s11161_s2 = int_to_ptr.vmem [resolvable:$false] %s11160_s2 }
 0x205   : > { %s11162_s19 = scalar_lea.vmem %s11161_s2, 2048  ;;  %p11163_p10 = scmp.lt.s32.totalorder %s11864_s24, %s11161_s2 }
 0x206   : > { %p11158_p5 = pnand %p11156_p2, %p11142_p3  ;;  %p11164_p12 = scmp.lt.s32.totalorder %s11162_s19, %s11155_s6 }
 0x208   : > { %p11159_p9 = pneg %p11158_p5  ;;  %p11165_p8 = por %p11164_p12, %p11163_p10 }
 0x20a   : > { %p11166_p1 = pnand %p11165_p8, %p11159_p9 }
 0x20c   : > { %11169 = shalt.err (!%p11166_p1)
}
 0x20d   : > { %10453 = dma.hbm_to_vmem [thread:$0]  (!%p11860_p6), %s11858_s7, 1024, %s11864_s24, %s11866_s1, %s11261_s5, %s11261_s5, %s11262_s21  }
 0x20e   : > { %s13232_s14 = sld [smem:[#allocation49_spill]] }
 0x214   : > { %p13233_p3 = scmp.ne.s32.totalorder %s13232_s14, 0 }
 0x215   : > { %s13234_s3 = sld [smem:[#allocation46_spill]] (!%p13233_p3) }
 0x216   : > { %836 = sbr.rel (%p13233_p3) target bundleno = 7024 (0x1b70), region = 112 }
 0x21b   : > { %s838_s28 = sand.u32 (!%p13233_p3), 1, %s13234_s3  }
 0x21c   : > { %s8796_s0 = sshll.u32 (!%p13233_p3), %s838_s28, 6  ;;  %s839_s12 = scalar_lea.sflag (!%p13233_p3), [#allocation7], %s838_s28 }
 0x21d   : > { %s11900_s29 = scalar_lea.vmem [#allocation6], %s8796_s0 }
 0x21e   : > { %11187 = dma.done.wait (%p11849_p7), %s839_s12, 1024  }
 0x21f   : > { %11189 = vsyncadd (%p11849_p7), %s839_s12, 4294966272  ;;  %s13235_s27 = sld [smem:[#allocation48_spill]] }
 0x225   : > { %p13236_p11 = scmp.eq.s32.totalorder %s13235_s27, 0 }
 0x227   : > { %11191 = dma.done.wait (%p13236_p11), [#allocation9], 3136   ;;  %p13237_p6 = pmov %p13236_p11 }
 0x229   : > { %11193 = vsyncadd (%p13237_p6), [#allocation9], 4294964160  ;;  %p13238_p4 = pmov %p13237_p6 }
 0x22b   : > { %11195 = dma.done.wait (%p13238_p4), [#allocation12], 49216   ;;  %p13239_p13 = pmov %p13238_p4 }
 0x22c   : > { %p13240_p0 = pmov %p13238_p4 }
 0x22d   : > { %11197 = vsyncadd (%p13239_p13), [#allocation12], 4294918080 }
 0x22e   : > { %11199 = dma.done.wait (%p13240_p0), [#allocation15], 4112   ;;  %p13241_p2 = pmov %p13240_p0 }
 0x22f   : > { %p13242_p7 = pmov %p13240_p0 }
 0x230   : > { %11201 = vsyncadd (%p13241_p2), [#allocation15], 4294963184 }
 0x231   : > { %11203 = dma.done.wait (%p13242_p7), [#allocation18], 2112   ;;  %p13243_p5 = pmov %p13240_p0 }
 0x232   : > { %p13244_p9 = pmov %p13240_p0 }
 0x233   : > { %11205 = vsyncadd (%p13243_p5), [#allocation18], 4294965184 }
 0x234   : > { %11207 = dma.done.wait (%p13244_p9), [#allocation21], 64   ;;  %p13245_p10 = pmov %p13240_p0 }
 0x235   : > { %p13246_p12 = pmov %p13240_p0 }
 0x236   : > { %11209 = vsyncadd (%p13245_p10), [#allocation21], 4294967232 }
 0x237   : > { %11211 = dma.done.wait (%p13246_p12), [#allocation24], 2080   ;;  %p13247_p8 = pmov %p13240_p0 }
 0x238   : > { %p13248_p1 = pmov %p13240_p0 }
 0x239   : > { %11213 = vsyncadd (%p13247_p8), [#allocation24], 4294965216 }
 0x23a   : > { %11215 = dma.done.wait (%p13248_p1), [#allocation27], 2080   ;;  %p13249_p3 = pmov %p13240_p0 }
 0x23b   : > { %p13250_p11 = pmov %p13240_p0 }
 0x23c   : > { %11217 = vsyncadd (%p13249_p3), [#allocation27], 4294965216 }
 0x23d   : > { %11219 = dma.done.wait (%p13250_p11), [#allocation30], 64   ;;  %p13251_p6 = pmov %p13240_p0 }
 0x23e   : > { %p13252_p4 = pmov %p13240_p0 }
 0x23f   : > { %11221 = vsyncadd (%p13251_p6), [#allocation30], 4294967232 }
 0x240   : > { %11223 = dma.done.wait (%p13252_p4), [#allocation33], 48   ;;  %p13253_p13 = pmov %p13240_p0 }
 0x241   : > { %p13254_p0 = scmp.ne.s32.totalorder %s13235_s27, 0 }
 0x242   : > { %11225 = vsyncadd (%p13253_p13), [#allocation33], 4294967248  ;;  %vm977_vm0 = vcmask (!%p13254_p0), 122880   ;;  %v986_v1 = vlaneseq (!%p13254_p0)  ;;  %v11269_v2 = vmov (!%p13254_p0), 0.0  }
 0x243   : > { %976 = sbr.rel (%p13254_p0) target bundleno = 587 (0x24b), region = 192  ;;  %978 = vst.msk [vmem:[#allocation2] sm:$0x1] (!%p13254_p0), %vm977_vm0, %v11269_v2  ;;  %979 = vst.msk [vmem:[#allocation2 + $0x18] sm:$0x1] (!%p13254_p0), %vm977_vm0, %v11269_v2 }
 0x244   : > { %980 = vst.msk [vmem:[#allocation2 + $0x30] sm:$0x1] (!%p13254_p0), %vm977_vm0, %v11269_v2  ;;  %981 = vst.msk [vmem:[#allocation2 + $0x48] sm:$0x1] (!%p13254_p0), %vm977_vm0, %v11269_v2  ;;  %vm988_vm1 = vcmp.lt.s32.totalorder (!%p13254_p0), %v986_v1, 256 }
 0x245   : > { %982 = vst.msk [vmem:[#allocation2 + $0x11] sm:$0x1] (!%p13254_p0), %vm977_vm0, %v11269_v2  ;;  %983 = vst.msk [vmem:[#allocation2 + $0x29] sm:$0x1] (!%p13254_p0), %vm977_vm0, %v11269_v2 }
 0x246   : > { %984 = vst.msk [vmem:[#allocation2 + $0x41] sm:$0x1] (!%p13254_p0), %vm977_vm0, %v11269_v2  ;;  %985 = vst.msk [vmem:[#allocation2 + $0x59] sm:$0x1] (!%p13254_p0), %vm977_vm0, %v11269_v2 }
 0x247   : > { %990 = vst.msk [vmem:[#allocation3] ss:$8 sm:$0x3] (!%p13254_p0), %vm988_vm1, %v11269_v2  ;;  %993 = vst.msk [vmem:[#allocation3 + $0x20] ss:$8 sm:$0x3] (!%p13254_p0), %vm988_vm1, %v11269_v2 }
 0x248   : > { %996 = vst.msk [vmem:[#allocation3 + $0x40] ss:$8 sm:$0x3] (!%p13254_p0), %vm988_vm1, %v11269_v2  ;;  %999 = vst.msk [vmem:[#allocation3 + $0x60] ss:$8 sm:$0x3] (!%p13254_p0), %vm988_vm1, %v11269_v2 }
 0x249   : > { %1002 = vst.msk [vmem:[#allocation3 + $0x11] ss:$8 sm:$0x3] (!%p13254_p0), %vm988_vm1, %v11269_v2  ;;  %1005 = vst.msk [vmem:[#allocation3 + $0x31] ss:$8 sm:$0x3] (!%p13254_p0), %vm988_vm1, %v11269_v2 }
 0x24a   : > { %1008 = vst.msk [vmem:[#allocation3 + $0x51] ss:$8 sm:$0x3] %vm988_vm1, %v11269_v2  ;;  %1011 = vst.msk [vmem:[#allocation3 + $0x71] ss:$8 sm:$0x3] %vm988_vm1, %v11269_v2 }
 0x24b PF: > { %v1056_v3 = vld [vmem:[#allocation8 + $0x48] sm:$0xff]  ;;  %v1058_v5 = vld [vmem:[#allocation8 + $0x58] sm:$0xff]  ;;  %v1055_v8 = vld [vmem:[#allocation8 + $0x40] sm:$0xff]  ;;  %v11270_v10 = vmov 0.0   ;;  %vm1021_vm2 = vcmask 130048   ;;  %vm2476_vm3 = vcmask 1046528  }
 0x24c   : > { %v1060_v4 = vld [vmem:[#allocation8 + $0x68] sm:$0xff]  ;;  %v1062_v7 = vld [vmem:[#allocation8 + $0x78] sm:$0xff]  ;;  %v1059_v9 = vld [vmem:[#allocation8 + $0x60] sm:$0xff]  ;;  %1151 = vmatprep.mubr.f32.mxu0 %v11270_v10  ;;  %1264 = vmatprep.mubr.f32.mxu1 %v11270_v10  ;;  %vm3026_vm4 = vcmask 1045504   ;;  %s13255_s4 = sld [smem:[#allocation55_spill]]  ;;  %s13258_s5 = sld [smem:[#allocation48_spill]] }
 0x24d   : > { %v9567_v6 = vpack.c.bf16 %v1060_v4, %v1056_v3  ;;  %v9571_v11 = vpack.c.bf16 %v1062_v7, %v1058_v5  ;;  %v9569_v12 = vpack.c.bf16 %v1059_v9, %v1055_v8  ;;  %v1057_v13 = vld [vmem:[#allocation8 + $0x50] sm:$0xff]  ;;  %v1039_v15 = vld [vmem:[#allocation8 + $0x8] sm:$0xff]  ;;  %v1041_v18 = vld [vmem:[#allocation8 + $0x18] sm:$0xff]  ;;  %vm4125_vm5 = vcmask 519168  }
 0x24e   : > { %v1061_v14 = vld [vmem:[#allocation8 + $0x70] sm:$0xff]  ;;  %v1043_v17 = vld [vmem:[#allocation8 + $0x28] sm:$0xff]  ;;  %v1045_v19 = vld [vmem:[#allocation8 + $0x38] sm:$0xff] }
 0x24f   : > { %9568 = vmatprep.subr.bf16.mxu0 %v9567_v6  ;;  %v9573_v16 = vpack.c.bf16 %v1061_v14, %v1057_v13  ;;  %9572 = vmatprep.subr.bf16.mxu1 %v9571_v11  ;;  %v9575_v20 = vpack.c.bf16 %v1043_v17, %v1039_v15  ;;  %v9579_v21 = vpack.c.bf16 %v1045_v19, %v1041_v18  ;;  %v1013_v22 = vld [vmem:[%s11900_s29] sm:$0xff]  ;;  %v1040_v25 = vld [vmem:[#allocation8 + $0x10] sm:$0xff]  ;;  %v1014_v27 = vld [vmem:[%s11900_s29 + $0x8] sm:$0xff] }
 0x250   : > { %9570 = vmatpush1.bf16.msra.mxu0 %v9569_v12  ;;  %1022 = vst.msk [vmem:[#allocation2 + $0x1] sm:$0xff] %vm1021_vm2, %v1013_v22  ;;  %v1038_v23 = vld [vmem:[#allocation8] sm:$0xff]  ;;  %v1044_v26 = vld [vmem:[#allocation8 + $0x30] sm:$0xff]  ;;  %1023 = vst.msk [vmem:[#allocation2 + $0x9] sm:$0xff] %vm1021_vm2, %v1014_v27 }
 0x251   : > { %9574 = vmatpush1.bf16.msra.mxu1 %v9573_v16  ;;  %v1042_v24 = vld [vmem:[#allocation8 + $0x20] sm:$0xff]  ;;  %9576 = vmatprep.subr.bf16.mxu0 %v9575_v20  ;;  %v1015_v28 = vld [vmem:[%s11900_s29 + $0x10] sm:$0xff]  ;;  %v1016_v29 = vld [vmem:[%s11900_s29 + $0x18] sm:$0xff]  ;;  %v9581_v39 = vpack.c.bf16 %v1044_v26, %v1040_v25 }
 0x252   : > { %9580 = vmatprep.subr.bf16.mxu1 %v9579_v21  ;;  %v1017_v30 = vld [vmem:[%s11900_s29 + $0x20] sm:$0xff]  ;;  %1024 = vst.msk [vmem:[#allocation2 + $0x19] sm:$0xff] %vm1021_vm2, %v1015_v28  ;;  %1025 = vst.msk [vmem:[#allocation2 + $0x21] sm:$0xff] %vm1021_vm2, %v1016_v29  ;;  %v1018_v31 = vld [vmem:[%s11900_s29 + $0x28] sm:$0xff]  ;;  %v9577_v38 = vpack.c.bf16 %v1042_v24, %v1038_v23  ;;  %s8865_s21 = sshll.u32 %s13258_s5, 2  ;;  %p8866_p2 = scmp.ne.s32.totalorder %s13258_s5, 1 }
 0x253   : > { %1026 = vst.msk [vmem:[#allocation2 + $0x31] sm:$0xff] %vm1021_vm2, %v1017_v30  ;;  %v1019_v32 = vld [vmem:[%s11900_s29 + $0x30] sm:$0xff]  ;;  %v1020_v33 = vld [vmem:[%s11900_s29 + $0x38] sm:$0xff]  ;;  %1027 = vst.msk [vmem:[#allocation2 + $0x39] sm:$0xff] %vm1021_vm2, %v1018_v31  ;;  %s4124_s7 = scalar_lea.vmem [#allocation4], %s8865_s21  ;;  %vm4164_vm6 = vcmask (!%p8866_p2), 523264  }
 0x254   : > { %1028 = vst.msk [vmem:[#allocation2 + $0x49] sm:$0xff] %vm1021_vm2, %v1019_v32  ;;  %1029 = vst.msk [vmem:[#allocation2 + $0x51] sm:$0xff] %vm1021_vm2, %v1020_v33  ;;  %v1573_v34 = vld [vmem:[#allocation8 + $0x88] sm:$0xff]  ;;  %v1575_v36 = vld [vmem:[#allocation8 + $0x98] sm:$0xff]  ;;  %s11275_s24 = smov (!%p8866_p2), 96   ;;  %s11276_s1 = smov (!%p8866_p2), 112  }
 0x255   : > { %v1577_v35 = vld [vmem:[#allocation8 + $0xa8] sm:$0xff]  ;;  %v1579_v37 = vld [vmem:[#allocation8 + $0xb8] sm:$0xff]  ;;  %v1572_v50 = vld [vmem:[#allocation8 + $0x80] sm:$0xff]  ;;  %vm11277_vm7 = vmmov (!%p8866_p2), 0   ;;  %s11278_s6 = smov (!%p8866_p2), 80   ;;  %s11279_s23 = smov (!%p8866_p2), 64  }
 0x256   : > { %v9583_v41 = vpack.c.bf16 %v1577_v35, %v1573_v34  ;;  %v9587_v42 = vpack.c.bf16 %v1579_v37, %v1575_v36  ;;  %v1576_v51 = vld [vmem:[#allocation8 + $0xa0] sm:$0xff]  ;;  %v1574_v52 = vld [vmem:[#allocation8 + $0x90] sm:$0xff]  ;;  %vm4975_vm8 = vcmask (!%p8866_p2), 1043456   ;;  %vm4882_vm9 = vcmask (!%p8866_p2), 27648   ;;  %s13259_s14 = sld [smem:[#allocation62_spill]] (!%p8866_p2)  ;;  %s13260_s28 = sld [smem:[#allocation63_spill]] (!%p8866_p2) }
 0x257   : > { %v1046_v40 = vld [vmem:[#allocation2 + $0x1] sm:$0xff]  ;;  %v1047_v43 = vld [vmem:[#allocation2 + $0x9] sm:$0xff]  ;;  %v1578_v53 = vld [vmem:[#allocation8 + $0xb0] sm:$0xff]  ;;  %v9585_v59 = vpack.c.bf16 %v1576_v51, %v1572_v50  ;;  %vm4971_vm10 = vcmask (!%p8866_p2), 31744   ;;  %vm8396_vm11 = vcmask (!%p8866_p2), 1041409   ;;  %vm8482_vm12 = vcmask (!%p8866_p2), 261120  }
 0x258   : > { %8816 = vmatmul.mubr.msk.f32.vlgmr.msra.gmra.mrb[0].mxu0 %vm1021_vm2, %v1046_v40  ;;  %8824 = vmatmul.mubr.msk.f32.vlgmr.msra.gmra.mrb[0].mxu1 %vm1021_vm2, %v1046_v40  ;;  %v2511_v54 = vld [vmem:[#allocation11 + $0x408] sm:$0xff]  ;;  %v2513_v56 = vld [vmem:[#allocation11 + $0x418] sm:$0xff]  ;;  %v9589_v60 = vpack.c.bf16 %v1578_v53, %v1574_v52  ;;  %v2510_v6 = vld [vmem:[#allocation11 + $0x400] sm:$0xff]  ;;  %vm8556_vm13 = vcmask (!%p8866_p2), 1024  }
 0x259   : > { %9578 = vmatpush1.bf16.msra.mxu0 %v9577_v38  ;;  %9582 = vmatpush1.bf16.msra.mxu1 %v9581_v39  ;;  %v1048_v44 = vld [vmem:[#allocation2 + $0x19] sm:$0xff]  ;;  %v1049_v45 = vld [vmem:[#allocation2 + $0x21] sm:$0xff]  ;;  %v2514_v7 = vld [vmem:[#allocation11 + $0x420] sm:$0xff] }
 0x25a   : > { %1157 = vmatprep.mubr.f32.mxu0 %v11270_v10  ;;  %1270 = vmatprep.mubr.f32.mxu1 %v11270_v10  ;;  %v1050_v46 = vld [vmem:[#allocation2 + $0x31] sm:$0xff]  ;;  %v1051_v47 = vld [vmem:[#allocation2 + $0x39] sm:$0xff]  ;;  %v2517_v57 = vld [vmem:[#allocation11 + $0x438] sm:$0xff]  ;;  %v9593_v16 = vpack.c.bf16 %v2514_v7, %v2510_v6 }
 0x25b   : > { %9584 = vmatprep.subr.bf16.mxu0 %v9583_v41  ;;  %9588 = vmatprep.subr.bf16.mxu1 %v9587_v42  ;;  %v1052_v48 = vld [vmem:[#allocation2 + $0x49] sm:$0xff]  ;;  %v1053_v49 = vld [vmem:[#allocation2 + $0x51] sm:$0xff]  ;;  %v1030_v58 = vld [vmem:[#allocation2] sm:$0xff]  ;;  %v9655_v62 = vpack.c.bf16 %v2517_v57, %v2513_v56 }
 0x25c   : > { %8817 = vmatmul.mubr.msk.f32.gmra.mrb[2].mxu0 %vm1021_vm2, %v1047_v43  ;;  %8825 = vmatmul.mubr.msk.f32.gmra.mrb[2].mxu1 %vm1021_vm2, %v1047_v43  ;;  %v2515_v55 = vld [vmem:[#allocation11 + $0x428] sm:$0xff]  ;;  %v1031_v63 = vld [vmem:[#allocation2 + $0x8] sm:$0xff]  ;;  %v1033_v1 = vld [vmem:[#allocation2 + $0x20] sm:$0xff] }
 0x25d   : > { %1163 = vmatprep.mubr.f32.mxu0 %v11270_v10  ;;  %1276 = vmatprep.mubr.f32.mxu1 %v11270_v10  ;;  %v9591_v61 = vpack.c.bf16 %v2515_v55, %v2511_v54  ;;  %v1032_v0 = vld [vmem:[#allocation2 + $0x18] sm:$0xff]  ;;  %v1034_v2 = vld [vmem:[#allocation2 + $0x30] sm:$0xff]  ;;  %v1036_v4 = vld [vmem:[#allocation2 + $0x48] sm:$0xff] }
 0x25e   : > { %v1035_v3 = vld [vmem:[#allocation2 + $0x38] sm:$0xff]  ;;  %v1037_v5 = vld [vmem:[#allocation2 + $0x50] sm:$0xff]  ;;  %v2521_v13 = vld [vmem:[#allocation11 + $0x458] sm:$0xff] }
 0x25f   : > { %v2512_v8 = vld [vmem:[#allocation11 + $0x410] sm:$0xff]  ;;  %v2519_v11 = vld [vmem:[#allocation11 + $0x448] sm:$0xff]  ;;  %v2525_v14 = vld [vmem:[#allocation11 + $0x478] sm:$0xff] }
 0x260   : > { %8818 = vmatmul.mubr.msk.f32.gmra.mrb[4].mxu0 %vm1021_vm2, %v1048_v44  ;;  %8826 = vmatmul.mubr.msk.f32.gmra.mrb[4].mxu1 %vm1021_vm2, %v1048_v44  ;;  %v2516_v9 = vld [vmem:[#allocation11 + $0x430] sm:$0xff]  ;;  %v2523_v12 = vld [vmem:[#allocation11 + $0x468] sm:$0xff]  ;;  %v2518_v18 = vld [vmem:[#allocation11 + $0x440] sm:$0xff]  ;;  %v9659_v21 = vpack.c.bf16 %v2525_v14, %v2521_v13 }
 0x261   : > { %1169 = vmatprep.mubr.f32.mxu0 %v11270_v10  ;;  %1282 = vmatprep.mubr.f32.mxu1 %v11270_v10  ;;  %v1563_v15 = vld [vmem:[#allocation2 + $0x2] sm:$0xff]  ;;  %v9657_v17 = vpack.c.bf16 %v2516_v9, %v2512_v8  ;;  %v2522_v19 = vld [vmem:[#allocation11 + $0x460] sm:$0xff]  ;;  %v9595_v20 = vpack.c.bf16 %v2523_v12, %v2519_v11  ;;  %v2527_v24 = vld [vmem:[#allocation11 + $0x488] sm:$0xff] }
 0x262   : > { %v2520_v22 = vld [vmem:[#allocation11 + $0x450] sm:$0xff]  ;;  %v2531_v25 = vld [vmem:[#allocation11 + $0x4a8] sm:$0xff]  ;;  %v2529_v26 = vld [vmem:[#allocation11 + $0x498] sm:$0xff]  ;;  %v9597_v29 = vpack.c.bf16 %v2522_v19, %v2518_v18 }
 0x263   : > { %v2524_v23 = vld [vmem:[#allocation11 + $0x470] sm:$0xff]  ;;  %v2533_v27 = vld [vmem:[#allocation11 + $0x4b8] sm:$0xff]  ;;  %v2526_v31 = vld [vmem:[#allocation11 + $0x480] sm:$0xff]  ;;  %v9599_v33 = vpack.c.bf16 %v2531_v25, %v2527_v24 }
 0x264   : > { %8819 = vmatmul.mubr.msk.f32.gmra.mrb[6].mxu0 %vm1021_vm2, %v1049_v45  ;;  %8827 = vmatmul.mubr.msk.f32.gmra.mrb[6].mxu1 %vm1021_vm2, %v1049_v45  ;;  %v1564_v28 = vld [vmem:[#allocation2 + $0xa] sm:$0xff]  ;;  %v9661_v30 = vpack.c.bf16 %v2524_v23, %v2520_v22  ;;  %v9663_v34 = vpack.c.bf16 %v2533_v27, %v2529_v26  ;;  %v2528_v35 = vld [vmem:[#allocation11 + $0x490] sm:$0xff]  ;;  %v2535_v37 = vld [vmem:[#allocation11 + $0x4c8] sm:$0xff] }
 0x265   : > { %1175 = vmatprep.mubr.f32.mxu0 %v11270_v10  ;;  %1288 = vmatprep.mubr.f32.mxu1 %v11270_v10  ;;  %v2530_v32 = vld [vmem:[#allocation11 + $0x4a0] sm:$0xff]  ;;  %v2532_v36 = vld [vmem:[#allocation11 + $0x4b0] sm:$0xff]  ;;  %v2539_v38 = vld [vmem:[#allocation11 + $0x4e8] sm:$0xff] }
 0x266   : > { %v2537_v39 = vld [vmem:[#allocation11 + $0x4d8] sm:$0xff]  ;;  %v1565_v41 = vld [vmem:[#allocation2 + $0x1a] sm:$0xff]  ;;  %v9601_v42 = vpack.c.bf16 %v2530_v32, %v2526_v31  ;;  %v9665_v43 = vpack.c.bf16 %v2532_v36, %v2528_v35  ;;  %v2534_v44 = vld [vmem:[#allocation11 + $0x4c0] sm:$0xff] }
 0x267   : > { %v2541_v40 = vld [vmem:[#allocation11 + $0x4f8] sm:$0xff]  ;;  %v2538_v45 = vld [vmem:[#allocation11 + $0x4e0] sm:$0xff]  ;;  %v2543_v50 = vld [vmem:[#allocation11 + $0x508] sm:$0xff] }
 0x268   : > { %8820 = vmatmul.mubr.msk.f32.gmra.mrb[8].mxu0 %vm1021_vm2, %v1050_v46  ;;  %8828 = vmatmul.mubr.msk.f32.gmra.mrb[8].mxu1 %vm1021_vm2, %v1050_v46  ;;  %v9603_v46 = vpack.c.bf16 %v2539_v38, %v2535_v37  ;;  %v2547_v51 = vld [vmem:[#allocation11 + $0x528] sm:$0xff]  ;;  %v2545_v52 = vld [vmem:[#allocation11 + $0x518] sm:$0xff]  ;;  %v9605_v55 = vpack.c.bf16 %v2538_v45, %v2534_v44  ;;  %v2542_v57 = vld [vmem:[#allocation11 + $0x500] sm:$0xff] }
 0x269   : > { %1181 = vmatprep.mubr.f32.mxu0 %v11270_v10  ;;  %1294 = vmatprep.mubr.f32.mxu1 %v11270_v10  ;;  %v2549_v53 = vld [vmem:[#allocation11 + $0x538] sm:$0xff]  ;;  %v2550_v6 = vld [vmem:[#allocation11 + $0x540] sm:$0xff]  ;;  %v2552_v11 = vld [vmem:[#allocation11 + $0x550] sm:$0xff] }
 0x26a   : > { %v1566_v54 = vld [vmem:[#allocation2 + $0x22] sm:$0xff]  ;;  %v2554_v7 = vld [vmem:[#allocation11 + $0x560] sm:$0xff]  ;;  %v2559_v13 = vld [vmem:[#allocation11 + $0x588] sm:$0xff] }
 0x26b   : > { %v2556_v12 = vld [vmem:[#allocation11 + $0x570] sm:$0xff]  ;;  %v2563_v14 = vld [vmem:[#allocation11 + $0x5a8] sm:$0xff]  ;;  %v9613_v18 = vpack.c.bf16 %v2554_v7, %v2550_v6  ;;  %v1569_v22 = vld [vmem:[#allocation2 + $0x4a] sm:$0xff] }
 0x26c   : > { %8821 = vmatmul.mubr.msk.f32.gmra.mrb[10].mxu0 %vm1021_vm2, %v1051_v47  ;;  %8829 = vmatmul.mubr.msk.f32.gmra.mrb[10].mxu1 %vm1021_vm2, %v1051_v47  ;;  %v9667_v47 = vpack.c.bf16 %v2541_v40, %v2537_v39  ;;  %v9677_v19 = vpack.c.bf16 %v2556_v12, %v2552_v11  ;;  %v1570_v23 = vld [vmem:[#allocation2 + $0x52] sm:$0xff]  ;;  %v2560_v26 = vld [vmem:[#allocation11 + $0x590] sm:$0xff]  ;;  %v2569_v32 = vld [vmem:[#allocation11 + $0x5d8] sm:$0xff] }
 0x26d   : > { %1187 = vmatprep.mubr.f32.mxu0 %v11270_v10  ;;  %1300 = vmatprep.mubr.f32.mxu1 %v11270_v10  ;;  %v2558_v24 = vld [vmem:[#allocation11 + $0x580] sm:$0xff]  ;;  %v2571_v31 = vld [vmem:[#allocation11 + $0x5e8] sm:$0xff]  ;;  %v2568_v38 = vld [vmem:[#allocation11 + $0x5d0] sm:$0xff] }
 0x26e   : > { %v2562_v25 = vld [vmem:[#allocation11 + $0x5a0] sm:$0xff]  ;;  %v2572_v39 = vld [vmem:[#allocation11 + $0x5f0] sm:$0xff]  ;;  %v2581_v45 = vld [vmem:[#allocation11 + $0x638] sm:$0xff] }
 0x26f   : > { %v9617_v27 = vpack.c.bf16 %v2562_v25, %v2558_v24  ;;  %v2566_v35 = vld [vmem:[#allocation11 + $0x5c0] sm:$0xff]  ;;  %v9685_v40 = vpack.c.bf16 %v2572_v39, %v2568_v38  ;;  %v2596_v12 = vld [vmem:[#allocation11 + $0x6b0] sm:$0xff]  ;;  %v2619_v38 = vld [vmem:[#allocation11 + $0x768] sm:$0xff] }
 0x270   : > { %8822 = vmatmul.mubr.msk.f32.gmra.mrb[12].mxu0 %vm1021_vm2, %v1052_v48  ;;  %8830 = vmatmul.mubr.msk.f32.gmra.mrb[12].mxu1 %vm1021_vm2, %v1052_v48  ;;  %v2536_v48 = vld [vmem:[#allocation11 + $0x4d0] sm:$0xff]  ;;  %v2590_v7 = vld [vmem:[#allocation11 + $0x680] sm:$0xff]  ;;  %v2617_v39 = vld [vmem:[#allocation11 + $0x758] sm:$0xff] }
 0x271   : > { %1193 = vmatprep.mubr.f32.mxu0 %v11270_v10  ;;  %1306 = vmatprep.mubr.f32.mxu1 %v11270_v10  ;;  %v2604_v24 = vld [vmem:[#allocation11 + $0x6f0] sm:$0xff] }
 0x274   : > { %8823 = vmatmul.mubr.msk.f32.gmra.mrb[14].mxu0 %vm1021_vm2, %v1053_v49  ;;  %8831 = vmatmul.mubr.msk.f32.gmra.mrb[14].mxu1 %vm1021_vm2, %v1053_v49  ;;  %v2540_v49 = vld [vmem:[#allocation11 + $0x4f0] sm:$0xff] }
 0x275   : > { %1401 = vmatprep.mubr.f32.mxu0 %v11270_v10  ;;  %1514 = vmatprep.mubr.f32.mxu1 %v11270_v10  ;;  %v9669_v56 = vpack.c.bf16 %v2540_v49, %v2536_v48 }
 0x278   : > { %8832 = vmatmul.mubr.msk.f32.vlgmr.msra.gmra.mrb[0].mxu0 %vm1021_vm2, %v1030_v58  ;;  %8840 = vmatmul.mubr.msk.f32.vlgmr.msra.gmra.mrb[0].mxu1 %vm1021_vm2, %v1030_v58  ;;  %v2546_v58 = vld [vmem:[#allocation11 + $0x520] sm:$0xff] }
 0x279   : > { %9586 = vmatpush1.bf16.msra.mxu0 %v9585_v59  ;;  %9590 = vmatpush1.bf16.msra.mxu1 %v9589_v60  ;;  %v9607_v59 = vpack.c.bf16 %v2547_v51, %v2543_v50  ;;  %v9671_v60 = vpack.c.bf16 %v2549_v53, %v2545_v52  ;;  %v2576_v50 = vld [vmem:[#allocation11 + $0x610] sm:$0xff]  ;;  %v2583_v53 = vld [vmem:[#allocation11 + $0x648] sm:$0xff] }
 0x27a   : > { %1407 = vmatprep.mubr.f32.mxu0 %v11270_v10  ;;  %1520 = vmatprep.mubr.f32.mxu1 %v11270_v10  ;;  %v2580_v51 = vld [vmem:[#allocation11 + $0x630] sm:$0xff] }
 0x27b   : > { %9592 = vmatprep.subr.bf16.mxu0 %v9591_v61  ;;  %9656 = vmatprep.subr.bf16.mxu1 %v9655_v62  ;;  %v2544_v61 = vld [vmem:[#allocation11 + $0x510] sm:$0xff]  ;;  %v9689_v52 = vpack.c.bf16 %v2580_v51, %v2576_v50  ;;  %v2627_v50 = vld [vmem:[#allocation11 + $0x7a8] sm:$0xff]  ;;  %v2625_v51 = vld [vmem:[#allocation11 + $0x798] sm:$0xff] }
 0x27c   : > { %8833 = vmatmul.mubr.msk.f32.gmra.mrb[2].mxu0 %vm1021_vm2, %v1031_v63  ;;  %8841 = vmatmul.mubr.msk.f32.gmra.mrb[2].mxu1 %vm1021_vm2, %v1031_v63  ;;  %v2548_v62 = vld [vmem:[#allocation11 + $0x530] sm:$0xff]  ;;  %v2551_v63 = vld [vmem:[#allocation11 + $0x548] sm:$0xff] }
 0x27d   : > { %1413 = vmatprep.mubr.f32.mxu0 %v11270_v10  ;;  %1526 = vmatprep.mubr.f32.mxu1 %v11270_v10 }
 0x280   : > { %8834 = vmatmul.mubr.msk.f32.gmra.mrb[4].mxu0 %vm1021_vm2, %v1032_v0  ;;  %8842 = vmatmul.mubr.msk.f32.gmra.mrb[4].mxu1 %vm1021_vm2, %v1032_v0  ;;  %v2555_v0 = vld [vmem:[#allocation11 + $0x568] sm:$0xff] }
 0x281   : > { %1419 = vmatprep.mubr.f32.mxu0 %v11270_v10  ;;  %1532 = vmatprep.mubr.f32.mxu1 %v11270_v10  ;;  %v9611_v8 = vpack.c.bf16 %v2555_v0, %v2551_v63  ;;  %v2588_v63 = vld [vmem:[#allocation11 + $0x670] sm:$0xff] }
 0x284   : > { %8835 = vmatmul.mubr.msk.f32.gmra.mrb[6].mxu0 %vm1021_vm2, %v1033_v1  ;;  %8843 = vmatmul.mubr.msk.f32.gmra.mrb[6].mxu1 %vm1021_vm2, %v1033_v1  ;;  %v2553_v1 = vld [vmem:[#allocation11 + $0x558] sm:$0xff] }
 0x285   : > { %1425 = vmatprep.mubr.f32.mxu0 %v11270_v10  ;;  %1538 = vmatprep.mubr.f32.mxu1 %v11270_v10 }
 0x288   : > { %8836 = vmatmul.mubr.msk.f32.gmra.mrb[8].mxu0 %vm1021_vm2, %v1034_v2  ;;  %8844 = vmatmul.mubr.msk.f32.gmra.mrb[8].mxu1 %vm1021_vm2, %v1034_v2  ;;  %v2557_v2 = vld [vmem:[#allocation11 + $0x578] sm:$0xff] }
 0x289   : > { %1431 = vmatprep.mubr.f32.mxu0 %v11270_v10  ;;  %1544 = vmatprep.mubr.f32.mxu1 %v11270_v10  ;;  %v9675_v9 = vpack.c.bf16 %v2557_v2, %v2553_v1  ;;  %v2591_v1 = vld [vmem:[#allocation11 + $0x688] sm:$0xff] }
 0x28a   : > { %v2595_v2 = vld [vmem:[#allocation11 + $0x6a8] sm:$0xff] }
 0x28c   : > { %8837 = vmatmul.mubr.msk.f32.gmra.mrb[10].mxu0 %vm1021_vm2, %v1035_v3  ;;  %8845 = vmatmul.mubr.msk.f32.gmra.mrb[10].mxu1 %vm1021_vm2, %v1035_v3  ;;  %v1567_v3 = vld [vmem:[#allocation2 + $0x32] sm:$0xff] }
 0x28d   : > { %1437 = vmatprep.mubr.f32.mxu0 %v11270_v10  ;;  %1550 = vmatprep.mubr.f32.mxu1 %v11270_v10 }
 0x290   : > { %8838 = vmatmul.mubr.msk.f32.gmra.mrb[12].mxu0 %vm1021_vm2, %v1036_v4  ;;  %8846 = vmatmul.mubr.msk.f32.gmra.mrb[12].mxu1 %vm1021_vm2, %v1036_v4  ;;  %v9609_v4 = vpack.c.bf16 %v2546_v58, %v2542_v57  ;;  %v2589_v57 = vld [vmem:[#allocation11 + $0x678] sm:$0xff] }
 0x291   : > { %1443 = vmatprep.mubr.f32.mxu0 %v11270_v10  ;;  %1556 = vmatprep.mubr.f32.mxu1 %v11270_v10 }
 0x294   : > { %8839 = vmatmul.mubr.msk.f32.gmra.mrb[14].mxu0 %vm1021_vm2, %v1037_v5  ;;  %8847 = vmatmul.mubr.msk.f32.gmra.mrb[14].mxu1 %vm1021_vm2, %v1037_v5  ;;  %v9673_v5 = vpack.c.bf16 %v2548_v62, %v2544_v61  ;;  %v2584_v61 = vld [vmem:[#allocation11 + $0x650] sm:$0xff] }
 0x295   : > { %1668 = vmatprep.mubr.f32.mxu0 %v11270_v10  ;;  %1781 = vmatprep.mubr.f32.mxu1 %v11270_v10  ;;  %v9693_v0 = vpack.c.bf16 %v2588_v63, %v2584_v61  ;;  %v2631_v61 = vld [vmem:[#allocation11 + $0x7c8] sm:$0xff]  ;;  %v2633_v63 = vld [vmem:[#allocation11 + $0x7d8] sm:$0xff] }
 0x298   : > { %8848 = vmatmul.mubr.msk.f32.vlgmr.msra.gmra.mrb[0].mxu0 %vm1021_vm2, %v1563_v15  ;;  %8856 = vmatmul.mubr.msk.f32.vlgmr.msra.gmra.mrb[0].mxu1 %vm1021_vm2, %v1563_v15  ;;  %v2561_v15 = vld [vmem:[#allocation11 + $0x598] sm:$0xff] }
 0x299   : > { %1674 = vmatprep.mubr.f32.mxu0 %v11270_v10  ;;  %1787 = vmatprep.mubr.f32.mxu1 %v11270_v10 }
 0x29a   : > { %9594 = vmatpush1.bf16.msra.mxu0 %v9593_v16  ;;  %9658 = vmatpush1.bf16.msra.mxu1 %v9657_v17  ;;  %v2565_v16 = vld [vmem:[#allocation11 + $0x5b8] sm:$0xff]  ;;  %v1568_v17 = vld [vmem:[#allocation2 + $0x3a] sm:$0xff] }
 0x29b   : > { %9596 = vmatprep.subr.bf16.mxu0 %v9595_v20  ;;  %9660 = vmatprep.subr.bf16.mxu1 %v9659_v21  ;;  %v9615_v20 = vpack.c.bf16 %v2563_v14, %v2559_v13  ;;  %v9679_v21 = vpack.c.bf16 %v2565_v16, %v2561_v15  ;;  %v2599_v14 = vld [vmem:[#allocation11 + $0x6c8] sm:$0xff]  ;;  %v2601_v16 = vld [vmem:[#allocation11 + $0x6d8] sm:$0xff] }
 0x29c   : > { %8849 = vmatmul.mubr.msk.f32.gmra.mrb[2].mxu0 %vm1021_vm2, %v1564_v28  ;;  %8857 = vmatmul.mubr.msk.f32.gmra.mrb[2].mxu1 %vm1021_vm2, %v1564_v28  ;;  %v2564_v28 = vld [vmem:[#allocation11 + $0x5b0] sm:$0xff]  ;;  %v2603_v15 = vld [vmem:[#allocation11 + $0x6e8] sm:$0xff] }
 0x29d   : > { %1680 = vmatprep.mubr.f32.mxu0 %v11270_v10  ;;  %1793 = vmatprep.mubr.f32.mxu1 %v11270_v10 }
 0x29e   : > { %9598 = vmatpush1.bf16.msra.mxu0 %v9597_v29  ;;  %9662 = vmatpush1.bf16.msra.mxu1 %v9661_v30  ;;  %v9681_v29 = vpack.c.bf16 %v2564_v28, %v2560_v26  ;;  %v2567_v30 = vld [vmem:[#allocation11 + $0x5c8] sm:$0xff]  ;;  %v2609_v28 = vld [vmem:[#allocation11 + $0x718] sm:$0xff] }
 0x29f   : > { %9600 = vmatprep.subr.bf16.mxu0 %v9599_v33  ;;  %9664 = vmatprep.subr.bf16.mxu1 %v9663_v34  ;;  %v9619_v33 = vpack.c.bf16 %v2571_v31, %v2567_v30  ;;  %v2573_v34 = vld [vmem:[#allocation11 + $0x5f8] sm:$0xff]  ;;  %v2607_v26 = vld [vmem:[#allocation11 + $0x708] sm:$0xff]  ;;  %v2606_v31 = vld [vmem:[#allocation11 + $0x700] sm:$0xff] }
 0x2a0   : > { %8850 = vmatmul.mubr.msk.f32.gmra.mrb[4].mxu0 %vm1021_vm2, %v1565_v41  ;;  %8858 = vmatmul.mubr.msk.f32.gmra.mrb[4].mxu1 %vm1021_vm2, %v1565_v41  ;;  %v9683_v36 = vpack.c.bf16 %v2573_v34, %v2569_v32  ;;  %v2575_v41 = vld [vmem:[#allocation11 + $0x608] sm:$0xff]  ;;  %v2613_v30 = vld [vmem:[#allocation11 + $0x738] sm:$0xff]  ;;  %v2610_v32 = vld [vmem:[#allocation11 + $0x720] sm:$0xff] }
 0x2a1   : > { %1686 = vmatprep.mubr.f32.mxu0 %v11270_v10  ;;  %1799 = vmatprep.mubr.f32.mxu1 %v11270_v10  ;;  %v9641_v34 = vpack.c.bf16 %v2610_v32, %v2606_v31 }
 0x2a2   : > { %9602 = vmatpush1.bf16.msra.mxu0 %v9601_v42  ;;  %9666 = vmatpush1.bf16.msra.mxu1 %v9665_v43  ;;  %v2579_v42 = vld [vmem:[#allocation11 + $0x628] sm:$0xff]  ;;  %v2577_v43 = vld [vmem:[#allocation11 + $0x618] sm:$0xff] }
 0x2a3   : > { %9604 = vmatprep.subr.bf16.mxu0 %v9603_v46  ;;  %9668 = vmatprep.subr.bf16.mxu1 %v9667_v47  ;;  %v9623_v44 = vpack.c.bf16 %v2579_v42, %v2575_v41  ;;  %v2574_v46 = vld [vmem:[#allocation11 + $0x600] sm:$0xff]  ;;  %v9687_v48 = vpack.c.bf16 %v2581_v45, %v2577_v43  ;;  %v2621_v41 = vld [vmem:[#allocation11 + $0x778] sm:$0xff] }
 0x2a4   : > { %8851 = vmatmul.mubr.msk.f32.gmra.mrb[6].mxu0 %vm1021_vm2, %v1566_v54  ;;  %8859 = vmatmul.mubr.msk.f32.gmra.mrb[6].mxu1 %vm1021_vm2, %v1566_v54  ;;  %v2578_v47 = vld [vmem:[#allocation11 + $0x620] sm:$0xff]  ;;  %v2587_v54 = vld [vmem:[#allocation11 + $0x668] sm:$0xff] }
 0x2a5   : > { %1692 = vmatprep.mubr.f32.mxu0 %v11270_v10  ;;  %1805 = vmatprep.mubr.f32.mxu1 %v11270_v10  ;;  %v9625_v49 = vpack.c.bf16 %v2578_v47, %v2574_v46  ;;  %v2614_v42 = vld [vmem:[#allocation11 + $0x740] sm:$0xff]  ;;  %v2616_v46 = vld [vmem:[#allocation11 + $0x750] sm:$0xff] }
 0x2a6   : > { %9606 = vmatpush1.bf16.msra.mxu0 %v9605_v55  ;;  %9670 = vmatpush1.bf16.msra.mxu1 %v9669_v56  ;;  %v2585_v55 = vld [vmem:[#allocation11 + $0x658] sm:$0xff]  ;;  %v9627_v56 = vpack.c.bf16 %v2587_v54, %v2583_v53  ;;  %v2618_v43 = vld [vmem:[#allocation11 + $0x760] sm:$0xff]  ;;  %v2620_v47 = vld [vmem:[#allocation11 + $0x770] sm:$0xff] }
 0x2a7   : > { %9608 = vmatprep.subr.bf16.mxu0 %v9607_v59  ;;  %9672 = vmatprep.subr.bf16.mxu1 %v9671_v60  ;;  %v9691_v58 = vpack.c.bf16 %v2589_v57, %v2585_v55  ;;  %v2582_v59 = vld [vmem:[#allocation11 + $0x640] sm:$0xff]  ;;  %v9645_v45 = vpack.c.bf16 %v2618_v43, %v2614_v42  ;;  %v2629_v53 = vld [vmem:[#allocation11 + $0x7b8] sm:$0xff]  ;;  %v12088_v42 = vld [vmem:[#allocation11 + $0x10] sm:$0xff] }
 0x2a8   : > { %8852 = vmatmul.mubr.msk.f32.gmra.mrb[8].mxu0 %vm1021_vm2, %v1567_v3  ;;  %8860 = vmatmul.mubr.msk.f32.gmra.mrb[8].mxu1 %vm1021_vm2, %v1567_v3  ;;  %v2586_v60 = vld [vmem:[#allocation11 + $0x660] sm:$0xff]  ;;  %v2593_v3 = vld [vmem:[#allocation11 + $0x698] sm:$0xff]  ;;  %v12090_v43 = vld [vmem:[#allocation11 + $0x30] sm:$0xff] }
 0x2a9   : > { %1698 = vmatprep.mubr.f32.mxu0 %v11270_v10  ;;  %1811 = vmatprep.mubr.f32.mxu1 %v11270_v10  ;;  %v9629_v62 = vpack.c.bf16 %v2586_v60, %v2582_v59  ;;  %v2622_v54 = vld [vmem:[#allocation11 + $0x780] sm:$0xff]  ;;  %v2628_v59 = vld [vmem:[#allocation11 + $0x7b0] sm:$0xff] }
 0x2aa   : > { %9610 = vmatpush1.bf16.msra.mxu0 %v9609_v4  ;;  %9674 = vmatpush1.bf16.msra.mxu1 %v9673_v5  ;;  %v9631_v4 = vpack.c.bf16 %v2595_v2, %v2591_v1  ;;  %v2597_v5 = vld [vmem:[#allocation11 + $0x6b8] sm:$0xff]  ;;  %v2626_v55 = vld [vmem:[#allocation11 + $0x7a0] sm:$0xff] }
 0x2ab   : > { %9612 = vmatprep.subr.bf16.mxu0 %v9611_v8  ;;  %9676 = vmatprep.subr.bf16.mxu1 %v9675_v9  ;;  %v9695_v6 = vpack.c.bf16 %v2597_v5, %v2593_v3  ;;  %v2594_v8 = vld [vmem:[#allocation11 + $0x6a0] sm:$0xff]  ;;  %v2592_v9 = vld [vmem:[#allocation11 + $0x690] sm:$0xff]  ;;  %v9649_v57 = vpack.c.bf16 %v2626_v55, %v2622_v54  ;;  %v2637_v1 = vld [vmem:[#allocation11 + $0x7f8] sm:$0xff] }
 0x2ac   : > { %8853 = vmatmul.mubr.msk.f32.gmra.mrb[10].mxu0 %vm1021_vm2, %v1568_v17  ;;  %8861 = vmatmul.mubr.msk.f32.gmra.mrb[10].mxu1 %vm1021_vm2, %v1568_v17  ;;  %v9633_v11 = vpack.c.bf16 %v2594_v8, %v2590_v7  ;;  %v9697_v13 = vpack.c.bf16 %v2596_v12, %v2592_v9  ;;  %v9635_v17 = vpack.c.bf16 %v2603_v15, %v2599_v14  ;;  %v2630_v2 = vld [vmem:[#allocation11 + $0x7c0] sm:$0xff]  ;;  %v2636_v7 = vld [vmem:[#allocation11 + $0x7f0] sm:$0xff]  ;;  %v2317_v9 = vld [vmem:[#allocation11 + $0x8] sm:$0xff] }
 0x2ad   : > { %1704 = vmatprep.mubr.f32.mxu0 %v11270_v10  ;;  %1817 = vmatprep.mubr.f32.mxu1 %v11270_v10  ;;  %v2634_v3 = vld [vmem:[#allocation11 + $0x7e0] sm:$0xff]  ;;  %v2319_v12 = vld [vmem:[#allocation11 + $0x18] sm:$0xff] }
 0x2ae   : > { %9614 = vmatpush1.bf16.msra.mxu0 %v9613_v18  ;;  %9678 = vmatpush1.bf16.msra.mxu1 %v9677_v19  ;;  %v2605_v18 = vld [vmem:[#allocation11 + $0x6f8] sm:$0xff]  ;;  %v9653_v5 = vpack.c.bf16 %v2634_v3, %v2630_v2 }
 0x2af   : > { %9616 = vmatprep.subr.bf16.mxu0 %v9615_v20  ;;  %9680 = vmatprep.subr.bf16.mxu1 %v9679_v21  ;;  %v9699_v19 = vpack.c.bf16 %v2605_v18, %v2601_v16  ;;  %v2598_v20 = vld [vmem:[#allocation11 + $0x6c0] sm:$0xff]  ;;  %v2323_v14 = vld [vmem:[#allocation11 + $0x38] sm:$0xff]  ;;  %v1864_v16 = vlaneseq }
 0x2b0   : > { %8854 = vmatmul.mubr.msk.f32.gmra.mrb[12].mxu0 %vm1021_vm2, %v1569_v22  ;;  %8862 = vmatmul.mubr.msk.f32.gmra.mrb[12].mxu1 %vm1021_vm2, %v1569_v22  ;;  %v2602_v21 = vld [vmem:[#allocation11 + $0x6e0] sm:$0xff]  ;;  %v2600_v22 = vld [vmem:[#allocation11 + $0x6d0] sm:$0xff]  ;;  %v9783_v15 = vpack.c.bf16 %v2323_v14, %v2319_v12 }
 0x2b1   : > { %1710 = vmatprep.mubr.f32.mxu0 %v11270_v10  ;;  %1823 = vmatprep.mubr.f32.mxu1 %v11270_v10  ;;  %v2570_v10 = vld [vmem:[#allocation11 + $0x5e0] sm:$0xff]  ;;  %v9701_v25 = vpack.c.bf16 %v2604_v24, %v2600_v22 }
 0x2b2   : > { %9618 = vmatpush1.bf16.msra.mxu0 %v9617_v27  ;;  %9682 = vmatpush1.bf16.msra.mxu1 %v9681_v29  ;;  %v9621_v37 = vpack.c.bf16 %v2570_v10, %v2566_v35  ;;  %v2611_v27 = vld [vmem:[#allocation11 + $0x728] sm:$0xff]  ;;  %v2608_v35 = vld [vmem:[#allocation11 + $0x710] sm:$0xff] }
 0x2b3   : > { %9620 = vmatprep.subr.bf16.mxu0 %v9619_v33  ;;  %9684 = vmatprep.subr.bf16.mxu1 %v9683_v36  ;;  %v9639_v29 = vpack.c.bf16 %v2611_v27, %v2607_v26  ;;  %v9703_v33 = vpack.c.bf16 %v2613_v30, %v2609_v28  ;;  %v2612_v10 = vld [vmem:[#allocation11 + $0x730] sm:$0xff] }
 0x2b4   : > { %8855 = vmatmul.mubr.msk.f32.gmra.mrb[14].mxu0 %vm1021_vm2, %v1570_v23  ;;  %8863 = vmatmul.mubr.msk.f32.gmra.mrb[14].mxu1 %vm1021_vm2, %v1570_v23  ;;  %v9637_v23 = vpack.c.bf16 %v2602_v21, %v2598_v20  ;;  %v9705_v36 = vpack.c.bf16 %v2612_v10, %v2608_v35  ;;  %v1862_v20 = vld [vmem:[#allocation10] sm:$0xf] }
 0x2b6   : > { %9622 = vmatpush1.bf16.msra.mxu0 %v9621_v37  ;;  %9686 = vmatpush1.bf16.msra.mxu1 %v9685_v40  ;;  %v2615_v37 = vld [vmem:[#allocation11 + $0x748] sm:$0xff] }
 0x2b7   : > { %9624 = vmatprep.subr.bf16.mxu0 %v9623_v44  ;;  %9688 = vmatprep.subr.bf16.mxu1 %v9687_v48  ;;  %v9643_v40 = vpack.c.bf16 %v2619_v38, %v2615_v37  ;;  %v9707_v44 = vpack.c.bf16 %v2621_v41, %v2617_v39  ;;  %v9709_v48 = vpack.c.bf16 %v2620_v47, %v2616_v46  ;;  %v12082_v38 = vld [vmem:[#allocation11] sm:$0xff] }
 0x2b8   : > { %v12084_v39 = vld [vmem:[#allocation11 + $0x20] sm:$0xff] }
 0x2ba   : > { %9626 = vmatpush1.bf16.msra.mxu0 %v9625_v49  ;;  %9690 = vmatpush1.bf16.msra.mxu1 %v9689_v52  ;;  %v2623_v49 = vld [vmem:[#allocation11 + $0x788] sm:$0xff] }
 0x2bb   : > { %9628 = vmatprep.subr.bf16.mxu0 %v9627_v56  ;;  %9692 = vmatprep.subr.bf16.mxu1 %v9691_v58  ;;  %v9647_v52 = vpack.c.bf16 %v2627_v50, %v2623_v49  ;;  %v9711_v56 = vpack.c.bf16 %v2629_v53, %v2625_v51  ;;  %v2624_v58 = vld [vmem:[#allocation11 + $0x790] sm:$0xff]  ;;  %v12099_v49 = vld [vmem:[#allocation11 + $0x58] sm:$0xff] }
 0x2bc   : > { %v9713_v60 = vpack.c.bf16 %v2628_v59, %v2624_v58  ;;  %v12101_v50 = vld [vmem:[#allocation11 + $0x78] sm:$0xff]  ;;  %v12110_v58 = vld [vmem:[#allocation11 + $0x60] sm:$0xff] }
 0x2be   : > { %9630 = vmatpush1.bf16.msra.mxu0 %v9629_v62  ;;  %9694 = vmatpush1.bf16.msra.mxu1 %v9693_v0  ;;  %v2635_v62 = vld [vmem:[#allocation11 + $0x7e8] sm:$0xff] }
 0x2bf   : > { %9632 = vmatprep.subr.bf16.mxu0 %v9631_v4  ;;  %9696 = vmatprep.subr.bf16.mxu1 %v9695_v6  ;;  %v9651_v0 = vpack.c.bf16 %v2635_v62, %v2631_v61  ;;  %v9715_v4 = vpack.c.bf16 %v2637_v1, %v2633_v63  ;;  %v2632_v6 = vld [vmem:[#allocation11 + $0x7d0] sm:$0xff] }
 0x2c0   : > { %v9717_v8 = vpack.c.bf16 %v2636_v7, %v2632_v6  ;;  %v12122_v6 = vld [vmem:[#allocation11 + $0x70] sm:$0xff] }
 0x2c2   : > { %9634 = vmatpush1.bf16.msra.mxu0 %v9633_v11  ;;  %9698 = vmatpush1.bf16.msra.mxu1 %v9697_v13  ;;  %v2321_v11 = vld [vmem:[#allocation11 + $0x28] sm:$0xff] }
 0x2c3   : > { %9636 = vmatprep.subr.bf16.mxu0 %v9635_v17  ;;  %9700 = vmatprep.subr.bf16.mxu1 %v9699_v19  ;;  %v9719_v13 = vpack.c.bf16 %v2321_v11, %v2317_v9  ;;  %v12056_v17 = vshrl.u32 %v1864_v16, 7  ;;  %v9787_v9 = vpack.c.bf16 %v12101_v50, %v12099_v49 }
 0x2c5   : > { %v12059_v18 = vsub.s32 0, %v12056_v17  ;;  %v13188_v19 = vsub.s32 2, %v12056_v17  ;;  %v12063_v21 = vsub.s32 1, %v12056_v17  ;;  %v13187_v22 = vsub.s32 3, %v12056_v17 }
 0x2c6   : > { %9638 = vmatpush1.bf16.msra.mxu0 %v9637_v23  ;;  %9702 = vmatpush1.bf16.msra.mxu1 %v9701_v25  ;;  %v11271_v23 = vmov 1966171168   ;;  %v11272_v25 = vmov 1983009808  }
 0x2c7   : > { %9640 = vmatprep.subr.bf16.mxu0 %v9639_v29  ;;  %9704 = vmatprep.subr.bf16.mxu1 %v9703_v33  ;;  %v2013_v24 = vunpack.c.l.s4 %v11271_v23  ;;  %v2207_v26 = vunpack.c.l.s4 %v11272_v25  ;;  %v12067_v27 = vrot.slane %v1862_v20, %v12059_v18  ;;  %v12071_v28 = vrot.slane %v1862_v20, %v13188_v19  ;;  %v12128_v23 = vld [vmem:[#allocation11 + $0x88] sm:$0xff] }
 0x2c8   : > { %v12074_v29 = vrot.slane %v1862_v20, %v12063_v21  ;;  %v12078_v30 = vrot.slane %v1862_v20, %v13187_v22 }
 0x2c9   : > { %v2014_v31 = vunpack.c.0.s8 %v2013_v24  ;;  %v12130_v24 = vld [vmem:[#allocation11 + $0xa8] sm:$0xff] }
 0x2ca   : > { %9642 = vmatpush1.bf16.msra.mxu0 %v9641_v34  ;;  %9706 = vmatpush1.bf16.msra.mxu1 %v9705_v36  ;;  %v2208_v34 = vunpack.c.0.s8 %v2207_v26 }
 0x2cb   : > { %9644 = vmatprep.subr.bf16.mxu0 %v9643_v40  ;;  %9708 = vmatprep.subr.bf16.mxu1 %v9707_v44  ;;  %v12092_v44 = vld [vmem:[#allocation11 + $0x48] sm:$0xff]  ;;  %v12095_v47 = vsub.s32 %v2014_v31, %v12056_v17 }
 0x2cc   : > { %v12104_v53 = vsub.s32 %v2208_v34, %v12056_v17 }
 0x2ce   : > { %9646 = vmatpush1.bf16.msra.mxu0 %v9645_v45  ;;  %9710 = vmatpush1.bf16.msra.mxu1 %v9709_v48  ;;  %v12097_v48 = vld [vmem:[#allocation11 + $0x68] sm:$0xff] }
 0x2cf   : > { %9648 = vmatprep.subr.bf16.mxu0 %v9647_v52  ;;  %9712 = vmatprep.subr.bf16.mxu1 %v9711_v56  ;;  %v9721_v56 = vpack.c.bf16 %v12084_v39, %v12082_v38 }
 0x2d2   : > { %9650 = vmatpush1.bf16.msra.mxu0 %v9649_v57  ;;  %9714 = vmatpush1.bf16.msra.mxu1 %v9713_v60  ;;  %v12108_v57 = vld [vmem:[#allocation11 + $0x40] sm:$0xff] }
 0x2d3   : > { %9652 = vmatprep.subr.bf16.mxu0 %v9651_v0  ;;  %9716 = vmatprep.subr.bf16.mxu1 %v9715_v4  ;;  %v9785_v0 = vpack.c.bf16 %v12090_v43, %v12088_v42  ;;  %v9723_v4 = vpack.c.bf16 %v12097_v48, %v12092_v44  ;;  %v9725_v11 = vpack.c.bf16 %v12110_v58, %v12108_v57  ;;  %v2341_v42 = vld [vmem:[#allocation11 + $0xc8] sm:$0xff] }
 0x2d6   : > { %9654 = vmatpush1.bf16.msra.mxu0 %v9653_v5  ;;  %9718 = vmatpush1.bf16.msra.mxu1 %v9717_v8  ;;  %v12120_v5 = vld [vmem:[#allocation11 + $0x50] sm:$0xff] }
 0x2d7   : > { %9720 = vmatprep.subr.bf16.mxu0 %v9719_v13  ;;  %9784 = vmatprep.subr.bf16.mxu1 %v9783_v15  ;;  %v9789_v34 = vpack.c.bf16 %v12122_v6, %v12120_v5  ;;  %v2353_v5 = vld [vmem:[#allocation11 + $0x128] sm:$0xff]  ;;  %v2351_v6 = vld [vmem:[#allocation11 + $0x118] sm:$0xff] }
 0x36b   : > { %v1670_v32 = vpop.f32.mrb[0].mxu0  ;;  %v1783_v33 = vpop.f32.mrb[0].mxu1 }
 0x36c   : > { %v1884_v35 = vadd.f32 %v12067_v27, %v1670_v32  ;;  %v1886_v10 = vadd.f32 %v12071_v28, %v1783_v33  ;;  %v1672_v36 = vpop.f32.mrb[1].mxu0  ;;  %v1785_v37 = vpop.f32.mrb[1].mxu1 }
 0x36d   : > { %v1885_v40 = vadd.f32 %v12074_v29, %v1672_v36  ;;  %v1887_v41 = vadd.f32 %v12078_v30, %v1785_v37 }
 0x36e   : > { %v1916_v45 = vmax.f32 %v1884_v35, 0.0  ;;  %v1918_v46 = vmax.f32 %v1886_v10, 0.0 }
 0x36f   : > { %v1917_v51 = vmax.f32 %v1885_v40, 0.0  ;;  %v1919_v52 = vmax.f32 %v1887_v41, 0.0  ;;  %v1676_v54 = vpop.f32.mrb[2].mxu0  ;;  %v1789_v55 = vpop.f32.mrb[2].mxu1 }
 0x370   : > { %v1948_v59 = vmax.f32 %v1916_v45, %v1918_v46  ;;  %v1888_v60 = vadd.f32 %v12067_v27, %v1676_v54  ;;  %v1890_v61 = vadd.f32 %v12071_v28, %v1789_v55  ;;  %v1678_v62 = vpop.f32.mrb[3].mxu0  ;;  %v1791_v63 = vpop.f32.mrb[3].mxu1  ;;  %v9727_v46 = vpack.c.bf16 %v12130_v24, %v12128_v23 }
 0x371   : > { %v1949_v1 = vmax.f32 %v1917_v51, %v1919_v52  ;;  %v1889_v2 = vadd.f32 %v12074_v29, %v1678_v62  ;;  %v1891_v3 = vadd.f32 %v12078_v30, %v1791_v63 }
 0x372   : > { %v1920_v7 = vmax.f32 %v1888_v60, 0.0  ;;  %v1922_v8 = vmax.f32 %v1890_v61, 0.0 }
 0x373   : > { %v1980_v12 = vcombine.low %v1948_v59, %v1949_v1  ;;  %v1981_v13 = vcombine.high %v1948_v59, %v1949_v1  ;;  %v1921_v14 = vmax.f32 %v1889_v2, 0.0  ;;  %v1923_v15 = vmax.f32 %v1891_v3, 0.0  ;;  %v1682_v16 = vpop.f32.mrb[4].mxu0  ;;  %v1795_v20 = vpop.f32.mrb[4].mxu1 }
 0x374   : > { %v1950_v25 = vmax.f32 %v1920_v7, %v1922_v8  ;;  %v1892_v26 = vadd.f32 %v12067_v27, %v1682_v16  ;;  %v1894_v31 = vadd.f32 %v12071_v28, %v1795_v20  ;;  %v1684_v32 = vpop.f32.mrb[5].mxu0  ;;  %v1797_v33 = vpop.f32.mrb[5].mxu1 }
 0x375   : > { %v2018_v35 = vrot.slane %v1980_v12, %v12095_v47  ;;  %v2025_v10 = vrot.slane %v1981_v13, %v12095_v47  ;;  %v1951_v36 = vmax.f32 %v1921_v14, %v1923_v15  ;;  %v1893_v37 = vadd.f32 %v12074_v29, %v1684_v32 }
 0x376   : > { %v1924_v40 = vmax.f32 %v1892_v26, 0.0  ;;  %v1926_v41 = vmax.f32 %v1894_v31, 0.0  ;;  %v1895_v45 = vadd.f32 %v12078_v30, %v1797_v33 }
 0x377   : > { %v2140_v51 = vrot.slane %v2018_v35, 4  ;;  %v2141_v52 = vrot.slane %v2025_v10, 4  ;;  %v1982_v54 = vcombine.low %v1950_v25, %v1951_v36  ;;  %v1983_v55 = vcombine.high %v1950_v25, %v1951_v36  ;;  %v1688_v59 = vpop.f32.mrb[6].mxu0  ;;  %v1801_v60 = vpop.f32.mrb[6].mxu1 }
 0x378   : > { %v1952_v61 = vmax.f32 %v1924_v40, %v1926_v41  ;;  %v1925_v62 = vmax.f32 %v1893_v37, 0.0  ;;  %v1927_v63 = vmax.f32 %v1895_v45, 0.0  ;;  %v1896_v1 = vadd.f32 %v12067_v27, %v1688_v59  ;;  %v1690_v2 = vpop.f32.mrb[7].mxu0  ;;  %v1803_v3 = vpop.f32.mrb[7].mxu1 }
 0x379   : > { %v2172_v7 = vmax.f32 %v2018_v35, %v2140_v51  ;;  %v2173_v8 = vmax.f32 %v2025_v10, %v2141_v52  ;;  %v2032_v12 = vrot.slane %v1982_v54, %v12095_v47  ;;  %v2039_v13 = vrot.slane %v1983_v55, %v12095_v47 }
 0x37a   : > { %v1953_v14 = vmax.f32 %v1925_v62, %v1927_v63  ;;  %v1928_v15 = vmax.f32 %v1896_v1, 0.0  ;;  %v1898_v16 = vadd.f32 %v12071_v28, %v1801_v60  ;;  %v1897_v20 = vadd.f32 %v12074_v29, %v1690_v2 }
 0x37b   : > { %v2204_v25 = vcombine.low %v2172_v7, %v2173_v8  ;;  %v2142_v26 = vrot.slane %v2032_v12, 4  ;;  %v2143_v31 = vrot.slane %v2039_v13, 4  ;;  %v1899_v32 = vadd.f32 %v12078_v30, %v1803_v3  ;;  %v1694_v33 = vpop.f32.mrb[8].mxu0  ;;  %v1807_v36 = vpop.f32.mrb[8].mxu1 }
 0x37c   : > { %v1984_v37 = vcombine.low %v1952_v61, %v1953_v14  ;;  %v1985_v35 = vcombine.high %v1952_v61, %v1953_v14  ;;  %v1930_v10 = vmax.f32 %v1898_v16, 0.0  ;;  %v1929_v40 = vmax.f32 %v1897_v20, 0.0  ;;  %v1696_v41 = vpop.f32.mrb[9].mxu0  ;;  %v1809_v45 = vpop.f32.mrb[9].mxu1 }
 0x37d   : > { %v2212_v51 = vrot.slane %v2204_v25, %v12104_v53  ;;  %v2174_v52 = vmax.f32 %v2032_v12, %v2142_v26  ;;  %v2175_v54 = vmax.f32 %v2039_v13, %v2143_v31  ;;  %v1931_v55 = vmax.f32 %v1899_v32, 0.0 }
 0x37e   : > { %v2046_v59 = vrot.slane %v1984_v37, %v12095_v47  ;;  %v2053_v60 = vrot.slane %v1985_v35, %v12095_v47  ;;  %v1954_v62 = vmax.f32 %v1928_v15, %v1930_v10  ;;  %v1900_v63 = vadd.f32 %v12067_v27, %v1694_v33 }
 0x37f   : > { %v2205_v1 = vcombine.low %v2174_v52, %v2175_v54  ;;  %v1955_v2 = vmax.f32 %v1929_v40, %v1931_v55  ;;  %v1902_v61 = vadd.f32 %v12071_v28, %v1807_v36  ;;  %v1901_v3 = vadd.f32 %v12074_v29, %v1696_v41  ;;  %v1700_v7 = vpop.f32.mrb[10].mxu0  ;;  %v1813_v8 = vpop.f32.mrb[10].mxu1 }
 0x380   : > { %v2144_v14 = vrot.slane %v2046_v59, 4  ;;  %v2145_v16 = vrot.slane %v2053_v60, 4  ;;  %v1932_v12 = vmax.f32 %v1900_v63, 0.0  ;;  %v1903_v13 = vadd.f32 %v12078_v30, %v1809_v45  ;;  %v1702_v20 = vpop.f32.mrb[11].mxu0  ;;  %v1815_v25 = vpop.f32.mrb[11].mxu1 }
 0x381   : > { %v2219_v26 = vrot.slane %v2205_v1, %v12104_v53  ;;  %v1986_v15 = vcombine.low %v1954_v62, %v1955_v2  ;;  %v1987_v31 = vcombine.high %v1954_v62, %v1955_v2  ;;  %v1934_v32 = vmax.f32 %v1902_v61, 0.0 }
 0x382   : > { %v2176_v33 = vmax.f32 %v2046_v59, %v2144_v14  ;;  %v2177_v37 = vmax.f32 %v2053_v60, %v2145_v16  ;;  %v1933_v35 = vmax.f32 %v1901_v3, 0.0  ;;  %v1935_v36 = vmax.f32 %v1903_v13, 0.0 }
 0x383   : > { %v2220_v10 = vcombine.low %v2212_v51, %v2219_v26  ;;  %v2221_v40 = vcombine.high %v2212_v51, %v2219_v26  ;;  %v2060_v41 = vrot.slane %v1986_v15, %v12095_v47  ;;  %v2067_v52 = vrot.slane %v1987_v31, %v12095_v47  ;;  %v1706_v54 = vpop.f32.mrb[12].mxu0  ;;  %v1819_v55 = vpop.f32.mrb[12].mxu1 }
 0x384   : > { %v2222_v45 = vcombine.low %v2176_v33, %v2177_v37  ;;  %v1956_v63 = vmax.f32 %v1932_v12, %v1934_v32  ;;  %v1957_v22 = vmax.f32 %v1933_v35, %v1935_v36  ;;  %v1904_v1 = vadd.f32 %v12067_v27, %v1700_v7  ;;  %v1708_v19 = vpop.f32.mrb[13].mxu0  ;;  %v1821_v62 = vpop.f32.mrb[13].mxu1 }
 0x385   : > { %v2276_v2 = vrot.slane %v2220_v10, 7  ;;  %v2277_v59 = vrot.slane %v2221_v40, 7  ;;  %v2146_v60 = vrot.slane %v2060_v41, 4  ;;  %v2147_v61 = vrot.slane %v2067_v52, 4 }
 0x386   : > { %v2230_v3 = vrot.slane %v2222_v45, %v12104_v53  ;;  %v1988_v51 = vcombine.low %v1956_v63, %v1957_v22  ;;  %v1989_v14 = vcombine.high %v1956_v63, %v1957_v22  ;;  %v1936_v16 = vmax.f32 %v1904_v1, 0.0 }
 0x387   : > { %2292 = vst [vmem:[#allocation3] sm:$0xfe] %v2276_v2  ;;  %2293 = vst [vmem:[#allocation3 + $0x8] sm:$0xfe] %v2277_v59  ;;  %v2178_v13 = vmax.f32 %v2060_v41, %v2146_v60  ;;  %v2179_v12 = vmax.f32 %v2067_v52, %v2147_v61  ;;  %v1906_v26 = vadd.f32 %v12071_v28, %v1813_v8  ;;  %v1712_v15 = vpop.f32.mrb[14].mxu0  ;;  %v1825_v31 = vpop.f32.mrb[14].mxu1 }
 0x388   : > { %2294 = vst [vmem:[#allocation3 + $0x10] sm:$0x1] %v2276_v2  ;;  %2295 = vst [vmem:[#allocation3 + $0x18] sm:$0x1] %v2277_v59  ;;  %v1905_v7 = vadd.f32 %v12074_v29, %v1702_v20  ;;  %v2074_v32 = vrot.slane %v1988_v51, %v12095_v47  ;;  %v2081_v33 = vrot.slane %v1989_v14, %v12095_v47  ;;  %v1714_v35 = vpop.f32.mrb[15].mxu0  ;;  %v1827_v36 = vpop.f32.mrb[15].mxu1 }
 0x389   : > { %v1907_v37 = vadd.f32 %v12078_v30, %v1815_v25  ;;  %v1908_v22 = vadd.f32 %v12067_v27, %v1706_v54  ;;  %v2223_v10 = vcombine.low %v2178_v13, %v2179_v12  ;;  %v1938_v40 = vmax.f32 %v1906_v26, 0.0  ;;  %v12170_v26 = vld [vmem:[#allocation11 + $0x98] sm:$0xff] }
 0x38a   : > { %v1937_v41 = vmax.f32 %v1905_v7, 0.0  ;;  %v1910_v52 = vadd.f32 %v12071_v28, %v1819_v55  ;;  %v2148_v8 = vrot.slane %v2074_v32, 4  ;;  %v2149_v45 = vrot.slane %v2081_v33, 4  ;;  %v12172_v7 = vld [vmem:[#allocation11 + $0xb8] sm:$0xff] }
 0x38b   : > { %v1939_v20 = vmax.f32 %v1907_v37, 0.0  ;;  %v1940_v63 = vmax.f32 %v1908_v22, 0.0  ;;  %v2237_v1 = vrot.slane %v2223_v10, %v12104_v53  ;;  %v1958_v2 = vmax.f32 %v1936_v16, %v1938_v40 }
 0x38c   : > { %v1942_v59 = vmax.f32 %v1910_v52, 0.0  ;;  %v1909_v60 = vadd.f32 %v12074_v29, %v1708_v19  ;;  %v2180_v25 = vmax.f32 %v2074_v32, %v2148_v8  ;;  %v2181_v61 = vmax.f32 %v2081_v33, %v2149_v45 }
 0x38d   : > { %v1959_v54 = vmax.f32 %v1937_v41, %v1939_v20  ;;  %v1911_v51 = vadd.f32 %v12078_v30, %v1821_v62  ;;  %v2238_v14 = vcombine.low %v2230_v3, %v2237_v1  ;;  %v2239_v13 = vcombine.high %v2230_v3, %v2237_v1 }
 0x38e   : > { %v1960_v12 = vmax.f32 %v1940_v63, %v1942_v59  ;;  %v1941_v55 = vmax.f32 %v1909_v60, 0.0  ;;  %v2240_v37 = vcombine.low %v2180_v25, %v2181_v61  ;;  %v1912_v32 = vadd.f32 %v12067_v27, %v1712_v15  ;;  %v2445_v52 = vld [vmem:[#allocation3 + $0x8] sm:$0xfe]  ;;  %v2444_v59 = vld [vmem:[#allocation3] sm:$0xfe] }
 0x38f   : > { %v1990_v22 = vcombine.low %v1958_v2, %v1959_v54  ;;  %v1991_v16 = vcombine.high %v1958_v2, %v1959_v54  ;;  %v1943_v10 = vmax.f32 %v1911_v51, 0.0  ;;  %v2278_v40 = vrot.slane %v2238_v14, 7  ;;  %v2446_v60 = vld [vmem:[#allocation3 + $0x10] sm:$0x1] }
 0x390   : > { %v2279_v19 = vrot.slane %v2239_v13, 7  ;;  %v1914_v33 = vadd.f32 %v12071_v28, %v1825_v31  ;;  %v9791_v8 = vpack.c.bf16 %v12172_v7, %v12170_v26  ;;  %v1944_v45 = vmax.f32 %v1912_v32, 0.0  ;;  %v2447_v28 = vld [vmem:[#allocation3 + $0x18] sm:$0x1]  ;;  %v2348_v26 = vld [vmem:[#allocation11 + $0x100] sm:$0xff] }
 0x391   : > { %v2088_v62 = vrot.slane %v1990_v22, %v12095_v47  ;;  %v2095_v3 = vrot.slane %v1991_v16, %v12095_v47  ;;  %v1961_v41 = vmax.f32 %v1941_v55, %v1943_v10  ;;  %2296 = vst [vmem:[#allocation3 + $0x20] sm:$0xfe] %v2278_v40  ;;  %2298 = vst [vmem:[#allocation3 + $0x30] sm:$0x1] %v2278_v40  ;;  %v2480_v51 = vrot.slane %v2445_v52, 1  ;;  %v2352_v7 = vld [vmem:[#allocation11 + $0x120] sm:$0xff] }
 0x392   : > { %2297 = vst [vmem:[#allocation3 + $0x28] sm:$0xfe] %v2279_v19  ;;  %2299 = vst [vmem:[#allocation3 + $0x38] sm:$0x1] %v2279_v19  ;;  %v1946_v20 = vmax.f32 %v1914_v33, 0.0  ;;  %v1913_v63 = vadd.f32 %v12074_v29, %v1714_v35  ;;  %v1915_v27 = vadd.f32 %v12078_v30, %v1827_v36  ;;  %v2481_v35 = vrot.slane %v2447_v28, 1 }
 0x393   : > { %v2150_v15 = vrot.slane %v2088_v62, 4  ;;  %v2151_v31 = vrot.slane %v2095_v3, 4  ;;  %v1992_v1 = vcombine.low %v1960_v12, %v1961_v41  ;;  %v1993_v2 = vcombine.high %v1960_v12, %v1961_v41 }
 0x394   : > { %v1962_v25 = vmax.f32 %v1944_v45, %v1946_v20  ;;  %v1945_v61 = vmax.f32 %v1913_v63, 0.0  ;;  %v1947_v54 = vmax.f32 %v1915_v27, 0.0  ;;  %v2477_v30 = vrot.slane %v2444_v59, 1 }
 0x395   : > { %v2182_v14 = vmax.f32 %v2088_v62, %v2150_v15  ;;  %v2183_v13 = vmax.f32 %v2095_v3, %v2151_v31  ;;  %v2102_v55 = vrot.slane %v1992_v1, %v12095_v47  ;;  %v2109_v22 = vrot.slane %v1993_v2, %v12095_v47 }
 0x396   : > { %v1963_v29 = vmax.f32 %v1945_v61, %v1947_v54  ;;  %v2478_v36 = vrot.slane %v2446_v60, 1  ;;  %v2248_v16 = vrot.slane %v2240_v37, %v12104_v53  ;;  %v2482_v33 = vsel %vm2476_vm3, %v2480_v51, %v2481_v35  ;;  %v2336_v61 = vld [vmem:[#allocation11 + $0xa0] sm:$0xff]  ;;  %v2342_v35 = vld [vmem:[#allocation11 + $0xd0] sm:$0xff] }
 0x397   : > { %v2241_v10 = vcombine.low %v2182_v14, %v2183_v13  ;;  %v2152_v12 = vrot.slane %v2102_v55, 4  ;;  %v2153_v40 = vrot.slane %v2109_v22, 4  ;;  %2702 = vmatprep.mubr.f32.mxu0 %v2482_v33  ;;  %2791 = vmatprep.mubr.f32.mxu1 %v2482_v33  ;;  %v2338_v14 = vld [vmem:[#allocation11 + $0xb0] sm:$0xff]  ;;  %v2345_v13 = vld [vmem:[#allocation11 + $0xe8] sm:$0xff] }
 0x398   : > { %v1994_v19 = vcombine.low %v1962_v25, %v1963_v29  ;;  %v1995_v32 = vcombine.high %v1962_v25, %v1963_v29  ;;  %v2479_v62 = vsel %vm2476_vm3, %v2477_v30, %v2478_v36  ;;  %v2448_v37 = vld [vmem:[#allocation3 + $0x20] sm:$0xfe]  ;;  %v2450_v31 = vld [vmem:[#allocation3 + $0x30] sm:$0x1]  ;;  %v9731_v57 = vpack.c.bf16 %v2345_v13, %v2341_v42  ;;  %v2349_v36 = vld [vmem:[#allocation11 + $0x108] sm:$0xff] }
 0x399   : > { %v2255_v3 = vrot.slane %v2241_v10, %v12104_v53  ;;  %v12188_v41 = vmax.f32 %v2102_v55, %v2152_v12  ;;  %v12190_v52 = vmax.f32 %v2109_v22, %v2153_v40  ;;  %v2449_v45 = vld [vmem:[#allocation3 + $0x28] sm:$0xfe]  ;;  %v2451_v20 = vld [vmem:[#allocation3 + $0x38] sm:$0x1]  ;;  %2703 = vmatmul.mubr.f32.vlgmr.msra.gmra.mrb[16].mxu0 %v2479_v62  ;;  %2792 = vmatmul.mubr.f32.vlgmr.msra.gmra.mrb[16].mxu1 %v2479_v62  ;;  %v2483_v60 = vrot.slane %v2448_v37, 1 }
 0x39a   : > { %v2116_v63 = vrot.slane %v1994_v19, %v12095_v47  ;;  %v2123_v27 = vrot.slane %v1995_v32, %v12095_v47  ;;  %v2486_v28 = vrot.slane %v2449_v45, 1  ;;  %v2487_v15 = vrot.slane %v2451_v20, 1  ;;  %9722 = vmatpush1.bf16.msra.mxu0 %v9721_v56  ;;  %9786 = vmatpush1.bf16.msra.mxu1 %v9785_v0  ;;  %v2332_v25 = vld [vmem:[#allocation11 + $0x80] sm:$0xff]  ;;  %v2334_v56 = vld [vmem:[#allocation11 + $0x90] sm:$0xff]  ;;  %v2343_v55 = vld [vmem:[#allocation11 + $0xd8] sm:$0xff] }
 0x39b   : > { %v2256_v1 = vcombine.low %v2248_v16, %v2255_v3  ;;  %v2257_v2 = vcombine.high %v2248_v16, %v2255_v3  ;;  %v2258_v59 = vcombine.low %v12188_v41, %v12190_v52  ;;  %9724 = vmatprep.subr.bf16.mxu0 %v9723_v4  ;;  %9788 = vmatprep.subr.bf16.mxu1 %v9787_v9  ;;  %v2484_v39 = vrot.slane %v2450_v31, 1  ;;  %v2347_v22 = vld [vmem:[#allocation11 + $0xf8] sm:$0xff]  ;;  %v2340_v4 = vld [vmem:[#allocation11 + $0xc0] sm:$0xff]  ;;  %v2350_v19 = vld [vmem:[#allocation11 + $0x110] sm:$0xff] }
 0x39c   : > { %v2154_v54 = vrot.slane %v2116_v63, 4  ;;  %v2155_v51 = vrot.slane %v2123_v27, 4  ;;  %v2488_v38 = vsel %vm2476_vm3, %v2486_v28, %v2487_v15  ;;  %v9729_v49 = vpack.c.bf16 %v2336_v61, %v2332_v25  ;;  %v2344_v9 = vld [vmem:[#allocation11 + $0xe0] sm:$0xff]  ;;  %v2354_v32 = vld [vmem:[#allocation11 + $0x130] sm:$0xff]  ;;  %v2357_v33 = vld [vmem:[#allocation11 + $0x148] sm:$0xff] }
 0x39d   : > { %v2280_v43 = vrot.slane %v2256_v1, 7  ;;  %v2281_v0 = vrot.slane %v2257_v2, 7  ;;  %2708 = vmatprep.mubr.f32.mxu0 %v2488_v38  ;;  %2797 = vmatprep.mubr.f32.mxu1 %v2488_v38  ;;  %v2485_v48 = vsel %vm2476_vm3, %v2483_v60, %v2484_v39  ;;  %v9793_v50 = vpack.c.bf16 %v2338_v14, %v2334_v56  ;;  %v2361_v62 = vld [vmem:[#allocation11 + $0x168] sm:$0xff]  ;;  %v2359_v3 = vld [vmem:[#allocation11 + $0x158] sm:$0xff]  ;;  %v2356_v60 = vld [vmem:[#allocation11 + $0x140] sm:$0xff] }
 0x39e   : > { %v2186_v29 = vmax.f32 %v2116_v63, %v2154_v54  ;;  %v2187_v44 = vmax.f32 %v2123_v27, %v2155_v51  ;;  %9726 = vmatpush1.bf16.msra.mxu0 %v9725_v11  ;;  %9790 = vmatpush1.bf16.msra.mxu1 %v9789_v34  ;;  %v9795_v58 = vpack.c.bf16 %v2347_v22, %v2343_v55  ;;  %v2346_v11 = vld [vmem:[#allocation11 + $0xf0] sm:$0xff]  ;;  %v2355_v34 = vld [vmem:[#allocation11 + $0x138] sm:$0xff]  ;;  %v2360_v25 = vld [vmem:[#allocation11 + $0x160] sm:$0xff] }
 0x39f   : > { %2300 = vst [vmem:[#allocation3 + $0x40] sm:$0xfe] %v2280_v43  ;;  %2301 = vst [vmem:[#allocation3 + $0x48] sm:$0xfe] %v2281_v0  ;;  %9728 = vmatprep.subr.bf16.mxu0 %v9727_v46  ;;  %9792 = vmatprep.subr.bf16.mxu1 %v9791_v8  ;;  %v2266_v16 = vrot.slane %v2258_v59, %v12104_v53  ;;  %v9733_v23 = vpack.c.bf16 %v2344_v9, %v2340_v4  ;;  %v2363_v41 = vld [vmem:[#allocation11 + $0x178] sm:$0xff]  ;;  %v2358_v38 = vld [vmem:[#allocation11 + $0x150] sm:$0xff] }
 0x3a0   : > { %2302 = vst [vmem:[#allocation3 + $0x50] sm:$0x1] %v2280_v43  ;;  %2303 = vst [vmem:[#allocation3 + $0x58] sm:$0x1] %v2281_v0  ;;  %v2259_v30 = vcombine.low %v2186_v29, %v2187_v44  ;;  %2709 = vmatmul.mubr.f32.gmra.mrb[18].mxu0 %v2485_v48  ;;  %2798 = vmatmul.mubr.f32.gmra.mrb[18].mxu1 %v2485_v48  ;;  %v9797_v24 = vpack.c.bf16 %v2346_v11, %v2342_v35  ;;  %v2362_v39 = vld [vmem:[#allocation11 + $0x170] sm:$0xff]  ;;  %v2365_v56 = vld [vmem:[#allocation11 + $0x188] sm:$0xff] }
 0x3a1   : > { %v9735_v46 = vpack.c.bf16 %v2353_v5, %v2349_v36  ;;  %v9799_v40 = vpack.c.bf16 %v2355_v34, %v2351_v6  ;;  %v9737_v2 = vpack.c.bf16 %v2352_v7, %v2348_v26  ;;  %v9801_v59 = vpack.c.bf16 %v2354_v32, %v2350_v19  ;;  %v2369_v42 = vld [vmem:[#allocation11 + $0x1a8] sm:$0xff]  ;;  %v2367_v43 = vld [vmem:[#allocation11 + $0x198] sm:$0xff]  ;;  %v2364_v22 = vld [vmem:[#allocation11 + $0x180] sm:$0xff] }
 0x3a2   : > { %v2273_v10 = vrot.slane %v2259_v30, %v12104_v53  ;;  %9730 = vmatpush1.bf16.msra.mxu0 %v9729_v49  ;;  %9794 = vmatpush1.bf16.msra.mxu1 %v9793_v50  ;;  %v9739_v54 = vpack.c.bf16 %v2361_v62, %v2357_v33  ;;  %v9803_v51 = vpack.c.bf16 %v2363_v41, %v2359_v3  ;;  %v2371_v0 = vld [vmem:[#allocation11 + $0x1b8] sm:$0xff]  ;;  %v2368_v48 = vld [vmem:[#allocation11 + $0x1a0] sm:$0xff]  ;;  %v2366_v49 = vld [vmem:[#allocation11 + $0x190] sm:$0xff] }
 0x3a3   : > { %9732 = vmatprep.subr.bf16.mxu0 %v9731_v57  ;;  %9796 = vmatprep.subr.bf16.mxu1 %v9795_v58  ;;  %v9741_v13 = vpack.c.bf16 %v2360_v25, %v2356_v60  ;;  %v9805_v55 = vpack.c.bf16 %v2362_v39, %v2358_v38  ;;  %v9743_v29 = vpack.c.bf16 %v2369_v42, %v2365_v56  ;;  %v2370_v50 = vld [vmem:[#allocation11 + $0x1b0] sm:$0xff]  ;;  %v2373_v4 = vld [vmem:[#allocation11 + $0x1c8] sm:$0xff]  ;;  %v2375_v35 = vld [vmem:[#allocation11 + $0x1d8] sm:$0xff] }
 0x3a4   : > { %v2274_v8 = vcombine.low %v2266_v16, %v2273_v10  ;;  %v2275_v12 = vcombine.high %v2266_v16, %v2273_v10  ;;  %v9807_v44 = vpack.c.bf16 %v2371_v0, %v2367_v43  ;;  %v2377_v9 = vld [vmem:[#allocation11 + $0x1e8] sm:$0xff]  ;;  %v2379_v34 = vld [vmem:[#allocation11 + $0x1f8] sm:$0xff]  ;;  %v9745_v10 = vpack.c.bf16 %v2368_v48, %v2364_v22  ;;  %v2374_v7 = vld [vmem:[#allocation11 + $0x1d0] sm:$0xff] }
 0x3a5   : > { %v9747_v19 = vpack.c.bf16 %v2377_v9, %v2373_v4  ;;  %v9811_v32 = vpack.c.bf16 %v2379_v34, %v2375_v35  ;;  %v2385_v33 = vld [vmem:[#allocation11 + $0x228] sm:$0xff]  ;;  %v2383_v62 = vld [vmem:[#allocation11 + $0x218] sm:$0xff]  ;;  %v2390_v39 = vld [vmem:[#allocation11 + $0x250] sm:$0xff] }
 0x3a6   : > { %v2282_v52 = vrot.slane %v2274_v8, 7  ;;  %v2283_v45 = vrot.slane %v2275_v12, 7  ;;  %v2453_v20 = vld [vmem:[#allocation3 + $0x48] sm:$0xfe]  ;;  %9734 = vmatpush1.bf16.msra.mxu0 %v9733_v23  ;;  %9798 = vmatpush1.bf16.msra.mxu1 %v9797_v24  ;;  %v2452_v28 = vld [vmem:[#allocation3 + $0x40] sm:$0xfe]  ;;  %v9809_v23 = vpack.c.bf16 %v2370_v50, %v2366_v49 }
 0x3a7   : > { %v2455_v37 = vld [vmem:[#allocation3 + $0x58] sm:$0x1]  ;;  %v2492_v63 = vrot.slane %v2453_v20, 1  ;;  %v2454_v15 = vld [vmem:[#allocation3 + $0x50] sm:$0x1]  ;;  %9736 = vmatprep.subr.bf16.mxu0 %v9735_v46  ;;  %9800 = vmatprep.subr.bf16.mxu1 %v9799_v40  ;;  %v2489_v31 = vrot.slane %v2452_v28, 1 }
 0x3a8   : > { %v2493_v27 = vrot.slane %v2455_v37, 1  ;;  %2304 = vst [vmem:[#allocation3 + $0x60] sm:$0xfe] %v2282_v52  ;;  %2305 = vst [vmem:[#allocation3 + $0x68] sm:$0xfe] %v2283_v45  ;;  %v2490_v1 = vrot.slane %v2454_v15, 1 }
 0x3a9   : > { %2306 = vst [vmem:[#allocation3 + $0x70] sm:$0x1] %v2282_v52  ;;  %2307 = vst [vmem:[#allocation3 + $0x78] sm:$0x1] %v2283_v45  ;;  %v2372_v24 = vld [vmem:[#allocation11 + $0x1c0] sm:$0xff]  ;;  %v2378_v8 = vld [vmem:[#allocation11 + $0x1f0] sm:$0xff] }
 0x3aa   : > { %v2494_v61 = vsel %vm2476_vm3, %v2492_v63, %v2493_v27  ;;  %v2491_v14 = vsel %vm2476_vm3, %v2489_v31, %v2490_v1  ;;  %9738 = vmatpush1.bf16.msra.mxu0 %v9737_v2  ;;  %9802 = vmatpush1.bf16.msra.mxu1 %v9801_v59  ;;  %v2376_v46 = vld [vmem:[#allocation11 + $0x1e0] sm:$0xff]  ;;  %v2381_v12 = vld [vmem:[#allocation11 + $0x208] sm:$0xff]  ;;  %v2387_v3 = vld [vmem:[#allocation11 + $0x238] sm:$0xff]  ;;  %v9813_v45 = vpack.c.bf16 %v2378_v8, %v2374_v7 }
 0x3ab   : > { %2714 = vmatprep.mubr.f32.mxu0 %v2494_v61  ;;  %2803 = vmatprep.mubr.f32.mxu1 %v2494_v61  ;;  %v2309_v41 = vld [vmem:[#allocation3 + $0x8] sm:$0xff]  ;;  %v9749_v52 = vpack.c.bf16 %v2376_v46, %v2372_v24  ;;  %v9751_v63 = vpack.c.bf16 %v2385_v33, %v2381_v12  ;;  %v9815_v27 = vpack.c.bf16 %v2387_v3, %v2383_v62  ;;  %v2382_v28 = vld [vmem:[#allocation11 + $0x210] sm:$0xff]  ;;  %v2389_v31 = vld [vmem:[#allocation11 + $0x248] sm:$0xff] }
 0x3ac   : > { %2715 = vmatmul.mubr.f32.gmra.mrb[20].mxu0 %v2491_v14  ;;  %2804 = vmatmul.mubr.f32.gmra.mrb[20].mxu1 %v2491_v14  ;;  %v2380_v20 = vld [vmem:[#allocation11 + $0x200] sm:$0xff]  ;;  %v2386_v15 = vld [vmem:[#allocation11 + $0x230] sm:$0xff]  ;;  %v2393_v1 = vld [vmem:[#allocation11 + $0x268] sm:$0xff] }
 0x3ad   : > { %9740 = vmatprep.subr.bf16.mxu0 %v9739_v54  ;;  %9804 = vmatprep.subr.bf16.mxu1 %v9803_v51  ;;  %v2384_v37 = vld [vmem:[#allocation11 + $0x220] sm:$0xff]  ;;  %v2391_v2 = vld [vmem:[#allocation11 + $0x258] sm:$0xff]  ;;  %v9817_v25 = vpack.c.bf16 %v2386_v15, %v2382_v28  ;;  %v9755_v51 = vpack.c.bf16 %v2393_v1, %v2389_v31  ;;  %v2394_v56 = vld [vmem:[#allocation11 + $0x270] sm:$0xff] }
 0x3ae   : > { %9742 = vmatpush1.bf16.msra.mxu0 %v9741_v13  ;;  %9806 = vmatpush1.bf16.msra.mxu1 %v9805_v55  ;;  %v2395_v59 = vld [vmem:[#allocation11 + $0x278] sm:$0xff]  ;;  %v9753_v60 = vpack.c.bf16 %v2384_v37, %v2380_v20  ;;  %v2388_v61 = vld [vmem:[#allocation11 + $0x240] sm:$0xff]  ;;  %v2397_v14 = vld [vmem:[#allocation11 + $0x288] sm:$0xff]  ;;  %v9821_v55 = vpack.c.bf16 %v2394_v56, %v2390_v39 }
 0x3af   : > { %v2457_v30 = vld [vmem:[#allocation3 + $0x68] sm:$0xfe]  ;;  %v2456_v58 = vld [vmem:[#allocation3 + $0x60] sm:$0xfe]  ;;  %9744 = vmatprep.subr.bf16.mxu0 %v9743_v29  ;;  %9808 = vmatprep.subr.bf16.mxu1 %v9807_v44  ;;  %v9819_v38 = vpack.c.bf16 %v2395_v59, %v2391_v2  ;;  %v2401_v42 = vld [vmem:[#allocation11 + $0x2a8] sm:$0xff] }
 0x3b0   : > { %v2459_v57 = vld [vmem:[#allocation3 + $0x78] sm:$0x1]  ;;  %v2498_v11 = vrot.slane %v2457_v30, 1  ;;  %v2458_v5 = vld [vmem:[#allocation3 + $0x70] sm:$0x1]  ;;  %v2495_v6 = vrot.slane %v2456_v58, 1  ;;  %v9759_v44 = vpack.c.bf16 %v2401_v42, %v2397_v14 }
 0x3b1   : > { %v2499_v36 = vrot.slane %v2459_v57, 1  ;;  %v2496_v16 = vrot.slane %v2458_v5, 1  ;;  %v2392_v54 = vld [vmem:[#allocation11 + $0x260] sm:$0xff]  ;;  %v2399_v43 = vld [vmem:[#allocation11 + $0x298] sm:$0xff]  ;;  %v2398_v49 = vld [vmem:[#allocation11 + $0x290] sm:$0xff] }
 0x3b2   : > { %9746 = vmatpush1.bf16.msra.mxu0 %v9745_v10  ;;  %9810 = vmatpush1.bf16.msra.mxu1 %v9809_v23  ;;  %v2403_v0 = vld [vmem:[#allocation11 + $0x2b8] sm:$0xff]  ;;  %v9757_v13 = vpack.c.bf16 %v2392_v54, %v2388_v61  ;;  %v2396_v22 = vld [vmem:[#allocation11 + $0x280] sm:$0xff]  ;;  %v2402_v50 = vld [vmem:[#allocation11 + $0x2b0] sm:$0xff] }
 0x3b3   : > { %v2500_v26 = vsel %vm2476_vm3, %v2498_v11, %v2499_v36  ;;  %v2497_v40 = vsel %vm2476_vm3, %v2495_v6, %v2496_v16  ;;  %9748 = vmatprep.subr.bf16.mxu0 %v9747_v19  ;;  %9812 = vmatprep.subr.bf16.mxu1 %v9811_v32  ;;  %v2400_v29 = vld [vmem:[#allocation11 + $0x2a0] sm:$0xff]  ;;  %v9823_v48 = vpack.c.bf16 %v2403_v0, %v2399_v43  ;;  %v2405_v4 = vld [vmem:[#allocation11 + $0x2c8] sm:$0xff]  ;;  %v2407_v35 = vld [vmem:[#allocation11 + $0x2d8] sm:$0xff] }
 0x3b4   : > { %2720 = vmatprep.mubr.f32.mxu0 %v2500_v26  ;;  %2809 = vmatprep.mubr.f32.mxu1 %v2500_v26  ;;  %v2409_v9 = vld [vmem:[#allocation11 + $0x2e8] sm:$0xff]  ;;  %v2411_v30 = vld [vmem:[#allocation11 + $0x2f8] sm:$0xff]  ;;  %v9761_v57 = vpack.c.bf16 %v2400_v29, %v2396_v22  ;;  %v9825_v58 = vpack.c.bf16 %v2402_v50, %v2398_v49  ;;  %v2404_v11 = vld [vmem:[#allocation11 + $0x2c0] sm:$0xff] }
 0x3b5   : > { %2721 = vmatmul.mubr.f32.gmra.mrb[22].mxu0 %v2497_v40  ;;  %2810 = vmatmul.mubr.f32.gmra.mrb[22].mxu1 %v2497_v40  ;;  %v2408_v36 = vld [vmem:[#allocation11 + $0x2e0] sm:$0xff]  ;;  %v9763_v5 = vpack.c.bf16 %v2409_v9, %v2405_v4  ;;  %v9827_v6 = vpack.c.bf16 %v2411_v30, %v2407_v35  ;;  %v2406_v34 = vld [vmem:[#allocation11 + $0x2d0] sm:$0xff]  ;;  %v2413_v10 = vld [vmem:[#allocation11 + $0x308] sm:$0xff] }
 0x3b6   : > { %2880 = vmatprep.mubr.f32.mxu0 %v2309_v41  ;;  %2969 = vmatprep.mubr.f32.mxu1 %v2309_v41  ;;  %v2410_v16 = vld [vmem:[#allocation11 + $0x2f0] sm:$0xff]  ;;  %v2417_v23 = vld [vmem:[#allocation11 + $0x328] sm:$0xff]  ;;  %v2415_v24 = vld [vmem:[#allocation11 + $0x318] sm:$0xff]  ;;  %v9765_v26 = vpack.c.bf16 %v2408_v36, %v2404_v11 }
 0x3b7   : > { %9750 = vmatpush1.bf16.msra.mxu0 %v9749_v52  ;;  %9814 = vmatpush1.bf16.msra.mxu1 %v9813_v45  ;;  %v2419_v46 = vld [vmem:[#allocation11 + $0x338] sm:$0xff]  ;;  %v9829_v7 = vpack.c.bf16 %v2410_v16, %v2406_v34  ;;  %v2412_v8 = vld [vmem:[#allocation11 + $0x300] sm:$0xff]  ;;  %v9767_v40 = vpack.c.bf16 %v2417_v23, %v2413_v10  ;;  %v2414_v32 = vld [vmem:[#allocation11 + $0x310] sm:$0xff] }
 0x3b8   : > { %9752 = vmatprep.subr.bf16.mxu0 %v9751_v63  ;;  %9816 = vmatprep.subr.bf16.mxu1 %v9815_v27  ;;  %v2416_v12 = vld [vmem:[#allocation11 + $0x320] sm:$0xff]  ;;  %v9831_v19 = vpack.c.bf16 %v2419_v46, %v2415_v24  ;;  %v2418_v33 = vld [vmem:[#allocation11 + $0x330] sm:$0xff]  ;;  %v2421_v62 = vld [vmem:[#allocation11 + $0x348] sm:$0xff] }
 0x3b9   : > { %v2425_v3 = vld [vmem:[#allocation11 + $0x368] sm:$0xff]  ;;  %v2423_v41 = vld [vmem:[#allocation11 + $0x358] sm:$0xff]  ;;  %v9769_v45 = vpack.c.bf16 %v2416_v12, %v2412_v8  ;;  %v9833_v20 = vpack.c.bf16 %v2418_v33, %v2414_v32  ;;  %v2420_v37 = vld [vmem:[#allocation11 + $0x340] sm:$0xff] }
 0x3ba   : > { %v2427_v52 = vld [vmem:[#allocation11 + $0x378] sm:$0xff]  ;;  %v2424_v63 = vld [vmem:[#allocation11 + $0x360] sm:$0xff]  ;;  %v9771_v27 = vpack.c.bf16 %v2425_v3, %v2421_v62  ;;  %v2422_v15 = vld [vmem:[#allocation11 + $0x350] sm:$0xff] }
 0x3bb   : > { %9754 = vmatpush1.bf16.msra.mxu0 %v9753_v60  ;;  %9818 = vmatpush1.bf16.msra.mxu1 %v9817_v25  ;;  %v9835_v28 = vpack.c.bf16 %v2427_v52, %v2423_v41  ;;  %v2426_v31 = vld [vmem:[#allocation11 + $0x370] sm:$0xff]  ;;  %v2429_v1 = vld [vmem:[#allocation11 + $0x388] sm:$0xff]  ;;  %v2431_v59 = vld [vmem:[#allocation11 + $0x398] sm:$0xff]  ;;  %v9773_v25 = vpack.c.bf16 %v2424_v63, %v2420_v37 }
 0x3bc   : > { %9756 = vmatprep.subr.bf16.mxu0 %v9755_v51  ;;  %9820 = vmatprep.subr.bf16.mxu1 %v9819_v38  ;;  %v2433_v2 = vld [vmem:[#allocation11 + $0x3a8] sm:$0xff]  ;;  %v2435_v60 = vld [vmem:[#allocation11 + $0x3b8] sm:$0xff]  ;;  %v9837_v61 = vpack.c.bf16 %v2426_v31, %v2422_v15  ;;  %v2428_v54 = vld [vmem:[#allocation11 + $0x380] sm:$0xff] }
 0x3bd   : > { %v2432_v51 = vld [vmem:[#allocation11 + $0x3a0] sm:$0xff]  ;;  %v9775_v38 = vpack.c.bf16 %v2433_v2, %v2429_v1  ;;  %v9839_v39 = vpack.c.bf16 %v2435_v60, %v2431_v59  ;;  %v2430_v56 = vld [vmem:[#allocation11 + $0x390] sm:$0xff]  ;;  %v2437_v42 = vld [vmem:[#allocation11 + $0x3c8] sm:$0xff] }
 0x3be   : > { %v2434_v14 = vld [vmem:[#allocation11 + $0x3b0] sm:$0xff]  ;;  %v2441_v43 = vld [vmem:[#allocation11 + $0x3e8] sm:$0xff]  ;;  %v2439_v0 = vld [vmem:[#allocation11 + $0x3d8] sm:$0xff] }
 0x3bf   : > { %9758 = vmatpush1.bf16.msra.mxu0 %v9757_v13  ;;  %9822 = vmatpush1.bf16.msra.mxu1 %v9821_v55  ;;  %v2443_v13 = vld [vmem:[#allocation11 + $0x3f8] sm:$0xff]  ;;  %v9777_v55 = vpack.c.bf16 %v2432_v51, %v2428_v54  ;;  %v9841_v22 = vpack.c.bf16 %v2434_v14, %v2430_v56  ;;  %v2436_v29 = vld [vmem:[#allocation11 + $0x3c0] sm:$0xff]  ;;  %v2438_v50 = vld [vmem:[#allocation11 + $0x3d0] sm:$0xff] }
 0x3c0   : > { %9760 = vmatprep.subr.bf16.mxu0 %v9759_v44  ;;  %9824 = vmatprep.subr.bf16.mxu1 %v9823_v48  ;;  %v2440_v44 = vld [vmem:[#allocation11 + $0x3e0] sm:$0xff]  ;;  %v9779_v48 = vpack.c.bf16 %v2441_v43, %v2437_v42  ;;  %v9843_v49 = vpack.c.bf16 %v2443_v13, %v2439_v0  ;;  %v2442_v4 = vld [vmem:[#allocation11 + $0x3f0] sm:$0xff]  ;;  %v3061_v9 = vld [vmem:[#allocation11 + $0x808] sm:$0xff] }
 0x3c1   : > { %v3065_v35 = vld [vmem:[#allocation11 + $0x828] sm:$0xff]  ;;  %v3063_v30 = vld [vmem:[#allocation11 + $0x818] sm:$0xff]  ;;  %v9845_v11 = vpack.c.bf16 %v2442_v4, %v2438_v50  ;;  %v3064_v34 = vld [vmem:[#allocation11 + $0x820] sm:$0xff] }
 0x3c2   : > { %v9847_v36 = vpack.c.bf16 %v3065_v35, %v3061_v9  ;;  %v3062_v16 = vld [vmem:[#allocation11 + $0x810] sm:$0xff]  ;;  %v3069_v23 = vld [vmem:[#allocation11 + $0x848] sm:$0xff]  ;;  %v3071_v46 = vld [vmem:[#allocation11 + $0x858] sm:$0xff] }
 0x3c3   : > { %9762 = vmatpush1.bf16.msra.mxu0 %v9761_v57  ;;  %9826 = vmatpush1.bf16.msra.mxu1 %v9825_v58  ;;  %v3067_v57 = vld [vmem:[#allocation11 + $0x838] sm:$0xff]  ;;  %v9781_v58 = vpack.c.bf16 %v2440_v44, %v2436_v29  ;;  %v3066_v10 = vld [vmem:[#allocation11 + $0x830] sm:$0xff]  ;;  %v3073_v24 = vld [vmem:[#allocation11 + $0x868] sm:$0xff] }
 0x3c4   : > { %9764 = vmatprep.subr.bf16.mxu0 %v9763_v5  ;;  %9828 = vmatprep.subr.bf16.mxu1 %v9827_v6  ;;  %v9911_v5 = vpack.c.bf16 %v3067_v57, %v3063_v30  ;;  %v3060_v6 = vld [vmem:[#allocation11 + $0x800] sm:$0xff]  ;;  %v9913_v12 = vpack.c.bf16 %v3066_v10, %v3062_v16  ;;  %v3074_v32 = vld [vmem:[#allocation11 + $0x870] sm:$0xff]  ;;  %v9851_v62 = vpack.c.bf16 %v3073_v24, %v3069_v23  ;;  %v3077_v41 = vld [vmem:[#allocation11 + $0x888] sm:$0xff] }
 0x3c5   : > { %v9849_v8 = vpack.c.bf16 %v3064_v34, %v3060_v6  ;;  %v2308_v33 = vld [vmem:[#allocation3] sm:$0xff]  ;;  %v3081_v52 = vld [vmem:[#allocation11 + $0x8a8] sm:$0xff]  ;;  %v3076_v63 = vld [vmem:[#allocation11 + $0x880] sm:$0xff] }
 0x3c6   : > { %v3083_v37 = vld [vmem:[#allocation11 + $0x8b8] sm:$0xff]  ;;  %v3080_v15 = vld [vmem:[#allocation11 + $0x8a0] sm:$0xff]  ;;  %v3078_v31 = vld [vmem:[#allocation11 + $0x890] sm:$0xff]  ;;  %v9855_v59 = vpack.c.bf16 %v3081_v52, %v3077_v41 }
 0x3c7   : > { %9766 = vmatpush1.bf16.msra.mxu0 %v9765_v26  ;;  %9830 = vmatpush1.bf16.msra.mxu1 %v9829_v7  ;;  %v3075_v26 = vld [vmem:[#allocation11 + $0x878] sm:$0xff]  ;;  %v3068_v7 = vld [vmem:[#allocation11 + $0x840] sm:$0xff]  ;;  %v3082_v1 = vld [vmem:[#allocation11 + $0x8b0] sm:$0xff]  ;;  %v9857_v42 = vpack.c.bf16 %v3080_v15, %v3076_v63 }
 0x3c8   : > { %9768 = vmatprep.subr.bf16.mxu0 %v9767_v40  ;;  %9832 = vmatprep.subr.bf16.mxu1 %v9831_v19  ;;  %v3072_v40 = vld [vmem:[#allocation11 + $0x860] sm:$0xff]  ;;  %v3070_v19 = vld [vmem:[#allocation11 + $0x850] sm:$0xff]  ;;  %v9915_v3 = vpack.c.bf16 %v3075_v26, %v3071_v46  ;;  %v3087_v51 = vld [vmem:[#allocation11 + $0x8d8] sm:$0xff]  ;;  %v9921_v43 = vpack.c.bf16 %v3082_v1, %v3078_v31 }
 0x3c9   : > { %v2310_v2 = vld [vmem:[#allocation3 + $0x20] sm:$0xff]  ;;  %v2313_v54 = vld [vmem:[#allocation3 + $0x48] sm:$0xff]  ;;  %v2997_v14 = vld [vmem:[#allocation3 + $0x18] sm:$0x3] }
 0x3ca   : > { %v2995_v56 = vld [vmem:[#allocation3 + $0x8] sm:$0xfc]  ;;  %v3086_v13 = vld [vmem:[#allocation11 + $0x8d0] sm:$0xff]  ;;  %v3031_v9 = vrot.slane %v2997_v14, 2  ;;  %v3101_v23 = vld [vmem:[#allocation11 + $0x948] sm:$0xff] }
 0x3cb   : > { %9770 = vmatpush1.bf16.msra.mxu0 %v9769_v45  ;;  %9834 = vmatpush1.bf16.msra.mxu1 %v9833_v20  ;;  %v2311_v45 = vld [vmem:[#allocation3 + $0x28] sm:$0xff]  ;;  %v3030_v4 = vrot.slane %v2995_v56, 2  ;;  %v2314_v6 = vld [vmem:[#allocation3 + $0x60] sm:$0xff]  ;;  %v3105_v46 = vld [vmem:[#allocation11 + $0x968] sm:$0xff] }
 0x3cc   : > { %9772 = vmatprep.subr.bf16.mxu0 %v9771_v27  ;;  %9836 = vmatprep.subr.bf16.mxu1 %v9835_v28  ;;  %v3079_v20 = vld [vmem:[#allocation11 + $0x898] sm:$0xff]  ;;  %v9853_v27 = vpack.c.bf16 %v3072_v40, %v3068_v7  ;;  %v9917_v28 = vpack.c.bf16 %v3074_v32, %v3070_v19  ;;  %v3088_v0 = vld [vmem:[#allocation11 + $0x8e0] sm:$0xff]  ;;  %v3098_v10 = vld [vmem:[#allocation11 + $0x930] sm:$0xff]  ;;  %v9867_v32 = vpack.c.bf16 %v3105_v46, %v3101_v23 }
 0x3cd   : > { %v9919_v60 = vpack.c.bf16 %v3083_v37, %v3079_v20  ;;  %v2315_v50 = vld [vmem:[#allocation3 + $0x68] sm:$0xff]  ;;  %v3032_v24 = vsel %vm3026_vm4, %v3030_v4, %v3031_v9  ;;  %v3109_v41 = vld [vmem:[#allocation11 + $0x988] sm:$0xff]  ;;  %v3110_v1 = vld [vmem:[#allocation11 + $0x990] sm:$0xff] }
 0x3ce   : > { %v3095_v35 = vld [vmem:[#allocation11 + $0x918] sm:$0xff]  ;;  %v3100_v40 = vld [vmem:[#allocation11 + $0x940] sm:$0xff]  ;;  %v3113_v52 = vld [vmem:[#allocation11 + $0x9a8] sm:$0xff] }
 0x3cf   : > { %9774 = vmatpush1.bf16.msra.mxu0 %v9773_v25  ;;  %9838 = vmatpush1.bf16.msra.mxu1 %v9837_v61  ;;  %v3085_v25 = vld [vmem:[#allocation11 + $0x8c8] sm:$0xff]  ;;  %v3099_v30 = vld [vmem:[#allocation11 + $0x938] sm:$0xff]  ;;  %v3104_v19 = vld [vmem:[#allocation11 + $0x960] sm:$0xff]  ;;  %v9871_v15 = vpack.c.bf16 %v3113_v52, %v3109_v41 }
 0x3d0   : > { %9776 = vmatprep.subr.bf16.mxu0 %v9775_v38  ;;  %9840 = vmatprep.subr.bf16.mxu1 %v9839_v39  ;;  %v3089_v61 = vld [vmem:[#allocation11 + $0x8e8] sm:$0xff]  ;;  %v3091_v38 = vld [vmem:[#allocation11 + $0x8f8] sm:$0xff]  ;;  %v3084_v39 = vld [vmem:[#allocation11 + $0x8c0] sm:$0xff]  ;;  %v9927_v16 = vpack.c.bf16 %v3099_v30, %v3095_v35  ;;  %v9869_v37 = vpack.c.bf16 %v3104_v19, %v3100_v40 }
 0x3d1   : > { %v9859_v29 = vpack.c.bf16 %v3089_v61, %v3085_v25  ;;  %v9923_v44 = vpack.c.bf16 %v3091_v38, %v3087_v51  ;;  %v9861_v57 = vpack.c.bf16 %v3088_v0, %v3084_v39  ;;  %v3103_v26 = vld [vmem:[#allocation11 + $0x958] sm:$0xff]  ;;  %v3116_v38 = vld [vmem:[#allocation11 + $0x9c0] sm:$0xff]  ;;  %v3125_v0 = vld [vmem:[#allocation11 + $0xa08] sm:$0xff] }
 0x3d2   : > { %v3107_v7 = vld [vmem:[#allocation11 + $0x978] sm:$0xff]  ;;  %v3120_v39 = vld [vmem:[#allocation11 + $0x9e0] sm:$0xff]  ;;  %v3126_v9 = vld [vmem:[#allocation11 + $0xa10] sm:$0xff] }
 0x3d3   : > { %9778 = vmatpush1.bf16.msra.mxu0 %v9777_v55  ;;  %9842 = vmatpush1.bf16.msra.mxu1 %v9841_v22  ;;  %v3090_v55 = vld [vmem:[#allocation11 + $0x8f0] sm:$0xff]  ;;  %v3115_v20 = vld [vmem:[#allocation11 + $0x9b8] sm:$0xff]  ;;  %v3133_v30 = vld [vmem:[#allocation11 + $0xa48] sm:$0xff] }
 0x3d4   : > { %9780 = vmatprep.subr.bf16.mxu0 %v9779_v48  ;;  %9844 = vmatprep.subr.bf16.mxu1 %v9843_v49  ;;  %v2312_v22 = vld [vmem:[#allocation3 + $0x40] sm:$0xff]  ;;  %v3093_v48 = vld [vmem:[#allocation11 + $0x908] sm:$0xff]  ;;  %v3140_v19 = vld [vmem:[#allocation11 + $0xa80] sm:$0xff] }
 0x3d5   : > { %v3097_v49 = vld [vmem:[#allocation11 + $0x928] sm:$0xff]  ;;  %v3119_v25 = vld [vmem:[#allocation11 + $0x9d8] sm:$0xff]  ;;  %v3130_v35 = vld [vmem:[#allocation11 + $0xa30] sm:$0xff] }
 0x3d6   : > { %v9863_v34 = vpack.c.bf16 %v3097_v49, %v3093_v48  ;;  %v3123_v61 = vld [vmem:[#allocation11 + $0x9f8] sm:$0xff]  ;;  %v3124_v48 = vld [vmem:[#allocation11 + $0xa00] sm:$0xff]  ;;  %v3134_v23 = vld [vmem:[#allocation11 + $0xa50] sm:$0xff] }
 0x3d7   : > { %9782 = vmatpush1.bf16.msra.mxu0 %v9781_v58  ;;  %9846 = vmatpush1.bf16.msra.mxu1 %v9845_v11  ;;  %v9925_v58 = vpack.c.bf16 %v3090_v55, %v3086_v13  ;;  %v3092_v11 = vld [vmem:[#allocation11 + $0x900] sm:$0xff]  ;;  %v9939_v14 = vpack.c.bf16 %v3123_v61, %v3119_v25  ;;  %v3129_v13 = vld [vmem:[#allocation11 + $0xa28] sm:$0xff]  ;;  %v3127_v55 = vld [vmem:[#allocation11 + $0xa18] sm:$0xff] }
 0x3d8   : > { %9848 = vmatprep.subr.bf16.mxu0 %v9847_v36  ;;  %9912 = vmatprep.subr.bf16.mxu1 %v9911_v5  ;;  %v3096_v36 = vld [vmem:[#allocation11 + $0x920] sm:$0xff]  ;;  %v3094_v5 = vld [vmem:[#allocation11 + $0x910] sm:$0xff]  ;;  %v3141_v46 = vld [vmem:[#allocation11 + $0xa88] sm:$0xff] }
 0x3d9   : > { %v3128_v49 = vld [vmem:[#allocation11 + $0xa20] sm:$0xff]  ;;  %v3146_v41 = vld [vmem:[#allocation11 + $0xab0] sm:$0xff]  ;;  %v3149_v52 = vld [vmem:[#allocation11 + $0xac8] sm:$0xff] }
 0x3da   : > { %2881 = vmatmul.mubr.f32.vlgmr.msra.gmra.mrb[16].mxu0 %v2308_v33  ;;  %2970 = vmatmul.mubr.f32.vlgmr.msra.gmra.mrb[16].mxu1 %v2308_v33  ;;  %v9931_v33 = vpack.c.bf16 %v3107_v7, %v3103_v26  ;;  %v3145_v26 = vld [vmem:[#allocation11 + $0xaa8] sm:$0xff]  ;;  %v3143_v7 = vld [vmem:[#allocation11 + $0xa98] sm:$0xff] }
 0x3db   : > { %2886 = vmatprep.mubr.f32.mxu0 %v2311_v45  ;;  %2975 = vmatprep.mubr.f32.mxu1 %v2311_v45  ;;  %v3111_v45 = vld [vmem:[#allocation11 + $0x998] sm:$0xff]  ;;  %v3161_v25 = vld [vmem:[#allocation11 + $0xb28] sm:$0xff] }
 0x3dc   : > { %9850 = vmatpush1.bf16.msra.mxu0 %v9849_v8  ;;  %9914 = vmatpush1.bf16.msra.mxu1 %v9913_v12  ;;  %v9865_v8 = vpack.c.bf16 %v3096_v36, %v3092_v11  ;;  %v9929_v12 = vpack.c.bf16 %v3098_v10, %v3094_v5  ;;  %v9935_v31 = vpack.c.bf16 %v3115_v20, %v3111_v45  ;;  %v3139_v11 = vld [vmem:[#allocation11 + $0xa78] sm:$0xff]  ;;  %v3153_v45 = vld [vmem:[#allocation11 + $0xae8] sm:$0xff] }
 0x3dd   : > { %9852 = vmatprep.subr.bf16.mxu0 %v9851_v62  ;;  %9916 = vmatprep.subr.bf16.mxu1 %v9915_v3  ;;  %v3102_v62 = vld [vmem:[#allocation11 + $0x950] sm:$0xff]  ;;  %v9881_v36 = vpack.c.bf16 %v3128_v49, %v3124_v48  ;;  %v9945_v5 = vpack.c.bf16 %v3130_v35, %v3126_v9  ;;  %v3151_v20 = vld [vmem:[#allocation11 + $0xad8] sm:$0xff]  ;;  %v3164_v49 = vld [vmem:[#allocation11 + $0xb40] sm:$0xff] }
 0x3de   : > { %2887 = vmatmul.mubr.f32.gmra.mrb[18].mxu0 %v2310_v2  ;;  %2976 = vmatmul.mubr.f32.gmra.mrb[18].mxu1 %v2310_v2  ;;  %v3106_v3 = vld [vmem:[#allocation11 + $0x970] sm:$0xff]  ;;  %v3159_v61 = vld [vmem:[#allocation11 + $0xb18] sm:$0xff] }
 0x3df   : > { %2892 = vmatprep.mubr.f32.mxu0 %v2313_v54  ;;  %2981 = vmatprep.mubr.f32.mxu1 %v2313_v54  ;;  %v9933_v63 = vpack.c.bf16 %v3106_v3, %v3102_v62  ;;  %v3114_v2 = vld [vmem:[#allocation11 + $0x9b0] sm:$0xff] }
 0x3e0   : > { %9854 = vmatpush1.bf16.msra.mxu0 %v9853_v27  ;;  %9918 = vmatpush1.bf16.msra.mxu1 %v9917_v28  ;;  %v3108_v27 = vld [vmem:[#allocation11 + $0x980] sm:$0xff]  ;;  %v9937_v51 = vpack.c.bf16 %v3114_v2, %v3110_v1  ;;  %v3142_v3 = vld [vmem:[#allocation11 + $0xa90] sm:$0xff] }
 0x3e1   : > { %9856 = vmatprep.subr.bf16.mxu0 %v9855_v59  ;;  %9920 = vmatprep.subr.bf16.mxu1 %v9919_v60  ;;  %v3112_v28 = vld [vmem:[#allocation11 + $0x9a0] sm:$0xff]  ;;  %v3117_v59 = vld [vmem:[#allocation11 + $0x9c8] sm:$0xff]  ;;  %v3150_v2 = vld [vmem:[#allocation11 + $0xad0] sm:$0xff] }
 0x3e2   : > { %2893 = vmatmul.mubr.f32.gmra.mrb[20].mxu0 %v2312_v22  ;;  %2982 = vmatmul.mubr.f32.gmra.mrb[20].mxu1 %v2312_v22  ;;  %v3121_v60 = vld [vmem:[#allocation11 + $0x9e8] sm:$0xff]  ;;  %v9873_v54 = vpack.c.bf16 %v3112_v28, %v3108_v27  ;;  %v3131_v22 = vld [vmem:[#allocation11 + $0xa38] sm:$0xff]  ;;  %v9953_v27 = vpack.c.bf16 %v3146_v41, %v3142_v3  ;;  %v3148_v28 = vld [vmem:[#allocation11 + $0xac0] sm:$0xff] }
 0x3e3   : > { %2898 = vmatprep.mubr.f32.mxu0 %v2315_v50  ;;  %2987 = vmatprep.mubr.f32.mxu1 %v2315_v50  ;;  %v9875_v56 = vpack.c.bf16 %v3121_v60, %v3117_v59  ;;  %v9879_v50 = vpack.c.bf16 %v3129_v13, %v3125_v0  ;;  %v9943_v4 = vpack.c.bf16 %v3131_v22, %v3127_v55  ;;  %v3154_v59 = vld [vmem:[#allocation11 + $0xaf0] sm:$0xff]  ;;  %v3157_v60 = vld [vmem:[#allocation11 + $0xb08] sm:$0xff]  ;;  %v3167_v22 = vld [vmem:[#allocation11 + $0xb58] sm:$0xff] }
 0x3e4   : > { %9858 = vmatpush1.bf16.msra.mxu0 %v9857_v42  ;;  %9922 = vmatpush1.bf16.msra.mxu1 %v9921_v43  ;;  %v3118_v42 = vld [vmem:[#allocation11 + $0x9d0] sm:$0xff]  ;;  %v3165_v13 = vld [vmem:[#allocation11 + $0xb48] sm:$0xff]  ;;  %v3184_v3 = vld [vmem:[#allocation11 + $0xbe0] sm:$0xff] }
 0x3e5   : > { %9860 = vmatprep.subr.bf16.mxu0 %v9859_v29  ;;  %9924 = vmatprep.subr.bf16.mxu1 %v9923_v44  ;;  %v3122_v43 = vld [vmem:[#allocation11 + $0x9f0] sm:$0xff]  ;;  %v9877_v29 = vpack.c.bf16 %v3120_v39, %v3116_v38  ;;  %v9957_v38 = vpack.c.bf16 %v3154_v59, %v3150_v2  ;;  %v3156_v39 = vld [vmem:[#allocation11 + $0xb00] sm:$0xff]  ;;  %v3169_v55 = vld [vmem:[#allocation11 + $0xb68] sm:$0xff] }
 0x3e6   : > { %2899 = vmatmul.mubr.f32.gmra.mrb[22].mxu0 %v2314_v6  ;;  %2988 = vmatmul.mubr.f32.gmra.mrb[22].mxu1 %v2314_v6  ;;  %v9941_v44 = vpack.c.bf16 %v3122_v43, %v3118_v42  ;;  %v3132_v6 = vld [vmem:[#allocation11 + $0xa40] sm:$0xff]  ;;  %v3158_v43 = vld [vmem:[#allocation11 + $0xb10] sm:$0xff] }
 0x3e7   : > { %3252 = vmatprep.mubr.f32.mxu0 %v3032_v24  ;;  %3341 = vmatprep.mubr.f32.mxu1 %v3032_v24  ;;  %v3138_v24 = vld [vmem:[#allocation11 + $0xa70] sm:$0xff] }
 0x3e8   : > { %9862 = vmatpush1.bf16.msra.mxu0 %v9861_v57  ;;  %9926 = vmatpush1.bf16.msra.mxu1 %v9925_v58  ;;  %v3137_v57 = vld [vmem:[#allocation11 + $0xa68] sm:$0xff]  ;;  %v3135_v58 = vld [vmem:[#allocation11 + $0xa58] sm:$0xff]  ;;  %v9949_v40 = vpack.c.bf16 %v3138_v24, %v3134_v23  ;;  %v3162_v0 = vld [vmem:[#allocation11 + $0xb30] sm:$0xff] }
 0x3e9   : > { %9864 = vmatprep.subr.bf16.mxu0 %v9863_v34  ;;  %9928 = vmatprep.subr.bf16.mxu1 %v9927_v16  ;;  %v3136_v34 = vld [vmem:[#allocation11 + $0xa60] sm:$0xff]  ;;  %v9883_v16 = vpack.c.bf16 %v3137_v57, %v3133_v30  ;;  %v9947_v10 = vpack.c.bf16 %v3139_v11, %v3135_v58  ;;  %v9961_v48 = vpack.c.bf16 %v3162_v0, %v3158_v43  ;;  %v3166_v35 = vld [vmem:[#allocation11 + $0xb50] sm:$0xff]  ;;  %v3173_v57 = vld [vmem:[#allocation11 + $0xb88] sm:$0xff] }
 0x3ea   : > { %v3170_v30 = vld [vmem:[#allocation11 + $0xb70] sm:$0xff]  ;;  %v3177_v58 = vld [vmem:[#allocation11 + $0xba8] sm:$0xff]  ;;  %v3175_v11 = vld [vmem:[#allocation11 + $0xb98] sm:$0xff] }
 0x3eb   : > { %v3174_v24 = vld [vmem:[#allocation11 + $0xb90] sm:$0xff]  ;;  %v3004_v43 = vld [vmem:[#allocation3 + $0x50] sm:$0x3]  ;;  %v3007_v0 = vld [vmem:[#allocation3 + $0x68] sm:$0xfc] }
 0x3ec   : > { %9866 = vmatpush1.bf16.msra.mxu0 %v9865_v8  ;;  %9930 = vmatpush1.bf16.msra.mxu1 %v9929_v12  ;;  %v3147_v8 = vld [vmem:[#allocation11 + $0xab8] sm:$0xff]  ;;  %v9885_v12 = vpack.c.bf16 %v3136_v34, %v3132_v6  ;;  %v9965_v6 = vpack.c.bf16 %v3170_v30, %v3166_v35  ;;  %v3172_v34 = vld [vmem:[#allocation11 + $0xb80] sm:$0xff]  ;;  %v3182_v41 = vld [vmem:[#allocation11 + $0xbd0] sm:$0xff] }
 0x3ed   : > { %9868 = vmatprep.subr.bf16.mxu0 %v9867_v32  ;;  %9932 = vmatprep.subr.bf16.mxu1 %v9931_v33  ;;  %v3144_v32 = vld [vmem:[#allocation11 + $0xaa0] sm:$0xff]  ;;  %v9887_v33 = vpack.c.bf16 %v3145_v26, %v3141_v46  ;;  %v9951_v62 = vpack.c.bf16 %v3147_v8, %v3143_v7  ;;  %v3178_v46 = vld [vmem:[#allocation11 + $0xbb0] sm:$0xff]  ;;  %v3181_v26 = vld [vmem:[#allocation11 + $0xbc8] sm:$0xff] }
 0x3ee   : > { %v3185_v7 = vld [vmem:[#allocation11 + $0xbe8] sm:$0xff]  ;;  %v3183_v8 = vld [vmem:[#allocation11 + $0xbd8] sm:$0xff] }
 0x3ef   : > { %v2998_v59 = vld [vmem:[#allocation3 + $0x20] sm:$0xfc] }
 0x3f0   : > { %9870 = vmatpush1.bf16.msra.mxu0 %v9869_v37  ;;  %9934 = vmatpush1.bf16.msra.mxu1 %v9933_v63  ;;  %v3155_v37 = vld [vmem:[#allocation11 + $0xaf8] sm:$0xff]  ;;  %v9889_v63 = vpack.c.bf16 %v3144_v32, %v3140_v19  ;;  %v9969_v19 = vpack.c.bf16 %v3178_v46, %v3174_v24  ;;  %v3180_v32 = vld [vmem:[#allocation11 + $0xbc0] sm:$0xff] }
 0x3f1   : > { %9872 = vmatprep.subr.bf16.mxu0 %v9871_v15  ;;  %9936 = vmatprep.subr.bf16.mxu1 %v9935_v31  ;;  %v3152_v15 = vld [vmem:[#allocation11 + $0xae0] sm:$0xff]  ;;  %v9891_v31 = vpack.c.bf16 %v3153_v45, %v3149_v52  ;;  %v9955_v1 = vpack.c.bf16 %v3155_v37, %v3151_v20  ;;  %v3186_v52 = vld [vmem:[#allocation11 + $0xbf0] sm:$0xff]  ;;  %v9909_v37 = vpack.c.bf16 %v3184_v3, %v3180_v32 }
 0x3f2   : > { %v2994_v45 = vld [vmem:[#allocation3] sm:$0xfc]  ;;  %v2996_v20 = vld [vmem:[#allocation3 + $0x10] sm:$0x3]  ;;  %v3631_v32 = vld [vmem:[%s13255_s4 + $0x18] sm:$0xff] }
 0x3f3   : > { %v3660_v46 = vld [vmem:[%s13255_s4 + $0x100] sm:$0xff]  ;;  %v3679_v3 = vld [vmem:[%s13255_s4 + $0x198] sm:$0xff] }
 0x3f4   : > { %9874 = vmatpush1.bf16.msra.mxu0 %v9873_v54  ;;  %9938 = vmatpush1.bf16.msra.mxu1 %v9937_v51  ;;  %v3163_v54 = vld [vmem:[#allocation11 + $0xb38] sm:$0xff]  ;;  %v9893_v51 = vpack.c.bf16 %v3152_v15, %v3148_v28  ;;  %v3001_v28 = vld [vmem:[#allocation3 + $0x38] sm:$0x3]  ;;  %v3027_v15 = vrot.slane %v2994_v45, 2 }
 0x3f5   : > { %9876 = vmatprep.subr.bf16.mxu0 %v9875_v56  ;;  %9940 = vmatprep.subr.bf16.mxu1 %v9939_v14  ;;  %v3160_v56 = vld [vmem:[#allocation11 + $0xb20] sm:$0xff]  ;;  %v9895_v14 = vpack.c.bf16 %v3161_v25, %v3157_v60  ;;  %v9959_v42 = vpack.c.bf16 %v3163_v54, %v3159_v61  ;;  %v3037_v2 = vrot.slane %v3001_v28, 2  ;;  %v3005_v61 = vld [vmem:[#allocation3 + $0x58] sm:$0x3] }
 0x3f6   : > { %v3000_v60 = vld [vmem:[#allocation3 + $0x30] sm:$0x3]  ;;  %v3003_v25 = vld [vmem:[#allocation3 + $0x48] sm:$0xfc]  ;;  %v3663_v45 = vld [vmem:[%s13255_s4 + $0x118] sm:$0xff] }
 0x3f8   : > { %9878 = vmatpush1.bf16.msra.mxu0 %v9877_v29  ;;  %9942 = vmatpush1.bf16.msra.mxu1 %v9941_v44  ;;  %v3171_v29 = vld [vmem:[#allocation11 + $0xb78] sm:$0xff]  ;;  %v9897_v44 = vpack.c.bf16 %v3160_v56, %v3156_v39  ;;  %v3042_v56 = vrot.slane %v3003_v25, 2 }
 0x3f9   : > { %9880 = vmatprep.subr.bf16.mxu0 %v9879_v50  ;;  %9944 = vmatprep.subr.bf16.mxu1 %v9943_v4  ;;  %v3168_v50 = vld [vmem:[#allocation11 + $0xb60] sm:$0xff]  ;;  %v9899_v4 = vpack.c.bf16 %v3169_v55, %v3165_v13  ;;  %v9963_v9 = vpack.c.bf16 %v3171_v29, %v3167_v22  ;;  %v3009_v13 = vld [vmem:[#allocation3 + $0x78] sm:$0x3]  ;;  %v3040_v29 = vrot.slane %v3004_v43, 2 }
 0x3fa   : > { %v3665_v25 = vld [vmem:[%s13255_s4 + $0x128] sm:$0xff]  ;;  %v3683_v43 = vld [vmem:[%s13255_s4 + $0x1b8] sm:$0xff] }
 0x3fc   : > { %9882 = vmatpush1.bf16.msra.mxu0 %v9881_v36  ;;  %9946 = vmatpush1.bf16.msra.mxu1 %v9945_v5  ;;  %v3179_v36 = vld [vmem:[#allocation11 + $0xbb8] sm:$0xff]  ;;  %v9901_v5 = vpack.c.bf16 %v3168_v50, %v3164_v49  ;;  %v3049_v49 = vrot.slane %v3009_v13, 2 }
 0x3fd   : > { %9884 = vmatprep.subr.bf16.mxu0 %v9883_v16  ;;  %9948 = vmatprep.subr.bf16.mxu1 %v9947_v10  ;;  %v3176_v16 = vld [vmem:[#allocation11 + $0xba0] sm:$0xff]  ;;  %v9903_v10 = vpack.c.bf16 %v3177_v58, %v3173_v57  ;;  %v9967_v23 = vpack.c.bf16 %v3179_v36, %v3175_v11  ;;  %v3006_v50 = vld [vmem:[#allocation3 + $0x60] sm:$0xfc] }
 0x3fe   : > { %v3045_v35 = vrot.slane %v3006_v50, 2  ;;  %v3644_v11 = vld [vmem:[%s13255_s4 + $0x80] sm:$0xff]  ;;  %v3645_v36 = vld [vmem:[%s13255_s4 + $0x88] sm:$0xff] }
 0x3ff   : > { %v3637_v50 = vld [vmem:[%s13255_s4 + $0x48] sm:$0xff] }
 0x400   : > { %9886 = vmatpush1.bf16.msra.mxu0 %v9885_v12  ;;  %9950 = vmatpush1.bf16.msra.mxu1 %v9949_v40  ;;  %v3187_v12 = vld [vmem:[#allocation11 + $0xbf8] sm:$0xff]  ;;  %v9905_v40 = vpack.c.bf16 %v3176_v16, %v3172_v34 }
 0x401   : > { %9888 = vmatprep.subr.bf16.mxu0 %v9887_v33  ;;  %9952 = vmatprep.subr.bf16.mxu1 %v9951_v62  ;;  %v9907_v33 = vpack.c.bf16 %v3185_v7, %v3181_v26  ;;  %v9971_v62 = vpack.c.bf16 %v3187_v12, %v3183_v8  ;;  %v3629_v34 = vld [vmem:[%s13255_s4 + $0x8] sm:$0xff]  ;;  %v3646_v8 = vld [vmem:[%s13255_s4 + $0x90] sm:$0xff]  ;;  %v3647_v12 = vld [vmem:[%s13255_s4 + $0x98] sm:$0xff] }
 0x402   : > { %v3661_v26 = vld [vmem:[%s13255_s4 + $0x108] sm:$0xff] }
 0x403   : > { %v10009_v7 = vpack.c.bf16 %v3661_v26, %v3660_v46  ;;  %v3670_v26 = vld [vmem:[%s13255_s4 + $0x150] sm:$0xff] }
 0x404   : > { %9890 = vmatpush1.bf16.msra.mxu0 %v9889_v63  ;;  %9954 = vmatpush1.bf16.msra.mxu1 %v9953_v27  ;;  %v9973_v63 = vpack.c.bf16 %v3186_v52, %v3182_v41  ;;  %v2999_v27 = vld [vmem:[#allocation3 + $0x28] sm:$0xfc]  ;;  %v3662_v52 = vld [vmem:[%s13255_s4 + $0x110] sm:$0xff] }
 0x405   : > { %9892 = vmatprep.subr.bf16.mxu0 %v9891_v31  ;;  %9956 = vmatprep.subr.bf16.mxu1 %v9955_v1  ;;  %v3028_v31 = vrot.slane %v2996_v20, 2  ;;  %v3036_v1 = vrot.slane %v2999_v27, 2  ;;  %v10013_v20 = vpack.c.bf16 %v3663_v45, %v3662_v52  ;;  %v3632_v27 = vld [vmem:[%s13255_s4 + $0x20] sm:$0xff]  ;;  %v3659_v52 = vld [vmem:[%s13255_s4 + $0xf8] sm:$0xff] }
 0x407   : > { %v3029_v54 = vsel %vm3026_vm4, %v3027_v15, %v3028_v31  ;;  %v3038_v39 = vsel %vm3026_vm4, %v3036_v1, %v3037_v2  ;;  %v3633_v15 = vld [vmem:[%s13255_s4 + $0x28] sm:$0xff]  ;;  %v3680_v31 = vld [vmem:[%s13255_s4 + $0x1a0] sm:$0xff] }
 0x408   : > { %9894 = vmatpush1.bf16.msra.mxu0 %v9893_v51  ;;  %9958 = vmatpush1.bf16.msra.mxu1 %v9957_v38  ;;  %v3033_v51 = vrot.slane %v2998_v59, 2  ;;  %v3034_v38 = vrot.slane %v3000_v60, 2  ;;  %v3681_v1 = vld [vmem:[%s13255_s4 + $0x1a8] sm:$0xff]  ;;  %v9985_v2 = vpack.c.bf16 %v3633_v15, %v3632_v27  ;;  %v3664_v60 = vld [vmem:[%s13255_s4 + $0x120] sm:$0xff]  ;;  %v3690_v27 = vld [vmem:[%s13255_s4 + $0x1f0] sm:$0xff] }
 0x409   : > { %9896 = vmatprep.subr.bf16.mxu0 %v9895_v14  ;;  %9960 = vmatprep.subr.bf16.mxu1 %v9959_v42  ;;  %v3043_v14 = vrot.slane %v3005_v61, 2  ;;  %v3002_v42 = vld [vmem:[#allocation3 + $0x40] sm:$0xfc]  ;;  %v10015_v59 = vpack.c.bf16 %v3681_v1, %v3680_v31  ;;  %v3650_v61 = vld [vmem:[%s13255_s4 + $0xb0] sm:$0xff]  ;;  %v3643_v1 = vld [vmem:[%s13255_s4 + $0x78] sm:$0xff] }
 0x40a   : > { %v3035_v55 = vsel %vm3026_vm4, %v3033_v51, %v3034_v38  ;;  %v3039_v22 = vrot.slane %v3002_v42, 2  ;;  %v3651_v51 = vld [vmem:[%s13255_s4 + $0xb8] sm:$0xff]  ;;  %v3634_v38 = vld [vmem:[%s13255_s4 + $0x30] sm:$0xff] }
 0x40b   : > { %v3682_v42 = vld [vmem:[%s13255_s4 + $0x1b0] sm:$0xff] }
 0x40c   : > { %9898 = vmatpush1.bf16.msra.mxu0 %v9897_v44  ;;  %9962 = vmatpush1.bf16.msra.mxu1 %v9961_v48  ;;  %v3044_v44 = vsel %vm3026_vm4, %v3042_v56, %v3043_v14  ;;  %v3048_v48 = vrot.slane %v3007_v0, 2  ;;  %v9987_v56 = vpack.c.bf16 %v3651_v51, %v3650_v61  ;;  %v3666_v0 = vld [vmem:[%s13255_s4 + $0x130] sm:$0xff]  ;;  %v10019_v13 = vpack.c.bf16 %v3683_v43, %v3682_v42 }
 0x40d   : > { %9900 = vmatprep.subr.bf16.mxu0 %v9899_v4  ;;  %9964 = vmatprep.subr.bf16.mxu1 %v9963_v9  ;;  %v3008_v4 = vld [vmem:[#allocation3 + $0x70] sm:$0x3]  ;;  %v3041_v9 = vsel %vm3026_vm4, %v3039_v22, %v3040_v29  ;;  %v3652_v22 = vld [vmem:[%s13255_s4 + $0xc0] sm:$0xff]  ;;  %v3653_v29 = vld [vmem:[%s13255_s4 + $0xc8] sm:$0xff] }
 0x40e   : > { %v3046_v30 = vrot.slane %v3008_v4, 2  ;;  %v3050_v57 = vsel %vm3026_vm4, %v3048_v48, %v3049_v49  ;;  %v9991_v48 = vpack.c.bf16 %v3653_v29, %v3652_v22  ;;  %v3636_v49 = vld [vmem:[%s13255_s4 + $0x40] sm:$0xff]  ;;  %v3642_v31 = vld [vmem:[%s13255_s4 + $0x70] sm:$0xff]  ;;  %v13257_v29 = vsub.s32 3, %v12056_v17 }
 0x40f   : > { %v3684_v4 = vld [vmem:[%s13255_s4 + $0x1c0] sm:$0xff]  ;;  %v3674_v61 = vld [vmem:[%s13255_s4 + $0x170] sm:$0xff]  ;;  %v10005_v51 = vpack.c.bf16 %v3643_v1, %v3642_v31 }
 0x410   : > { %9902 = vmatpush1.bf16.msra.mxu0 %v9901_v5  ;;  %9966 = vmatpush1.bf16.msra.mxu1 %v9965_v6  ;;  %v3047_v58 = vsel %vm3026_vm4, %v3045_v35, %v3046_v30  ;;  %v9975_v5 = vpack.c.bf16 %v3645_v36, %v3644_v11  ;;  %v3628_v6 = vld [vmem:[%s13255_s4] sm:$0xff]  ;;  %v3669_v30 = vld [vmem:[%s13255_s4 + $0x148] sm:$0xff]  ;;  %v3654_v11 = vld [vmem:[%s13255_s4 + $0xd0] sm:$0xff] }
 0x411   : > { %9904 = vmatprep.subr.bf16.mxu0 %v9903_v10  ;;  %9968 = vmatprep.subr.bf16.mxu1 %v9967_v23  ;;  %v9977_v16 = vpack.c.bf16 %v3629_v34, %v3628_v6  ;;  %v3676_v10 = vld [vmem:[%s13255_s4 + $0x180] sm:$0xff]  ;;  %v3677_v23 = vld [vmem:[%s13255_s4 + $0x188] sm:$0xff]  ;;  %v3655_v36 = vld [vmem:[%s13255_s4 + $0xd8] sm:$0xff] }
 0x412   : > { %v10007_v24 = vpack.c.bf16 %v3677_v23, %v3676_v10  ;;  %v3668_v35 = vld [vmem:[%s13255_s4 + $0x140] sm:$0xff]  ;;  %v9995_v6 = vpack.c.bf16 %v3655_v36, %v3654_v11  ;;  %v3639_v34 = vld [vmem:[%s13255_s4 + $0x58] sm:$0xff]  ;;  %v3382_v43 = vld [vmem:[#allocation13] sm:$0xf] }
 0x413   : > { %v3687_v10 = vld [vmem:[%s13255_s4 + $0x1d8] sm:$0xff]  ;;  %v10025_v23 = vpack.c.bf16 %v3669_v30, %v3668_v35  ;;  %v12446_v22 = vrot.slane %v3382_v43, %v12063_v21 }
 0x414   : > { %9906 = vmatpush1.bf16.msra.mxu0 %v9905_v40  ;;  %9970 = vmatpush1.bf16.msra.mxu1 %v9969_v19  ;;  %v9979_v40 = vpack.c.bf16 %v3647_v12, %v3646_v8  ;;  %v3630_v19 = vld [vmem:[%s13255_s4 + $0x10] sm:$0xff]  ;;  %v3657_v8 = vld [vmem:[%s13255_s4 + $0xe8] sm:$0xff] }
 0x415   : > { %9908 = vmatprep.subr.bf16.mxu0 %v9907_v33  ;;  %9972 = vmatprep.subr.bf16.mxu1 %v9971_v62  ;;  %v9981_v33 = vpack.c.bf16 %v3631_v32, %v3630_v19  ;;  %v3678_v62 = vld [vmem:[%s13255_s4 + $0x190] sm:$0xff]  ;;  %v3689_v19 = vld [vmem:[%s13255_s4 + $0x1e8] sm:$0xff] }
 0x416   : > { %v10011_v41 = vpack.c.bf16 %v3679_v3, %v3678_v62  ;;  %v3641_v62 = vld [vmem:[%s13255_s4 + $0x68] sm:$0xff] }
 0x418   : > { %9910 = vmatpush1.bf16.msra.mxu0 %v9909_v37  ;;  %9974 = vmatpush1.bf16.msra.mxu1 %v9973_v63  ;;  %v3648_v37 = vld [vmem:[%s13255_s4 + $0xa0] sm:$0xff]  ;;  %v3649_v63 = vld [vmem:[%s13255_s4 + $0xa8] sm:$0xff] }
 0x419   : > { %9976 = vmatprep.subr.bf16.mxu0 %v9975_v5  ;;  %10008 = vmatprep.subr.bf16.mxu1 %v10007_v24  ;;  %v9983_v28 = vpack.c.bf16 %v3649_v63, %v3648_v37  ;;  %v3638_v5 = vld [vmem:[%s13255_s4 + $0x50] sm:$0xff]  ;;  %v3656_v24 = vld [vmem:[%s13255_s4 + $0xe0] sm:$0xff]  ;;  %v3673_v37 = vld [vmem:[%s13255_s4 + $0x168] sm:$0xff] }
 0x41a   : > { %v9997_v12 = vpack.c.bf16 %v3639_v34, %v3638_v5  ;;  %v9999_v32 = vpack.c.bf16 %v3657_v8, %v3656_v24 }
 0x41b   : > { %3253 = vmatmul.mubr.f32.vlgmr.msra.gmra.mrb[16].mxu0 %v3029_v54  ;;  %3342 = vmatmul.mubr.f32.vlgmr.msra.gmra.mrb[16].mxu1 %v3029_v54  ;;  %v10017_v54 = vpack.c.bf16 %v3665_v25, %v3664_v60  ;;  %v3709_v60 = vld [vmem:[%s13255_s4 + $0x288] sm:$0xff] }
 0x41c   : > { %3258 = vmatprep.mubr.f32.mxu0 %v3038_v39  ;;  %3347 = vmatprep.mubr.f32.mxu1 %v3038_v39  ;;  %v3635_v39 = vld [vmem:[%s13255_s4 + $0x38] sm:$0xff] }
 0x41d   : > { %9978 = vmatpush3.bf16.msra.mxu0 %v9977_v16  ;;  %10010 = vmatpush3.bf16.msra.mxu1 %v10009_v7  ;;  %v9989_v14 = vpack.c.bf16 %v3635_v39, %v3634_v38  ;;  %v3686_v16 = vld [vmem:[%s13255_s4 + $0x1d0] sm:$0xff]  ;;  %v3671_v7 = vld [vmem:[%s13255_s4 + $0x158] sm:$0xff]  ;;  %v3740_v38 = vld [vmem:[%s13255_s4 + $0x380] sm:$0xff] }
 0x41e   : > { %9980 = vmatprep.subr.bf16.mxu0 %v9979_v40  ;;  %10012 = vmatprep.subr.bf16.mxu1 %v10011_v41  ;;  %v10027_v46 = vpack.c.bf16 %v3687_v10, %v3686_v16  ;;  %v3688_v40 = vld [vmem:[%s13255_s4 + $0x1e0] sm:$0xff]  ;;  %v10029_v3 = vpack.c.bf16 %v3671_v7, %v3670_v26  ;;  %v3658_v41 = vld [vmem:[%s13255_s4 + $0xf0] sm:$0xff]  ;;  %v3741_v39 = vld [vmem:[%s13255_s4 + $0x388] sm:$0xff] }
 0x41f   : > { %3259 = vmatmul.mubr.f32.gmra.mrb[18].mxu0 %v3035_v55  ;;  %3348 = vmatmul.mubr.f32.gmra.mrb[18].mxu1 %v3035_v55  ;;  %v3667_v55 = vld [vmem:[%s13255_s4 + $0x138] sm:$0xff]  ;;  %v10031_v45 = vpack.c.bf16 %v3689_v19, %v3688_v40  ;;  %v10003_v15 = vpack.c.bf16 %v3659_v52, %v3658_v41  ;;  %v10071_v42 = vpack.c.bf16 %v3741_v39, %v3740_v38  ;;  %v11273_v19 = vmov 1935823168  }
 0x420   : > { %3264 = vmatprep.mubr.f32.mxu0 %v3044_v44  ;;  %3353 = vmatprep.mubr.f32.mxu1 %v3044_v44  ;;  %v10021_v44 = vpack.c.bf16 %v3667_v55, %v3666_v0  ;;  %v3387_v0 = vrot.slane %v3382_v43, %v12059_v18 }
 0x421   : > { %9982 = vmatpush3.bf16.msra.mxu0 %v9981_v33  ;;  %10014 = vmatpush3.bf16.msra.mxu1 %v10013_v20  ;;  %v3640_v33 = vld [vmem:[%s13255_s4 + $0x60] sm:$0xff] }
 0x422   : > { %9984 = vmatprep.subr.bf16.mxu0 %v9983_v28  ;;  %10016 = vmatprep.subr.bf16.mxu1 %v10015_v59  ;;  %v3672_v20 = vld [vmem:[%s13255_s4 + $0x160] sm:$0xff]  ;;  %v10001_v63 = vpack.c.bf16 %v3641_v62, %v3640_v33  ;;  %v3691_v28 = vld [vmem:[%s13255_s4 + $0x1f8] sm:$0xff] }
 0x423   : > { %3265 = vmatmul.mubr.f32.gmra.mrb[20].mxu0 %v3041_v9  ;;  %3354 = vmatmul.mubr.f32.gmra.mrb[20].mxu1 %v3041_v9  ;;  %v3685_v9 = vld [vmem:[%s13255_s4 + $0x1c8] sm:$0xff]  ;;  %v3708_v59 = vld [vmem:[%s13255_s4 + $0x280] sm:$0xff]  ;;  %v10035_v25 = vpack.c.bf16 %v3691_v28, %v3690_v27 }
 0x424   : > { %3270 = vmatprep.mubr.f32.mxu0 %v3050_v57  ;;  %3359 = vmatprep.mubr.f32.mxu1 %v3050_v57  ;;  %v9993_v57 = vpack.c.bf16 %v3637_v50, %v3636_v49 }
 0x425   : > { %9986 = vmatpush3.bf16.msra.mxu0 %v9985_v2  ;;  %10018 = vmatpush3.bf16.msra.mxu1 %v10017_v54  ;;  %v10033_v2 = vpack.c.bf16 %v3673_v37, %v3672_v20  ;;  %v3675_v54 = vld [vmem:[%s13255_s4 + $0x178] sm:$0xff] }
 0x426   : > { %9988 = vmatprep.subr.bf16.mxu0 %v9987_v56  ;;  %10020 = vmatprep.subr.bf16.mxu1 %v10019_v13  ;;  %v10039_v56 = vpack.c.bf16 %v3709_v60, %v3708_v59  ;;  %v13256_v13 = vsub.s32 2, %v12056_v17 }
 0x427   : > { %3271 = vmatmul.mubr.f32.gmra.mrb[22].mxu0 %v3047_v58  ;;  %3360 = vmatmul.mubr.f32.gmra.mrb[22].mxu1 %v3047_v58  ;;  %v10023_v58 = vpack.c.bf16 %v3685_v9, %v3684_v4 }
 0x428   : > { %v12443_v55 = vrot.slane %v3382_v43, %v13256_v13 }
 0x429   : > { %9990 = vmatpush3.bf16.msra.mxu0 %v9989_v14  ;;  %10022 = vmatpush3.bf16.msra.mxu1 %v10021_v44  ;;  %v10037_v14 = vpack.c.bf16 %v3675_v54, %v3674_v61  ;;  %v12450_v44 = vrot.slane %v3382_v43, %v13257_v29 }
 0x42a   : > { %9992 = vmatprep.subr.bf16.mxu0 %v9991_v48  ;;  %10024 = vmatprep.subr.bf16.mxu1 %v10023_v58 }
 0x42d   : > { %9994 = vmatpush3.bf16.msra.mxu0 %v9993_v57  ;;  %10026 = vmatpush3.bf16.msra.mxu1 %v10025_v23 }
 0x42e   : > { %9996 = vmatprep.subr.bf16.mxu0 %v9995_v6  ;;  %10028 = vmatprep.subr.bf16.mxu1 %v10027_v46 }
 0x431   : > { %9998 = vmatpush3.bf16.msra.mxu0 %v9997_v12  ;;  %10030 = vmatpush3.bf16.msra.mxu1 %v10029_v3 }
 0x432   : > { %10000 = vmatprep.subr.bf16.mxu0 %v9999_v32  ;;  %10032 = vmatprep.subr.bf16.mxu1 %v10031_v45  ;;  %v3601_v32 = vunpack.c.l.s4 %v11273_v19 }
 0x434   : > { %v3602_v61 = vunpack.c.0.s8 %v3601_v32 }
 0x435   : > { %10002 = vmatpush3.bf16.msra.mxu0 %v10001_v63  ;;  %10034 = vmatpush3.bf16.msra.mxu1 %v10033_v2 }
 0x436   : > { %10004 = vmatprep.subr.bf16.mxu0 %v10003_v15  ;;  %10036 = vmatprep.subr.bf16.mxu1 %v10035_v25  ;;  %v3605_v19 = vsub.s32 %v3602_v61, %v12056_v17 }
 0x439   : > { %10006 = vmatpush3.bf16.msra.mxu0 %v10005_v51  ;;  %10038 = vmatpush3.bf16.msra.mxu1 %v10037_v14 }
 0x43a   : > { %10040 = vmatprep.subr.bf16.mxu0 %v10039_v56  ;;  %10072 = vmatprep.subr.bf16.mxu1 %v10071_v42 }
 0x4ee   : > { %v3254_v48 = vpop.f32.mrb[16].mxu0  ;;  %v3343_v49 = vpop.f32.mrb[16].mxu1 }
 0x4ef   : > { %v3404_v50 = vadd.f32 %v3387_v0, %v3254_v48  ;;  %v3406_v4 = vadd.f32 %v12443_v55, %v3343_v49  ;;  %v3256_v9 = vpop.f32.mrb[17].mxu0  ;;  %v3345_v35 = vpop.f32.mrb[17].mxu1 }
 0x4f0   : > { %v3405_v30 = vadd.f32 %v12446_v22, %v3256_v9  ;;  %v3407_v57 = vadd.f32 %v12450_v44, %v3345_v35 }
 0x4f1   : > { %v3420_v58 = vmax.f32 %v3404_v50, 0.0  ;;  %v3422_v11 = vmax.f32 %v3406_v4, 0.0 }
 0x4f2   : > { %v3421_v36 = vmax.f32 %v3405_v30, 0.0  ;;  %v3423_v5 = vmax.f32 %v3407_v57, 0.0  ;;  %v3260_v6 = vpop.f32.mrb[18].mxu0  ;;  %v3349_v34 = vpop.f32.mrb[18].mxu1 }
 0x4f3   : > { %v3436_v16 = vmax.f32 %v3420_v58, %v3422_v11  ;;  %v3408_v10 = vadd.f32 %v3387_v0, %v3260_v6  ;;  %v3410_v23 = vadd.f32 %v12443_v55, %v3349_v34  ;;  %v3262_v24 = vpop.f32.mrb[19].mxu0  ;;  %v3351_v46 = vpop.f32.mrb[19].mxu1 }
 0x4f4   : > { %v3437_v26 = vmax.f32 %v3421_v36, %v3423_v5  ;;  %v3409_v7 = vadd.f32 %v12446_v22, %v3262_v24  ;;  %v3411_v8 = vadd.f32 %v12450_v44, %v3351_v46 }
 0x4f5   : > { %v3424_v12 = vmax.f32 %v3408_v10, 0.0  ;;  %v3426_v40 = vmax.f32 %v3410_v23, 0.0 }
 0x4f6   : > { %v3452_v33 = vcombine.low %v3436_v16, %v3437_v26  ;;  %v3453_v62 = vcombine.high %v3436_v16, %v3437_v26  ;;  %v3425_v3 = vmax.f32 %v3409_v7, 0.0  ;;  %v3427_v41 = vmax.f32 %v3411_v8, 0.0  ;;  %v3266_v52 = vpop.f32.mrb[20].mxu0  ;;  %v3355_v45 = vpop.f32.mrb[20].mxu1 }
 0x4f7   : > { %v3438_v20 = vmax.f32 %v3424_v12, %v3426_v40  ;;  %v3412_v37 = vadd.f32 %v3387_v0, %v3266_v52  ;;  %v3414_v63 = vadd.f32 %v12443_v55, %v3355_v45  ;;  %v3268_v27 = vpop.f32.mrb[21].mxu0  ;;  %v3357_v28 = vpop.f32.mrb[21].mxu1 }
 0x4f8   : > { %v3474_v15 = vrot.slane %v3452_v33, %v12095_v47  ;;  %v3481_v31 = vrot.slane %v3453_v62, %v12095_v47  ;;  %v3439_v1 = vmax.f32 %v3425_v3, %v3427_v41  ;;  %v3413_v2 = vadd.f32 %v12446_v22, %v3268_v27 }
 0x4f9   : > { %v3428_v59 = vmax.f32 %v3412_v37, 0.0  ;;  %v3430_v60 = vmax.f32 %v3414_v63, 0.0  ;;  %v3415_v25 = vadd.f32 %v12450_v44, %v3357_v28 }
 0x4fa   : > { %v3532_v54 = vrot.slane %v3474_v15, 4  ;;  %v3533_v51 = vrot.slane %v3481_v31, 4  ;;  %v3454_v38 = vcombine.low %v3438_v20, %v3439_v1  ;;  %v3455_v39 = vcombine.high %v3438_v20, %v3439_v1  ;;  %v3272_v56 = vpop.f32.mrb[22].mxu0  ;;  %v3361_v14 = vpop.f32.mrb[22].mxu1 }
 0x4fb   : > { %v3440_v42 = vmax.f32 %v3428_v59, %v3430_v60  ;;  %v3429_v43 = vmax.f32 %v3413_v2, 0.0  ;;  %v3431_v13 = vmax.f32 %v3415_v25, 0.0  ;;  %v3416_v29 = vadd.f32 %v3387_v0, %v3272_v56  ;;  %v3274_v48 = vpop.f32.mrb[23].mxu0  ;;  %v3363_v49 = vpop.f32.mrb[23].mxu1 }
 0x4fc   : > { %v3548_v50 = vmax.f32 %v3474_v15, %v3532_v54  ;;  %v3549_v4 = vmax.f32 %v3481_v31, %v3533_v51  ;;  %v3488_v9 = vrot.slane %v3454_v38, %v12095_v47  ;;  %v3495_v35 = vrot.slane %v3455_v39, %v12095_v47 }
 0x4fd   : > { %v3441_v30 = vmax.f32 %v3429_v43, %v3431_v13  ;;  %v3432_v57 = vmax.f32 %v3416_v29, 0.0  ;;  %v3418_v58 = vadd.f32 %v12443_v55, %v3361_v14  ;;  %v3417_v11 = vadd.f32 %v12446_v22, %v3274_v48  ;;  %v3692_v13 = vld [vmem:[%s13255_s4 + $0x200] sm:$0xff] }
 0x4fe   : > { %v3564_v36 = vcombine.low %v3548_v50, %v3549_v4  ;;  %v3534_v5 = vrot.slane %v3488_v9, 4  ;;  %v3535_v6 = vrot.slane %v3495_v35, 4  ;;  %v3419_v34 = vadd.f32 %v12450_v44, %v3363_v49  ;;  %v3724_v50 = vld [vmem:[%s13255_s4 + $0x300] sm:$0xff] }
 0x4ff   : > { %v3456_v0 = vcombine.low %v3440_v42, %v3441_v30  ;;  %v3457_v16 = vcombine.high %v3440_v42, %v3441_v30  ;;  %v3434_v10 = vmax.f32 %v3418_v58, 0.0  ;;  %v3433_v23 = vmax.f32 %v3417_v11, 0.0  ;;  %v3711_v30 = vld [vmem:[%s13255_s4 + $0x298] sm:$0xff] }
 0x500   : > { %v3550_v24 = vmax.f32 %v3488_v9, %v3534_v5  ;;  %v3551_v46 = vmax.f32 %v3495_v35, %v3535_v6  ;;  %v3435_v26 = vmax.f32 %v3419_v34, 0.0  ;;  %v3571_v55 = vrot.slane %v3564_v36, %v12104_v53  ;;  %v3725_v9 = vld [vmem:[%s13255_s4 + $0x308] sm:$0xff]  ;;  %v3710_v35 = vld [vmem:[%s13255_s4 + $0x290] sm:$0xff]  ;;  %v3743_v5 = vld [vmem:[%s13255_s4 + $0x398] sm:$0xff] }
 0x501   : > { %v3502_v7 = vrot.slane %v3456_v0, %v12095_v47  ;;  %v3509_v8 = vrot.slane %v3457_v16, %v12095_v47  ;;  %v3442_v12 = vmax.f32 %v3432_v57, %v3434_v10  ;;  %v3742_v36 = vld [vmem:[%s13255_s4 + $0x390] sm:$0xff]  ;;  %v3695_v0 = vld [vmem:[%s13255_s4 + $0x218] sm:$0xff] }
 0x502   : > { %v3572_v22 = vcombine.low %v3550_v24, %v3551_v46  ;;  %v3443_v40 = vmax.f32 %v3433_v23, %v3435_v26  ;;  %v3606_v37 = vrot.slane %v3571_v55, %v3605_v19  ;;  %v3694_v34 = vld [vmem:[%s13255_s4 + $0x210] sm:$0xff]  ;;  %v10073_v23 = vpack.c.bf16 %v3725_v9, %v3724_v50  ;;  %v3712_v46 = vld [vmem:[%s13255_s4 + $0x2a0] sm:$0xff]  ;;  %v3713_v26 = vld [vmem:[%s13255_s4 + $0x2a8] sm:$0xff] }
 0x503   : > { %v3536_v32 = vrot.slane %v3502_v7, 4  ;;  %v3537_v44 = vrot.slane %v3509_v8, 4  ;;  %v10043_v24 = vpack.c.bf16 %v3711_v30, %v3710_v35  ;;  %v10045_v55 = vpack.c.bf16 %v3695_v0, %v3694_v34  ;;  %v3733_v50 = vld [vmem:[%s13255_s4 + $0x348] sm:$0xff]  ;;  %v3750_v35 = vld [vmem:[%s13255_s4 + $0x3d0] sm:$0xff]  ;;  %v3751_v30 = vld [vmem:[%s13255_s4 + $0x3d8] sm:$0xff] }
 0x504   : > { %v3579_v33 = vrot.slane %v3572_v22, %v12104_v53  ;;  %v3458_v62 = vcombine.low %v3442_v12, %v3443_v40  ;;  %v3459_v3 = vcombine.high %v3442_v12, %v3443_v40  ;;  %v3727_v12 = vld [vmem:[%s13255_s4 + $0x318] sm:$0xff]  ;;  %v3744_v22 = vld [vmem:[%s13255_s4 + $0x3a0] sm:$0xff]  ;;  %v3745_v40 = vld [vmem:[%s13255_s4 + $0x3a8] sm:$0xff]  ;;  %v10091_v34 = vpack.c.bf16 %v3751_v30, %v3750_v35 }
 0x505   : > { %v3552_v41 = vmax.f32 %v3502_v7, %v3536_v32  ;;  %v3553_v52 = vmax.f32 %v3509_v8, %v3537_v44  ;;  %v10075_v7 = vpack.c.bf16 %v3743_v5, %v3742_v36  ;;  %v3726_v8 = vld [vmem:[%s13255_s4 + $0x310] sm:$0xff]  ;;  %v10047_v32 = vpack.c.bf16 %v3713_v26, %v3712_v46  ;;  %v3696_v44 = vld [vmem:[%s13255_s4 + $0x220] sm:$0xff] }
 0x506   : > { %v3516_v45 = vrot.slane %v3458_v62, %v12095_v47  ;;  %v3523_v20 = vrot.slane %v3459_v3, %v12095_v47  ;;  %v3613_v63 = vrot.slane %v3579_v33, %v3605_v19  ;;  %v3697_v33 = vld [vmem:[%s13255_s4 + $0x228] sm:$0xff]  ;;  %v10077_v62 = vpack.c.bf16 %v3727_v12, %v3726_v8  ;;  %v3714_v3 = vld [vmem:[%s13255_s4 + $0x2b0] sm:$0xff]  ;;  %v3720_v5 = vld [vmem:[%s13255_s4 + $0x2e0] sm:$0xff] }
 0x507   : > { %v3580_v27 = vcombine.low %v3552_v41, %v3553_v52  ;;  %v3715_v41 = vld [vmem:[%s13255_s4 + $0x2b8] sm:$0xff]  ;;  %v10079_v52 = vpack.c.bf16 %v3745_v40, %v3744_v22  ;;  %v3734_v0 = vld [vmem:[%s13255_s4 + $0x350] sm:$0xff]  ;;  %v3704_v26 = vld [vmem:[%s13255_s4 + $0x260] sm:$0xff]  ;;  %v11274_v35 = vmov (!%p8866_p2), 0.0  }
 0x508   : > { %v3538_v28 = vrot.slane %v3516_v45, 4  ;;  %v3539_v15 = vrot.slane %v3523_v20, 4  ;;  %v3767_v31 = vcombine.low %v3606_v37, %v3613_v63  ;;  %v3768_v1 = vcombine.high %v3606_v37, %v3613_v63  ;;  %v3746_v63 = vld [vmem:[%s13255_s4 + $0x3b0] sm:$0xff]  ;;  %v3736_v40 = vld [vmem:[%s13255_s4 + $0x360] sm:$0xff] }
 0x509   : > { %v3587_v60 = vrot.slane %v3580_v27, %v12104_v53  ;;  %v10049_v37 = vpack.c.bf16 %v3697_v33, %v3696_v44  ;;  %v3747_v27 = vld [vmem:[%s13255_s4 + $0x3b8] sm:$0xff]  ;;  %v3722_v12 = vld [vmem:[%s13255_s4 + $0x2f0] sm:$0xff] }
 0x50a   : > { %v3554_v2 = vmax.f32 %v3516_v45, %v3538_v28  ;;  %v3555_v59 = vmax.f32 %v3523_v20, %v3539_v15  ;;  %v3777_v56 = vrot.slane %v3767_v31, %v12095_v47  ;;  %v12480_v42 = vrot.slane %v3768_v1, %v12095_v47  ;;  %v3728_v45 = vld [vmem:[%s13255_s4 + $0x320] sm:$0xff]  ;;  %v3729_v20 = vld [vmem:[%s13255_s4 + $0x328] sm:$0xff]  ;;  %v3698_v15 = vld [vmem:[%s13255_s4 + $0x230] sm:$0xff] }
 0x50b   : > { %v3620_v54 = vrot.slane %v3587_v60, %v3605_v19  ;;  %v10051_v28 = vpack.c.bf16 %v3715_v41, %v3714_v3  ;;  %v3699_v31 = vld [vmem:[%s13255_s4 + $0x238] sm:$0xff]  ;;  %v10081_v1 = vpack.c.bf16 %v3729_v20, %v3728_v45  ;;  %v10083_v60 = vpack.c.bf16 %v3747_v27, %v3746_v63  ;;  %v3754_v44 = vld [vmem:[%s13255_s4 + $0x3f0] sm:$0xff] }
 0x50c   : > { %v3588_v25 = vcombine.low %v3554_v2, %v3555_v59  ;;  %v3716_v2 = vld [vmem:[%s13255_s4 + $0x2c0] sm:$0xff]  ;;  %v3717_v59 = vld [vmem:[%s13255_s4 + $0x2c8] sm:$0xff]  ;;  %v3755_v33 = vld [vmem:[%s13255_s4 + $0x3f8] sm:$0xff] }
 0x50d   : > { %v3706_v3 = vld [vmem:[%s13255_s4 + $0x270] sm:$0xff]  ;;  %v3707_v41 = vld [vmem:[%s13255_s4 + $0x278] sm:$0xff]  ;;  %v10099_v45 = vpack.c.bf16 %v3755_v33, %v3754_v44 }
 0x50e   : > { %v3595_v61 = vrot.slane %v3588_v25, %v12104_v53  ;;  %v3693_v53 = vld [vmem:[%s13255_s4 + $0x208] sm:$0xff]  ;;  %v3730_v25 = vld [vmem:[%s13255_s4 + $0x330] sm:$0xff]  ;;  %v10069_v63 = vpack.c.bf16 %v3707_v41, %v3706_v3 }
 0x50f   : > { %v10041_v11 = vpack.c.bf16 %v3693_v53, %v3692_v13  ;;  %v3718_v53 = vld [vmem:[%s13255_s4 + $0x2d0] sm:$0xff] }
 0x510   : > { %v3627_v51 = vrot.slane %v3595_v61, %v3605_v19  ;;  %v3731_v61 = vld [vmem:[%s13255_s4 + $0x338] sm:$0xff]  ;;  %v3738_v20 = vld [vmem:[%s13255_s4 + $0x370] sm:$0xff] }
 0x511   : > { %v10085_v13 = vpack.c.bf16 %v3731_v61, %v3730_v25 }
 0x512   : > { %v3769_v38 = vcombine.low %v3620_v54, %v3627_v51  ;;  %v3770_v39 = vcombine.high %v3620_v54, %v3627_v51  ;;  %v10053_v54 = vpack.c.bf16 %v3699_v31, %v3698_v15  ;;  %v3748_v51 = vld [vmem:[%s13255_s4 + $0x3c0] sm:$0xff] }
 0x514   : > { %v3791_v14 = vrot.slane %v3769_v38, %v12095_v47  ;;  %v12483_v43 = vrot.slane %v3770_v39, %v12095_v47  ;;  %v3749_v38 = vld [vmem:[%s13255_s4 + $0x3c8] sm:$0xff]  ;;  %v10055_v39 = vpack.c.bf16 %v3717_v59, %v3716_v2 }
 0x516   : > { %v3799_v29 = vcombine.low %v3777_v56, %v3791_v14  ;;  %v3800_v48 = vcombine.high %v3777_v56, %v3791_v14  ;;  %v3802_v49 = vcombine.high %v12480_v42, %v12483_v43  ;;  %v3801_v4 = vcombine.low %v12480_v42, %v12483_v43  ;;  %v3700_v56 = vld [vmem:[%s13255_s4 + $0x240] sm:$0xff]  ;;  %v3701_v14 = vld [vmem:[%s13255_s4 + $0x248] sm:$0xff] }
 0x517   : > { %v10057_v9 = vpack.c.bf16 %v3701_v14, %v3700_v56 }
 0x518   : > { %v3823_v57 = vrot.slane %v3800_v48, %v12095_v47  ;;  %v3809_v58 = vrot.slane %v3799_v29, %v12095_v47  ;;  %v3830_v6 = vrot.slane %v3802_v49, %v12095_v47  ;;  %v3719_v29 = vld [vmem:[%s13255_s4 + $0x2d8] sm:$0xff]  ;;  %v10087_v48 = vpack.c.bf16 %v3749_v38, %v3748_v51  ;;  %v3732_v49 = vld [vmem:[%s13255_s4 + $0x340] sm:$0xff] }
 0x519   : > { %v10089_v36 = vpack.c.bf16 %v3733_v50, %v3732_v49  ;;  %v4135_v49 = vld [vmem:[#allocation16 + $0x10] sm:$0xff] (!%p8866_p2)  ;;  %v4138_v50 = vld [vmem:[#allocation16 + $0x28] sm:$0xff] (!%p8866_p2) }
 0x51a   : > { %3907 = vmatprep.mubr.f32.mxu0 %v3823_v57  ;;  %v3833_v16 = vcombine.high %v3823_v57, %v3823_v57  ;;  %v3831_v10 = vcombine.high %v3809_v58, %v3809_v58  ;;  %v3834_v19 = vcombine.high %v3830_v6, %v3830_v6  ;;  %v10059_v57 = vpack.c.bf16 %v3719_v29, %v3718_v53  ;;  %v4136_v53 = vld [vmem:[#allocation16 + $0x18] sm:$0xff] (!%p8866_p2)  ;;  %v4133_v29 = vld [vmem:[#allocation16] sm:$0xff] (!%p8866_p2) }
 0x51b   : > { %3908 = vmatmul.mubr.f32.vlgmr.msra.gmra.mrb[24].mxu0 %v3809_v58  ;;  %v3702_v58 = vld [vmem:[%s13255_s4 + $0x250] sm:$0xff]  ;;  %v10105_v30 = vpack.c.bf16 (!%p8866_p2), %v4135_v49, %v4133_v29 }
 0x51c   : > { %10042 = vmatpush3.bf16.msra.mxu0 %v10041_v11  ;;  %3977 = vmatprep.mubr.f32.mxu1 %v3833_v16  ;;  %v3703_v11 = vld [vmem:[%s13255_s4 + $0x258] sm:$0xff] }
 0x51d   : > { %4047 = vmatprep.mubr.f32.mxu0 %v3830_v6  ;;  %3978 = vmatmul.mubr.f32.vlgmr.msra.gmra.mrb[24].mxu1 %v3831_v10  ;;  %v3721_v6 = vld [vmem:[%s13255_s4 + $0x2e8] sm:$0xff]  ;;  %v3735_v16 = vld [vmem:[%s13255_s4 + $0x358] sm:$0xff]  ;;  %v10061_v10 = vpack.c.bf16 %v3703_v11, %v3702_v58 }
 0x51e   : > { %10074 = vmatpush3.bf16.msra.mxu1 %v10073_v23  ;;  %10044 = vmatprep.subr.bf16.mxu0 %v10043_v24  ;;  %v3752_v23 = vld [vmem:[%s13255_s4 + $0x3e0] sm:$0xff]  ;;  %v3753_v24 = vld [vmem:[%s13255_s4 + $0x3e8] sm:$0xff]  ;;  %v10063_v46 = vpack.c.bf16 %v3721_v6, %v3720_v5  ;;  %v10093_v8 = vpack.c.bf16 %v3735_v16, %v3734_v0  ;;  %v4137_v58 = vld [vmem:[#allocation16 + $0x20] sm:$0xff] (!%p8866_p2) }
 0x51f   : > { %4117 = vmatprep.mubr.f32.mxu1 %v3834_v19  ;;  %10076 = vmatprep.subr.bf16.mxu1 %v10075_v7  ;;  %v3705_v7 = vld [vmem:[%s13255_s4 + $0x268] sm:$0xff]  ;;  %v10095_v22 = vpack.c.bf16 %v3753_v24, %v3752_v23  ;;  %v4141_v0 = vld [vmem:[#allocation16 + $0x40] sm:$0xff] (!%p8866_p2) }
 0x520   : > { %10046 = vmatpush3.bf16.msra.mxu0 %v10045_v55  ;;  %v3723_v55 = vld [vmem:[%s13255_s4 + $0x2f8] sm:$0xff]  ;;  %v3737_v19 = vld [vmem:[%s13255_s4 + $0x368] sm:$0xff] }
 0x521   : > { %10048 = vmatprep.subr.bf16.mxu0 %v10047_v32  ;;  %v10065_v32 = vpack.c.bf16 %v3705_v7, %v3704_v26  ;;  %v4139_v11 = vld [vmem:[#allocation16 + $0x30] sm:$0xff] (!%p8866_p2)  ;;  %v4144_v5 = vld [vmem:[#allocation16 + $0x58] sm:$0xff] (!%p8866_p2)  ;;  %v4145_v26 = vld [vmem:[#allocation16 + $0x60] sm:$0xff] (!%p8866_p2) }
 0x522   : > { %10078 = vmatpush3.bf16.msra.mxu1 %v10077_v62  ;;  %v10067_v62 = vpack.c.bf16 %v3723_v55, %v3722_v12  ;;  %v10109_v6 = vpack.c.bf16 (!%p8866_p2), %v4139_v11, %v4137_v58  ;;  %v4143_v16 = vld [vmem:[#allocation16 + $0x50] sm:$0xff] (!%p8866_p2)  ;;  %v4148_v23 = vld [vmem:[#allocation16 + $0x78] sm:$0xff] (!%p8866_p2) }
 0x523   : > { %10080 = vmatprep.subr.bf16.mxu1 %v10079_v52  ;;  %v10097_v52 = vpack.c.bf16 %v3737_v19, %v3736_v40  ;;  %v10113_v24 = vpack.c.bf16 (!%p8866_p2), %v4143_v16, %v4141_v0  ;;  %v4147_v7 = vld [vmem:[#allocation16 + $0x70] sm:$0xff] (!%p8866_p2)  ;;  %v4149_v40 = vld [vmem:[#allocation17] sm:$0x3] (!%p8866_p2) }
 0x524   : > { %10050 = vmatpush3.bf16.msra.mxu0 %v10049_v37  ;;  %v3739_v37 = vld [vmem:[%s13255_s4 + $0x378] sm:$0xff]  ;;  %v4154_v19 = vrot.slane (!%p8866_p2), %v4149_v40, %v12059_v18 }
 0x525   : > { %10052 = vmatprep.subr.bf16.mxu0 %v10051_v28  ;;  %v10101_v27 = vpack.c.bf16 %v3739_v37, %v3738_v20  ;;  %v3816_v28 = vrot.slane %v3801_v4, %v12095_v47 }
 0x526   : > { %10082 = vmatpush3.bf16.msra.mxu1 %v10081_v1  ;;  %v8864_v1 = vld [vmem:[#allocation14] ss:$0 sm:$0xff] }
 0x527   : > { %10084 = vmatprep.subr.bf16.mxu1 %v10083_v60  ;;  %v3832_v15 = vcombine.high %v3816_v28, %v3816_v28 }
 0x528   : > { %10054 = vmatpush3.bf16.msra.mxu0 %v10053_v54 }
 0x529   : > { %10056 = vmatprep.subr.bf16.mxu0 %v10055_v39 }
 0x52a   : > { %10086 = vmatpush3.bf16.msra.mxu1 %v10085_v13  ;;  %v4134_v13 = vld [vmem:[#allocation16 + $0x8] sm:$0xff] (!%p8866_p2) }
 0x52b   : > { %10088 = vmatprep.subr.bf16.mxu1 %v10087_v48  ;;  %v10103_v48 = vpack.c.bf16 (!%p8866_p2), %v4136_v53, %v4134_v13 }
 0x52c   : > { %10058 = vmatpush3.bf16.msra.mxu0 %v10057_v9  ;;  %v4140_v9 = vld [vmem:[#allocation16 + $0x38] sm:$0xff] (!%p8866_p2) }
 0x52d   : > { %10060 = vmatprep.subr.bf16.mxu0 %v10059_v57  ;;  %v10107_v57 = vpack.c.bf16 (!%p8866_p2), %v4140_v9, %v4138_v50 }
 0x52e   : > { %10090 = vmatpush3.bf16.msra.mxu1 %v10089_v36  ;;  %v4142_v36 = vld [vmem:[#allocation16 + $0x48] sm:$0xff] (!%p8866_p2) }
 0x52f   : > { %10092 = vmatprep.subr.bf16.mxu1 %v10091_v34  ;;  %v10111_v34 = vpack.c.bf16 (!%p8866_p2), %v4144_v5, %v4142_v36 }
 0x530   : > { %10062 = vmatpush3.bf16.msra.mxu0 %v10061_v10  ;;  %v4146_v10 = vld [vmem:[#allocation16 + $0x68] sm:$0xff] (!%p8866_p2) }
 0x531   : > { %10064 = vmatprep.subr.bf16.mxu0 %v10063_v46  ;;  %v10115_v46 = vpack.c.bf16 (!%p8866_p2), %v4148_v23, %v4146_v10 }
 0x532   : > { %10094 = vmatpush3.bf16.msra.mxu1 %v10093_v8  ;;  %v10117_v8 = vpack.c.bf16 (!%p8866_p2), %v4147_v7, %v4145_v26 }
 0x533   : > { %10096 = vmatprep.subr.bf16.mxu1 %v10095_v22 }
 0x534   : > { %10066 = vmatpush3.bf16.msra.mxu0 %v10065_v32 }
 0x535   : > { %10068 = vmatprep.subr.bf16.mxu0 %v10067_v62 }
 0x536   : > { %10098 = vmatpush3.bf16.msra.mxu1 %v10097_v52 }
 0x537   : > { %10100 = vmatprep.subr.bf16.mxu1 %v10099_v45 }
 0x538   : > { %10070 = vmatpush3.bf16.msra.mxu0 %v10069_v63 }
 0x539   : > { %10104 = vmatprep.subr.bf16.mxu0 (!%p8866_p2), %v10103_v48 }
 0x53a   : > { %10102 = vmatpush3.bf16.msra.mxu1 %v10101_v27 }
 0x53b   : > { %4048 = vmatmul.mubr.f32.vlgmr.msra.gmra.mrb[26].mxu0 %v3816_v28  ;;  %9245 = vmatprep.subr.mxu1 (!%p8866_p2), %v11274_v35 }
 0x53c   : > { %4231 = vmatprep.mubr.f32.mxu0 (!%p8866_p2), %v11274_v35  ;;  %10106 = vmatpush1.bf16.msra.mxu0 (!%p8866_p2), %v10105_v30 }
 0x53d   : > { %4118 = vmatmul.mubr.f32.vlgmr.msra.gmra.mrb[26].mxu1 %v3832_v15  ;;  %10108 = vmatprep.subr.bf16.mxu0 (!%p8866_p2), %v10107_v57 }
 0x53e   : > { %9247 = vmatprep.mubr.msk.f32.mxu1 (!%p8866_p2), %vm11277_vm7, %v11274_v35 }
 0x540   : > { %10110 = vmatpush1.bf16.msra.mxu0 (!%p8866_p2), %v10109_v6 }
 0x541   : > { %10112 = vmatprep.subr.bf16.mxu0 (!%p8866_p2), %v10111_v34 }
 0x544   : > { %10114 = vmatpush1.bf16.msra.mxu0 (!%p8866_p2), %v10113_v24 }
 0x545   : > { %10116 = vmatprep.subr.bf16.mxu0 (!%p8866_p2), %v10115_v46 }
 0x548   : > { %10118 = vmatpush1.bf16.msra.mxu0 (!%p8866_p2), %v10117_v8 }
 0x549   : > { %9275 = vmatprep.subr.mxu0 (!%p8866_p2), %v11274_v35 }
 0x5ee   : > { %v8999_v31 = vpop.f32.mrb[24].mxu0 }
 0x5ef   : > { %v9000_v2 = vpop.f32.mrb[25].mxu0 }
 0x5f0   : > { %v9001_v59 = vadd.f32 %v9000_v2, %v8999_v31  ;;  %v9034_v60 = vpop.f32.mrb[24].mxu1 }
 0x5f1   : > { %v9035_v25 = vpop.f32.mrb[25].mxu1 }
 0x5f2   : > { %v3910_v61 = vadd.f32 %v9001_v59, %v8864_v1  ;;  %v9036_v54 = vadd.f32 %v9035_v25, %v9034_v60  ;;  %v4158_v1 = vrot.slane (!%p8866_p2), %v4149_v40, %v12063_v21 }
 0x5f4   : > { %v3980_v51 = vadd.f32 %v9036_v54, %v3910_v61 }
 0x60e   : > { %v9069_v38 = vpop.f32.mrb[26].mxu0 }
 0x60f   : > { %v9070_v39 = vpop.f32.mrb[27].mxu0 }
 0x610   : > { %v9071_v56 = vadd.f32 %v9070_v39, %v9069_v38  ;;  %v9104_v42 = vpop.f32.mrb[26].mxu1  ;;  %4130 = sbr.rel (%p8866_p2) target bundleno = 7024 (0x1b70), region = 196 }
 0x611   : > { %v9105_v47 = vpop.f32.mrb[27].mxu1 }
 0x612   : > { %v4050_v43 = vadd.f32 %v9071_v56, %v3980_v51  ;;  %v9106_v4 = vadd.f32 %v9105_v47, %v9104_v42 }
 0x614   : > { %v4120_v14 = vadd.f32 %v9106_v4, %v4050_v43 }
 0x616   : > { %4126 = vst.msk [vmem:[%s4124_s7] sm:$0xf] %vm4125_vm5, %v4120_v14 }
 0x61d   : > { %v12681_v12 = vld [vmem:[#allocation4] sm:$0xf]  ;;  %v12683_v55 = vld [vmem:[#allocation4 + $0x4] sm:$0xf] }
 0x61e   : > { %v4163_v22 = vcombine.low %v12681_v12, %v12683_v55 }
 0x620   : > { %8867 = vmatmul.mubr.msk.f32.vlgmr.msra.gmra.mrb[0].mxu0 %vm4164_vm6, %v4163_v22 }
 0x621   : > { %9277 = vmatprep.mubr.msk.f32.mxu0 %vm11277_vm7, %v11274_v35 }
 0x6f3   : > { %v4233_v32 = vpop.f32.mrb[0].mxu0 }
 0x6f4   : > { %v4234_v44 = vadd.f32 %v4233_v32, %v4154_v19  ;;  %v4235_v33 = vpop.f32.mrb[1].mxu0 }
 0x6f5   : > { %v12732_v60 = vadd.f32 %v4235_v33, %v4158_v1 }
 0x6f6   : > { %4244 = vrot.lane.b32.xlu1 %v4234_v44, %s11275_s24  ;;  %4240 = vrot.lane.b32.xlu0 %v4234_v44, %s11276_s1  ;;  %v4239_v62 = vcombine.high %v4234_v44, %v4234_v44 }
 0x6f7   : > { %v12753_v61 = vcombine.high %v12732_v60, %v12732_v60 }
 0x6fa   : > { %4246 = vrot.lane.b32.xlu1 %v4239_v62, %s11275_s24  ;;  %4242 = vrot.lane.b32.xlu0 %v4239_v62, %s11276_s1 }
 0x6fe   : > { %4250 = vrot.lane.b32.xlu1 %v4239_v62, %s11278_s6  ;;  %4248 = vrot.lane.b32.xlu0 %v4234_v44, %s11278_s6 }
 0x702   : > { %4342 = vrot.lane.b32.xlu1 %v4239_v62, %s11279_s23  ;;  %4266 = vrot.lane.b32.xlu0 %v4234_v44, %s11279_s23 }
 0x768   : > { %v4245_v3 = vpop.permute.xlu1 %4244  ;;  %v4241_v41 = vpop.permute.xlu0 %4240 }
 0x769   : > { %4418 = vrot.lane.b32.xlu0 %v4241_v41, %s11279_s23 }
 0x76c   : > { %v4247_v52 = vpop.permute.xlu1 %4246  ;;  %v4243_v45 = vpop.permute.xlu0 %4242 }
 0x76d   : > { %4570 = vrot.lane.b32.xlu0 %v4245_v3, %s11279_s23  ;;  %4494 = vrot.lane.b32.xlu1 %v4243_v45, %s11279_s23 }
 0x770   : > { %v4249_v20 = vpop.permute.xlu0 %4248  ;;  %v4251_v37 = vpop.permute.xlu1 %4250 }
 0x771   : > { %4646 = vrot.lane.b32.xlu1 %v4247_v52, %s11279_s23  ;;  %4722 = vrot.lane.b32.xlu0 %v4249_v20, %s11279_s23 }
 0x774   : > { %v4267_v63 = vpop.permute.xlu0 %4266  ;;  %v4343_v27 = vpop.permute.xlu1 %4342 }
 0x775   : > { %4798 = vrot.lane.b32.xlu1 %v4251_v37, %s11279_s23  ;;  %9246 = vmatpush3.xpose.msk.msra.mxu1 %vm1021_vm2, %v4267_v63 }
 0x776   : > { %9250 = vmatprep.subr.mxu1 %v11274_v35 }
 0x778   : > { %9248 = vmatmul.mubr.msk.f32.vlgmr.msra.gmra.mrb[0].mxu1 %vm1021_vm2, %v4234_v44 }
 0x779   : > { %9251 = vmatpush3.xpose.msk.msra.mxu1 %vm1021_vm2, %v4343_v27  ;;  %9252 = vmatprep.mubr.msk.f32.mxu1 %vm11277_vm7, %v11274_v35 }
 0x77a   : > { %9255 = vmatprep.subr.mxu1 %v11274_v35 }
 0x77c   : > { %9253 = vmatmul.mubr.msk.f32.vlgmr.msra.gmra.mrb[2].mxu1 %vm1021_vm2, %v4239_v62 }
 0x77d   : > { %9257 = vmatprep.mubr.msk.f32.mxu1 %vm11277_vm7, %v11274_v35 }
 0x7db   : > { %v4419_v28 = vpop.permute.xlu0 %4418 }
 0x7dc   : > { %9256 = vmatpush3.xpose.msk.msra.mxu1 %vm1021_vm2, %v4419_v28 }
 0x7dd   : > { %9260 = vmatprep.subr.mxu1 %v11274_v35 }
 0x7df   : > { %v4495_v15 = vpop.permute.xlu1 %4494  ;;  %9258 = vmatmul.mubr.msk.f32.vlgmr.msra.gmra.mrb[4].mxu1 %vm1021_vm2, %v4241_v41  ;;  %v4571_v31 = vpop.permute.xlu0 %4570 }
 0x7e0   : > { %9261 = vmatpush3.xpose.msk.msra.mxu1 %vm1021_vm2, %v4495_v15  ;;  %9262 = vmatprep.mubr.msk.f32.mxu1 %vm11277_vm7, %v11274_v35 }
 0x7e1   : > { %9265 = vmatprep.subr.mxu1 %v11274_v35 }
 0x7e3   : > { %9263 = vmatmul.mubr.msk.f32.vlgmr.msra.gmra.mrb[6].mxu1 %vm1021_vm2, %v4243_v45  ;;  %v4723_v2 = vpop.permute.xlu0 %4722  ;;  %v4647_v59 = vpop.permute.xlu1 %4646 }
 0x7e4   : > { %9266 = vmatpush3.xpose.msk.msra.mxu1 %vm1021_vm2, %v4571_v31  ;;  %9276 = vmatpush3.xpose.msk.msra.mxu0 %vm1021_vm2, %v4723_v2 }
 0x7e5   : > { %9267 = vmatprep.mubr.msk.f32.mxu1 %vm11277_vm7, %v11274_v35  ;;  %9270 = vmatprep.subr.mxu1 %v11274_v35 }
 0x7e6   : > { %9285 = vmatprep.subr.mxu0 %v11274_v35 }
 0x7e7   : > { %9268 = vmatmul.mubr.msk.f32.vlgmr.msra.gmra.mrb[8].mxu1 %vm1021_vm2, %v4245_v3  ;;  %9278 = vmatmul.mubr.msk.f32.vlgmr.msra.gmra.mrb[2].mxu0 %vm1021_vm2, %v4249_v20  ;;  %v4799_v25 = vpop.permute.xlu1 %4798 }
 0x7e8   : > { %9271 = vmatpush3.xpose.msk.msra.mxu1 %vm1021_vm2, %v4647_v59  ;;  %9286 = vmatpush3.msk.msra.mxu0 %vm4975_vm8, %v12732_v60 }
 0x7e9   : > { %9272 = vmatprep.mubr.msk.f32.mxu1 %vm11277_vm7, %v11274_v35  ;;  %9280 = vmatprep.subr.mxu1 %v11274_v35 }
 0x7ea   : > { %9287 = vmatprep.mubr.msk.f32.mxu0 %vm11277_vm7, %v11274_v35  ;;  %9295 = vmatprep.subr.mxu0 %v11274_v35 }
 0x7eb   : > { %9273 = vmatmul.mubr.msk.f32.vlgmr.msra.gmra.mrb[10].mxu1 %vm1021_vm2, %v4247_v52 }
 0x7ec   : > { %9281 = vmatpush3.xpose.msk.msra.mxu1 %vm1021_vm2, %v4799_v25  ;;  %9282 = vmatprep.mubr.msk.f32.mxu1 %vm11277_vm7, %v11274_v35 }
 0x7ed   : > { %9290 = vmatprep.subr.mxu1 %v11274_v35 }
 0x7ef   : > { %9283 = vmatmul.mubr.msk.f32.vlgmr.msra.gmra.mrb[12].mxu1 %vm1021_vm2, %v4251_v37 }
 0x7f0   : > { %9291 = vmatpush3.msk.msra.mxu1 %vm4975_vm8, %v12753_v61  ;;  %9292 = vmatprep.mubr.msk.f32.mxu1 %vm11277_vm7, %v11274_v35 }
 0x7f1   : > { %9300 = vmatprep.subr.mxu1 %v11274_v35 }
 0x84b   : > { %v4338_v54 = vpop.f32.mrb[0].mxu1 }
 0x84c   : > { %v4874_v51 = vmul.f32 0.25, %v4338_v54  ;;  %v9249_v38 = vpop.f32.mrb[1].mxu1 }
 0x84e   : > { %v4883_v39 = vsel %vm4882_vm9, %v4874_v51, -inf }
 0x84f   : > { %4884 = vmax.xlane.f32.xlu0 %v4883_v39  ;;  %v4414_v56 = vpop.f32.mrb[2].mxu1 }
 0x850   : > { %v4875_v42 = vmul.f32 0.25, %v4414_v56  ;;  %v9254_v47 = vpop.f32.mrb[3].mxu1 }
 0x852   : > { %v4886_v43 = vsel %vm4882_vm9, %v4875_v42, -inf }
 0x853   : > { %4887 = vmax.xlane.f32.xlu1 %v4886_v43 }
 0x8b2   : > { %v4490_v4 = vpop.f32.mrb[4].mxu1 }
 0x8b3   : > { %v4876_v14 = vmul.f32 0.25, %v4490_v4  ;;  %v9259_v13 = vpop.f32.mrb[5].mxu1 }
 0x8b5   : > { %v4889_v53 = vsel %vm4882_vm9, %v4876_v14, -inf }
 0x8b6   : > { %4890 = vmax.xlane.f32.xlu0 %v4889_v53  ;;  %v4566_v29 = vpop.f32.mrb[6].mxu1 }
 0x8b7   : > { %v4877_v48 = vmul.f32 0.25, %v4566_v29  ;;  %v9264_v49 = vpop.f32.mrb[7].mxu1 }
 0x8b9   : > { %v4892_v50 = vsel %vm4882_vm9, %v4877_v48, -inf }
 0x8ba   : > { %4893 = vmax.xlane.f32.xlu0 %v4892_v50  ;;  %v4642_v9 = vpop.f32.mrb[8].mxu1  ;;  %v4794_v30 = vpop.f32.mrb[2].mxu0 }
 0x8bb   : > { %v4878_v57 = vmul.f32 0.25, %v4642_v9  ;;  %v9269_v58 = vpop.f32.mrb[9].mxu1  ;;  %v9279_v11 = vpop.f32.mrb[3].mxu0  ;;  %v4880_v36 = vmul.f32 0.25, %v4794_v30 }
 0x8bd   : > { %v4895_v5 = vsel %vm4882_vm9, %v4878_v57, -inf  ;;  %v4901_v10 = vsel %vm4882_vm9, %v4880_v36, -inf }
 0x8be   : > { %4896 = vmax.xlane.f32.xlu1 %v4895_v5  ;;  %v4718_v6 = vpop.f32.mrb[10].mxu1 }
 0x8bf   : > { %v4879_v34 = vmul.f32 0.25, %v4718_v6  ;;  %v9274_v0 = vpop.f32.mrb[11].mxu1 }
 0x8c1   : > { %v4898_v16 = vsel %vm4882_vm9, %v4879_v34, -inf }
 0x8c2   : > { %4899 = vmax.xlane.f32.xlu0 %v4898_v16  ;;  %v4870_v23 = vpop.f32.mrb[12].mxu1  ;;  %4902 = vmax.xlane.f32.xlu1 %v4901_v10 }
 0x8c3   : > { %v4881_v24 = vmul.f32 0.25, %v4870_v23  ;;  %v9284_v46 = vpop.f32.mrb[13].mxu1 }
 0x8c5   : > { %v4904_v26 = vsel %vm4882_vm9, %v4881_v24, -inf }
 0x8c6   : > { %4905 = vmax.xlane.f32.xlu0 %v4904_v26 }
 0x8d3   : > { %4254 = vrot.lane.b32.xlu1 %v12732_v60, %s11276_s1 }
 0x8d7   : > { %4258 = vrot.lane.b32.xlu1 %v12732_v60, %s11275_s24 }
 0x8db   : > { %4260 = vrot.lane.b32.xlu1 %v12753_v61, %s11275_s24 }
 0x8dc   : > { %4256 = vrot.lane.b32.xlu0 %v12753_v61, %s11276_s1  ;;  %v4885_v22 = vpop.xlane.xlu0 %4884 }
 0x8dd   : > { %v4907_v40 = vsub.f32 %v4874_v51, %v4885_v22 }
 0x8df   : > { %v4915_v32 = vmul.f32 1.442695, %v4907_v40 }
 0x8e0   : > { %v4888_v7 = vpop.xlane.xlu1 %4887 }
 0x8e1   : > { %v4908_v8 = vsub.f32 %v4875_v42, %v4888_v7 }
 0x8e3   : > { %v4917_v19 = vmul.f32 1.442695, %v4908_v8 }
 0x8e5   : > { %10564 = vpow2.f32 %v4917_v19  ;;  %v5573_v19 = vld [vmem:[#allocation19] sm:$0xff] }
 0x8e6   : > { %10566 = vpow2.f32 %v4915_v32  ;;  %v5574_v32 = vld [vmem:[#allocation19 + $0x8] sm:$0xff] }
 0x8ef   : > { %v10565_v44 = vpop.eup %10564 }
 0x8f0   : > { %v4934_v33 = vsel %vm4882_vm9, %v10565_v44, 0.0  ;;  %v12778_v62 = vpop.eup %10566 }
 0x8f1   : > { %v4931_v3 = vsel %vm4882_vm9, %v12778_v62, 0.0 }
 0x8fb   : > { %4935 = vadd.xlane.f32.xlu0 %v4934_v33 }
 0x8ff   : > { %4932 = vadd.xlane.f32.xlu1 %v4931_v3 }
 0x943   : > { %v4891_v41 = vpop.xlane.xlu0 %4890 }
 0x944   : > { %v4909_v52 = vsub.f32 %v4876_v14, %v4891_v41  ;;  %v10123_v41 = vpack.c.bf16 %v5574_v32, %v5573_v19  ;;  %v11281_v32 = vmov 839922192  }
 0x946   : > { %v4919_v45 = vmul.f32 1.442695, %v4909_v52 }
 0x947   : > { %v4894_v20 = vpop.xlane.xlu0 %4893 }
 0x948   : > { %10568 = vpow2.f32 %v4919_v45  ;;  %v4910_v37 = vsub.f32 %v4877_v48, %v4894_v20  ;;  %v11280_v20 = vmov 0.0|0.0  }
 0x94a   : > { %v4921_v63 = vmul.f32 1.442695, %v4910_v37 }
 0x94b   : > { %v4897_v27 = vpop.xlane.xlu1 %4896 }
 0x94c   : > { %10570 = vpow2.f32 %v4921_v63  ;;  %v4911_v28 = vsub.f32 %v4878_v57, %v4897_v27  ;;  %v5576_v27 = vld [vmem:[#allocation19 + $0x10] sm:$0xff] }
 0x94e   : > { %v4923_v25 = vmul.f32 1.442695, %v4911_v28  ;;  %v5577_v28 = vld [vmem:[#allocation19 + $0x18] sm:$0xff] }
 0x94f   : > { %v4903_v15 = vpop.xlane.xlu1 %4902  ;;  %v4900_v31 = vpop.xlane.xlu0 %4899 }
 0x950   : > { %v4913_v1 = vsub.f32 %v4880_v36, %v4903_v15  ;;  %v4912_v2 = vsub.f32 %v4879_v34, %v4900_v31  ;;  %v10120_v15 = vpack.c.bf16 %v5577_v28, %v5576_v27 }
 0x952   : > { %v10569_v59 = vpop.eup %10568  ;;  %v4927_v54 = vmul.f32 1.442695, %v4913_v1  ;;  %v4925_v51 = vmul.f32 1.442695, %v4912_v2  ;;  %v5808_v2 = vld [vmem:[#allocation19 + $0x30] sm:$0xff] }
 0x953   : > { %v4906_v38 = vpop.xlane.xlu0 %4905  ;;  %v4937_v39 = vsel %vm4882_vm9, %v10569_v59, 0.0  ;;  %v4255_v9 = vpop.permute.xlu1 %4254 }
 0x954   : > { %10572 = vpow2.f32 %v4927_v54  ;;  %v4914_v56 = vsub.f32 %v4881_v24, %v4906_v38  ;;  %4938 = vadd.xlane.f32.xlu1 %v4937_v39 }
 0x955   : > { %10574 = vpow2.f32 %v4925_v51 }
 0x956   : > { %v10571_v42 = vpop.eup %10570  ;;  %10576 = vpow2.f32 %v4923_v25  ;;  %v4929_v47 = vmul.f32 1.442695, %v4914_v56 }
 0x957   : > { %v4940_v43 = vsel %vm4882_vm9, %v10571_v42, 0.0  ;;  %v4259_v30 = vpop.permute.xlu1 %4258  ;;  %v4257_v57 = vpop.permute.xlu0 %4256 }
 0x958   : > { %10578 = vpow2.f32 %v4929_v47  ;;  %4941 = vadd.xlane.f32.xlu0 %v4940_v43  ;;  %v5730_v47 = vld [vmem:[#allocation19 + $0x28] sm:$0xff] }
 0x95b   : > { %v4261_v58 = vpop.permute.xlu1 %4260 }
 0x95e   : > { %v12784_v4 = vpop.eup %10572 }
 0x95f   : > { %v10575_v14 = vpop.eup %10574  ;;  %v4949_v13 = vsel %vm4882_vm9, %v12784_v4, 0.0 }
 0x960   : > { %v12788_v53 = vpop.eup %10576  ;;  %4950 = vadd.xlane.f32.xlu1 %v4949_v13  ;;  %v4946_v29 = vsel %vm4882_vm9, %v10575_v14, 0.0 }
 0x961   : > { %4947 = vadd.xlane.f32.xlu0 %v4946_v29  ;;  %v4943_v49 = vsel %vm4882_vm9, %v12788_v53, 0.0 }
 0x962   : > { %v12791_v48 = vpop.eup %10578 }
 0x963   : > { %v4952_v50 = vsel %vm4882_vm9, %v12791_v48, 0.0 }
 0x964   : > { %4944 = vadd.xlane.f32.xlu1 %v4943_v49 }
 0x965   : > { %4953 = vadd.xlane.f32.xlu0 %v4952_v50 }
 0x975   : > { %4264 = vrot.lane.b32.xlu1 %v12753_v61, %s11278_s6 }
 0x97b   : > { %4262 = vrot.lane.b32.xlu0 %v12732_v60, %s11278_s6 }
 0x988   : > { %v4936_v11 = vpop.xlane.xlu0 %4935 }
 0x989   : > { %10580 = vrcp.f32 %v4936_v11 }
 0x98c   : > { %v4933_v36 = vpop.xlane.xlu1 %4932 }
 0x98d   : > { %10582 = vrcp.f32 %v4933_v36 }
 0x993   : > { %v10581_v5 = vpop.eup %10580 }
 0x994   : > { %v4958_v6 = vmul.f32 %v10581_v5, %v10565_v44 }
 0x996   : > { %9293 = vmatmul.mubr.msk.f32.vlgmr.msra.gmra.mrb[14].mxu1 %vm4971_vm10, %v4958_v6 }
 0x997   : > { %v10583_v34 = vpop.eup %10582  ;;  %9301 = vmatpush3.msk.msra.mxu1 %vm4975_vm8, %v4257_v57  ;;  %9302 = vmatprep.mubr.msk.f32.mxu1 %vm11277_vm7, %v11274_v35 }
 0x998   : > { %v4956_v60 = vmul.f32 %v10583_v34, %v12778_v62  ;;  %9310 = vmatprep.subr.mxu1 %v11274_v35 }
 0x99a   : > { %9288 = vmatmul.mubr.msk.f32.vlgmr.msra.gmra.mrb[4].mxu0 %vm4971_vm10, %v4956_v60 }
 0x99b   : > { %9296 = vmatpush3.msk.msra.mxu0 %vm4975_vm8, %v4255_v9  ;;  %9297 = vmatprep.mubr.msk.f32.mxu0 %vm11277_vm7, %v11274_v35 }
 0x99c   : > { %9305 = vmatprep.subr.mxu0 %v11274_v35 }
 0x9e1   : > { %v4939_v61 = vpop.xlane.xlu1 %4938 }
 0x9e2   : > { %10584 = vrcp.f32 %v4939_v61 }
 0x9e5   : > { %v4942_v0 = vpop.xlane.xlu0 %4941 }
 0x9e6   : > { %10586 = vrcp.f32 %v4942_v0 }
 0x9ec   : > { %v10585_v16 = vpop.eup %10584 }
 0x9ed   : > { %v4960_v10 = vmul.f32 %v10585_v16, %v10569_v59  ;;  %v4951_v23 = vpop.xlane.xlu1 %4950  ;;  %v5809_v59 = vld [vmem:[#allocation19 + $0x38] sm:$0xff] }
 0x9ee   : > { %v4948_v24 = vpop.xlane.xlu0 %4947  ;;  %v10129_v54 = vpack.c.bf16 %v5809_v59, %v5808_v2  ;;  %v5980_v59 = vld [vmem:[#allocation25] sm:$0xff] }
 0x9ef   : > { %10588 = vrcp.f32 %v4948_v24  ;;  %9298 = vmatmul.mubr.msk.f32.vlgmr.msra.gmra.mrb[6].mxu0 %vm4971_vm10, %v4960_v10 }
 0x9f0   : > { %v10587_v46 = vpop.eup %10586  ;;  %9306 = vmatpush3.msk.msra.mxu0 %vm4975_vm8, %v4259_v30  ;;  %9307 = vmatprep.mubr.msk.f32.mxu0 %vm11277_vm7, %v11274_v35 }
 0x9f1   : > { %v4962_v26 = vmul.f32 %v10587_v46, %v10571_v42  ;;  %v4945_v7 = vpop.xlane.xlu1 %4944  ;;  %9315 = vmatprep.subr.mxu0 %v11274_v35  ;;  %v5729_v42 = vld [vmem:[#allocation19 + $0x20] sm:$0xff] }
 0x9f2   : > { %10590 = vrcp.f32 %v4945_v7  ;;  %v4954_v8 = vpop.xlane.xlu0 %4953 }
 0x9f3   : > { %10592 = vrcp.f32 %v4954_v8  ;;  %9303 = vmatmul.mubr.msk.f32.vlgmr.msra.gmra.mrb[16].mxu1 %vm4971_vm10, %v4962_v26 }
 0x9f4   : > { %10594 = vrcp.f32 %v4951_v23  ;;  %9311 = vmatpush3.msk.msra.mxu1 %vm4975_vm8, %v4261_v58  ;;  %9312 = vmatprep.mubr.msk.f32.mxu1 %vm11277_vm7, %v11274_v35  ;;  %v8904_v23 = vld [vmem:[#allocation20] ss:$0 sm:$0xff] }
 0x9f5   : > { %9320 = vmatprep.subr.mxu1 %v11274_v35  ;;  %v4265_v33 = vpop.permute.xlu1 %4264 }
 0x9f6   : > { %v4263_v37 = vpop.permute.xlu0 %4262 }
 0x9f9   : > { %v10589_v22 = vpop.eup %10588 }
 0x9fa   : > { %v4966_v40 = vmul.f32 %v10589_v22, %v10575_v14 }
 0x9fc   : > { %v10591_v44 = vpop.eup %10590  ;;  %9313 = vmatmul.mubr.msk.f32.vlgmr.msra.gmra.mrb[18].mxu1 %vm4971_vm10, %v4966_v40 }
 0x9fd   : > { %v10593_v62 = vpop.eup %10592  ;;  %v4964_v3 = vmul.f32 %v10591_v44, %v12788_v53  ;;  %9321 = vmatpush3.msk.msra.mxu1 %vm4975_vm8, %v4265_v33  ;;  %9322 = vmatprep.mubr.msk.f32.mxu1 %vm11277_vm7, %v11274_v35  ;;  %v5912_v44 = vunpack.c.l.s4 %v11281_v32  ;;  %v11282_v33 = vmov 1985246804  }
 0x9fe   : > { %v10595_v52 = vpop.eup %10594  ;;  %v4970_v45 = vmul.f32 %v10593_v62, %v12791_v48  ;;  %10122 = vmatprep.subr.bf16.mxu1 %v11280_v20  ;;  %v5919_v62 = vunpack.c.l.s4 %v11282_v33 }
 0x9ff   : > { %9308 = vmatmul.mubr.msk.f32.vlgmr.msra.gmra.mrb[8].mxu0 %vm4971_vm10, %v4964_v3  ;;  %v4968_v63 = vmul.f32 %v10595_v52, %v12784_v4  ;;  %v10126_v4 = vpack.c.bf16 %v5730_v47, %v5729_v42  ;;  %v5913_v3 = vunpack.c.0.s8 %v5912_v44  ;;  %v5986_v42 = vld [vmem:[#allocation25 + $0x30] sm:$0xff] }
 0xa00   : > { %9316 = vmatpush3.msk.msra.mxu0 %vm4975_vm8, %v4263_v37  ;;  %9323 = vmatmul.mubr.msk.f32.vlgmr.msra.gmra.mrb[20].mxu1 %vm4971_vm10, %v4970_v45 }
 0xa01   : > { %9317 = vmatprep.mubr.msk.f32.mxu0 %vm11277_vm7, %v11274_v35  ;;  %10124 = vmatpush3.bf16.msra.mxu1 %v10123_v41  ;;  %v5920_v41 = vunpack.c.0.s8 %v5919_v62  ;;  %v12861_v52 = vsub.s32 %v5913_v3, %v12056_v17  ;;  %v8909_v3 = vld [vmem:[#allocation29] ss:$0 sm:$0xff] }
 0xa02   : > { %9336 = vmatprep.mubr.msk.f32.mxu1 %vm11277_vm7, %v11274_v35  ;;  %10119 = vmatprep.subr.bf16.mxu0 %v11280_v20 }
 0xa03   : > { %9318 = vmatmul.mubr.msk.f32.vlgmr.msra.gmra.mrb[10].mxu0 %vm4971_vm10, %v4968_v63  ;;  %10128 = vmatprep.subr.bf16.mxu1 %v11280_v20  ;;  %v12864_v45 = vsub.s32 %v5920_v41, %v12056_v17  ;;  %v5982_v17 = vld [vmem:[#allocation25 + $0x10] sm:$0xff] }
 0xa04   : > { %9329 = vmatprep.mubr.msk.f32.mxu0 %vm11277_vm7, %v11274_v35  ;;  %10121 = vmatpush3.bf16.msra.mxu0 %v10120_v15 }
 0xa05   : > { %10125 = vmatprep.subr.bf16.mxu0 %v11280_v20 }
 0xa69   : > { %v5119_v31 = vpop.f32.mrb[14].mxu1 }
 0xa6a   : > { %v9294_v1 = vpop.f32.mrb[15].mxu1 }
 0xa6d   : > { %v5044_v25 = vpop.f32.mrb[4].mxu0 }
 0xa6e   : > { %v5655_v51 = vcombine.low %v5044_v25, %v5119_v31  ;;  %v9289_v38 = vpop.f32.mrb[5].mxu0  ;;  %v5981_v25 = vld [vmem:[#allocation25 + $0x8] sm:$0xff] }
 0xa70   : > { %9337 = vmatmul.mubr.msk.f32.vlgmr.msra.gmra.mrb[22].mxu1 %vm1021_vm2, %v5655_v51  ;;  %v5983_v51 = vld [vmem:[#allocation25 + $0x18] sm:$0xff] }
 0xa71   : > { %10130 = vmatpush3.bf16.msra.mxu1 %v10129_v54  ;;  %9350 = vmatprep.mubr.msk.f32.mxu1 %vm11277_vm7, %v11274_v35  ;;  %v10132_v54 = vpack.c.bf16 %v5981_v25, %v5980_v59  ;;  %v10135_v38 = vpack.c.bf16 %v5983_v51, %v5982_v17 }
 0xa72   : > { %10143 = vmatprep.subr.bf16.mxu1 %v11280_v20 }
 0xac2   : > { %v5194_v39 = vpop.f32.mrb[6].mxu0 }
 0xac3   : > { %v9299_v56 = vpop.f32.mrb[7].mxu0 }
 0xac4   : > { %v5985_v56 = vld [vmem:[#allocation25 + $0x28] sm:$0xff] }
 0xac6   : > { %v5269_v43 = vpop.f32.mrb[16].mxu1 }
 0xac7   : > { %v5580_v14 = vcombine.low %v5194_v39, %v5269_v43  ;;  %v9304_v13 = vpop.f32.mrb[17].mxu1  ;;  %v5984_v39 = vld [vmem:[#allocation25 + $0x20] sm:$0xff]  ;;  %v5987_v43 = vld [vmem:[#allocation25 + $0x38] sm:$0xff] }
 0xac8   : > { %v10138_v47 = vpack.c.bf16 %v5985_v56, %v5984_v39  ;;  %v6072_v13 = vld [vmem:[#allocation28 + $0x8] sm:$0xff]  ;;  %v6246_v56 = vld [vmem:[#allocation16 + $0x88] sm:$0xff] }
 0xac9   : > { %9330 = vmatmul.mubr.msk.f32.vlgmr.msra.gmra.mrb[12].mxu0 %vm1021_vm2, %v5580_v14  ;;  %v6071_v14 = vld [vmem:[#allocation28] sm:$0xff] }
 0xaca   : > { %10127 = vmatpush3.bf16.msra.mxu0 %v10126_v4  ;;  %9343 = vmatprep.mubr.msk.f32.mxu0 %vm11277_vm7, %v11274_v35  ;;  %v10141_v4 = vpack.c.bf16 %v5987_v43, %v5986_v42  ;;  %v6248_v42 = vld [vmem:[#allocation16 + $0x98] sm:$0xff]  ;;  %v6245_v43 = vld [vmem:[#allocation16 + $0x80] sm:$0xff] }
 0xacb   : > { %10131 = vmatprep.subr.bf16.mxu0 %v11280_v20 }
 0xacf   : > { %v5419_v53 = vpop.f32.mrb[18].mxu1 }
 0xad0   : > { %v9314_v29 = vpop.f32.mrb[19].mxu1 }
 0xad1   : > { %v10144_v29 = vpack.c.bf16 %v6072_v13, %v6071_v14  ;;  %v6250_v13 = vld [vmem:[#allocation16 + $0xa8] sm:$0xff] }
 0xad2   : > { %v5344_v48 = vpop.f32.mrb[8].mxu0 }
 0xad3   : > { %v5733_v49 = vcombine.low %v5344_v48, %v5419_v53  ;;  %v5569_v50 = vpop.f32.mrb[20].mxu1  ;;  %v9309_v9 = vpop.f32.mrb[9].mxu0  ;;  %v6073_v53 = vld [vmem:[#allocation28 + $0x10] sm:$0xff]  ;;  %v6074_v48 = vld [vmem:[#allocation28 + $0x18] sm:$0xff] }
 0xad4   : > { %v9324_v30 = vpop.f32.mrb[21].mxu1  ;;  %v6076_v9 = vld [vmem:[#allocation28 + $0x28] sm:$0xff] }
 0xad5   : > { %9344 = vmatmul.mubr.msk.f32.vlgmr.msra.gmra.mrb[14].mxu0 %vm1021_vm2, %v5733_v49  ;;  %v10147_v49 = vpack.c.bf16 %v6074_v48, %v6073_v53  ;;  %v6252_v53 = vld [vmem:[#allocation16 + $0xb8] sm:$0xff]  ;;  %v6249_v48 = vld [vmem:[#allocation16 + $0xa0] sm:$0xff] }
 0xad6   : > { %v5494_v57 = vpop.f32.mrb[10].mxu0  ;;  %9369 = vmatprep.mubr.msk.f32.mxu0 %vm11277_vm7, %v11274_v35  ;;  %10133 = vmatpush3.bf16.msra.mxu0 %v10132_v54 }
 0xad7   : > { %v5812_v58 = vcombine.low %v5494_v57, %v5569_v50  ;;  %v9319_v11 = vpop.f32.mrb[11].mxu0  ;;  %10134 = vmatprep.subr.bf16.mxu0 %v11280_v20  ;;  %v6075_v50 = vld [vmem:[#allocation28 + $0x20] sm:$0xff] }
 0xad8   : > { %v10150_v30 = vpack.c.bf16 %v6076_v9, %v6075_v50  ;;  %v6254_v9 = vld [vmem:[#allocation16 + $0xc8] sm:$0xff] }
 0xad9   : > { %9351 = vmatmul.mubr.msk.f32.vlgmr.msra.gmra.mrb[24].mxu1 %vm1021_vm2, %v5812_v58 }
 0xada   : > { %9388 = vmatprep.mubr.msk.f32.mxu1 %vm11277_vm7, %v11274_v35  ;;  %10136 = vmatpush3.bf16.msra.mxu0 %v10135_v38 }
 0xadb   : > { %10137 = vmatprep.subr.bf16.mxu0 %v11280_v20  ;;  %10145 = vmatpush3.bf16.msra.mxu1 %v10144_v29  ;;  %v10159_v29 = vpack.c.bf16 %v6252_v53, %v6250_v13 }
 0xadc   : > { %10146 = vmatprep.subr.bf16.mxu1 %v11280_v20 }
 0xade   : > { %10139 = vmatpush3.bf16.msra.mxu0 %v10138_v47  ;;  %v10155_v47 = vpack.c.bf16 %v6248_v42, %v6246_v56 }
 0xadf   : > { %10140 = vmatprep.subr.bf16.mxu0 %v11280_v20  ;;  %10148 = vmatpush3.bf16.msra.mxu1 %v10147_v49  ;;  %v6251_v49 = vld [vmem:[#allocation16 + $0xb0] sm:$0xff] }
 0xae0   : > { %10149 = vmatprep.subr.bf16.mxu1 %v11280_v20  ;;  %v10161_v50 = vpack.c.bf16 %v6251_v49, %v6249_v48 }
 0xae2   : > { %10142 = vmatpush3.bf16.msra.mxu0 %v10141_v4  ;;  %v6247_v4 = vld [vmem:[#allocation16 + $0x90] sm:$0xff] }
 0xae3   : > { %10151 = vmatpush3.bf16.msra.mxu1 %v10150_v30  ;;  %v10157_v14 = vpack.c.bf16 %v6247_v4, %v6245_v43  ;;  %10156 = vmatprep.subr.bf16.mxu0 %v10155_v47  ;;  %v6256_v30 = vld [vmem:[#allocation16 + $0xd8] sm:$0xff] }
 0xae4   : > { %10152 = vmatprep.subr.bf16.mxu1 %v11280_v20 }
 0xb43   : > { %v5724_v36 = vpop.f32.mrb[22].mxu1 }
 0xb44   : > { %v9338_v5 = vpop.f32.mrb[23].mxu1 }
 0xb9c   : > { %v5649_v6 = vpop.f32.mrb[12].mxu0 }
 0xb9d   : > { %v5725_v34 = vadd.f32 %v5724_v36, %v5649_v6  ;;  %v9331_v60 = vpop.f32.mrb[13].mxu0  ;;  %v8905_v36 = vld [vmem:[#allocation22] ss:$0 sm:$0xff]  ;;  %v8906_v6 = vld [vmem:[#allocation23] ss:$0 sm:$0xff] }
 0xba8   : > { %v5802_v61 = vpop.f32.mrb[14].mxu0 }
 0xba9   : > { %v5806_v0 = vadd.f32 %v5802_v61, %v5725_v34  ;;  %v9345_v16 = vpop.f32.mrb[15].mxu0  ;;  %v5966_v61 = vcombine.high %v8905_v36, %v8905_v36 }
 0xbac   : > { %v5881_v10 = vpop.f32.mrb[24].mxu1 }
 0xbad   : > { %v5885_v24 = vadd.f32 %v5881_v10, %v5806_v0  ;;  %v9352_v46 = vpop.f32.mrb[25].mxu1  ;;  %v5976_v10 = vcombine.high %v8906_v6, %v8906_v6 }
 0xbaf   : > { %v5893_v26 = vadd.f32 %v8904_v23, %v5885_v24 }
 0xbb1   : > { %v5895_v7 = vcombine.high %v5893_v26, %v5893_v26  ;;  %v5897_v8 = vadd.f32 %v5893_v26, %v12681_v12 }
 0xbb3   : > { %v5898_v22 = vadd.f32 %v5895_v7, %v12683_v55 }
 0xbb5   : > { %v5903_v40 = vcombine.low %v5897_v8, %v5898_v22 }
 0xbb7   : > { %v5905_v19 = vsel %vm4164_vm6, %v5903_v40, 0.0 }
 0xbb8   : > { %5906 = vadd.xlane.f32.xlu0 %v5905_v19  ;;  %v8907_v19 = vld [vmem:[#allocation26] ss:$0 sm:$0xff] }
 0xc45   : > { %v5907_v37 = vpop.xlane.xlu0 %5906 }
 0xc46   : > { %v5909_v12 = vmul.f32 0.015625, %v5907_v37 }
 0xc48   : > { %v5917_v55 = vrot.slane %v5909_v12, %v12861_v52  ;;  %v5924_v63 = vrot.slane %v5909_v12, %v12864_v45 }
 0xc4a   : > { %v5927_v27 = vsub.f32 %v5897_v8, %v5917_v55  ;;  %v5928_v28 = vsub.f32 %v5898_v22, %v5924_v63  ;;  %v6077_v8 = vld [vmem:[#allocation28 + $0x30] sm:$0xff]  ;;  %v6078_v22 = vld [vmem:[#allocation28 + $0x38] sm:$0xff] }
 0xc4b   : > { %v10153_v40 = vpack.c.bf16 %v6078_v22, %v6077_v8 }
 0xc4c   : > { %v5929_v15 = vmul.f32 %v5927_v27, %v5927_v27  ;;  %v5930_v31 = vmul.f32 %v5928_v28, %v5928_v28 }
 0xc4d   : > { %10154 = vmatpush3.bf16.msra.mxu1 %v10153_v40 }
 0xc4e   : > { %v5933_v1 = vcombine.low %v5929_v15, %v5930_v31  ;;  %9391 = vmatprep.subr.mxu1 %v11274_v35 }
 0xc50   : > { %v5935_v2 = vsel %vm4164_vm6, %v5933_v1, 0.0 }
 0xc51   : > { %5936 = vadd.xlane.f32.xlu1 %v5935_v2 }
 0xcde   : > { %v5937_v57 = vpop.xlane.xlu1 %5936 }
 0xcdf   : > { %v5938_v58 = vmul.f32 0.015625, %v5937_v57  ;;  %v10163_v57 = vpack.c.bf16 %v6256_v30, %v6254_v9 }
 0xce1   : > { %v5939_v11 = vadd.f32 1e-05, %v5938_v58  ;;  %v6253_v58 = vld [vmem:[#allocation16 + $0xc0] sm:$0xff] }
 0xce3   : > { %10596 = vrsqrt.f32 %v5939_v11  ;;  %v6255_v11 = vld [vmem:[#allocation16 + $0xd0] sm:$0xff] }
 0xced   : > { %v10597_v5 = vpop.eup %10596 }
 0xcee   : > { %v5948_v34 = vrot.slane %v10597_v5, %v12861_v52  ;;  %v5955_v60 = vrot.slane %v10597_v5, %v12864_v45  ;;  %v10165_v5 = vpack.c.bf16 %v6255_v11, %v6253_v58 }
 0xcf0   : > { %v5958_v0 = vmul.f32 %v5948_v34, %v5927_v27  ;;  %v5959_v16 = vmul.f32 %v5955_v60, %v5928_v28  ;;  %v6257_v34 = vld [vmem:[#allocation16 + $0xe0] sm:$0xff]  ;;  %v6259_v60 = vld [vmem:[#allocation16 + $0xf0] sm:$0xff] }
 0xcf2   : > { %v5968_v23 = vmul.f32 %v8905_v36, %v5958_v0  ;;  %v5969_v24 = vmul.f32 %v5966_v61, %v5959_v16  ;;  %v6258_v36 = vld [vmem:[#allocation16 + $0xe8] sm:$0xff]  ;;  %v10169_v0 = vpack.c.bf16 %v6259_v60, %v6257_v34 }
 0xcf4   : > { %v5978_v46 = vadd.f32 %v8906_v6, %v5968_v23  ;;  %v5979_v26 = vadd.f32 %v5976_v10, %v5969_v24  ;;  %v6260_v6 = vld [vmem:[#allocation16 + $0xf8] sm:$0xff]  ;;  %v8911_v24 = vld [vmem:[#allocation31] ss:$0 sm:$0xff] }
 0xcf5   : > { %v10167_v61 = vpack.c.bf16 %v6260_v6, %v6258_v36  ;;  %v6230_v22 = vcombine.high %v8911_v24, %v8911_v24 }
 0xcf6   : > { %v5997_v7 = vcombine.low %v5978_v46, %v5979_v26 }
 0xcf8   : > { %9370 = vmatmul.mubr.msk.f32.vlgmr.msra.gmra.mrb[16].mxu0 %vm4164_vm6, %v5997_v7 }
 0xcf9   : > { %6343 = vmatprep.mubr.f32.mxu0 %v11274_v35  ;;  %10158 = vmatpush1.bf16.msra.mxu0 %v10157_v14 }
 0xcfa   : > { %10160 = vmatprep.subr.bf16.mxu0 %v10159_v29 }
 0xcfd   : > { %10162 = vmatpush1.bf16.msra.mxu0 %v10161_v50 }
 0xcfe   : > { %10164 = vmatprep.subr.bf16.mxu0 %v10163_v57 }
 0xd01   : > { %10166 = vmatpush1.bf16.msra.mxu0 %v10165_v5 }
 0xd02   : > { %10168 = vmatprep.subr.bf16.mxu0 %v10167_v61 }
 0xd05   : > { %10170 = vmatpush1.bf16.msra.mxu0 %v10169_v0 }
 0xd06   : > { %9411 = vmatprep.subr.mxu0 %v11274_v35 }
 0xdcb   : > { %v6066_v32 = vpop.f32.mrb[16].mxu0 }
 0xdcc   : > { %v6067_v44 = vadd.f32 %v8907_v19, %v6066_v32  ;;  %v9371_v33 = vpop.f32.mrb[17].mxu0 }
 0xdce   : > { %v6070_v62 = vmax.f32 %v6067_v44, 0.0 }
 0xdd0   : > { %9389 = vmatmul.mubr.msk.f32.vlgmr.msra.gmra.mrb[26].mxu1 %vm4164_vm6, %v6070_v62 }
 0xdd1   : > { %9393 = vmatprep.mubr.msk.f32.mxu1 %vm11277_vm7, %v11274_v35 }
 0xea3   : > { %v6155_v41 = vpop.f32.mrb[26].mxu1 }
 0xea4   : > { %v6156_v37 = vadd.f32 %v8909_v3, %v6155_v41  ;;  %v9390_v12 = vpop.f32.mrb[27].mxu1 }
 0xea6   : > { %v6160_v55 = vcombine.high %v6156_v37, %v6156_v37  ;;  %v6162_v63 = vadd.f32 %v6156_v37, %v5978_v46  ;;  %v6262_v37 = vld [vmem:[#allocation17 + $0x2] sm:$0x3] }
 0xea7   : > { %v6267_v12 = vrot.slane %v6262_v37, %v12059_v18 }
 0xea8   : > { %v6163_v27 = vadd.f32 %v6160_v55, %v5979_v26  ;;  %v8912_v26 = vld [vmem:[#allocation32] ss:$0 sm:$0xff] }
 0xea9   : > { %v6240_v32 = vcombine.high %v8912_v26, %v8912_v26 }
 0xeaa   : > { %v6168_v28 = vcombine.low %v6162_v63, %v6163_v27 }
 0xeac   : > { %v6170_v15 = vsel %vm4164_vm6, %v6168_v28, 0.0 }
 0xead   : > { %6171 = vadd.xlane.f32.xlu0 %v6170_v15 }
 0xf3a   : > { %v6172_v31 = vpop.xlane.xlu0 %6171 }
 0xf3b   : > { %v6173_v1 = vmul.f32 0.015625, %v6172_v31 }
 0xf3d   : > { %v6181_v2 = vrot.slane %v6173_v1, %v12861_v52  ;;  %v6188_v59 = vrot.slane %v6173_v1, %v12864_v45 }
 0xf3f   : > { %v6191_v25 = vsub.f32 %v6162_v63, %v6181_v2  ;;  %v6192_v54 = vsub.f32 %v6163_v27, %v6188_v59 }
 0xf41   : > { %v6193_v17 = vmul.f32 %v6191_v25, %v6191_v25  ;;  %v6194_v51 = vmul.f32 %v6192_v54, %v6192_v54 }
 0xf43   : > { %v6197_v38 = vcombine.low %v6193_v17, %v6194_v51 }
 0xf45   : > { %v6199_v39 = vsel %vm4164_vm6, %v6197_v38, 0.0 }
 0xf46   : > { %6200 = vadd.xlane.f32.xlu0 %v6199_v39  ;;  %v6271_v39 = vrot.slane %v6262_v37, %v12063_v21 }
 0xfd3   : > { %v6201_v16 = vpop.xlane.xlu0 %6200 }
 0xfd4   : > { %v6202_v10 = vmul.f32 0.015625, %v6201_v16 }
 0xfd6   : > { %v6203_v23 = vadd.f32 1e-05, %v6202_v10 }
 0xfd8   : > { %10598 = vrsqrt.f32 %v6203_v23 }
 0xfe2   : > { %v10599_v46 = vpop.eup %10598 }
 0xfe3   : > { %v6212_v7 = vrot.slane %v10599_v46, %v12861_v52  ;;  %v6219_v8 = vrot.slane %v10599_v46, %v12864_v45 }
 0xfe5   : > { %v6222_v40 = vmul.f32 %v6212_v7, %v6191_v25  ;;  %v6223_v19 = vmul.f32 %v6219_v8, %v6192_v54 }
 0xfe7   : > { %v6232_v44 = vmul.f32 %v8911_v24, %v6222_v40  ;;  %v6233_v33 = vmul.f32 %v6230_v22, %v6223_v19 }
 0xfe9   : > { %v12890_v62 = vadd.f32 %v8912_v26, %v6232_v44  ;;  %v12892_v3 = vadd.f32 %v6240_v32, %v6233_v33 }
 0xfeb   : > { %v6276_v41 = vcombine.low %v12890_v62, %v12892_v3 }
 0xfed   : > { %8913 = vmatmul.mubr.msk.f32.vlgmr.msra.gmra.mrb[18].mxu0 %vm4164_vm6, %v6276_v41 }
 0xfee   : > { %9413 = vmatprep.mubr.msk.f32.mxu0 %vm11277_vm7, %v11274_v35 }
0x10c0   : > { %v6345_v55 = vpop.f32.mrb[18].mxu0 }
0x10c1   : > { %v6346_v63 = vadd.f32 %v6345_v55, %v6267_v12  ;;  %v6347_v27 = vpop.f32.mrb[19].mxu0 }
0x10c2   : > { %v12942_v47 = vadd.f32 %v6347_v27, %v6271_v39 }
0x10c3   : > { %6352 = vrot.lane.b32.xlu1 %v6346_v63, %s11276_s1  ;;  %v6351_v28 = vcombine.high %v6346_v63, %v6346_v63 }
0x10c4   : > { %v12956_v43 = vcombine.high %v12942_v47, %v12942_v47 }
0x10c5   : > { %6354 = vrot.lane.b32.xlu0 %v6351_v28, %s11276_s1 }
0x10c7   : > { %6356 = vrot.lane.b32.xlu1 %v6346_v63, %s11275_s24 }
0x10c9   : > { %6360 = vrot.lane.b32.xlu0 %v6346_v63, %s11278_s6 }
0x10cb   : > { %6358 = vrot.lane.b32.xlu1 %v6351_v28, %s11275_s24 }
0x10cd   : > { %6378 = vrot.lane.b32.xlu0 %v6346_v63, %s11279_s23 }
0x10cf   : > { %6362 = vrot.lane.b32.xlu1 %v6351_v28, %s11278_s6 }
0x10d3   : > { %6454 = vrot.lane.b32.xlu1 %v6351_v28, %s11279_s23 }
0x1135   : > { %v6353_v18 = vpop.permute.xlu1 %6352 }
0x1136   : > { %6530 = vrot.lane.b32.xlu0 %v6353_v18, %s11279_s23 }
0x1137   : > { %v6355_v15 = vpop.permute.xlu0 %6354 }
0x1138   : > { %6606 = vrot.lane.b32.xlu1 %v6355_v15, %s11279_s23 }
0x1139   : > { %v6357_v31 = vpop.permute.xlu1 %6356 }
0x113a   : > { %6682 = vrot.lane.b32.xlu0 %v6357_v31, %s11279_s23 }
0x113b   : > { %v6361_v1 = vpop.permute.xlu0 %6360 }
0x113d   : > { %v6359_v2 = vpop.permute.xlu1 %6358 }
0x113e   : > { %6758 = vrot.lane.b32.xlu1 %v6359_v2, %s11279_s23  ;;  %6834 = vrot.lane.b32.xlu0 %v6361_v1, %s11279_s23 }
0x113f   : > { %v6379_v59 = vpop.permute.xlu0 %6378 }
0x1140   : > { %9392 = vmatpush3.xpose.msk.msra.mxu1 %vm1021_vm2, %v6379_v59 }
0x1141   : > { %v6363_v25 = vpop.permute.xlu1 %6362  ;;  %9396 = vmatprep.subr.mxu1 %v11274_v35 }
0x1142   : > { %6910 = vrot.lane.b32.xlu1 %v6363_v25, %s11279_s23 }
0x1143   : > { %9394 = vmatmul.mubr.msk.f32.vlgmr.msra.gmra.mrb[28].mxu1 %vm1021_vm2, %v6346_v63 }
0x1144   : > { %9398 = vmatprep.mubr.msk.f32.mxu1 %vm11277_vm7, %v11274_v35 }
0x1145   : > { %v6455_v54 = vpop.permute.xlu1 %6454 }
0x1146   : > { %9397 = vmatpush3.xpose.msk.msra.mxu1 %vm1021_vm2, %v6455_v54 }
0x1147   : > { %9401 = vmatprep.subr.mxu1 %v11274_v35 }
0x1149   : > { %9399 = vmatmul.mubr.msk.f32.vlgmr.msra.gmra.mrb[30].mxu1 %vm1021_vm2, %v6351_v28 }
0x114a   : > { %9403 = vmatprep.mubr.msk.f32.mxu1 %vm11277_vm7, %v11274_v35 }
0x11a8   : > { %v6531_v17 = vpop.permute.xlu0 %6530 }
0x11a9   : > { %9402 = vmatpush3.xpose.msk.msra.mxu1 %vm1021_vm2, %v6531_v17 }
0x11aa   : > { %9406 = vmatprep.subr.mxu1 %v11274_v35  ;;  %v6607_v51 = vpop.permute.xlu1 %6606 }
0x11ac   : > { %9404 = vmatmul.mubr.msk.f32.vlgmr.msra.gmra.mrb[32].mxu1 %vm1021_vm2, %v6353_v18  ;;  %v6683_v38 = vpop.permute.xlu0 %6682 }
0x11ad   : > { %9407 = vmatpush3.xpose.msk.msra.mxu1 %vm1021_vm2, %v6607_v51  ;;  %9412 = vmatpush3.xpose.msk.msra.mxu0 %vm1021_vm2, %v6683_v38 }
0x11ae   : > { %9408 = vmatprep.mubr.msk.f32.mxu1 %vm11277_vm7, %v11274_v35  ;;  %9416 = vmatprep.subr.mxu1 %v11274_v35 }
0x11af   : > { %9421 = vmatprep.subr.mxu0 %v11274_v35 }
0x11b0   : > { %v6759_v56 = vpop.permute.xlu1 %6758  ;;  %9409 = vmatmul.mubr.msk.f32.vlgmr.msra.gmra.mrb[34].mxu1 %vm1021_vm2, %v6355_v15  ;;  %9414 = vmatmul.mubr.msk.f32.vlgmr.msra.gmra.mrb[20].mxu0 %vm1021_vm2, %v6357_v31  ;;  %v6835_v42 = vpop.permute.xlu0 %6834 }
0x11b1   : > { %9417 = vmatpush3.xpose.msk.msra.mxu1 %vm1021_vm2, %v6759_v56  ;;  %9422 = vmatpush3.xpose.msk.msra.mxu0 %vm1021_vm2, %v6835_v42 }
0x11b2   : > { %9418 = vmatprep.mubr.msk.f32.mxu1 %vm11277_vm7, %v11274_v35  ;;  %9423 = vmatprep.mubr.msk.f32.mxu0 %vm11277_vm7, %v11274_v35 }
0x11b3   : > { %9426 = vmatprep.subr.mxu1 %v11274_v35  ;;  %9431 = vmatprep.subr.mxu0 %v11274_v35 }
0x11b4   : > { %v6911_v21 = vpop.permute.xlu1 %6910  ;;  %9419 = vmatmul.mubr.msk.f32.vlgmr.msra.gmra.mrb[36].mxu1 %vm1021_vm2, %v6359_v2  ;;  %9424 = vmatmul.mubr.msk.f32.vlgmr.msra.gmra.mrb[22].mxu0 %vm1021_vm2, %v6361_v1 }
0x11b5   : > { %9427 = vmatpush3.xpose.msk.msra.mxu1 %vm1021_vm2, %v6911_v21  ;;  %9432 = vmatpush3.msk.msra.mxu0 %vm4975_vm8, %v12942_v47 }
0x11b6   : > { %9428 = vmatprep.mubr.msk.f32.mxu1 %vm11277_vm7, %v11274_v35  ;;  %9436 = vmatprep.subr.mxu1 %v11274_v35 }
0x11b7   : > { %9433 = vmatprep.mubr.msk.f32.mxu0 %vm11277_vm7, %v11274_v35  ;;  %9441 = vmatprep.subr.mxu0 %v11274_v35 }
0x11b8   : > { %9429 = vmatmul.mubr.msk.f32.vlgmr.msra.gmra.mrb[38].mxu1 %vm1021_vm2, %v6363_v25 }
0x11b9   : > { %9437 = vmatpush3.msk.msra.mxu1 %vm4975_vm8, %v12956_v43  ;;  %9438 = vmatprep.mubr.msk.f32.mxu1 %vm11277_vm7, %v11274_v35 }
0x11ba   : > { %9446 = vmatprep.subr.mxu1 %v11274_v35 }
0x1216   : > { %v6450_v4 = vpop.f32.mrb[28].mxu1 }
0x1217   : > { %v6986_v14 = vmul.f32 0.25, %v6450_v4  ;;  %v9395_v13 = vpop.f32.mrb[29].mxu1 }
0x1219   : > { %v6994_v53 = vsel %vm4882_vm9, %v6986_v14, -inf }
0x121a   : > { %6995 = vmax.xlane.f32.xlu0 %v6994_v53 }
0x121c   : > { %v6526_v29 = vpop.f32.mrb[30].mxu1 }
0x121d   : > { %v6987_v48 = vmul.f32 0.25, %v6526_v29  ;;  %v9400_v49 = vpop.f32.mrb[31].mxu1 }
0x121f   : > { %v6997_v50 = vsel %vm4882_vm9, %v6987_v48, -inf }
0x1220   : > { %6998 = vmax.xlane.f32.xlu1 %v6997_v50 }
0x127f   : > { %v6602_v9 = vpop.f32.mrb[32].mxu1 }
0x1280   : > { %v6988_v30 = vmul.f32 0.25, %v6602_v9  ;;  %v9405_v57 = vpop.f32.mrb[33].mxu1 }
0x1282   : > { %v7000_v58 = vsel %vm4882_vm9, %v6988_v30, -inf }
0x1283   : > { %7001 = vmax.xlane.f32.xlu0 %v7000_v58  ;;  %v6678_v11 = vpop.f32.mrb[34].mxu1  ;;  %v6754_v36 = vpop.f32.mrb[20].mxu0 }
0x1284   : > { %v6989_v5 = vmul.f32 0.25, %v6678_v11  ;;  %v6990_v6 = vmul.f32 0.25, %v6754_v36  ;;  %v9410_v34 = vpop.f32.mrb[35].mxu1  ;;  %v9415_v60 = vpop.f32.mrb[21].mxu0 }
0x1286   : > { %v7003_v61 = vsel %vm4882_vm9, %v6989_v5, -inf  ;;  %v7006_v0 = vsel %vm4882_vm9, %v6990_v6, -inf }
0x1287   : > { %7004 = vmax.xlane.f32.xlu0 %v7003_v61  ;;  %v6830_v16 = vpop.f32.mrb[36].mxu1  ;;  %7007 = vmax.xlane.f32.xlu1 %v7006_v0  ;;  %v6906_v10 = vpop.f32.mrb[22].mxu0 }
0x1288   : > { %v6991_v23 = vmul.f32 0.25, %v6830_v16  ;;  %v6992_v24 = vmul.f32 0.25, %v6906_v10  ;;  %v9420_v46 = vpop.f32.mrb[37].mxu1  ;;  %v9425_v26 = vpop.f32.mrb[23].mxu0 }
0x128a   : > { %v7009_v7 = vsel %vm4882_vm9, %v6991_v23, -inf  ;;  %v7012_v8 = vsel %vm4882_vm9, %v6992_v24, -inf }
0x128b   : > { %7010 = vmax.xlane.f32.xlu0 %v7009_v7  ;;  %v6982_v22 = vpop.f32.mrb[38].mxu1  ;;  %7013 = vmax.xlane.f32.xlu1 %v7012_v8 }
0x128c   : > { %v6993_v40 = vmul.f32 0.25, %v6982_v22  ;;  %v9430_v19 = vpop.f32.mrb[39].mxu1 }
0x128e   : > { %v7015_v32 = vsel %vm4882_vm9, %v6993_v40, -inf }
0x128f   : > { %7016 = vmax.xlane.f32.xlu0 %v7015_v32 }
0x129c   : > { %6366 = vrot.lane.b32.xlu1 %v12942_v47, %s11276_s1 }
0x12a0   : > { %6370 = vrot.lane.b32.xlu1 %v12942_v47, %s11275_s24 }
0x12a4   : > { %6372 = vrot.lane.b32.xlu1 %v12956_v43, %s11275_s24 }
0x12a5   : > { %6368 = vrot.lane.b32.xlu0 %v12956_v43, %s11276_s1  ;;  %s13261_s1 = sld [smem:[#allocation64_spill]] }
0x12a7   : > { %v6996_v41 = vpop.xlane.xlu0 %6995 }
0x12a8   : > { %v7018_v37 = vsub.f32 %v6986_v14, %v6996_v41 }
0x12aa   : > { %v7026_v55 = vmul.f32 1.442695, %v7018_v37 }
0x12ad   : > { %v6999_v44 = vpop.xlane.xlu1 %6998 }
0x12ae   : > { %v7019_v33 = vsub.f32 %v6987_v48, %v6999_v44 }
0x12b0   : > { %v7028_v12 = vmul.f32 1.442695, %v7019_v33 }
0x12b2   : > { %10600 = vpow2.f32 %v7028_v12 }
0x12b3   : > { %10602 = vpow2.f32 %v7026_v55 }
0x12bc   : > { %v10601_v63 = vpop.eup %10600 }
0x12bd   : > { %v7045_v27 = vsel %vm4882_vm9, %v10601_v63, 0.0  ;;  %v10603_v28 = vpop.eup %10602 }
0x12be   : > { %v7042_v18 = vsel %vm4882_vm9, %v10603_v28, 0.0 }
0x12c4   : > { %7046 = vadd.xlane.f32.xlu0 %v7045_v27 }
0x12c8   : > { %7043 = vadd.xlane.f32.xlu1 %v7042_v18  ;;  %v7683_v18 = vld [vmem:[#allocation19 + $0x40] sm:$0xff] }
0x1310   : > { %v7002_v15 = vpop.xlane.xlu0 %7001 }
0x1311   : > { %v7020_v31 = vsub.f32 %v6988_v30, %v7002_v15  ;;  %v7684_v15 = vld [vmem:[#allocation19 + $0x48] sm:$0xff] }
0x1313   : > { %v7030_v1 = vmul.f32 1.442695, %v7020_v31 }
0x1314   : > { %v7008_v2 = vpop.xlane.xlu1 %7007  ;;  %v7005_v59 = vpop.xlane.xlu0 %7004 }
0x1315   : > { %10604 = vpow2.f32 %v7030_v1  ;;  %v7022_v25 = vsub.f32 %v6990_v6, %v7008_v2  ;;  %v7021_v54 = vsub.f32 %v6989_v5, %v7005_v59  ;;  %v10175_v2 = vpack.c.bf16 %v7684_v15, %v7683_v18 }
0x1317   : > { %v7034_v17 = vmul.f32 1.442695, %v7022_v25  ;;  %v7032_v51 = vmul.f32 1.442695, %v7021_v54  ;;  %v7686_v25 = vld [vmem:[#allocation19 + $0x50] sm:$0xff]  ;;  %v7687_v54 = vld [vmem:[#allocation19 + $0x58] sm:$0xff] }
0x1318   : > { %v7014_v38 = vpop.xlane.xlu1 %7013  ;;  %v7011_v39 = vpop.xlane.xlu0 %7010 }
0x1319   : > { %10606 = vpow2.f32 %v7034_v17  ;;  %v7024_v56 = vsub.f32 %v6992_v24, %v7014_v38  ;;  %v7023_v42 = vsub.f32 %v6991_v23, %v7011_v39  ;;  %v10172_v17 = vpack.c.bf16 %v7687_v54, %v7686_v25  ;;  %v7918_v39 = vld [vmem:[#allocation19 + $0x70] sm:$0xff]  ;;  %v8096_v54 = vld [vmem:[#allocation25 + $0x58] sm:$0xff] }
0x131a   : > { %10608 = vpow2.f32 %v7032_v51  ;;  %v8095_v25 = vld [vmem:[#allocation25 + $0x50] sm:$0xff] }
0x131b   : > { %v7038_v21 = vmul.f32 1.442695, %v7024_v56  ;;  %v7036_v4 = vmul.f32 1.442695, %v7023_v42  ;;  %v7919_v56 = vld [vmem:[#allocation19 + $0x78] sm:$0xff] }
0x131c   : > { %v7017_v14 = vpop.xlane.xlu0 %7016  ;;  %v6367_v34 = vpop.permute.xlu1 %6366 }
0x131d   : > { %10610 = vpow2.f32 %v7038_v21  ;;  %v7025_v13 = vsub.f32 %v6993_v40, %v7017_v14  ;;  %v10181_v21 = vpack.c.bf16 %v7919_v56, %v7918_v39  ;;  %v8099_v56 = vld [vmem:[#allocation25 + $0x70] sm:$0xff] }
0x131e   : > { %10612 = vpow2.f32 %v7036_v4 }
0x131f   : > { %v10605_v53 = vpop.eup %10604  ;;  %v7040_v29 = vmul.f32 1.442695, %v7025_v13 }
0x1320   : > { %v7048_v48 = vsel %vm4882_vm9, %v10605_v53, 0.0  ;;  %v6371_v60 = vpop.permute.xlu1 %6370  ;;  %v6369_v61 = vpop.permute.xlu0 %6368 }
0x1321   : > { %10614 = vpow2.f32 %v7040_v29  ;;  %7049 = vadd.xlane.f32.xlu1 %v7048_v48  ;;  %v7839_v29 = vld [vmem:[#allocation19 + $0x60] sm:$0xff]  ;;  %v7840_v48 = vld [vmem:[#allocation19 + $0x68] sm:$0xff] }
0x1323   : > { %v10607_v49 = vpop.eup %10606 }
0x1324   : > { %v10609_v50 = vpop.eup %10608  ;;  %v7054_v9 = vsel %vm4882_vm9, %v10607_v49, 0.0  ;;  %v6373_v0 = vpop.permute.xlu1 %6372 }
0x1325   : > { %7055 = vadd.xlane.f32.xlu1 %v7054_v9  ;;  %v7051_v30 = vsel %vm4882_vm9, %v10609_v50, 0.0 }
0x1326   : > { %7052 = vadd.xlane.f32.xlu0 %v7051_v30  ;;  %v10178_v30 = vpack.c.bf16 %v7840_v48, %v7839_v29  ;;  %v8189_v29 = vld [vmem:[#allocation28 + $0x58] sm:$0xff] }
0x1327   : > { %v10611_v57 = vpop.eup %10610 }
0x1328   : > { %v10613_v58 = vpop.eup %10612  ;;  %v7060_v11 = vsel %vm4882_vm9, %v10611_v57, 0.0 }
0x1329   : > { %7061 = vadd.xlane.f32.xlu1 %v7060_v11  ;;  %v7057_v36 = vsel %vm4882_vm9, %v10613_v58, 0.0 }
0x132a   : > { %7058 = vadd.xlane.f32.xlu0 %v7057_v36 }
0x132b   : > { %v12990_v5 = vpop.eup %10614 }
0x132c   : > { %v7063_v6 = vsel %vm4882_vm9, %v12990_v5, 0.0 }
0x132e   : > { %7064 = vadd.xlane.f32.xlu0 %v7063_v6 }
0x133a   : > { %6376 = vrot.lane.b32.xlu1 %v12956_v43, %s11278_s6 }
0x1344   : > { %6374 = vrot.lane.b32.xlu0 %v12942_v47, %s11278_s6 }
0x1351   : > { %v7047_v16 = vpop.xlane.xlu0 %7046 }
0x1352   : > { %10616 = vrcp.f32 %v7047_v16 }
0x1355   : > { %v7044_v10 = vpop.xlane.xlu1 %7043 }
0x1356   : > { %10618 = vrcp.f32 %v7044_v10 }
0x135c   : > { %v10617_v23 = vpop.eup %10616 }
0x135d   : > { %v7069_v24 = vmul.f32 %v10617_v23, %v10601_v63 }
0x135f   : > { %9439 = vmatmul.mubr.msk.f32.vlgmr.msra.gmra.mrb[40].mxu1 %vm4971_vm10, %v7069_v24 }
0x1360   : > { %v10619_v46 = vpop.eup %10618  ;;  %9447 = vmatpush3.msk.msra.mxu1 %vm4975_vm8, %v6369_v61  ;;  %9448 = vmatprep.mubr.msk.f32.mxu1 %vm11277_vm7, %v11274_v35 }
0x1361   : > { %v7067_v43 = vmul.f32 %v10619_v46, %v10603_v28  ;;  %9456 = vmatprep.subr.mxu1 %v11274_v35 }
0x1363   : > { %9434 = vmatmul.mubr.msk.f32.vlgmr.msra.gmra.mrb[24].mxu0 %vm4971_vm10, %v7067_v43 }
0x1364   : > { %9442 = vmatpush3.msk.msra.mxu0 %vm4975_vm8, %v6367_v34  ;;  %9443 = vmatprep.mubr.msk.f32.mxu0 %vm11277_vm7, %v11274_v35 }
0x1365   : > { %9451 = vmatprep.subr.mxu0 %v11274_v35 }
0x13ae   : > { %v7050_v47 = vpop.xlane.xlu1 %7049 }
0x13af   : > { %10620 = vrcp.f32 %v7050_v47 }
0x13b2   : > { %v7056_v26 = vpop.xlane.xlu1 %7055 }
0x13b3   : > { %10622 = vrcp.f32 %v7056_v26  ;;  %v7053_v7 = vpop.xlane.xlu0 %7052 }
0x13b4   : > { %10624 = vrcp.f32 %v7053_v7 }
0x13b6   : > { %v7062_v8 = vpop.xlane.xlu1 %7061 }
0x13b7   : > { %10626 = vrcp.f32 %v7062_v8  ;;  %v7059_v22 = vpop.xlane.xlu0 %7058  ;;  %v8950_v8 = vld [vmem:[#allocation20 + $0x1] ss:$0 sm:$0xff] }
0x13b8   : > { %10628 = vrcp.f32 %v7059_v22 }
0x13b9   : > { %v10621_v40 = vpop.eup %10620 }
0x13ba   : > { %v7071_v19 = vmul.f32 %v10621_v40, %v10605_v53  ;;  %v6377_v31 = vpop.permute.xlu1 %6376 }
0x13bb   : > { %v7065_v32 = vpop.xlane.xlu0 %7064 }
0x13bc   : > { %10630 = vrcp.f32 %v7065_v32  ;;  %9444 = vmatmul.mubr.msk.f32.vlgmr.msra.gmra.mrb[26].mxu0 %vm4971_vm10, %v7071_v19 }
0x13bd   : > { %v10623_v44 = vpop.eup %10622  ;;  %9452 = vmatpush3.msk.msra.mxu0 %vm4975_vm8, %v6371_v60  ;;  %9453 = vmatprep.mubr.msk.f32.mxu0 %vm11277_vm7, %v11274_v35 }
0x13be   : > { %v10625_v33 = vpop.eup %10624  ;;  %v7075_v41 = vmul.f32 %v10623_v44, %v10607_v49  ;;  %9461 = vmatprep.subr.mxu0 %v11274_v35 }
0x13bf   : > { %v7073_v37 = vmul.f32 %v10625_v33, %v10609_v50  ;;  %v6375_v12 = vpop.permute.xlu0 %6374 }
0x13c0   : > { %9454 = vmatmul.mubr.msk.f32.vlgmr.msra.gmra.mrb[28].mxu0 %vm4971_vm10, %v7075_v41 }
0x13c1   : > { %v10627_v55 = vpop.eup %10626  ;;  %9449 = vmatmul.mubr.msk.f32.vlgmr.msra.gmra.mrb[42].mxu1 %vm4971_vm10, %v7073_v37  ;;  %9462 = vmatpush3.msk.msra.mxu0 %vm4975_vm8, %v6375_v12 }
0x13c2   : > { %v10629_v63 = vpop.eup %10628  ;;  %v7079_v27 = vmul.f32 %v10627_v55, %v10611_v57  ;;  %9457 = vmatpush3.msk.msra.mxu1 %vm4975_vm8, %v6373_v0  ;;  %9458 = vmatprep.mubr.msk.f32.mxu1 %vm11277_vm7, %v11274_v35 }
0x13c3   : > { %v7077_v28 = vmul.f32 %v10629_v63, %v10613_v58  ;;  %9463 = vmatprep.mubr.msk.f32.mxu0 %vm11277_vm7, %v11274_v35  ;;  %9466 = vmatprep.subr.mxu1 %v11274_v35 }
0x13c4   : > { %9464 = vmatmul.mubr.msk.f32.vlgmr.msra.gmra.mrb[30].mxu0 %vm4971_vm10, %v7079_v27  ;;  %10171 = vmatprep.subr.bf16.mxu0 %v11280_v20 }
0x13c5   : > { %9459 = vmatmul.mubr.msk.f32.vlgmr.msra.gmra.mrb[44].mxu1 %vm4971_vm10, %v7077_v28  ;;  %9475 = vmatprep.mubr.msk.f32.mxu0 %vm11277_vm7, %v11274_v35 }
0x13c6   : > { %v10631_v1 = vpop.eup %10630  ;;  %9467 = vmatpush3.msk.msra.mxu1 %vm4975_vm8, %v6377_v31  ;;  %9468 = vmatprep.mubr.msk.f32.mxu1 %vm11277_vm7, %v11274_v35 }
0x13c7   : > { %v7081_v59 = vmul.f32 %v10631_v1, %v12990_v5  ;;  %10174 = vmatprep.subr.bf16.mxu1 %v11280_v20  ;;  %10173 = vmatpush3.bf16.msra.mxu0 %v10172_v17  ;;  %v10187_v17 = vpack.c.bf16 %v8096_v54, %v8095_v25  ;;  %v8379_v54 = vld [vmem:[%s13259_s14] sm:$0xff] }
0x13c8   : > { %10177 = vmatprep.subr.bf16.mxu0 %v11280_v20 }
0x13c9   : > { %9469 = vmatmul.mubr.msk.f32.vlgmr.msra.gmra.mrb[46].mxu1 %vm4971_vm10, %v7081_v59 }
0x13ca   : > { %10176 = vmatpush3.bf16.msra.mxu1 %v10175_v2  ;;  %9482 = vmatprep.mubr.msk.f32.mxu1 %vm11277_vm7, %v11274_v35 }
0x13cb   : > { %10180 = vmatprep.subr.bf16.mxu1 %v11280_v20 }
0x1432   : > { %v7228_v51 = vpop.f32.mrb[40].mxu1 }
0x1433   : > { %v9440_v38 = vpop.f32.mrb[41].mxu1 }
0x1434   : > { %v8098_v38 = vld [vmem:[#allocation25 + $0x68] sm:$0xff] }
0x1436   : > { %v7153_v42 = vpop.f32.mrb[24].mxu0 }
0x1437   : > { %v7765_v4 = vcombine.low %v7153_v42, %v7228_v51  ;;  %v9435_v14 = vpop.f32.mrb[25].mxu0  ;;  %v8097_v51 = vld [vmem:[#allocation25 + $0x60] sm:$0xff]  ;;  %v8100_v42 = vld [vmem:[#allocation25 + $0x78] sm:$0xff] }
0x1438   : > { %v10190_v39 = vpack.c.bf16 %v8098_v38, %v8097_v51  ;;  %v8187_v14 = vld [vmem:[#allocation28 + $0x48] sm:$0xff]  ;;  %v8381_v51 = vld [vmem:[%s13259_s14 + $0x10] sm:$0xff] }
0x1439   : > { %9483 = vmatmul.mubr.msk.f32.vlgmr.msra.gmra.mrb[48].mxu1 %vm1021_vm2, %v7765_v4  ;;  %v8186_v4 = vld [vmem:[#allocation28 + $0x40] sm:$0xff] }
0x143a   : > { %10182 = vmatpush3.bf16.msra.mxu1 %v10181_v21  ;;  %9496 = vmatprep.mubr.msk.f32.mxu1 %vm11277_vm7, %v11274_v35  ;;  %v10193_v21 = vpack.c.bf16 %v8100_v42, %v8099_v56  ;;  %v8383_v42 = vld [vmem:[%s13259_s14 + $0x20] sm:$0xff] }
0x143b   : > { %10195 = vmatprep.subr.bf16.mxu1 %v11280_v20 }
0x148f   : > { %v7303_v13 = vpop.f32.mrb[26].mxu0 }
0x1490   : > { %v9445_v53 = vpop.f32.mrb[27].mxu0 }
0x1491   : > { %v10196_v53 = vpack.c.bf16 %v8187_v14, %v8186_v4  ;;  %v8385_v14 = vld [vmem:[%s13259_s14 + $0x30] sm:$0xff] }
0x1493   : > { %v7453_v49 = vpop.f32.mrb[28].mxu0 }
0x1494   : > { %v7378_v50 = vpop.f32.mrb[42].mxu1  ;;  %v9455_v9 = vpop.f32.mrb[29].mxu0 }
0x1495   : > { %v7690_v57 = vcombine.low %v7303_v13, %v7378_v50  ;;  %v9450_v58 = vpop.f32.mrb[43].mxu1  ;;  %v8188_v13 = vld [vmem:[#allocation28 + $0x50] sm:$0xff]  ;;  %v8191_v50 = vld [vmem:[#allocation28 + $0x68] sm:$0xff] }
0x1496   : > { %v10199_v48 = vpack.c.bf16 %v8189_v29, %v8188_v13  ;;  %v8386_v13 = vld [vmem:[%s13259_s14 + $0x38] sm:$0xff]  ;;  %v8471_v29 = vld [vmem:[%s13260_s28] sm:$0xff] }
0x1497   : > { %9476 = vmatmul.mubr.msk.f32.vlgmr.msra.gmra.mrb[32].mxu0 %vm1021_vm2, %v7690_v57  ;;  %v7603_v11 = vpop.f32.mrb[30].mxu0 }
0x1498   : > { %v7528_v36 = vpop.f32.mrb[44].mxu1  ;;  %10179 = vmatpush3.bf16.msra.mxu0 %v10178_v30  ;;  %v9465_v5 = vpop.f32.mrb[31].mxu0  ;;  %9489 = vmatprep.mubr.msk.f32.mxu0 %vm11277_vm7, %v11274_v35 }
0x1499   : > { %v7843_v6 = vcombine.low %v7453_v49, %v7528_v36  ;;  %v9460_v34 = vpop.f32.mrb[45].mxu1  ;;  %10183 = vmatprep.subr.bf16.mxu0 %v11280_v20  ;;  %v8190_v49 = vld [vmem:[#allocation28 + $0x60] sm:$0xff]  ;;  %v8952_v5 = vld [vmem:[#allocation23 + $0x1] ss:$0 sm:$0xff] }
0x149a   : > { %v10202_v9 = vpack.c.bf16 %v8191_v50, %v8190_v49 }
0x149b   : > { %9490 = vmatmul.mubr.msk.f32.vlgmr.msra.gmra.mrb[34].mxu0 %vm1021_vm2, %v7843_v6 }
0x149c   : > { %v7678_v60 = vpop.f32.mrb[46].mxu1  ;;  %9515 = vmatprep.mubr.msk.f32.mxu0 %vm11277_vm7, %v11274_v35 }
0x149d   : > { %v7922_v61 = vcombine.low %v7603_v11, %v7678_v60  ;;  %v9470_v0 = vpop.f32.mrb[47].mxu1  ;;  %v8951_v11 = vld [vmem:[#allocation22 + $0x1] ss:$0 sm:$0xff] }
0x149e   : > { %v8078_v6 = vcombine.high %v8951_v11, %v8951_v11 }
0x149f   : > { %9497 = vmatmul.mubr.msk.f32.vlgmr.msra.gmra.mrb[50].mxu1 %vm1021_vm2, %v7922_v61 }
0x14a0   : > { %9534 = vmatprep.mubr.msk.f32.mxu1 %vm11277_vm7, %v11274_v35  ;;  %10197 = vmatpush3.bf16.msra.mxu1 %v10196_v53  ;;  %v10217_v53 = vpack.c.bf16 %v8386_v13, %v8385_v14 }
0x14a1   : > { %10198 = vmatprep.subr.bf16.mxu1 %v11280_v20 }
0x14a4   : > { %10200 = vmatpush3.bf16.msra.mxu1 %v10199_v48  ;;  %v8472_v48 = vld [vmem:[%s13260_s28 + $0x8] sm:$0xff] }
0x14a5   : > { %10201 = vmatprep.subr.bf16.mxu1 %v11280_v20  ;;  %v10220_v49 = vpack.c.bf16 %v8472_v48, %v8471_v29 }
0x14a8   : > { %10203 = vmatpush3.bf16.msra.mxu1 %v10202_v9 }
0x14a9   : > { %10204 = vmatprep.subr.bf16.mxu1 %v11280_v20 }
0x150c   : > { %v7834_v16 = vpop.f32.mrb[48].mxu1 }
0x150d   : > { %v9484_v10 = vpop.f32.mrb[49].mxu1 }
0x156a   : > { %v7759_v23 = vpop.f32.mrb[32].mxu0 }
0x156b   : > { %v7835_v24 = vadd.f32 %v7834_v16, %v7759_v23  ;;  %v9477_v46 = vpop.f32.mrb[33].mxu0  ;;  %v8088_v16 = vcombine.high %v8952_v5, %v8952_v5 }
0x156e   : > { %v7912_v43 = vpop.f32.mrb[34].mxu0 }
0x156f   : > { %v7916_v47 = vadd.f32 %v7912_v43, %v7835_v24  ;;  %v9491_v26 = vpop.f32.mrb[35].mxu0 }
0x1570   : > { %v8193_v26 = vld [vmem:[#allocation28 + $0x78] sm:$0xff] }
0x1572   : > { %v7991_v7 = vpop.f32.mrb[50].mxu1 }
0x1573   : > { %v7995_v22 = vadd.f32 %v7991_v7, %v7916_v47  ;;  %v9498_v40 = vpop.f32.mrb[51].mxu1  ;;  %v8192_v47 = vld [vmem:[#allocation28 + $0x70] sm:$0xff] }
0x1574   : > { %v10205_v7 = vpack.c.bf16 %v8193_v26, %v8192_v47 }
0x1575   : > { %v8004_v19 = vadd.f32 %v8950_v8, %v7995_v22  ;;  %v8953_v8 = vld [vmem:[#allocation26 + $0x1] ss:$0 sm:$0xff] }
0x1576   : > { %10206 = vmatpush3.bf16.msra.mxu1 %v10205_v7 }
0x1577   : > { %v8006_v32 = vcombine.high %v8004_v19, %v8004_v19  ;;  %v8008_v44 = vadd.f32 %v8004_v19, %v12890_v62  ;;  %v8093_v62 = vld [vmem:[#allocation25 + $0x40] sm:$0xff]  ;;  %10219 = vmatprep.subr.bf16.mxu1 %v11280_v20 }
0x1579   : > { %v8009_v33 = vadd.f32 %v8006_v32, %v12892_v3  ;;  %v8094_v3 = vld [vmem:[#allocation25 + $0x48] sm:$0xff] }
0x157a   : > { %v10184_v59 = vpack.c.bf16 %v8094_v3, %v8093_v62 }
0x157b   : > { %v8016_v41 = vcombine.low %v8008_v44, %v8009_v33 }
0x157c   : > { %10185 = vmatpush3.bf16.msra.mxu0 %v10184_v59 }
0x157d   : > { %v8018_v37 = vsel %vm4164_vm6, %v8016_v41, 0.0  ;;  %10186 = vmatprep.subr.bf16.mxu0 %v11280_v20 }
0x157e   : > { %8019 = vadd.xlane.f32.xlu0 %v8018_v37 }
0x1580   : > { %10188 = vmatpush3.bf16.msra.mxu0 %v10187_v17  ;;  %v8380_v17 = vld [vmem:[%s13259_s14 + $0x8] sm:$0xff] }
0x1581   : > { %10189 = vmatprep.subr.bf16.mxu0 %v11280_v20  ;;  %v10208_v38 = vpack.c.bf16 %v8380_v17, %v8379_v54 }
0x1584   : > { %10191 = vmatpush3.bf16.msra.mxu0 %v10190_v39  ;;  %v8382_v39 = vld [vmem:[%s13259_s14 + $0x18] sm:$0xff] }
0x1585   : > { %10192 = vmatprep.subr.bf16.mxu0 %v11280_v20  ;;  %v10211_v56 = vpack.c.bf16 %v8382_v39, %v8381_v51 }
0x1588   : > { %10194 = vmatpush3.bf16.msra.mxu0 %v10193_v21  ;;  %v8384_v21 = vld [vmem:[%s13259_s14 + $0x28] sm:$0xff] }
0x1589   : > { %10207 = vmatprep.subr.bf16.mxu0 %v11280_v20  ;;  %v10214_v4 = vpack.c.bf16 %v8384_v21, %v8383_v42 }
0x160b   : > { %v8020_v12 = vpop.xlane.xlu0 %8019 }
0x160c   : > { %v8021_v55 = vmul.f32 0.015625, %v8020_v12 }
0x160e   : > { %v8029_v63 = vrot.slane %v8021_v55, %v12861_v52  ;;  %v8036_v27 = vrot.slane %v8021_v55, %v12864_v45 }
0x1610   : > { %v8039_v28 = vsub.f32 %v8008_v44, %v8029_v63  ;;  %v8040_v18 = vsub.f32 %v8009_v33, %v8036_v27  ;;  %v8955_v44 = vld [vmem:[#allocation29 + $0x1] ss:$0 sm:$0xff] }
0x1612   : > { %v8041_v15 = vmul.f32 %v8039_v28, %v8039_v28  ;;  %v8042_v31 = vmul.f32 %v8040_v18, %v8040_v18 }
0x1614   : > { %v8045_v1 = vcombine.low %v8041_v15, %v8042_v31 }
0x1616   : > { %v8047_v2 = vsel %vm4164_vm6, %v8045_v1, 0.0 }
0x1617   : > { %8048 = vadd.xlane.f32.xlu1 %v8047_v2 }
0x16a4   : > { %v8049_v30 = vpop.xlane.xlu1 %8048 }
0x16a5   : > { %v8050_v57 = vmul.f32 0.015625, %v8049_v30 }
0x16a7   : > { %v8051_v58 = vadd.f32 1e-05, %v8050_v57  ;;  %v8957_v57 = vld [vmem:[#allocation31 + $0x1] ss:$0 sm:$0xff] }
0x16a9   : > { %10632 = vrsqrt.f32 %v8051_v58 }
0x16b3   : > { %v10633_v36 = vpop.eup %10632 }
0x16b4   : > { %v8060_v34 = vrot.slane %v10633_v36, %v12861_v52  ;;  %v8067_v60 = vrot.slane %v10633_v36, %v12864_v45  ;;  %v8348_v36 = vcombine.high %v8957_v57, %v8957_v57 }
0x16b6   : > { %v8070_v61 = vmul.f32 %v8060_v34, %v8039_v28  ;;  %v8071_v0 = vmul.f32 %v8067_v60, %v8040_v18 }
0x16b8   : > { %v8080_v10 = vmul.f32 %v8951_v11, %v8070_v61  ;;  %v8081_v23 = vmul.f32 %v8078_v6, %v8071_v0  ;;  %v8958_v11 = vld [vmem:[#allocation32 + $0x1] ss:$0 sm:$0xff] }
0x16b9   : > { %v8358_v61 = vcombine.high %v8958_v11, %v8958_v11 }
0x16ba   : > { %v8090_v24 = vadd.f32 %v8952_v5, %v8080_v10  ;;  %v8091_v46 = vadd.f32 %v8088_v16, %v8081_v23 }
0x16bc   : > { %v8111_v43 = vcombine.low %v8090_v24, %v8091_v46 }
0x16be   : > { %9516 = vmatmul.mubr.msk.f32.vlgmr.msra.gmra.mrb[36].mxu0 %vm4164_vm6, %v8111_v43 }
0x16bf   : > { %9553 = vmatprep.mubr.msk.f32.mxu0 %vm11277_vm7, %v11274_v35  ;;  %10209 = vmatpush3.bf16.msra.mxu0 %v10208_v38 }
0x16c0   : > { %10210 = vmatprep.subr.bf16.mxu0 %v11280_v20 }
0x16c3   : > { %10212 = vmatpush3.bf16.msra.mxu0 %v10211_v56 }
0x16c4   : > { %10213 = vmatprep.subr.bf16.mxu0 %v11280_v20 }
0x16c7   : > { %10215 = vmatpush3.bf16.msra.mxu0 %v10214_v4 }
0x16c8   : > { %10216 = vmatprep.subr.bf16.mxu0 %v11280_v20 }
0x16cb   : > { %10218 = vmatpush3.bf16.msra.mxu0 %v10217_v53 }
0x1791   : > { %v8180_v22 = vpop.f32.mrb[36].mxu0 }
0x1792   : > { %v8181_v40 = vadd.f32 %v8953_v8, %v8180_v22  ;;  %v9517_v19 = vpop.f32.mrb[37].mxu0 }
0x1794   : > { %v8184_v32 = vmax.f32 %v8181_v40, 0.0 }
0x1796   : > { %9535 = vmatmul.mubr.msk.f32.vlgmr.msra.gmra.mrb[52].mxu1 %vm4164_vm6, %v8184_v32 }
0x1797   : > { %9564 = vmatprep.mubr.msk.f32.mxu1 %vm11277_vm7, %v11274_v35  ;;  %10221 = vmatpush3.bf16.msra.mxu1 %v10220_v49 }
0x1798   : > { %10222 = vmatprep.subr.bf16.mxu1 %v11280_v20 }
0x1869   : > { %v8271_v33 = vpop.f32.mrb[52].mxu1 }
0x186a   : > { %v8272_v41 = vadd.f32 %v8955_v44, %v8271_v33  ;;  %v9536_v37 = vpop.f32.mrb[53].mxu1 }
0x186b   : > { %v8473_v37 = vld [vmem:[%s13260_s28 + $0x10] sm:$0xff] }
0x186c   : > { %v8276_v12 = vcombine.high %v8272_v41, %v8272_v41  ;;  %v8278_v55 = vadd.f32 %v8272_v41, %v8090_v24 }
0x186e   : > { %v8279_v63 = vadd.f32 %v8276_v12, %v8091_v46  ;;  %v8474_v12 = vld [vmem:[%s13260_s28 + $0x18] sm:$0xff] }
0x1870   : > { %v8286_v27 = vcombine.low %v8278_v55, %v8279_v63 }
0x1872   : > { %v8288_v28 = vsel %vm4164_vm6, %v8286_v27, 0.0 }
0x1873   : > { %8289 = vadd.xlane.f32.xlu0 %v8288_v28 }
0x1900   : > { %v8290_v18 = vpop.xlane.xlu0 %8289 }
0x1901   : > { %v8291_v15 = vmul.f32 0.015625, %v8290_v18 }
0x1903   : > { %v8299_v31 = vrot.slane %v8291_v15, %v12861_v52  ;;  %v8306_v1 = vrot.slane %v8291_v15, %v12864_v45 }
0x1905   : > { %v8309_v2 = vsub.f32 %v8278_v55, %v8299_v31  ;;  %v8310_v62 = vsub.f32 %v8279_v63, %v8306_v1  ;;  %v10223_v55 = vpack.c.bf16 %v8474_v12, %v8473_v37  ;;  %v8959_v63 = vld [vmem:[#allocation34] ss:$0 sm:$0xff]  ;;  %v8961_v31 = vld [vmem:[#allocation5] ss:$0 sm:$0xff] }
0x1907   : > { %v8311_v35 = vmul.f32 %v8309_v2, %v8309_v2  ;;  %v8312_v3 = vmul.f32 %v8310_v62, %v8310_v62  ;;  %10224 = vmatpush3.bf16.msra.mxu1 %v10223_v55 }
0x1909   : > { %v8315_v59 = vcombine.low %v8311_v35, %v8312_v3 }
0x190b   : > { %v8317_v25 = vsel %vm4164_vm6, %v8315_v59, 0.0 }
0x190c   : > { %8318 = vadd.xlane.f32.xlu0 %v8317_v25 }
0x1999   : > { %v8319_v50 = vpop.xlane.xlu0 %8318 }
0x199a   : > { %v8320_v9 = vmul.f32 0.015625, %v8319_v50 }
0x199c   : > { %v8321_v30 = vadd.f32 1e-05, %v8320_v9 }
0x199e   : > { %10634 = vrsqrt.f32 %v8321_v30 }
0x19a8   : > { %v10635_v58 = vpop.eup %10634 }
0x19a9   : > { %v8330_v5 = vrot.slane %v10635_v58, %v12861_v52  ;;  %v8337_v6 = vrot.slane %v10635_v58, %v12864_v45 }
0x19ab   : > { %v8340_v34 = vmul.f32 %v8330_v5, %v8309_v2  ;;  %v8341_v60 = vmul.f32 %v8337_v6, %v8310_v62 }
0x19ad   : > { %v8350_v0 = vmul.f32 %v8957_v57, %v8340_v34  ;;  %v8351_v16 = vmul.f32 %v8348_v36, %v8341_v60 }
0x19af   : > { %v8360_v10 = vadd.f32 %v8958_v11, %v8350_v0  ;;  %v8361_v23 = vadd.f32 %v8358_v61, %v8351_v16 }
0x19b1   : > { %v8362_v20 = vsel %vm4125_vm5, %v8360_v10, 0.0  ;;  %v8369_v24 = vsel %vm4125_vm5, %v8361_v23, 0.0 }
0x19b2   : > { %v8363_v46 = vrot.slane %v8362_v20, 4  ;;  %v8370_v43 = vrot.slane %v8369_v24, 4 }
0x19b4   : > { %v8364_v47 = vadd.f32 %v8363_v46, %v8362_v20  ;;  %v8371_v26 = vadd.f32 %v8370_v43, %v8369_v24 }
0x19b6   : > { %v8365_v7 = vrot.slane %v8364_v47, 2  ;;  %v8372_v8 = vrot.slane %v8371_v26, 2 }
0x19b8   : > { %v8366_v52 = vadd.f32 %v8365_v7, %v8364_v47  ;;  %v8373_v22 = vadd.f32 %v8372_v8, %v8371_v26 }
0x19ba   : > { %v8367_v45 = vrot.slane %v8366_v52, 1  ;;  %v8374_v40 = vrot.slane %v8373_v22, 1 }
0x19bc   : > { %v8368_v19 = vadd.f32 %v8367_v45, %v8366_v52  ;;  %v8375_v32 = vadd.f32 %v8374_v40, %v8373_v22 }
0x19be   : > { %v8377_v44 = vmul.f32 0.25, %v8368_v19  ;;  %v8378_v33 = vmul.f32 0.25, %v8375_v32 }
0x19c0   : > { %v8397_v41 = vsel %vm8396_vm11, %v8378_v33, %v8377_v44 }
0x19c1   : > { %9554 = vmatmul.mubr.msk.f32.vlgmr.msra.gmra.mrb[38].mxu0 %vm4164_vm6, %v8397_v41 }
0x1a94   : > { %v8466_v27 = vpop.f32.mrb[38].mxu0 }
0x1a95   : > { %v8467_v28 = vadd.f32 %v8959_v63, %v8466_v27  ;;  %v9555_v18 = vpop.f32.mrb[39].mxu0 }
0x1a97   : > { %v8470_v15 = vmax.f32 %v8467_v28, 0.0 }
0x1a99   : > { %9565 = vmatmul.mubr.msk.f32.vlgmr.msra.gmra.mrb[54].mxu1 %vm8482_vm12, %v8470_v15 }
0x1b6c   : > { %v8552_v1 = vpop.f32.mrb[54].mxu1 }
0x1b6d   : > { %v8553_v2 = vadd.f32 %v8961_v31, %v8552_v1  ;;  %v9566_v62 = vpop.f32.mrb[55].mxu1 }
0x1b6f   : > { %8557 = vst.msk [vmem:[%s13261_s1] sm:$0x3] %vm8556_vm13, %v8553_v2 }
0x1b70 PF: > { %s13262_s24 = sld [smem:[#allocation46_spill]]  ;;  %s13263_s6 = sld [smem:[#allocation47_spill]] }
0x1b71   : > { %s13264_s23 = smov %s11845_s25  ;;  %p44_p7 = scmp.ge.s32.totalorder %s11833_s8, 4  }
0x1b72   : > { %s13266_s5 = smov %s13264_s23  ;;  %s13267_s1 = smov %s11833_s8 }
0x1b73   :  { %46 = sbr.rel (!%p44_p7) target bundleno = 28 (0x1c), region = 258 }
0x1b76   : > { %s13265_s25 = smov %s13263_s6 }
0x1b7a   :  { %8569 = vsyncpa [#allocation7], 1 }
0x1b7b   :  { %8571 = vsyncpa [#allocation7 + $0x1], 1 }
0x1b7c   :  { %8572 = vsyncpa [#allocation9], 1 }
0x1b7d   :  { %8573 = vsyncpa [#allocation12], 1 }
0x1b7e   :  { %8574 = vsyncpa [#allocation15], 1 }
0x1b7f   :  { %8575 = vsyncpa [#allocation18], 1 }
0x1b80   :  { %8576 = vsyncpa [#allocation21], 1 }
0x1b81   :  { %8577 = vsyncpa [#allocation24], 1 }
0x1b82   :  { %8578 = vsyncpa [#allocation27], 1 }
0x1b83   :  { %8579 = vsyncpa [#allocation30], 1 }
0x1b84   :  { %8580 = vsyncpa [#allocation33], 1 }

</bundles_post_ra>
